<compile_context>
chip_gen: v7x
topology: tpu7x:2x2x1
jax: 0.10.0
libtpu: 0.0.40
codegen_flags: <defaults>
</compile_context>

<pallas_src>
import functools

import jax
import jax.numpy as jnp
from jax.experimental import pallas as pl
from jax.experimental.pallas import tpu as pltpu

# ----- config (mirrors config.get_config(), small synthetic values) -----
D_MODEL = 32
SEQ_LEN = 8
N_HEADS = 4
N_LAYERS = 2
D_ATT = 8            # per-head attention dim; N_HEADS * D_ATT == D_MODEL
D_FFN = 64
DROPOUT = 0.1        # identity at inference
BATCH = 16           # B*T = 128 rows -> full MXU row group
LN_EPS = 1e-5


def _layernorm(x, gamma, beta):
    mu = jnp.mean(x, axis=-1, keepdims=True)
    var = jnp.mean(jnp.square(x - mu), axis=-1, keepdims=True)
    return (x - mu) * jax.lax.rsqrt(var + LN_EPS) * gamma + beta


# ---------------- single fused forward kernel ----------------
def fused_decoder_kernel(idx_ref, wt_ref, bt_ref, mask_ref,
                         wq_ref, bq_ref, wk_ref, bk_ref, wv_ref, bv_ref,
                         wo_ref, bo_ref,
                         g1_ref, be1_ref, w1_ref, b1_ref,
                         w2_ref, b2_ref, g2_ref, be2_ref,
                         ffw_w_ref, ffw_b_ref, out_w_ref, out_b_ref,
                         o_ref, *, n_heads):
    Bb, T, _ = idx_ref.shape                 # batch block handled by this grid step
    D = wt_ref.shape[-1]
    H = n_heads
    dk = wq_ref.shape[-1]
    L = wq_ref.shape[0] // H
    N = Bb * T
    scale = 1.0 / float(dk) ** 0.5

    # ---- Time2Vec: lanes = [w0*t+b0, sin(w*t+b)..., t]; mask precomputed on host ----
    t3 = idx_ref[...]                                            # (Bb, T, 1)
    wt = wt_ref[...].reshape(1, 1, D)
    bt = bt_ref[...].reshape(1, 1, D)
    msk = mask_ref[...].reshape(1, 1, D)
    raw = t3 * wt + bt                                           # (Bb, T, D)
    x = raw + msk * (jnp.sin(raw) - raw)                         # sin on periodic lanes
    xf = x.reshape(N, D)                                         # (N, D)

    # ---- transformer blocks (small static layer count -> unrolled) ----
    for l in range(L):
        # per-head projections from host-pre-sliced weights (no runtime lane slicing),
        # gathered along a leading/major axis into a head-batched layout
        qs, ks, vs = [], [], []
        for h in range(H):
            w = l * H + h
            qs.append((jnp.dot(xf, wq_ref[w], preferred_element_type=jnp.float32)
                       + bq_ref[w]).reshape(Bb, T, dk))
            ks.append((jnp.dot(xf, wk_ref[w], preferred_element_type=jnp.float32)
                       + bk_ref[w]).reshape(Bb, T, dk))
            vs.append((jnp.dot(xf, wv_ref[w], preferred_element_type=jnp.float32)
                       + bv_ref[w]).reshape(Bb, T, dk))
        q = jnp.concatenate(qs, axis=0)                          # (H*Bb, T, dk)
        k = jnp.concatenate(ks, axis=0)
        v = jnp.concatenate(vs, axis=0)

        # head-batched attention: 2 einsums + 1 batched softmax per layer
        s = jnp.einsum('bqd,bkd->bqk', q, k,
                       preferred_element_type=jnp.float32) * scale
        s = s - jnp.max(s, axis=-1, keepdims=True)
        p = jnp.exp(s)
        p = p * pl.reciprocal(jnp.sum(p, axis=-1, keepdims=True), approx=True)
        pv = jnp.einsum('bqk,bkd->bqd', p, v,
                        preferred_element_type=jnp.float32)      # (H*Bb, T, dk)

        # output projection: concat_h(pv_h) @ Wo  ==  sum_h pv_h @ Wo_h  (no lane concat)
        attn = bo_ref[l]
        for h in range(H):
            pv_h = pv[h * Bb:(h + 1) * Bb].reshape(N, dk)
            attn = attn + jnp.dot(pv_h, wo_ref[l * H + h],
                                  preferred_element_type=jnp.float32)

        # post-LN residual block with ReLU FFN
        h1 = _layernorm(xf + attn, g1_ref[l], be1_ref[l])
        f = jnp.dot(h1, w1_ref[l], preferred_element_type=jnp.float32) + b1_ref[l]
        f = jnp.maximum(f, 0.0)
        f = jnp.dot(f, w2_ref[l], preferred_element_type=jnp.float32) + b2_ref[l]
        xf = _layernorm(h1 + f, g2_ref[l], be2_ref[l])

    # ---- AdaptiveAvgPool1d(1) over last dim + MLP head (dropout = identity) ----
    pooled = jnp.mean(xf.reshape(Bb, T, D), axis=-1)             # (Bb, T)
    y = jnp.dot(pooled, ffw_w_ref[...], preferred_element_type=jnp.float32) + ffw_b_ref[...]
    y = jnp.maximum(y, 0.0)
    out = jnp.dot(y, out_w_ref[...], preferred_element_type=jnp.float32) + out_b_ref[...]
    o_ref[...] = out                                             # (Bb, 1)


# ---------------- wrapper-side weight folding (runs ONCE) ----------------
def make_fused_params(params):
    D = D_MODEL
    wt = jnp.concatenate([jnp.reshape(params['t2v_w0'], (1,)), params['t2v_w'],
                          jnp.ones((1,), jnp.float32)]).reshape(1, D)
    bt = jnp.concatenate([jnp.reshape(params['t2v_b0'], (1,)), params['t2v_b'],
                          jnp.zeros((1,), jnp.float32)]).reshape(1, D)
    mask = jnp.concatenate([jnp.zeros((1,), jnp.float32),
                            jnp.ones((D - 2,), jnp.float32),
                            jnp.zeros((1,), jnp.float32)]).reshape(1, D)
    blocks = params['blocks']
    st = lambda key: jnp.stack([b[key] for b in blocks])
    LH = N_LAYERS * N_HEADS
    wq = st('wq').reshape(LH, D, D_ATT)
    bq = st('bq').reshape(LH, 1, D_ATT)
    wk = st('wk').reshape(LH, D, D_ATT)
    bk = st('bk').reshape(LH, 1, D_ATT)
    wv = st('wv').reshape(LH, D, D_ATT)
    bv = st('bv').reshape(LH, 1, D_ATT)
    wo = st('wo').reshape(LH, D_ATT, D)
    bo = st('bo')                                                # (L, 1, D)
    head = params['head']
    return (wt, bt, mask, wq, bq, wk, bk, wv, bv, wo, bo,
            st('g1'), st('be1'), st('w1'), st('b1'),
            st('w2'), st('b2'), st('g2'), st('be2'),
            head['ffw_w'], head['ffw_b'], head['out_w'], head['out_b'])


def _resident_spec(shape):
    """Full-array block, constant index map -> DMA'd once, stays VMEM-resident."""
    zeros = (0,) * len(shape)
    return pl.BlockSpec(shape, lambda i: zeros)


# ---------------- full forward (jitted; folded weights passed in) ----------------
@jax.jit
def decoder_block_forward(idx, fused, ground_truth=None):
    B, T = idx.shape
    # batch grid: 2 blocks when the per-block batch stays sublane-aligned (v7x: 2 TCs)
    grid_b = 2 if (B % 2 == 0 and (B // 2) % 8 == 0) else 1
    b_blk = B // grid_b
    idx3 = idx.astype(jnp.float32).reshape(B, T, 1)

    in_specs = [pl.BlockSpec((b_blk, T, 1), lambda i: (i, 0, 0))]
    in_specs += [_resident_spec(a.shape) for a in fused]
    out_spec = pl.BlockSpec((b_blk, 1), lambda i: (i, 0))

    # rough advisory cost for XLA's scheduler
    D, H, dk, F, L = D_MODEL, N_HEADS, D_ATT, D_FFN, N_LAYERS
    tok = B * T
    flops = L * (2 * tok * D * 3 * H * dk + 4 * B * H * T * T * dk
                 + 2 * tok * H * dk * D + 4 * tok * D * F) + 2 * B * T * 64 + 2 * B * 64
    transcendentals = tok * D + L * B * H * T * T + L * B * H * T
    bytes_accessed = int(idx3.size * 4
                         + sum(int(a.size) * a.dtype.itemsize for a in fused) + B * 4)

    out = pl.pallas_call(
        functools.partial(fused_decoder_kernel, n_heads=N_HEADS),
        out_shape=jax.ShapeDtypeStruct((B, 1), jnp.float32),
        grid=(grid_b,),
        in_specs=in_specs,
        out_specs=out_spec,
        compiler_params=pltpu.CompilerParams(dimension_semantics=("parallel",)),
        cost_estimate=pl.CostEstimate(flops=flops,
                                      transcendentals=transcendentals,
                                      bytes_accessed=bytes_accessed),
    )(idx3, *fused)

    if ground_truth is None:
        loss = None
    else:
        loss = jnp.mean(jnp.square(out - ground_truth))
    return out, loss


# ---------------- deterministic parameter construction ----------------
def make_params(key):
    def nrm(k, shape, scale=0.02):
        return (scale * jax.random.normal(k, shape)).astype(jnp.float32)

    keys = jax.random.split(key, 4 + N_LAYERS)
    params = {
        't2v_w0': jnp.float32(0.3),
        't2v_b0': jnp.float32(0.1),
        't2v_w': nrm(keys[0], (D_MODEL - 2,), 1.0),
        't2v_b': nrm(keys[1], (D_MODEL - 2,), 1.0),
        'blocks': [],
        'head': {
            'ffw_w': nrm(keys[2], (SEQ_LEN, 64)),
            'ffw_b': jnp.zeros((1, 64), jnp.float32),
            'out_w': nrm(keys[3], (64, 1)),
            'out_b': jnp.zeros((1, 1), jnp.float32),
        },
    }
    for l in range(N_LAYERS):
        ks = jax.random.split(keys[4 + l], 6)
        params['blocks'].append({
            'wq': nrm(ks[0], (N_HEADS, D_MODEL, D_ATT)),
            'bq': jnp.zeros((N_HEADS, 1, D_ATT), jnp.float32),
            'wk': nrm(ks[1], (N_HEADS, D_MODEL, D_ATT)),
            'bk': jnp.zeros((N_HEADS, 1, D_ATT), jnp.float32),
            'wv': nrm(ks[2], (N_HEADS, D_MODEL, D_ATT)),
            'bv': jnp.zeros((N_HEADS, 1, D_ATT), jnp.float32),
            'wo': nrm(ks[3], (N_HEADS, D_ATT, D_MODEL)),
            'bo': jnp.zeros((1, D_MODEL), jnp.float32),
            'g1': jnp.ones((1, D_MODEL), jnp.float32),
            'be1': jnp.zeros((1, D_MODEL), jnp.float32),
            'w1': nrm(ks[4], (D_MODEL, D_FFN)),
            'b1': jnp.zeros((1, D_FFN), jnp.float32),
            'w2': nrm(ks[5], (D_FFN, D_MODEL)),
            'b2': jnp.zeros((1, D_MODEL), jnp.float32),
            'g2': jnp.ones((1, D_MODEL), jnp.float32),
            'be2': jnp.zeros((1, D_MODEL), jnp.float32),
        })
    return params


if __name__ == "__main__":
    key = jax.random.PRNGKey(0)
    k_param, k_idx = jax.random.split(key)
    params = make_params(k_param)
    fused = make_fused_params(params)      # weight folding done once, reused per call
    idx = jax.random.normal(k_idx, (BATCH, SEQ_LEN), dtype=jnp.float32)

    out, loss = decoder_block_forward(idx, fused, None)
    out = jax.block_until_ready(out)
    assert out.shape == (BATCH, 1) and out.dtype == jnp.float32
    assert loss is None
    print("KERNEL_OK")
</pallas_src>

<mosaic_0001>
module attributes {stable_mosaic.version = 11 : i64} {
  func.func @fused_decoder_kernel(%arg0: i32, %arg1: memref<8x8x1xf32, #tpu.memory_space<vmem>>, %arg2: memref<1x32xf32, #tpu.memory_space<vmem>>, %arg3: memref<1x32xf32, #tpu.memory_space<vmem>>, %arg4: memref<1x32xf32, #tpu.memory_space<vmem>>, %arg5: memref<8x32x8xf32, #tpu.memory_space<vmem>>, %arg6: memref<8x1x8xf32, #tpu.memory_space<vmem>>, %arg7: memref<8x32x8xf32, #tpu.memory_space<vmem>>, %arg8: memref<8x1x8xf32, #tpu.memory_space<vmem>>, %arg9: memref<8x32x8xf32, #tpu.memory_space<vmem>>, %arg10: memref<8x1x8xf32, #tpu.memory_space<vmem>>, %arg11: memref<8x8x32xf32, #tpu.memory_space<vmem>>, %arg12: memref<2x1x32xf32, #tpu.memory_space<vmem>>, %arg13: memref<2x1x32xf32, #tpu.memory_space<vmem>>, %arg14: memref<2x1x32xf32, #tpu.memory_space<vmem>>, %arg15: memref<2x32x64xf32, #tpu.memory_space<vmem>>, %arg16: memref<2x1x64xf32, #tpu.memory_space<vmem>>, %arg17: memref<2x64x32xf32, #tpu.memory_space<vmem>>, %arg18: memref<2x1x32xf32, #tpu.memory_space<vmem>>, %arg19: memref<2x1x32xf32, #tpu.memory_space<vmem>>, %arg20: memref<2x1x32xf32, #tpu.memory_space<vmem>>, %arg21: memref<8x64xf32, #tpu.memory_space<vmem>>, %arg22: memref<1x64xf32, #tpu.memory_space<vmem>>, %arg23: memref<64x1xf32, #tpu.memory_space<vmem>>, %arg24: memref<1x1xf32, #tpu.memory_space<vmem>>, %arg25: memref<8x1xf32, #tpu.memory_space<vmem>>) attributes {dimension_semantics = [#tpu.dimension_semantics<parallel>], iteration_bounds = array<i64: 2>, scalar_prefetch = 0 : i64, scratch_operands = 0 : i64, tpu.core_type = #tpu.core_type<tc>, window_params = [{transform_indices = @transform_0, window_bounds = array<i64: 8, 8, 1>}, {pipeline_mode = #tpu.pipeline_mode<synchronous>, transform_indices = @transform_1, window_bounds = array<i64: 1, 32>}, {pipeline_mode = #tpu.pipeline_mode<synchronous>, transform_indices = @transform_2, window_bounds = array<i64: 1, 32>}, {pipeline_mode = #tpu.pipeline_mode<synchronous>, transform_indices = @transform_3, window_bounds = array<i64: 1, 32>}, {pipeline_mode = #tpu.pipeline_mode<synchronous>, transform_indices = @transform_4, window_bounds = array<i64: 8, 32, 8>}, {pipeline_mode = #tpu.pipeline_mode<synchronous>, transform_indices = @transform_5, window_bounds = array<i64: 8, 1, 8>}, {pipeline_mode = #tpu.pipeline_mode<synchronous>, transform_indices = @transform_6, window_bounds = array<i64: 8, 32, 8>}, {pipeline_mode = #tpu.pipeline_mode<synchronous>, transform_indices = @transform_7, window_bounds = array<i64: 8, 1, 8>}, {pipeline_mode = #tpu.pipeline_mode<synchronous>, transform_indices = @transform_8, window_bounds = array<i64: 8, 32, 8>}, {pipeline_mode = #tpu.pipeline_mode<synchronous>, transform_indices = @transform_9, window_bounds = array<i64: 8, 1, 8>}, {pipeline_mode = #tpu.pipeline_mode<synchronous>, transform_indices = @transform_10, window_bounds = array<i64: 8, 8, 32>}, {pipeline_mode = #tpu.pipeline_mode<synchronous>, transform_indices = @transform_11, window_bounds = array<i64: 2, 1, 32>}, {pipeline_mode = #tpu.pipeline_mode<synchronous>, transform_indices = @transform_12, window_bounds = array<i64: 2, 1, 32>}, {pipeline_mode = #tpu.pipeline_mode<synchronous>, transform_indices = @transform_13, window_bounds = array<i64: 2, 1, 32>}, {pipeline_mode = #tpu.pipeline_mode<synchronous>, transform_indices = @transform_14, window_bounds = array<i64: 2, 32, 64>}, {pipeline_mode = #tpu.pipeline_mode<synchronous>, transform_indices = @transform_15, window_bounds = array<i64: 2, 1, 64>}, {pipeline_mode = #tpu.pipeline_mode<synchronous>, transform_indices = @transform_16, window_bounds = array<i64: 2, 64, 32>}, {pipeline_mode = #tpu.pipeline_mode<synchronous>, transform_indices = @transform_17, window_bounds = array<i64: 2, 1, 32>}, {pipeline_mode = #tpu.pipeline_mode<synchronous>, transform_indices = @transform_18, window_bounds = array<i64: 2, 1, 32>}, {pipeline_mode = #tpu.pipeline_mode<synchronous>, transform_indices = @transform_19, window_bounds = array<i64: 2, 1, 32>}, {pipeline_mode = #tpu.pipeline_mode<synchronous>, transform_indices = @transform_20, window_bounds = array<i64: 8, 64>}, {pipeline_mode = #tpu.pipeline_mode<synchronous>, transform_indices = @transform_21, window_bounds = array<i64: 1, 64>}, {pipeline_mode = #tpu.pipeline_mode<synchronous>, transform_indices = @transform_22, window_bounds = array<i64: 64, 1>}, {pipeline_mode = #tpu.pipeline_mode<synchronous>, transform_indices = @transform_23, window_bounds = array<i64: 1, 1>}, {transform_indices = @transform_24, window_bounds = array<i64: 8, 1>}]} {
    %c0 = arith.constant 0 : index
    %c0_0 = arith.constant 0 : index
    %c0_1 = arith.constant 0 : index
    %0 = vector.load %arg1[%c0, %c0_0, %c0_1] : memref<8x8x1xf32, #tpu.memory_space<vmem>>, vector<8x8x1xf32>
    %c0_2 = arith.constant 0 : index
    %c0_3 = arith.constant 0 : index
    %1 = vector.load %arg2[%c0_2, %c0_3] : memref<1x32xf32, #tpu.memory_space<vmem>>, vector<1x32xf32>
    %2 = vector.shape_cast %1 : vector<1x32xf32> to vector<1x1x32xf32>
    %c0_4 = arith.constant 0 : index
    %c0_5 = arith.constant 0 : index
    %3 = vector.load %arg3[%c0_4, %c0_5] : memref<1x32xf32, #tpu.memory_space<vmem>>, vector<1x32xf32>
    %4 = vector.shape_cast %3 : vector<1x32xf32> to vector<1x1x32xf32>
    %c0_6 = arith.constant 0 : index
    %c0_7 = arith.constant 0 : index
    %5 = vector.load %arg4[%c0_6, %c0_7] : memref<1x32xf32, #tpu.memory_space<vmem>>, vector<1x32xf32>
    %6 = vector.shape_cast %5 : vector<1x32xf32> to vector<1x1x32xf32>
    %7 = vector.broadcast %0 : vector<8x8x1xf32> to vector<8x8x32xf32>
    %8 = vector.broadcast %2 : vector<1x1x32xf32> to vector<8x8x32xf32>
    %9 = arith.mulf %7, %8 : vector<8x8x32xf32>
    %10 = vector.broadcast %4 : vector<1x1x32xf32> to vector<8x8x32xf32>
    %11 = arith.addf %9, %10 : vector<8x8x32xf32>
    %12 = math.sin %11 : vector<8x8x32xf32>
    %13 = arith.subf %12, %11 : vector<8x8x32xf32>
    %14 = vector.broadcast %6 : vector<1x1x32xf32> to vector<8x8x32xf32>
    %15 = arith.mulf %14, %13 : vector<8x8x32xf32>
    %16 = arith.addf %11, %15 : vector<8x8x32xf32>
    %17 = vector.shape_cast %16 : vector<8x8x32xf32> to vector<64x32xf32>
    %c0_8 = arith.constant 0 : index
    %c0_9 = arith.constant 0 : index
    %c0_10 = arith.constant 0 : index
    %18 = vector.load %arg5[%c0_8, %c0_9, %c0_10] : memref<8x32x8xf32, #tpu.memory_space<vmem>>, vector<1x32x8xf32>
    %19 = vector.shape_cast %18 : vector<1x32x8xf32> to vector<32x8xf32>
    %cst = arith.constant dense<0.000000e+00> : vector<64x8xf32>
    %20 = tpu.matmul %17, %19, %cst {dimension_numbers = #tpu.dot_dimension_numbers<[1], [0], [0], [1], [0, 0, 1, 1], [], []>} : vector<64x32xf32>, vector<32x8xf32>, vector<64x8xf32> -> vector<64x8xf32>
    %c0_11 = arith.constant 0 : index
    %c0_12 = arith.constant 0 : index
    %c0_13 = arith.constant 0 : index
    %21 = vector.load %arg6[%c0_11, %c0_12, %c0_13] : memref<8x1x8xf32, #tpu.memory_space<vmem>>, vector<1x1x8xf32>
    %22 = vector.shape_cast %21 : vector<1x1x8xf32> to vector<1x8xf32>
    %23 = vector.broadcast %22 : vector<1x8xf32> to vector<64x8xf32>
    %24 = arith.addf %20, %23 : vector<64x8xf32>
    %25 = vector.shape_cast %24 : vector<64x8xf32> to vector<8x8x8xf32>
    %c0_14 = arith.constant 0 : index
    %c0_15 = arith.constant 0 : index
    %c0_16 = arith.constant 0 : index
    %26 = vector.load %arg7[%c0_14, %c0_15, %c0_16] : memref<8x32x8xf32, #tpu.memory_space<vmem>>, vector<1x32x8xf32>
    %27 = vector.shape_cast %26 : vector<1x32x8xf32> to vector<32x8xf32>
    %cst_17 = arith.constant dense<0.000000e+00> : vector<64x8xf32>
    %28 = tpu.matmul %17, %27, %cst_17 {dimension_numbers = #tpu.dot_dimension_numbers<[1], [0], [0], [1], [0, 0, 1, 1], [], []>} : vector<64x32xf32>, vector<32x8xf32>, vector<64x8xf32> -> vector<64x8xf32>
    %c0_18 = arith.constant 0 : index
    %c0_19 = arith.constant 0 : index
    %c0_20 = arith.constant 0 : index
    %29 = vector.load %arg8[%c0_18, %c0_19, %c0_20] : memref<8x1x8xf32, #tpu.memory_space<vmem>>, vector<1x1x8xf32>
    %30 = vector.shape_cast %29 : vector<1x1x8xf32> to vector<1x8xf32>
    %31 = vector.broadcast %30 : vector<1x8xf32> to vector<64x8xf32>
    %32 = arith.addf %28, %31 : vector<64x8xf32>
    %33 = vector.shape_cast %32 : vector<64x8xf32> to vector<8x8x8xf32>
    %c0_21 = arith.constant 0 : index
    %c0_22 = arith.constant 0 : index
    %c0_23 = arith.constant 0 : index
    %34 = vector.load %arg9[%c0_21, %c0_22, %c0_23] : memref<8x32x8xf32, #tpu.memory_space<vmem>>, vector<1x32x8xf32>
    %35 = vector.shape_cast %34 : vector<1x32x8xf32> to vector<32x8xf32>
    %cst_24 = arith.constant dense<0.000000e+00> : vector<64x8xf32>
    %36 = tpu.matmul %17, %35, %cst_24 {dimension_numbers = #tpu.dot_dimension_numbers<[1], [0], [0], [1], [0, 0, 1, 1], [], []>} : vector<64x32xf32>, vector<32x8xf32>, vector<64x8xf32> -> vector<64x8xf32>
    %c0_25 = arith.constant 0 : index
    %c0_26 = arith.constant 0 : index
    %c0_27 = arith.constant 0 : index
    %37 = vector.load %arg10[%c0_25, %c0_26, %c0_27] : memref<8x1x8xf32, #tpu.memory_space<vmem>>, vector<1x1x8xf32>
    %38 = vector.shape_cast %37 : vector<1x1x8xf32> to vector<1x8xf32>
    %39 = vector.broadcast %38 : vector<1x8xf32> to vector<64x8xf32>
    %40 = arith.addf %36, %39 : vector<64x8xf32>
    %41 = vector.shape_cast %40 : vector<64x8xf32> to vector<8x8x8xf32>
    %c1 = arith.constant 1 : index
    %c0_28 = arith.constant 0 : index
    %c0_29 = arith.constant 0 : index
    %42 = vector.load %arg5[%c1, %c0_28, %c0_29] : memref<8x32x8xf32, #tpu.memory_space<vmem>>, vector<1x32x8xf32>
    %43 = vector.shape_cast %42 : vector<1x32x8xf32> to vector<32x8xf32>
    %cst_30 = arith.constant dense<0.000000e+00> : vector<64x8xf32>
    %44 = tpu.matmul %17, %43, %cst_30 {dimension_numbers = #tpu.dot_dimension_numbers<[1], [0], [0], [1], [0, 0, 1, 1], [], []>} : vector<64x32xf32>, vector<32x8xf32>, vector<64x8xf32> -> vector<64x8xf32>
    %c1_31 = arith.constant 1 : index
    %c0_32 = arith.constant 0 : index
    %c0_33 = arith.constant 0 : index
    %45 = vector.load %arg6[%c1_31, %c0_32, %c0_33] : memref<8x1x8xf32, #tpu.memory_space<vmem>>, vector<1x1x8xf32>
    %46 = vector.shape_cast %45 : vector<1x1x8xf32> to vector<1x8xf32>
    %47 = vector.broadcast %46 : vector<1x8xf32> to vector<64x8xf32>
    %48 = arith.addf %44, %47 : vector<64x8xf32>
    %49 = vector.shape_cast %48 : vector<64x8xf32> to vector<8x8x8xf32>
    %c1_34 = arith.constant 1 : index
    %c0_35 = arith.constant 0 : index
    %c0_36 = arith.constant 0 : index
    %50 = vector.load %arg7[%c1_34, %c0_35, %c0_36] : memref<8x32x8xf32, #tpu.memory_space<vmem>>, vector<1x32x8xf32>
    %51 = vector.shape_cast %50 : vector<1x32x8xf32> to vector<32x8xf32>
    %cst_37 = arith.constant dense<0.000000e+00> : vector<64x8xf32>
    %52 = tpu.matmul %17, %51, %cst_37 {dimension_numbers = #tpu.dot_dimension_numbers<[1], [0], [0], [1], [0, 0, 1, 1], [], []>} : vector<64x32xf32>, vector<32x8xf32>, vector<64x8xf32> -> vector<64x8xf32>
    %c1_38 = arith.constant 1 : index
    %c0_39 = arith.constant 0 : index
    %c0_40 = arith.constant 0 : index
    %53 = vector.load %arg8[%c1_38, %c0_39, %c0_40] : memref<8x1x8xf32, #tpu.memory_space<vmem>>, vector<1x1x8xf32>
    %54 = vector.shape_cast %53 : vector<1x1x8xf32> to vector<1x8xf32>
    %55 = vector.broadcast %54 : vector<1x8xf32> to vector<64x8xf32>
    %56 = arith.addf %52, %55 : vector<64x8xf32>
    %57 = vector.shape_cast %56 : vector<64x8xf32> to vector<8x8x8xf32>
    %c1_41 = arith.constant 1 : index
    %c0_42 = arith.constant 0 : index
    %c0_43 = arith.constant 0 : index
    %58 = vector.load %arg9[%c1_41, %c0_42, %c0_43] : memref<8x32x8xf32, #tpu.memory_space<vmem>>, vector<1x32x8xf32>
    %59 = vector.shape_cast %58 : vector<1x32x8xf32> to vector<32x8xf32>
    %cst_44 = arith.constant dense<0.000000e+00> : vector<64x8xf32>
    %60 = tpu.matmul %17, %59, %cst_44 {dimension_numbers = #tpu.dot_dimension_numbers<[1], [0], [0], [1], [0, 0, 1, 1], [], []>} : vector<64x32xf32>, vector<32x8xf32>, vector<64x8xf32> -> vector<64x8xf32>
    %c1_45 = arith.constant 1 : index
    %c0_46 = arith.constant 0 : index
    %c0_47 = arith.constant 0 : index
    %61 = vector.load %arg10[%c1_45, %c0_46, %c0_47] : memref<8x1x8xf32, #tpu.memory_space<vmem>>, vector<1x1x8xf32>
    %62 = vector.shape_cast %61 : vector<1x1x8xf32> to vector<1x8xf32>
    %63 = vector.broadcast %62 : vector<1x8xf32> to vector<64x8xf32>
    %64 = arith.addf %60, %63 : vector<64x8xf32>
    %65 = vector.shape_cast %64 : vector<64x8xf32> to vector<8x8x8xf32>
    %c2 = arith.constant 2 : index
    %c0_48 = arith.constant 0 : index
    %c0_49 = arith.constant 0 : index
    %66 = vector.load %arg5[%c2, %c0_48, %c0_49] : memref<8x32x8xf32, #tpu.memory_space<vmem>>, vector<1x32x8xf32>
    %67 = vector.shape_cast %66 : vector<1x32x8xf32> to vector<32x8xf32>
    %cst_50 = arith.constant dense<0.000000e+00> : vector<64x8xf32>
    %68 = tpu.matmul %17, %67, %cst_50 {dimension_numbers = #tpu.dot_dimension_numbers<[1], [0], [0], [1], [0, 0, 1, 1], [], []>} : vector<64x32xf32>, vector<32x8xf32>, vector<64x8xf32> -> vector<64x8xf32>
    %c2_51 = arith.constant 2 : index
    %c0_52 = arith.constant 0 : index
    %c0_53 = arith.constant 0 : index
    %69 = vector.load %arg6[%c2_51, %c0_52, %c0_53] : memref<8x1x8xf32, #tpu.memory_space<vmem>>, vector<1x1x8xf32>
    %70 = vector.shape_cast %69 : vector<1x1x8xf32> to vector<1x8xf32>
    %71 = vector.broadcast %70 : vector<1x8xf32> to vector<64x8xf32>
    %72 = arith.addf %68, %71 : vector<64x8xf32>
    %73 = vector.shape_cast %72 : vector<64x8xf32> to vector<8x8x8xf32>
    %c2_54 = arith.constant 2 : index
    %c0_55 = arith.constant 0 : index
    %c0_56 = arith.constant 0 : index
    %74 = vector.load %arg7[%c2_54, %c0_55, %c0_56] : memref<8x32x8xf32, #tpu.memory_space<vmem>>, vector<1x32x8xf32>
    %75 = vector.shape_cast %74 : vector<1x32x8xf32> to vector<32x8xf32>
    %cst_57 = arith.constant dense<0.000000e+00> : vector<64x8xf32>
    %76 = tpu.matmul %17, %75, %cst_57 {dimension_numbers = #tpu.dot_dimension_numbers<[1], [0], [0], [1], [0, 0, 1, 1], [], []>} : vector<64x32xf32>, vector<32x8xf32>, vector<64x8xf32> -> vector<64x8xf32>
    %c2_58 = arith.constant 2 : index
    %c0_59 = arith.constant 0 : index
    %c0_60 = arith.constant 0 : index
    %77 = vector.load %arg8[%c2_58, %c0_59, %c0_60] : memref<8x1x8xf32, #tpu.memory_space<vmem>>, vector<1x1x8xf32>
    %78 = vector.shape_cast %77 : vector<1x1x8xf32> to vector<1x8xf32>
    %79 = vector.broadcast %78 : vector<1x8xf32> to vector<64x8xf32>
    %80 = arith.addf %76, %79 : vector<64x8xf32>
    %81 = vector.shape_cast %80 : vector<64x8xf32> to vector<8x8x8xf32>
    %c2_61 = arith.constant 2 : index
    %c0_62 = arith.constant 0 : index
    %c0_63 = arith.constant 0 : index
    %82 = vector.load %arg9[%c2_61, %c0_62, %c0_63] : memref<8x32x8xf32, #tpu.memory_space<vmem>>, vector<1x32x8xf32>
    %83 = vector.shape_cast %82 : vector<1x32x8xf32> to vector<32x8xf32>
    %cst_64 = arith.constant dense<0.000000e+00> : vector<64x8xf32>
    %84 = tpu.matmul %17, %83, %cst_64 {dimension_numbers = #tpu.dot_dimension_numbers<[1], [0], [0], [1], [0, 0, 1, 1], [], []>} : vector<64x32xf32>, vector<32x8xf32>, vector<64x8xf32> -> vector<64x8xf32>
    %c2_65 = arith.constant 2 : index
    %c0_66 = arith.constant 0 : index
    %c0_67 = arith.constant 0 : index
    %85 = vector.load %arg10[%c2_65, %c0_66, %c0_67] : memref<8x1x8xf32, #tpu.memory_space<vmem>>, vector<1x1x8xf32>
    %86 = vector.shape_cast %85 : vector<1x1x8xf32> to vector<1x8xf32>
    %87 = vector.broadcast %86 : vector<1x8xf32> to vector<64x8xf32>
    %88 = arith.addf %84, %87 : vector<64x8xf32>
    %89 = vector.shape_cast %88 : vector<64x8xf32> to vector<8x8x8xf32>
    %c3 = arith.constant 3 : index
    %c0_68 = arith.constant 0 : index
    %c0_69 = arith.constant 0 : index
    %90 = vector.load %arg5[%c3, %c0_68, %c0_69] : memref<8x32x8xf32, #tpu.memory_space<vmem>>, vector<1x32x8xf32>
    %91 = vector.shape_cast %90 : vector<1x32x8xf32> to vector<32x8xf32>
    %cst_70 = arith.constant dense<0.000000e+00> : vector<64x8xf32>
    %92 = tpu.matmul %17, %91, %cst_70 {dimension_numbers = #tpu.dot_dimension_numbers<[1], [0], [0], [1], [0, 0, 1, 1], [], []>} : vector<64x32xf32>, vector<32x8xf32>, vector<64x8xf32> -> vector<64x8xf32>
    %c3_71 = arith.constant 3 : index
    %c0_72 = arith.constant 0 : index
    %c0_73 = arith.constant 0 : index
    %93 = vector.load %arg6[%c3_71, %c0_72, %c0_73] : memref<8x1x8xf32, #tpu.memory_space<vmem>>, vector<1x1x8xf32>
    %94 = vector.shape_cast %93 : vector<1x1x8xf32> to vector<1x8xf32>
    %95 = vector.broadcast %94 : vector<1x8xf32> to vector<64x8xf32>
    %96 = arith.addf %92, %95 : vector<64x8xf32>
    %97 = vector.shape_cast %96 : vector<64x8xf32> to vector<8x8x8xf32>
    %c3_74 = arith.constant 3 : index
    %c0_75 = arith.constant 0 : index
    %c0_76 = arith.constant 0 : index
    %98 = vector.load %arg7[%c3_74, %c0_75, %c0_76] : memref<8x32x8xf32, #tpu.memory_space<vmem>>, vector<1x32x8xf32>
    %99 = vector.shape_cast %98 : vector<1x32x8xf32> to vector<32x8xf32>
    %cst_77 = arith.constant dense<0.000000e+00> : vector<64x8xf32>
    %100 = tpu.matmul %17, %99, %cst_77 {dimension_numbers = #tpu.dot_dimension_numbers<[1], [0], [0], [1], [0, 0, 1, 1], [], []>} : vector<64x32xf32>, vector<32x8xf32>, vector<64x8xf32> -> vector<64x8xf32>
    %c3_78 = arith.constant 3 : index
    %c0_79 = arith.constant 0 : index
    %c0_80 = arith.constant 0 : index
    %101 = vector.load %arg8[%c3_78, %c0_79, %c0_80] : memref<8x1x8xf32, #tpu.memory_space<vmem>>, vector<1x1x8xf32>
    %102 = vector.shape_cast %101 : vector<1x1x8xf32> to vector<1x8xf32>
    %103 = vector.broadcast %102 : vector<1x8xf32> to vector<64x8xf32>
    %104 = arith.addf %100, %103 : vector<64x8xf32>
    %105 = vector.shape_cast %104 : vector<64x8xf32> to vector<8x8x8xf32>
    %c3_81 = arith.constant 3 : index
    %c0_82 = arith.constant 0 : index
    %c0_83 = arith.constant 0 : index
    %106 = vector.load %arg9[%c3_81, %c0_82, %c0_83] : memref<8x32x8xf32, #tpu.memory_space<vmem>>, vector<1x32x8xf32>
    %107 = vector.shape_cast %106 : vector<1x32x8xf32> to vector<32x8xf32>
    %cst_84 = arith.constant dense<0.000000e+00> : vector<64x8xf32>
    %108 = tpu.matmul %17, %107, %cst_84 {dimension_numbers = #tpu.dot_dimension_numbers<[1], [0], [0], [1], [0, 0, 1, 1], [], []>} : vector<64x32xf32>, vector<32x8xf32>, vector<64x8xf32> -> vector<64x8xf32>
    %c3_85 = arith.constant 3 : index
    %c0_86 = arith.constant 0 : index
    %c0_87 = arith.constant 0 : index
    %109 = vector.load %arg10[%c3_85, %c0_86, %c0_87] : memref<8x1x8xf32, #tpu.memory_space<vmem>>, vector<1x1x8xf32>
    %110 = vector.shape_cast %109 : vector<1x1x8xf32> to vector<1x8xf32>
    %111 = vector.broadcast %110 : vector<1x8xf32> to vector<64x8xf32>
    %112 = arith.addf %108, %111 : vector<64x8xf32>
    %113 = vector.shape_cast %112 : vector<64x8xf32> to vector<8x8x8xf32>
    %114 = tpu.concatenate %25, %49, %73, %97 in 0 : vector<8x8x8xf32>, vector<8x8x8xf32>, vector<8x8x8xf32>, vector<8x8x8xf32> -> vector<32x8x8xf32>
    %115 = tpu.concatenate %33, %57, %81, %105 in 0 : vector<8x8x8xf32>, vector<8x8x8xf32>, vector<8x8x8xf32>, vector<8x8x8xf32> -> vector<32x8x8xf32>
    %116 = tpu.concatenate %41, %65, %89, %113 in 0 : vector<8x8x8xf32>, vector<8x8x8xf32>, vector<8x8x8xf32>, vector<8x8x8xf32> -> vector<32x8x8xf32>
    "tpu.trace_start"() <{level = 10 : i32, message = "bqd,bkd->bqk"}> : () -> ()
    %cst_88 = arith.constant dense<0.000000e+00> : vector<32x8x8xf32>
    %117 = tpu.matmul %114, %115, %cst_88 {dimension_numbers = #tpu.dot_dimension_numbers<[2], [2], [1], [1], [0, 0, 0, 1, 1, 1], [0], [0]>} : vector<32x8x8xf32>, vector<32x8x8xf32>, vector<32x8x8xf32> -> vector<32x8x8xf32>
    "tpu.trace_stop"() : () -> ()
    %cst_89 = arith.constant 0.353553385 : f32
    %118 = vector.broadcast %cst_89 : f32 to vector<32x8x8xf32>
    %119 = arith.mulf %117, %118 : vector<32x8x8xf32>
    %cst_90 = arith.constant dense<0xFF800000> : vector<32x8xf32>
    %120 = vector.multi_reduction <maximumf>, %119, %cst_90 [2] : vector<32x8x8xf32> to vector<32x8xf32>
    %121 = vector.shape_cast %120 : vector<32x8xf32> to vector<32x8x1xf32>
    %122 = vector.broadcast %121 : vector<32x8x1xf32> to vector<32x8x8xf32>
    %123 = arith.subf %119, %122 : vector<32x8x8xf32>
    %124 = math.exp %123 : vector<32x8x8xf32>
    %cst_91 = arith.constant dense<0.000000e+00> : vector<32x8xf32>
    %125 = vector.multi_reduction <add>, %124, %cst_91 [2] : vector<32x8x8xf32> to vector<32x8xf32>
    %126 = vector.shape_cast %125 : vector<32x8xf32> to vector<32x8x1xf32>
    %127 = tpu.reciprocal %126 {approx = true} : vector<32x8x1xf32> -> vector<32x8x1xf32>
    %128 = vector.broadcast %127 : vector<32x8x1xf32> to vector<32x8x8xf32>
    %129 = arith.mulf %124, %128 : vector<32x8x8xf32>
    "tpu.trace_start"() <{level = 10 : i32, message = "bqk,bkd->bqd"}> : () -> ()
    %cst_92 = arith.constant dense<0.000000e+00> : vector<32x8x8xf32>
    %130 = tpu.matmul %129, %116, %cst_92 {dimension_numbers = #tpu.dot_dimension_numbers<[2], [1], [1], [2], [0, 0, 0, 1, 1, 2], [0], [0]>} : vector<32x8x8xf32>, vector<32x8x8xf32>, vector<32x8x8xf32> -> vector<32x8x8xf32>
    "tpu.trace_stop"() : () -> ()
    %c0_93 = arith.constant 0 : index
    %c0_94 = arith.constant 0 : index
    %c0_95 = arith.constant 0 : index
    %131 = vector.load %arg12[%c0_93, %c0_94, %c0_95] : memref<2x1x32xf32, #tpu.memory_space<vmem>>, vector<1x1x32xf32>
    %132 = vector.shape_cast %131 : vector<1x1x32xf32> to vector<1x32xf32>
    %133 = vector.extract_strided_slice %130 {offsets = [0, 0, 0], sizes = [8, 8, 8], strides = [1, 1, 1]} : vector<32x8x8xf32> to vector<8x8x8xf32>
    %134 = vector.shape_cast %133 : vector<8x8x8xf32> to vector<64x8xf32>
    %c0_96 = arith.constant 0 : index
    %c0_97 = arith.constant 0 : index
    %c0_98 = arith.constant 0 : index
    %135 = vector.load %arg11[%c0_96, %c0_97, %c0_98] : memref<8x8x32xf32, #tpu.memory_space<vmem>>, vector<1x8x32xf32>
    %136 = vector.shape_cast %135 : vector<1x8x32xf32> to vector<8x32xf32>
    %cst_99 = arith.constant dense<0.000000e+00> : vector<64x32xf32>
    %137 = tpu.matmul %134, %136, %cst_99 {dimension_numbers = #tpu.dot_dimension_numbers<[1], [0], [0], [1], [0, 0, 1, 1], [], []>} : vector<64x8xf32>, vector<8x32xf32>, vector<64x32xf32> -> vector<64x32xf32>
    %138 = vector.broadcast %132 : vector<1x32xf32> to vector<64x32xf32>
    %139 = arith.addf %138, %137 : vector<64x32xf32>
    %140 = vector.extract_strided_slice %130 {offsets = [8, 0, 0], sizes = [8, 8, 8], strides = [1, 1, 1]} : vector<32x8x8xf32> to vector<8x8x8xf32>
    %141 = vector.shape_cast %140 : vector<8x8x8xf32> to vector<64x8xf32>
    %c1_100 = arith.constant 1 : index
    %c0_101 = arith.constant 0 : index
    %c0_102 = arith.constant 0 : index
    %142 = vector.load %arg11[%c1_100, %c0_101, %c0_102] : memref<8x8x32xf32, #tpu.memory_space<vmem>>, vector<1x8x32xf32>
    %143 = vector.shape_cast %142 : vector<1x8x32xf32> to vector<8x32xf32>
    %cst_103 = arith.constant dense<0.000000e+00> : vector<64x32xf32>
    %144 = tpu.matmul %141, %143, %cst_103 {dimension_numbers = #tpu.dot_dimension_numbers<[1], [0], [0], [1], [0, 0, 1, 1], [], []>} : vector<64x8xf32>, vector<8x32xf32>, vector<64x32xf32> -> vector<64x32xf32>
    %145 = arith.addf %139, %144 : vector<64x32xf32>
    %146 = vector.extract_strided_slice %130 {offsets = [16, 0, 0], sizes = [8, 8, 8], strides = [1, 1, 1]} : vector<32x8x8xf32> to vector<8x8x8xf32>
    %147 = vector.shape_cast %146 : vector<8x8x8xf32> to vector<64x8xf32>
    %c2_104 = arith.constant 2 : index
    %c0_105 = arith.constant 0 : index
    %c0_106 = arith.constant 0 : index
    %148 = vector.load %arg11[%c2_104, %c0_105, %c0_106] : memref<8x8x32xf32, #tpu.memory_space<vmem>>, vector<1x8x32xf32>
    %149 = vector.shape_cast %148 : vector<1x8x32xf32> to vector<8x32xf32>
    %cst_107 = arith.constant dense<0.000000e+00> : vector<64x32xf32>
    %150 = tpu.matmul %147, %149, %cst_107 {dimension_numbers = #tpu.dot_dimension_numbers<[1], [0], [0], [1], [0, 0, 1, 1], [], []>} : vector<64x8xf32>, vector<8x32xf32>, vector<64x32xf32> -> vector<64x32xf32>
    %151 = arith.addf %145, %150 : vector<64x32xf32>
    %152 = vector.extract_strided_slice %130 {offsets = [24, 0, 0], sizes = [8, 8, 8], strides = [1, 1, 1]} : vector<32x8x8xf32> to vector<8x8x8xf32>
    %153 = vector.shape_cast %152 : vector<8x8x8xf32> to vector<64x8xf32>
    %c3_108 = arith.constant 3 : index
    %c0_109 = arith.constant 0 : index
    %c0_110 = arith.constant 0 : index
    %154 = vector.load %arg11[%c3_108, %c0_109, %c0_110] : memref<8x8x32xf32, #tpu.memory_space<vmem>>, vector<1x8x32xf32>
    %155 = vector.shape_cast %154 : vector<1x8x32xf32> to vector<8x32xf32>
    %cst_111 = arith.constant dense<0.000000e+00> : vector<64x32xf32>
    %156 = tpu.matmul %153, %155, %cst_111 {dimension_numbers = #tpu.dot_dimension_numbers<[1], [0], [0], [1], [0, 0, 1, 1], [], []>} : vector<64x8xf32>, vector<8x32xf32>, vector<64x32xf32> -> vector<64x32xf32>
    %157 = arith.addf %151, %156 : vector<64x32xf32>
    %158 = arith.addf %17, %157 : vector<64x32xf32>
    %c0_112 = arith.constant 0 : index
    %c0_113 = arith.constant 0 : index
    %c0_114 = arith.constant 0 : index
    %159 = vector.load %arg13[%c0_112, %c0_113, %c0_114] : memref<2x1x32xf32, #tpu.memory_space<vmem>>, vector<1x1x32xf32>
    %160 = vector.shape_cast %159 : vector<1x1x32xf32> to vector<1x32xf32>
    %c0_115 = arith.constant 0 : index
    %c0_116 = arith.constant 0 : index
    %c0_117 = arith.constant 0 : index
    %161 = vector.load %arg14[%c0_115, %c0_116, %c0_117] : memref<2x1x32xf32, #tpu.memory_space<vmem>>, vector<1x1x32xf32>
    %162 = vector.shape_cast %161 : vector<1x1x32xf32> to vector<1x32xf32>
    %cst_118 = arith.constant dense<0.000000e+00> : vector<64xf32>
    %163 = vector.multi_reduction <add>, %158, %cst_118 [1] : vector<64x32xf32> to vector<64xf32>
    %164 = vector.shape_cast %163 : vector<64xf32> to vector<64x1xf32>
    %cst_119 = arith.constant 3.200000e+01 : f32
    %165 = vector.broadcast %cst_119 : f32 to vector<64x1xf32>
    %166 = arith.divf %164, %165 : vector<64x1xf32>
    %167 = vector.broadcast %166 : vector<64x1xf32> to vector<64x32xf32>
    %168 = arith.subf %158, %167 : vector<64x32xf32>
    %169 = arith.mulf %168, %168 : vector<64x32xf32>
    %cst_120 = arith.constant dense<0.000000e+00> : vector<64xf32>
    %170 = vector.multi_reduction <add>, %169, %cst_120 [1] : vector<64x32xf32> to vector<64xf32>
    %171 = vector.shape_cast %170 : vector<64xf32> to vector<64x1xf32>
    %cst_121 = arith.constant 3.200000e+01 : f32
    %172 = vector.broadcast %cst_121 : f32 to vector<64x1xf32>
    %173 = arith.divf %171, %172 : vector<64x1xf32>
    %174 = vector.broadcast %166 : vector<64x1xf32> to vector<64x32xf32>
    %175 = arith.subf %158, %174 : vector<64x32xf32>
    %cst_122 = arith.constant 9.99999974E-6 : f32
    %176 = vector.broadcast %cst_122 : f32 to vector<64x1xf32>
    %177 = arith.addf %173, %176 : vector<64x1xf32>
    %178 = math.rsqrt %177 : vector<64x1xf32>
    %179 = vector.broadcast %178 : vector<64x1xf32> to vector<64x32xf32>
    %180 = arith.mulf %175, %179 : vector<64x32xf32>
    %181 = vector.broadcast %160 : vector<1x32xf32> to vector<64x32xf32>
    %182 = arith.mulf %180, %181 : vector<64x32xf32>
    %183 = vector.broadcast %162 : vector<1x32xf32> to vector<64x32xf32>
    %184 = arith.addf %182, %183 : vector<64x32xf32>
    %c0_123 = arith.constant 0 : index
    %c0_124 = arith.constant 0 : index
    %c0_125 = arith.constant 0 : index
    %185 = vector.load %arg15[%c0_123, %c0_124, %c0_125] : memref<2x32x64xf32, #tpu.memory_space<vmem>>, vector<1x32x64xf32>
    %186 = vector.shape_cast %185 : vector<1x32x64xf32> to vector<32x64xf32>
    %cst_126 = arith.constant dense<0.000000e+00> : vector<64x64xf32>
    %187 = tpu.matmul %184, %186, %cst_126 {dimension_numbers = #tpu.dot_dimension_numbers<[1], [0], [0], [1], [0, 0, 1, 1], [], []>} : vector<64x32xf32>, vector<32x64xf32>, vector<64x64xf32> -> vector<64x64xf32>
    %c0_127 = arith.constant 0 : index
    %c0_128 = arith.constant 0 : index
    %c0_129 = arith.constant 0 : index
    %188 = vector.load %arg16[%c0_127, %c0_128, %c0_129] : memref<2x1x64xf32, #tpu.memory_space<vmem>>, vector<1x1x64xf32>
    %189 = vector.shape_cast %188 : vector<1x1x64xf32> to vector<1x64xf32>
    %190 = vector.broadcast %189 : vector<1x64xf32> to vector<64x64xf32>
    %191 = arith.addf %187, %190 : vector<64x64xf32>
    %cst_130 = arith.constant 0.000000e+00 : f32
    %192 = vector.broadcast %cst_130 : f32 to vector<64x64xf32>
    %193 = arith.maximumf %191, %192 : vector<64x64xf32>
    %c0_131 = arith.constant 0 : index
    %c0_132 = arith.constant 0 : index
    %c0_133 = arith.constant 0 : index
    %194 = vector.load %arg17[%c0_131, %c0_132, %c0_133] : memref<2x64x32xf32, #tpu.memory_space<vmem>>, vector<1x64x32xf32>
    %195 = vector.shape_cast %194 : vector<1x64x32xf32> to vector<64x32xf32>
    %cst_134 = arith.constant dense<0.000000e+00> : vector<64x32xf32>
    %196 = tpu.matmul %193, %195, %cst_134 {dimension_numbers = #tpu.dot_dimension_numbers<[1], [0], [0], [1], [0, 0, 1, 1], [], []>} : vector<64x64xf32>, vector<64x32xf32>, vector<64x32xf32> -> vector<64x32xf32>
    %c0_135 = arith.constant 0 : index
    %c0_136 = arith.constant 0 : index
    %c0_137 = arith.constant 0 : index
    %197 = vector.load %arg18[%c0_135, %c0_136, %c0_137] : memref<2x1x32xf32, #tpu.memory_space<vmem>>, vector<1x1x32xf32>
    %198 = vector.shape_cast %197 : vector<1x1x32xf32> to vector<1x32xf32>
    %199 = vector.broadcast %198 : vector<1x32xf32> to vector<64x32xf32>
    %200 = arith.addf %196, %199 : vector<64x32xf32>
    %201 = arith.addf %184, %200 : vector<64x32xf32>
    %c0_138 = arith.constant 0 : index
    %c0_139 = arith.constant 0 : index
    %c0_140 = arith.constant 0 : index
    %202 = vector.load %arg19[%c0_138, %c0_139, %c0_140] : memref<2x1x32xf32, #tpu.memory_space<vmem>>, vector<1x1x32xf32>
    %203 = vector.shape_cast %202 : vector<1x1x32xf32> to vector<1x32xf32>
    %c0_141 = arith.constant 0 : index
    %c0_142 = arith.constant 0 : index
    %c0_143 = arith.constant 0 : index
    %204 = vector.load %arg20[%c0_141, %c0_142, %c0_143] : memref<2x1x32xf32, #tpu.memory_space<vmem>>, vector<1x1x32xf32>
    %205 = vector.shape_cast %204 : vector<1x1x32xf32> to vector<1x32xf32>
    %cst_144 = arith.constant dense<0.000000e+00> : vector<64xf32>
    %206 = vector.multi_reduction <add>, %201, %cst_144 [1] : vector<64x32xf32> to vector<64xf32>
    %207 = vector.shape_cast %206 : vector<64xf32> to vector<64x1xf32>
    %cst_145 = arith.constant 3.200000e+01 : f32
    %208 = vector.broadcast %cst_145 : f32 to vector<64x1xf32>
    %209 = arith.divf %207, %208 : vector<64x1xf32>
    %210 = vector.broadcast %209 : vector<64x1xf32> to vector<64x32xf32>
    %211 = arith.subf %201, %210 : vector<64x32xf32>
    %212 = arith.mulf %211, %211 : vector<64x32xf32>
    %cst_146 = arith.constant dense<0.000000e+00> : vector<64xf32>
    %213 = vector.multi_reduction <add>, %212, %cst_146 [1] : vector<64x32xf32> to vector<64xf32>
    %214 = vector.shape_cast %213 : vector<64xf32> to vector<64x1xf32>
    %cst_147 = arith.constant 3.200000e+01 : f32
    %215 = vector.broadcast %cst_147 : f32 to vector<64x1xf32>
    %216 = arith.divf %214, %215 : vector<64x1xf32>
    %217 = vector.broadcast %209 : vector<64x1xf32> to vector<64x32xf32>
    %218 = arith.subf %201, %217 : vector<64x32xf32>
    %cst_148 = arith.constant 9.99999974E-6 : f32
    %219 = vector.broadcast %cst_148 : f32 to vector<64x1xf32>
    %220 = arith.addf %216, %219 : vector<64x1xf32>
    %221 = math.rsqrt %220 : vector<64x1xf32>
    %222 = vector.broadcast %221 : vector<64x1xf32> to vector<64x32xf32>
    %223 = arith.mulf %218, %222 : vector<64x32xf32>
    %224 = vector.broadcast %203 : vector<1x32xf32> to vector<64x32xf32>
    %225 = arith.mulf %223, %224 : vector<64x32xf32>
    %226 = vector.broadcast %205 : vector<1x32xf32> to vector<64x32xf32>
    %227 = arith.addf %225, %226 : vector<64x32xf32>
    %c4 = arith.constant 4 : index
    %c0_149 = arith.constant 0 : index
    %c0_150 = arith.constant 0 : index
    %228 = vector.load %arg5[%c4, %c0_149, %c0_150] : memref<8x32x8xf32, #tpu.memory_space<vmem>>, vector<1x32x8xf32>
    %229 = vector.shape_cast %228 : vector<1x32x8xf32> to vector<32x8xf32>
    %cst_151 = arith.constant dense<0.000000e+00> : vector<64x8xf32>
    %230 = tpu.matmul %227, %229, %cst_151 {dimension_numbers = #tpu.dot_dimension_numbers<[1], [0], [0], [1], [0, 0, 1, 1], [], []>} : vector<64x32xf32>, vector<32x8xf32>, vector<64x8xf32> -> vector<64x8xf32>
    %c4_152 = arith.constant 4 : index
    %c0_153 = arith.constant 0 : index
    %c0_154 = arith.constant 0 : index
    %231 = vector.load %arg6[%c4_152, %c0_153, %c0_154] : memref<8x1x8xf32, #tpu.memory_space<vmem>>, vector<1x1x8xf32>
    %232 = vector.shape_cast %231 : vector<1x1x8xf32> to vector<1x8xf32>
    %233 = vector.broadcast %232 : vector<1x8xf32> to vector<64x8xf32>
    %234 = arith.addf %230, %233 : vector<64x8xf32>
    %235 = vector.shape_cast %234 : vector<64x8xf32> to vector<8x8x8xf32>
    %c4_155 = arith.constant 4 : index
    %c0_156 = arith.constant 0 : index
    %c0_157 = arith.constant 0 : index
    %236 = vector.load %arg7[%c4_155, %c0_156, %c0_157] : memref<8x32x8xf32, #tpu.memory_space<vmem>>, vector<1x32x8xf32>
    %237 = vector.shape_cast %236 : vector<1x32x8xf32> to vector<32x8xf32>
    %cst_158 = arith.constant dense<0.000000e+00> : vector<64x8xf32>
    %238 = tpu.matmul %227, %237, %cst_158 {dimension_numbers = #tpu.dot_dimension_numbers<[1], [0], [0], [1], [0, 0, 1, 1], [], []>} : vector<64x32xf32>, vector<32x8xf32>, vector<64x8xf32> -> vector<64x8xf32>
    %c4_159 = arith.constant 4 : index
    %c0_160 = arith.constant 0 : index
    %c0_161 = arith.constant 0 : index
    %239 = vector.load %arg8[%c4_159, %c0_160, %c0_161] : memref<8x1x8xf32, #tpu.memory_space<vmem>>, vector<1x1x8xf32>
    %240 = vector.shape_cast %239 : vector<1x1x8xf32> to vector<1x8xf32>
    %241 = vector.broadcast %240 : vector<1x8xf32> to vector<64x8xf32>
    %242 = arith.addf %238, %241 : vector<64x8xf32>
    %243 = vector.shape_cast %242 : vector<64x8xf32> to vector<8x8x8xf32>
    %c4_162 = arith.constant 4 : index
    %c0_163 = arith.constant 0 : index
    %c0_164 = arith.constant 0 : index
    %244 = vector.load %arg9[%c4_162, %c0_163, %c0_164] : memref<8x32x8xf32, #tpu.memory_space<vmem>>, vector<1x32x8xf32>
    %245 = vector.shape_cast %244 : vector<1x32x8xf32> to vector<32x8xf32>
    %cst_165 = arith.constant dense<0.000000e+00> : vector<64x8xf32>
    %246 = tpu.matmul %227, %245, %cst_165 {dimension_numbers = #tpu.dot_dimension_numbers<[1], [0], [0], [1], [0, 0, 1, 1], [], []>} : vector<64x32xf32>, vector<32x8xf32>, vector<64x8xf32> -> vector<64x8xf32>
    %c4_166 = arith.constant 4 : index
    %c0_167 = arith.constant 0 : index
    %c0_168 = arith.constant 0 : index
    %247 = vector.load %arg10[%c4_166, %c0_167, %c0_168] : memref<8x1x8xf32, #tpu.memory_space<vmem>>, vector<1x1x8xf32>
    %248 = vector.shape_cast %247 : vector<1x1x8xf32> to vector<1x8xf32>
    %249 = vector.broadcast %248 : vector<1x8xf32> to vector<64x8xf32>
    %250 = arith.addf %246, %249 : vector<64x8xf32>
    %251 = vector.shape_cast %250 : vector<64x8xf32> to vector<8x8x8xf32>
    %c5 = arith.constant 5 : index
    %c0_169 = arith.constant 0 : index
    %c0_170 = arith.constant 0 : index
    %252 = vector.load %arg5[%c5, %c0_169, %c0_170] : memref<8x32x8xf32, #tpu.memory_space<vmem>>, vector<1x32x8xf32>
    %253 = vector.shape_cast %252 : vector<1x32x8xf32> to vector<32x8xf32>
    %cst_171 = arith.constant dense<0.000000e+00> : vector<64x8xf32>
    %254 = tpu.matmul %227, %253, %cst_171 {dimension_numbers = #tpu.dot_dimension_numbers<[1], [0], [0], [1], [0, 0, 1, 1], [], []>} : vector<64x32xf32>, vector<32x8xf32>, vector<64x8xf32> -> vector<64x8xf32>
    %c5_172 = arith.constant 5 : index
    %c0_173 = arith.constant 0 : index
    %c0_174 = arith.constant 0 : index
    %255 = vector.load %arg6[%c5_172, %c0_173, %c0_174] : memref<8x1x8xf32, #tpu.memory_space<vmem>>, vector<1x1x8xf32>
    %256 = vector.shape_cast %255 : vector<1x1x8xf32> to vector<1x8xf32>
    %257 = vector.broadcast %256 : vector<1x8xf32> to vector<64x8xf32>
    %258 = arith.addf %254, %257 : vector<64x8xf32>
    %259 = vector.shape_cast %258 : vector<64x8xf32> to vector<8x8x8xf32>
    %c5_175 = arith.constant 5 : index
    %c0_176 = arith.constant 0 : index
    %c0_177 = arith.constant 0 : index
    %260 = vector.load %arg7[%c5_175, %c0_176, %c0_177] : memref<8x32x8xf32, #tpu.memory_space<vmem>>, vector<1x32x8xf32>
    %261 = vector.shape_cast %260 : vector<1x32x8xf32> to vector<32x8xf32>
    %cst_178 = arith.constant dense<0.000000e+00> : vector<64x8xf32>
    %262 = tpu.matmul %227, %261, %cst_178 {dimension_numbers = #tpu.dot_dimension_numbers<[1], [0], [0], [1], [0, 0, 1, 1], [], []>} : vector<64x32xf32>, vector<32x8xf32>, vector<64x8xf32> -> vector<64x8xf32>
    %c5_179 = arith.constant 5 : index
    %c0_180 = arith.constant 0 : index
    %c0_181 = arith.constant 0 : index
    %263 = vector.load %arg8[%c5_179, %c0_180, %c0_181] : memref<8x1x8xf32, #tpu.memory_space<vmem>>, vector<1x1x8xf32>
    %264 = vector.shape_cast %263 : vector<1x1x8xf32> to vector<1x8xf32>
    %265 = vector.broadcast %264 : vector<1x8xf32> to vector<64x8xf32>
    %266 = arith.addf %262, %265 : vector<64x8xf32>
    %267 = vector.shape_cast %266 : vector<64x8xf32> to vector<8x8x8xf32>
    %c5_182 = arith.constant 5 : index
    %c0_183 = arith.constant 0 : index
    %c0_184 = arith.constant 0 : index
    %268 = vector.load %arg9[%c5_182, %c0_183, %c0_184] : memref<8x32x8xf32, #tpu.memory_space<vmem>>, vector<1x32x8xf32>
    %269 = vector.shape_cast %268 : vector<1x32x8xf32> to vector<32x8xf32>
    %cst_185 = arith.constant dense<0.000000e+00> : vector<64x8xf32>
    %270 = tpu.matmul %227, %269, %cst_185 {dimension_numbers = #tpu.dot_dimension_numbers<[1], [0], [0], [1], [0, 0, 1, 1], [], []>} : vector<64x32xf32>, vector<32x8xf32>, vector<64x8xf32> -> vector<64x8xf32>
    %c5_186 = arith.constant 5 : index
    %c0_187 = arith.constant 0 : index
    %c0_188 = arith.constant 0 : index
    %271 = vector.load %arg10[%c5_186, %c0_187, %c0_188] : memref<8x1x8xf32, #tpu.memory_space<vmem>>, vector<1x1x8xf32>
    %272 = vector.shape_cast %271 : vector<1x1x8xf32> to vector<1x8xf32>
    %273 = vector.broadcast %272 : vector<1x8xf32> to vector<64x8xf32>
    %274 = arith.addf %270, %273 : vector<64x8xf32>
    %275 = vector.shape_cast %274 : vector<64x8xf32> to vector<8x8x8xf32>
    %c6 = arith.constant 6 : index
    %c0_189 = arith.constant 0 : index
    %c0_190 = arith.constant 0 : index
    %276 = vector.load %arg5[%c6, %c0_189, %c0_190] : memref<8x32x8xf32, #tpu.memory_space<vmem>>, vector<1x32x8xf32>
    %277 = vector.shape_cast %276 : vector<1x32x8xf32> to vector<32x8xf32>
    %cst_191 = arith.constant dense<0.000000e+00> : vector<64x8xf32>
    %278 = tpu.matmul %227, %277, %cst_191 {dimension_numbers = #tpu.dot_dimension_numbers<[1], [0], [0], [1], [0, 0, 1, 1], [], []>} : vector<64x32xf32>, vector<32x8xf32>, vector<64x8xf32> -> vector<64x8xf32>
    %c6_192 = arith.constant 6 : index
    %c0_193 = arith.constant 0 : index
    %c0_194 = arith.constant 0 : index
    %279 = vector.load %arg6[%c6_192, %c0_193, %c0_194] : memref<8x1x8xf32, #tpu.memory_space<vmem>>, vector<1x1x8xf32>
    %280 = vector.shape_cast %279 : vector<1x1x8xf32> to vector<1x8xf32>
    %281 = vector.broadcast %280 : vector<1x8xf32> to vector<64x8xf32>
    %282 = arith.addf %278, %281 : vector<64x8xf32>
    %283 = vector.shape_cast %282 : vector<64x8xf32> to vector<8x8x8xf32>
    %c6_195 = arith.constant 6 : index
    %c0_196 = arith.constant 0 : index
    %c0_197 = arith.constant 0 : index
    %284 = vector.load %arg7[%c6_195, %c0_196, %c0_197] : memref<8x32x8xf32, #tpu.memory_space<vmem>>, vector<1x32x8xf32>
    %285 = vector.shape_cast %284 : vector<1x32x8xf32> to vector<32x8xf32>
    %cst_198 = arith.constant dense<0.000000e+00> : vector<64x8xf32>
    %286 = tpu.matmul %227, %285, %cst_198 {dimension_numbers = #tpu.dot_dimension_numbers<[1], [0], [0], [1], [0, 0, 1, 1], [], []>} : vector<64x32xf32>, vector<32x8xf32>, vector<64x8xf32> -> vector<64x8xf32>
    %c6_199 = arith.constant 6 : index
    %c0_200 = arith.constant 0 : index
    %c0_201 = arith.constant 0 : index
    %287 = vector.load %arg8[%c6_199, %c0_200, %c0_201] : memref<8x1x8xf32, #tpu.memory_space<vmem>>, vector<1x1x8xf32>
    %288 = vector.shape_cast %287 : vector<1x1x8xf32> to vector<1x8xf32>
    %289 = vector.broadcast %288 : vector<1x8xf32> to vector<64x8xf32>
    %290 = arith.addf %286, %289 : vector<64x8xf32>
    %291 = vector.shape_cast %290 : vector<64x8xf32> to vector<8x8x8xf32>
    %c6_202 = arith.constant 6 : index
    %c0_203 = arith.constant 0 : index
    %c0_204 = arith.constant 0 : index
    %292 = vector.load %arg9[%c6_202, %c0_203, %c0_204] : memref<8x32x8xf32, #tpu.memory_space<vmem>>, vector<1x32x8xf32>
    %293 = vector.shape_cast %292 : vector<1x32x8xf32> to vector<32x8xf32>
    %cst_205 = arith.constant dense<0.000000e+00> : vector<64x8xf32>
    %294 = tpu.matmul %227, %293, %cst_205 {dimension_numbers = #tpu.dot_dimension_numbers<[1], [0], [0], [1], [0, 0, 1, 1], [], []>} : vector<64x32xf32>, vector<32x8xf32>, vector<64x8xf32> -> vector<64x8xf32>
    %c6_206 = arith.constant 6 : index
    %c0_207 = arith.constant 0 : index
    %c0_208 = arith.constant 0 : index
    %295 = vector.load %arg10[%c6_206, %c0_207, %c0_208] : memref<8x1x8xf32, #tpu.memory_space<vmem>>, vector<1x1x8xf32>
    %296 = vector.shape_cast %295 : vector<1x1x8xf32> to vector<1x8xf32>
    %297 = vector.broadcast %296 : vector<1x8xf32> to vector<64x8xf32>
    %298 = arith.addf %294, %297 : vector<64x8xf32>
    %299 = vector.shape_cast %298 : vector<64x8xf32> to vector<8x8x8xf32>
    %c7 = arith.constant 7 : index
    %c0_209 = arith.constant 0 : index
    %c0_210 = arith.constant 0 : index
    %300 = vector.load %arg5[%c7, %c0_209, %c0_210] : memref<8x32x8xf32, #tpu.memory_space<vmem>>, vector<1x32x8xf32>
    %301 = vector.shape_cast %300 : vector<1x32x8xf32> to vector<32x8xf32>
    %cst_211 = arith.constant dense<0.000000e+00> : vector<64x8xf32>
    %302 = tpu.matmul %227, %301, %cst_211 {dimension_numbers = #tpu.dot_dimension_numbers<[1], [0], [0], [1], [0, 0, 1, 1], [], []>} : vector<64x32xf32>, vector<32x8xf32>, vector<64x8xf32> -> vector<64x8xf32>
    %c7_212 = arith.constant 7 : index
    %c0_213 = arith.constant 0 : index
    %c0_214 = arith.constant 0 : index
    %303 = vector.load %arg6[%c7_212, %c0_213, %c0_214] : memref<8x1x8xf32, #tpu.memory_space<vmem>>, vector<1x1x8xf32>
    %304 = vector.shape_cast %303 : vector<1x1x8xf32> to vector<1x8xf32>
    %305 = vector.broadcast %304 : vector<1x8xf32> to vector<64x8xf32>
    %306 = arith.addf %302, %305 : vector<64x8xf32>
    %307 = vector.shape_cast %306 : vector<64x8xf32> to vector<8x8x8xf32>
    %c7_215 = arith.constant 7 : index
    %c0_216 = arith.constant 0 : index
    %c0_217 = arith.constant 0 : index
    %308 = vector.load %arg7[%c7_215, %c0_216, %c0_217] : memref<8x32x8xf32, #tpu.memory_space<vmem>>, vector<1x32x8xf32>
    %309 = vector.shape_cast %308 : vector<1x32x8xf32> to vector<32x8xf32>
    %cst_218 = arith.constant dense<0.000000e+00> : vector<64x8xf32>
    %310 = tpu.matmul %227, %309, %cst_218 {dimension_numbers = #tpu.dot_dimension_numbers<[1], [0], [0], [1], [0, 0, 1, 1], [], []>} : vector<64x32xf32>, vector<32x8xf32>, vector<64x8xf32> -> vector<64x8xf32>
    %c7_219 = arith.constant 7 : index
    %c0_220 = arith.constant 0 : index
    %c0_221 = arith.constant 0 : index
    %311 = vector.load %arg8[%c7_219, %c0_220, %c0_221] : memref<8x1x8xf32, #tpu.memory_space<vmem>>, vector<1x1x8xf32>
    %312 = vector.shape_cast %311 : vector<1x1x8xf32> to vector<1x8xf32>
    %313 = vector.broadcast %312 : vector<1x8xf32> to vector<64x8xf32>
    %314 = arith.addf %310, %313 : vector<64x8xf32>
    %315 = vector.shape_cast %314 : vector<64x8xf32> to vector<8x8x8xf32>
    %c7_222 = arith.constant 7 : index
    %c0_223 = arith.constant 0 : index
    %c0_224 = arith.constant 0 : index
    %316 = vector.load %arg9[%c7_222, %c0_223, %c0_224] : memref<8x32x8xf32, #tpu.memory_space<vmem>>, vector<1x32x8xf32>
    %317 = vector.shape_cast %316 : vector<1x32x8xf32> to vector<32x8xf32>
    %cst_225 = arith.constant dense<0.000000e+00> : vector<64x8xf32>
    %318 = tpu.matmul %227, %317, %cst_225 {dimension_numbers = #tpu.dot_dimension_numbers<[1], [0], [0], [1], [0, 0, 1, 1], [], []>} : vector<64x32xf32>, vector<32x8xf32>, vector<64x8xf32> -> vector<64x8xf32>
    %c7_226 = arith.constant 7 : index
    %c0_227 = arith.constant 0 : index
    %c0_228 = arith.constant 0 : index
    %319 = vector.load %arg10[%c7_226, %c0_227, %c0_228] : memref<8x1x8xf32, #tpu.memory_space<vmem>>, vector<1x1x8xf32>
    %320 = vector.shape_cast %319 : vector<1x1x8xf32> to vector<1x8xf32>
    %321 = vector.broadcast %320 : vector<1x8xf32> to vector<64x8xf32>
    %322 = arith.addf %318, %321 : vector<64x8xf32>
    %323 = vector.shape_cast %322 : vector<64x8xf32> to vector<8x8x8xf32>
    %324 = tpu.concatenate %235, %259, %283, %307 in 0 : vector<8x8x8xf32>, vector<8x8x8xf32>, vector<8x8x8xf32>, vector<8x8x8xf32> -> vector<32x8x8xf32>
    %325 = tpu.concatenate %243, %267, %291, %315 in 0 : vector<8x8x8xf32>, vector<8x8x8xf32>, vector<8x8x8xf32>, vector<8x8x8xf32> -> vector<32x8x8xf32>
    %326 = tpu.concatenate %251, %275, %299, %323 in 0 : vector<8x8x8xf32>, vector<8x8x8xf32>, vector<8x8x8xf32>, vector<8x8x8xf32> -> vector<32x8x8xf32>
    "tpu.trace_start"() <{level = 10 : i32, message = "bqd,bkd->bqk"}> : () -> ()
    %cst_229 = arith.constant dense<0.000000e+00> : vector<32x8x8xf32>
    %327 = tpu.matmul %324, %325, %cst_229 {dimension_numbers = #tpu.dot_dimension_numbers<[2], [2], [1], [1], [0, 0, 0, 1, 1, 1], [0], [0]>} : vector<32x8x8xf32>, vector<32x8x8xf32>, vector<32x8x8xf32> -> vector<32x8x8xf32>
    "tpu.trace_stop"() : () -> ()
    %cst_230 = arith.constant 0.353553385 : f32
    %328 = vector.broadcast %cst_230 : f32 to vector<32x8x8xf32>
    %329 = arith.mulf %327, %328 : vector<32x8x8xf32>
    %cst_231 = arith.constant dense<0xFF800000> : vector<32x8xf32>
    %330 = vector.multi_reduction <maximumf>, %329, %cst_231 [2] : vector<32x8x8xf32> to vector<32x8xf32>
    %331 = vector.shape_cast %330 : vector<32x8xf32> to vector<32x8x1xf32>
    %332 = vector.broadcast %331 : vector<32x8x1xf32> to vector<32x8x8xf32>
    %333 = arith.subf %329, %332 : vector<32x8x8xf32>
    %334 = math.exp %333 : vector<32x8x8xf32>
    %cst_232 = arith.constant dense<0.000000e+00> : vector<32x8xf32>
    %335 = vector.multi_reduction <add>, %334, %cst_232 [2] : vector<32x8x8xf32> to vector<32x8xf32>
    %336 = vector.shape_cast %335 : vector<32x8xf32> to vector<32x8x1xf32>
    %337 = tpu.reciprocal %336 {approx = true} : vector<32x8x1xf32> -> vector<32x8x1xf32>
    %338 = vector.broadcast %337 : vector<32x8x1xf32> to vector<32x8x8xf32>
    %339 = arith.mulf %334, %338 : vector<32x8x8xf32>
    "tpu.trace_start"() <{level = 10 : i32, message = "bqk,bkd->bqd"}> : () -> ()
    %cst_233 = arith.constant dense<0.000000e+00> : vector<32x8x8xf32>
    %340 = tpu.matmul %339, %326, %cst_233 {dimension_numbers = #tpu.dot_dimension_numbers<[2], [1], [1], [2], [0, 0, 0, 1, 1, 2], [0], [0]>} : vector<32x8x8xf32>, vector<32x8x8xf32>, vector<32x8x8xf32> -> vector<32x8x8xf32>
    "tpu.trace_stop"() : () -> ()
    %c1_234 = arith.constant 1 : index
    %c0_235 = arith.constant 0 : index
    %c0_236 = arith.constant 0 : index
    %341 = vector.load %arg12[%c1_234, %c0_235, %c0_236] : memref<2x1x32xf32, #tpu.memory_space<vmem>>, vector<1x1x32xf32>
    %342 = vector.shape_cast %341 : vector<1x1x32xf32> to vector<1x32xf32>
    %343 = vector.extract_strided_slice %340 {offsets = [0, 0, 0], sizes = [8, 8, 8], strides = [1, 1, 1]} : vector<32x8x8xf32> to vector<8x8x8xf32>
    %344 = vector.shape_cast %343 : vector<8x8x8xf32> to vector<64x8xf32>
    %c4_237 = arith.constant 4 : index
    %c0_238 = arith.constant 0 : index
    %c0_239 = arith.constant 0 : index
    %345 = vector.load %arg11[%c4_237, %c0_238, %c0_239] : memref<8x8x32xf32, #tpu.memory_space<vmem>>, vector<1x8x32xf32>
    %346 = vector.shape_cast %345 : vector<1x8x32xf32> to vector<8x32xf32>
    %cst_240 = arith.constant dense<0.000000e+00> : vector<64x32xf32>
    %347 = tpu.matmul %344, %346, %cst_240 {dimension_numbers = #tpu.dot_dimension_numbers<[1], [0], [0], [1], [0, 0, 1, 1], [], []>} : vector<64x8xf32>, vector<8x32xf32>, vector<64x32xf32> -> vector<64x32xf32>
    %348 = vector.broadcast %342 : vector<1x32xf32> to vector<64x32xf32>
    %349 = arith.addf %348, %347 : vector<64x32xf32>
    %350 = vector.extract_strided_slice %340 {offsets = [8, 0, 0], sizes = [8, 8, 8], strides = [1, 1, 1]} : vector<32x8x8xf32> to vector<8x8x8xf32>
    %351 = vector.shape_cast %350 : vector<8x8x8xf32> to vector<64x8xf32>
    %c5_241 = arith.constant 5 : index
    %c0_242 = arith.constant 0 : index
    %c0_243 = arith.constant 0 : index
    %352 = vector.load %arg11[%c5_241, %c0_242, %c0_243] : memref<8x8x32xf32, #tpu.memory_space<vmem>>, vector<1x8x32xf32>
    %353 = vector.shape_cast %352 : vector<1x8x32xf32> to vector<8x32xf32>
    %cst_244 = arith.constant dense<0.000000e+00> : vector<64x32xf32>
    %354 = tpu.matmul %351, %353, %cst_244 {dimension_numbers = #tpu.dot_dimension_numbers<[1], [0], [0], [1], [0, 0, 1, 1], [], []>} : vector<64x8xf32>, vector<8x32xf32>, vector<64x32xf32> -> vector<64x32xf32>
    %355 = arith.addf %349, %354 : vector<64x32xf32>
    %356 = vector.extract_strided_slice %340 {offsets = [16, 0, 0], sizes = [8, 8, 8], strides = [1, 1, 1]} : vector<32x8x8xf32> to vector<8x8x8xf32>
    %357 = vector.shape_cast %356 : vector<8x8x8xf32> to vector<64x8xf32>
    %c6_245 = arith.constant 6 : index
    %c0_246 = arith.constant 0 : index
    %c0_247 = arith.constant 0 : index
    %358 = vector.load %arg11[%c6_245, %c0_246, %c0_247] : memref<8x8x32xf32, #tpu.memory_space<vmem>>, vector<1x8x32xf32>
    %359 = vector.shape_cast %358 : vector<1x8x32xf32> to vector<8x32xf32>
    %cst_248 = arith.constant dense<0.000000e+00> : vector<64x32xf32>
    %360 = tpu.matmul %357, %359, %cst_248 {dimension_numbers = #tpu.dot_dimension_numbers<[1], [0], [0], [1], [0, 0, 1, 1], [], []>} : vector<64x8xf32>, vector<8x32xf32>, vector<64x32xf32> -> vector<64x32xf32>
    %361 = arith.addf %355, %360 : vector<64x32xf32>
    %362 = vector.extract_strided_slice %340 {offsets = [24, 0, 0], sizes = [8, 8, 8], strides = [1, 1, 1]} : vector<32x8x8xf32> to vector<8x8x8xf32>
    %363 = vector.shape_cast %362 : vector<8x8x8xf32> to vector<64x8xf32>
    %c7_249 = arith.constant 7 : index
    %c0_250 = arith.constant 0 : index
    %c0_251 = arith.constant 0 : index
    %364 = vector.load %arg11[%c7_249, %c0_250, %c0_251] : memref<8x8x32xf32, #tpu.memory_space<vmem>>, vector<1x8x32xf32>
    %365 = vector.shape_cast %364 : vector<1x8x32xf32> to vector<8x32xf32>
    %cst_252 = arith.constant dense<0.000000e+00> : vector<64x32xf32>
    %366 = tpu.matmul %363, %365, %cst_252 {dimension_numbers = #tpu.dot_dimension_numbers<[1], [0], [0], [1], [0, 0, 1, 1], [], []>} : vector<64x8xf32>, vector<8x32xf32>, vector<64x32xf32> -> vector<64x32xf32>
    %367 = arith.addf %361, %366 : vector<64x32xf32>
    %368 = arith.addf %227, %367 : vector<64x32xf32>
    %c1_253 = arith.constant 1 : index
    %c0_254 = arith.constant 0 : index
    %c0_255 = arith.constant 0 : index
    %369 = vector.load %arg13[%c1_253, %c0_254, %c0_255] : memref<2x1x32xf32, #tpu.memory_space<vmem>>, vector<1x1x32xf32>
    %370 = vector.shape_cast %369 : vector<1x1x32xf32> to vector<1x32xf32>
    %c1_256 = arith.constant 1 : index
    %c0_257 = arith.constant 0 : index
    %c0_258 = arith.constant 0 : index
    %371 = vector.load %arg14[%c1_256, %c0_257, %c0_258] : memref<2x1x32xf32, #tpu.memory_space<vmem>>, vector<1x1x32xf32>
    %372 = vector.shape_cast %371 : vector<1x1x32xf32> to vector<1x32xf32>
    %cst_259 = arith.constant dense<0.000000e+00> : vector<64xf32>
    %373 = vector.multi_reduction <add>, %368, %cst_259 [1] : vector<64x32xf32> to vector<64xf32>
    %374 = vector.shape_cast %373 : vector<64xf32> to vector<64x1xf32>
    %cst_260 = arith.constant 3.200000e+01 : f32
    %375 = vector.broadcast %cst_260 : f32 to vector<64x1xf32>
    %376 = arith.divf %374, %375 : vector<64x1xf32>
    %377 = vector.broadcast %376 : vector<64x1xf32> to vector<64x32xf32>
    %378 = arith.subf %368, %377 : vector<64x32xf32>
    %379 = arith.mulf %378, %378 : vector<64x32xf32>
    %cst_261 = arith.constant dense<0.000000e+00> : vector<64xf32>
    %380 = vector.multi_reduction <add>, %379, %cst_261 [1] : vector<64x32xf32> to vector<64xf32>
    %381 = vector.shape_cast %380 : vector<64xf32> to vector<64x1xf32>
    %cst_262 = arith.constant 3.200000e+01 : f32
    %382 = vector.broadcast %cst_262 : f32 to vector<64x1xf32>
    %383 = arith.divf %381, %382 : vector<64x1xf32>
    %384 = vector.broadcast %376 : vector<64x1xf32> to vector<64x32xf32>
    %385 = arith.subf %368, %384 : vector<64x32xf32>
    %cst_263 = arith.constant 9.99999974E-6 : f32
    %386 = vector.broadcast %cst_263 : f32 to vector<64x1xf32>
    %387 = arith.addf %383, %386 : vector<64x1xf32>
    %388 = math.rsqrt %387 : vector<64x1xf32>
    %389 = vector.broadcast %388 : vector<64x1xf32> to vector<64x32xf32>
    %390 = arith.mulf %385, %389 : vector<64x32xf32>
    %391 = vector.broadcast %370 : vector<1x32xf32> to vector<64x32xf32>
    %392 = arith.mulf %390, %391 : vector<64x32xf32>
    %393 = vector.broadcast %372 : vector<1x32xf32> to vector<64x32xf32>
    %394 = arith.addf %392, %393 : vector<64x32xf32>
    %c1_264 = arith.constant 1 : index
    %c0_265 = arith.constant 0 : index
    %c0_266 = arith.constant 0 : index
    %395 = vector.load %arg15[%c1_264, %c0_265, %c0_266] : memref<2x32x64xf32, #tpu.memory_space<vmem>>, vector<1x32x64xf32>
    %396 = vector.shape_cast %395 : vector<1x32x64xf32> to vector<32x64xf32>
    %cst_267 = arith.constant dense<0.000000e+00> : vector<64x64xf32>
    %397 = tpu.matmul %394, %396, %cst_267 {dimension_numbers = #tpu.dot_dimension_numbers<[1], [0], [0], [1], [0, 0, 1, 1], [], []>} : vector<64x32xf32>, vector<32x64xf32>, vector<64x64xf32> -> vector<64x64xf32>
    %c1_268 = arith.constant 1 : index
    %c0_269 = arith.constant 0 : index
    %c0_270 = arith.constant 0 : index
    %398 = vector.load %arg16[%c1_268, %c0_269, %c0_270] : memref<2x1x64xf32, #tpu.memory_space<vmem>>, vector<1x1x64xf32>
    %399 = vector.shape_cast %398 : vector<1x1x64xf32> to vector<1x64xf32>
    %400 = vector.broadcast %399 : vector<1x64xf32> to vector<64x64xf32>
    %401 = arith.addf %397, %400 : vector<64x64xf32>
    %cst_271 = arith.constant 0.000000e+00 : f32
    %402 = vector.broadcast %cst_271 : f32 to vector<64x64xf32>
    %403 = arith.maximumf %401, %402 : vector<64x64xf32>
    %c1_272 = arith.constant 1 : index
    %c0_273 = arith.constant 0 : index
    %c0_274 = arith.constant 0 : index
    %404 = vector.load %arg17[%c1_272, %c0_273, %c0_274] : memref<2x64x32xf32, #tpu.memory_space<vmem>>, vector<1x64x32xf32>
    %405 = vector.shape_cast %404 : vector<1x64x32xf32> to vector<64x32xf32>
    %cst_275 = arith.constant dense<0.000000e+00> : vector<64x32xf32>
    %406 = tpu.matmul %403, %405, %cst_275 {dimension_numbers = #tpu.dot_dimension_numbers<[1], [0], [0], [1], [0, 0, 1, 1], [], []>} : vector<64x64xf32>, vector<64x32xf32>, vector<64x32xf32> -> vector<64x32xf32>
    %c1_276 = arith.constant 1 : index
    %c0_277 = arith.constant 0 : index
    %c0_278 = arith.constant 0 : index
    %407 = vector.load %arg18[%c1_276, %c0_277, %c0_278] : memref<2x1x32xf32, #tpu.memory_space<vmem>>, vector<1x1x32xf32>
    %408 = vector.shape_cast %407 : vector<1x1x32xf32> to vector<1x32xf32>
    %409 = vector.broadcast %408 : vector<1x32xf32> to vector<64x32xf32>
    %410 = arith.addf %406, %409 : vector<64x32xf32>
    %411 = arith.addf %394, %410 : vector<64x32xf32>
    %c1_279 = arith.constant 1 : index
    %c0_280 = arith.constant 0 : index
    %c0_281 = arith.constant 0 : index
    %412 = vector.load %arg19[%c1_279, %c0_280, %c0_281] : memref<2x1x32xf32, #tpu.memory_space<vmem>>, vector<1x1x32xf32>
    %413 = vector.shape_cast %412 : vector<1x1x32xf32> to vector<1x32xf32>
    %c1_282 = arith.constant 1 : index
    %c0_283 = arith.constant 0 : index
    %c0_284 = arith.constant 0 : index
    %414 = vector.load %arg20[%c1_282, %c0_283, %c0_284] : memref<2x1x32xf32, #tpu.memory_space<vmem>>, vector<1x1x32xf32>
    %415 = vector.shape_cast %414 : vector<1x1x32xf32> to vector<1x32xf32>
    %cst_285 = arith.constant dense<0.000000e+00> : vector<64xf32>
    %416 = vector.multi_reduction <add>, %411, %cst_285 [1] : vector<64x32xf32> to vector<64xf32>
    %417 = vector.shape_cast %416 : vector<64xf32> to vector<64x1xf32>
    %cst_286 = arith.constant 3.200000e+01 : f32
    %418 = vector.broadcast %cst_286 : f32 to vector<64x1xf32>
    %419 = arith.divf %417, %418 : vector<64x1xf32>
    %420 = vector.broadcast %419 : vector<64x1xf32> to vector<64x32xf32>
    %421 = arith.subf %411, %420 : vector<64x32xf32>
    %422 = arith.mulf %421, %421 : vector<64x32xf32>
    %cst_287 = arith.constant dense<0.000000e+00> : vector<64xf32>
    %423 = vector.multi_reduction <add>, %422, %cst_287 [1] : vector<64x32xf32> to vector<64xf32>
    %424 = vector.shape_cast %423 : vector<64xf32> to vector<64x1xf32>
    %cst_288 = arith.constant 3.200000e+01 : f32
    %425 = vector.broadcast %cst_288 : f32 to vector<64x1xf32>
    %426 = arith.divf %424, %425 : vector<64x1xf32>
    %427 = vector.broadcast %419 : vector<64x1xf32> to vector<64x32xf32>
    %428 = arith.subf %411, %427 : vector<64x32xf32>
    %cst_289 = arith.constant 9.99999974E-6 : f32
    %429 = vector.broadcast %cst_289 : f32 to vector<64x1xf32>
    %430 = arith.addf %426, %429 : vector<64x1xf32>
    %431 = math.rsqrt %430 : vector<64x1xf32>
    %432 = vector.broadcast %431 : vector<64x1xf32> to vector<64x32xf32>
    %433 = arith.mulf %428, %432 : vector<64x32xf32>
    %434 = vector.broadcast %413 : vector<1x32xf32> to vector<64x32xf32>
    %435 = arith.mulf %433, %434 : vector<64x32xf32>
    %436 = vector.broadcast %415 : vector<1x32xf32> to vector<64x32xf32>
    %437 = arith.addf %435, %436 : vector<64x32xf32>
    %438 = vector.shape_cast %437 : vector<64x32xf32> to vector<8x8x32xf32>
    %cst_290 = arith.constant dense<0.000000e+00> : vector<8x8xf32>
    %439 = vector.multi_reduction <add>, %438, %cst_290 [2] : vector<8x8x32xf32> to vector<8x8xf32>
    %cst_291 = arith.constant 3.200000e+01 : f32
    %440 = vector.broadcast %cst_291 : f32 to vector<8x8xf32>
    %441 = arith.divf %439, %440 : vector<8x8xf32>
    %c0_292 = arith.constant 0 : index
    %c0_293 = arith.constant 0 : index
    %442 = vector.load %arg21[%c0_292, %c0_293] : memref<8x64xf32, #tpu.memory_space<vmem>>, vector<8x64xf32>
    %cst_294 = arith.constant dense<0.000000e+00> : vector<8x64xf32>
    %443 = tpu.matmul %441, %442, %cst_294 {dimension_numbers = #tpu.dot_dimension_numbers<[1], [0], [0], [1], [0, 0, 1, 1], [], []>} : vector<8x8xf32>, vector<8x64xf32>, vector<8x64xf32> -> vector<8x64xf32>
    %c0_295 = arith.constant 0 : index
    %c0_296 = arith.constant 0 : index
    %444 = vector.load %arg22[%c0_295, %c0_296] : memref<1x64xf32, #tpu.memory_space<vmem>>, vector<1x64xf32>
    %445 = vector.broadcast %444 : vector<1x64xf32> to vector<8x64xf32>
    %446 = arith.addf %443, %445 : vector<8x64xf32>
    %cst_297 = arith.constant 0.000000e+00 : f32
    %447 = vector.broadcast %cst_297 : f32 to vector<8x64xf32>
    %448 = arith.maximumf %446, %447 : vector<8x64xf32>
    %c0_298 = arith.constant 0 : index
    %c0_299 = arith.constant 0 : index
    %449 = vector.load %arg23[%c0_298, %c0_299] : memref<64x1xf32, #tpu.memory_space<vmem>>, vector<64x1xf32>
    %cst_300 = arith.constant dense<0.000000e+00> : vector<8x1xf32>
    %450 = tpu.matmul %448, %449, %cst_300 {dimension_numbers = #tpu.dot_dimension_numbers<[1], [0], [0], [1], [0, 0, 1, 1], [], []>} : vector<8x64xf32>, vector<64x1xf32>, vector<8x1xf32> -> vector<8x1xf32>
    %c0_301 = arith.constant 0 : index
    %c0_302 = arith.constant 0 : index
    %451 = vector.load %arg24[%c0_301, %c0_302] : memref<1x1xf32, #tpu.memory_space<vmem>>, vector<1x1xf32>
    %452 = vector.broadcast %451 : vector<1x1xf32> to vector<8x1xf32>
    %453 = arith.addf %450, %452 : vector<8x1xf32>
    %c0_303 = arith.constant 0 : index
    %c0_304 = arith.constant 0 : index
    %454 = vector.load %arg25[%c0_303, %c0_304] : memref<8x1xf32, #tpu.memory_space<vmem>>, vector<8x1xf32>
    tpu.vector_store %arg25[%c0_303, %c0_304], %453 {strides = array<i32>} : memref<8x1xf32, #tpu.memory_space<vmem>>, vector<8x1xf32>,
    return
  }
  func.func @transform_0(%arg0: i32) -> (i32, i32, i32) {
    %c0_i32 = arith.constant 0 : i32
    %c0_i32_0 = arith.constant 0 : i32
    %c0_i32_1 = arith.constant 0 : i32
    return %arg0, %c0_i32, %c0_i32_0 : i32, i32, i32
  }
  func.func @transform_1(%arg0: i32) -> (i32, i32) {
    %c0_i32 = arith.constant 0 : i32
    %c0_i32_0 = arith.constant 0 : i32
    %c0_i32_1 = arith.constant 0 : i32
    return %c0_i32, %c0_i32_0 : i32, i32
  }
  func.func @transform_2(%arg0: i32) -> (i32, i32) {
    %c0_i32 = arith.constant 0 : i32
    %c0_i32_0 = arith.constant 0 : i32
    %c0_i32_1 = arith.constant 0 : i32
    return %c0_i32, %c0_i32_0 : i32, i32
  }
  func.func @transform_3(%arg0: i32) -> (i32, i32) {
    %c0_i32 = arith.constant 0 : i32
    %c0_i32_0 = arith.constant 0 : i32
    %c0_i32_1 = arith.constant 0 : i32
    return %c0_i32, %c0_i32_0 : i32, i32
  }
  func.func @transform_4(%arg0: i32) -> (i32, i32, i32) {
    %c0_i32 = arith.constant 0 : i32
    %c0_i32_0 = arith.constant 0 : i32
    %c0_i32_1 = arith.constant 0 : i32
    %c0_i32_2 = arith.constant 0 : i32
    return %c0_i32, %c0_i32_0, %c0_i32_1 : i32, i32, i32
  }
  func.func @transform_5(%arg0: i32) -> (i32, i32, i32) {
    %c0_i32 = arith.constant 0 : i32
    %c0_i32_0 = arith.constant 0 : i32
    %c0_i32_1 = arith.constant 0 : i32
    %c0_i32_2 = arith.constant 0 : i32
    return %c0_i32, %c0_i32_0, %c0_i32_1 : i32, i32, i32
  }
  func.func @transform_6(%arg0: i32) -> (i32, i32, i32) {
    %c0_i32 = arith.constant 0 : i32
    %c0_i32_0 = arith.constant 0 : i32
    %c0_i32_1 = arith.constant 0 : i32
    %c0_i32_2 = arith.constant 0 : i32
    return %c0_i32, %c0_i32_0, %c0_i32_1 : i32, i32, i32
  }
  func.func @transform_7(%arg0: i32) -> (i32, i32, i32) {
    %c0_i32 = arith.constant 0 : i32
    %c0_i32_0 = arith.constant 0 : i32
    %c0_i32_1 = arith.constant 0 : i32
    %c0_i32_2 = arith.constant 0 : i32
    return %c0_i32, %c0_i32_0, %c0_i32_1 : i32, i32, i32
  }
  func.func @transform_8(%arg0: i32) -> (i32, i32, i32) {
    %c0_i32 = arith.constant 0 : i32
    %c0_i32_0 = arith.constant 0 : i32
    %c0_i32_1 = arith.constant 0 : i32
    %c0_i32_2 = arith.constant 0 : i32
    return %c0_i32, %c0_i32_0, %c0_i32_1 : i32, i32, i32
  }
  func.func @transform_9(%arg0: i32) -> (i32, i32, i32) {
    %c0_i32 = arith.constant 0 : i32
    %c0_i32_0 = arith.constant 0 : i32
    %c0_i32_1 = arith.constant 0 : i32
    %c0_i32_2 = arith.constant 0 : i32
    return %c0_i32, %c0_i32_0, %c0_i32_1 : i32, i32, i32
  }
  func.func @transform_10(%arg0: i32) -> (i32, i32, i32) {
    %c0_i32 = arith.constant 0 : i32
    %c0_i32_0 = arith.constant 0 : i32
    %c0_i32_1 = arith.constant 0 : i32
    %c0_i32_2 = arith.constant 0 : i32
    return %c0_i32, %c0_i32_0, %c0_i32_1 : i32, i32, i32
  }
  func.func @transform_11(%arg0: i32) -> (i32, i32, i32) {
    %c0_i32 = arith.constant 0 : i32
    %c0_i32_0 = arith.constant 0 : i32
    %c0_i32_1 = arith.constant 0 : i32
    %c0_i32_2 = arith.constant 0 : i32
    return %c0_i32, %c0_i32_0, %c0_i32_1 : i32, i32, i32
  }
  func.func @transform_12(%arg0: i32) -> (i32, i32, i32) {
    %c0_i32 = arith.constant 0 : i32
    %c0_i32_0 = arith.constant 0 : i32
    %c0_i32_1 = arith.constant 0 : i32
    %c0_i32_2 = arith.constant 0 : i32
    return %c0_i32, %c0_i32_0, %c0_i32_1 : i32, i32, i32
  }
  func.func @transform_13(%arg0: i32) -> (i32, i32, i32) {
    %c0_i32 = arith.constant 0 : i32
    %c0_i32_0 = arith.constant 0 : i32
    %c0_i32_1 = arith.constant 0 : i32
    %c0_i32_2 = arith.constant 0 : i32
    return %c0_i32, %c0_i32_0, %c0_i32_1 : i32, i32, i32
  }
  func.func @transform_14(%arg0: i32) -> (i32, i32, i32) {
    %c0_i32 = arith.constant 0 : i32
    %c0_i32_0 = arith.constant 0 : i32
    %c0_i32_1 = arith.constant 0 : i32
    %c0_i32_2 = arith.constant 0 : i32
    return %c0_i32, %c0_i32_0, %c0_i32_1 : i32, i32, i32
  }
  func.func @transform_15(%arg0: i32) -> (i32, i32, i32) {
    %c0_i32 = arith.constant 0 : i32
    %c0_i32_0 = arith.constant 0 : i32
    %c0_i32_1 = arith.constant 0 : i32
    %c0_i32_2 = arith.constant 0 : i32
    return %c0_i32, %c0_i32_0, %c0_i32_1 : i32, i32, i32
  }
  func.func @transform_16(%arg0: i32) -> (i32, i32, i32) {
    %c0_i32 = arith.constant 0 : i32
    %c0_i32_0 = arith.constant 0 : i32
    %c0_i32_1 = arith.constant 0 : i32
    %c0_i32_2 = arith.constant 0 : i32
    return %c0_i32, %c0_i32_0, %c0_i32_1 : i32, i32, i32
  }
  func.func @transform_17(%arg0: i32) -> (i32, i32, i32) {
    %c0_i32 = arith.constant 0 : i32
    %c0_i32_0 = arith.constant 0 : i32
    %c0_i32_1 = arith.constant 0 : i32
    %c0_i32_2 = arith.constant 0 : i32
    return %c0_i32, %c0_i32_0, %c0_i32_1 : i32, i32, i32
  }
  func.func @transform_18(%arg0: i32) -> (i32, i32, i32) {
    %c0_i32 = arith.constant 0 : i32
    %c0_i32_0 = arith.constant 0 : i32
    %c0_i32_1 = arith.constant 0 : i32
    %c0_i32_2 = arith.constant 0 : i32
    return %c0_i32, %c0_i32_0, %c0_i32_1 : i32, i32, i32
  }
  func.func @transform_19(%arg0: i32) -> (i32, i32, i32) {
    %c0_i32 = arith.constant 0 : i32
    %c0_i32_0 = arith.constant 0 : i32
    %c0_i32_1 = arith.constant 0 : i32
    %c0_i32_2 = arith.constant 0 : i32
    return %c0_i32, %c0_i32_0, %c0_i32_1 : i32, i32, i32
  }
  func.func @transform_20(%arg0: i32) -> (i32, i32) {
    %c0_i32 = arith.constant 0 : i32
    %c0_i32_0 = arith.constant 0 : i32
    %c0_i32_1 = arith.constant 0 : i32
    return %c0_i32, %c0_i32_0 : i32, i32
  }
  func.func @transform_21(%arg0: i32) -> (i32, i32) {
    %c0_i32 = arith.constant 0 : i32
    %c0_i32_0 = arith.constant 0 : i32
    %c0_i32_1 = arith.constant 0 : i32
    return %c0_i32, %c0_i32_0 : i32, i32
  }
  func.func @transform_22(%arg0: i32) -> (i32, i32) {
    %c0_i32 = arith.constant 0 : i32
    %c0_i32_0 = arith.constant 0 : i32
    %c0_i32_1 = arith.constant 0 : i32
    return %c0_i32, %c0_i32_0 : i32, i32
  }
  func.func @transform_23(%arg0: i32) -> (i32, i32) {
    %c0_i32 = arith.constant 0 : i32
    %c0_i32_0 = arith.constant 0 : i32
    %c0_i32_1 = arith.constant 0 : i32
    return %c0_i32, %c0_i32_0 : i32, i32
  }
  func.func @transform_24(%arg0: i32) -> (i32, i32) {
    %c0_i32 = arith.constant 0 : i32
    %c0_i32_0 = arith.constant 0 : i32
    return %arg0, %c0_i32 : i32, i32
  }
}

</mosaic_0001>

<bundles_post_ra>
// kernel: decoder_block_forward.1
= control target key start
LH: loop header
LB: loop body
LE: loop exit
PB: predicated region body
PF: predicated region fallthrough
CT: control target
= control target key end

     0   :  { %s21062_s27 = smov 0   ;;  %s24775_s0 = inlined_call_operand.vmem [shape: f32[16,8,1], index: 0, kind: input, shape index: {}]   ;;  %s24776_s1 = inlined_call_operand.vmem [shape: f32[1,32], index: 1, kind: input, shape index: {}]   ;;  %s24777_s2 = inlined_call_operand.vmem [shape: f32[1,32], index: 2, kind: input, shape index: {}]   ;;  %s24778_s3 = inlined_call_operand.vmem [shape: f32[1,32], index: 3, kind: input, shape index: {}]   ;;  %s24779_s4 = inlined_call_operand.vmem [shape: f32[8,32,8], index: 4, kind: input, shape index: {}]   ;;  %s24780_s5 = inlined_call_operand.vmem [shape: f32[8,1,8], index: 5, kind: input, shape index: {}]   ;;  %s24781_s6 = inlined_call_operand.vmem [shape: f32[8,32,8], index: 6, kind: input, shape index: {}]   ;;  %s24782_s7 = inlined_call_operand.vmem [shape: f32[8,1,8], index: 7, kind: input, shape index: {}]   ;;  %s24783_s8 = inlined_call_operand.vmem [shape: f32[8,32,8], index: 8, kind: input, shape index: {}]   ;;  %s24784_s9 = inlined_call_operand.vmem [shape: f32[8,1,8], index: 9, kind: input, shape index: {}]   ;;  %s24785_s10 = inlined_call_operand.vmem [shape: f32[8,8,32], index: 10, kind: input, shape index: {}]   ;;  %s24786_s11 = inlined_call_operand.vmem [shape: f32[2,1,32], index: 11, kind: input, shape index: {}]   ;;  %s24787_s12 = inlined_call_operand.vmem [shape: f32[2,1,32], index: 12, kind: input, shape index: {}]   ;;  %s24788_s13 = inlined_call_operand.vmem [shape: f32[2,1,32], index: 13, kind: input, shape index: {}]   ;;  %s24789_s14 = inlined_call_operand.vmem [shape: f32[2,32,64], index: 14, kind: input, shape index: {}]   ;;  %s24790_s15 = inlined_call_operand.vmem [shape: f32[2,1,64], index: 15, kind: input, shape index: {}]   ;;  %s24791_s16 = inlined_call_operand.vmem [shape: f32[2,64,32], index: 16, kind: input, shape index: {}]   ;;  %s24792_s17 = inlined_call_operand.vmem [shape: f32[2,1,32], index: 17, kind: input, shape index: {}]   ;;  %s24793_s18 = inlined_call_operand.vmem [shape: f32[2,1,32], index: 18, kind: input, shape index: {}]   ;;  %s24794_s19 = inlined_call_operand.vmem [shape: f32[2,1,32], index: 19, kind: input, shape index: {}]   ;;  %s24795_s20 = inlined_call_operand.vmem [shape: f32[8,64], index: 20, kind: input, shape index: {}]   ;;  %s24796_s21 = inlined_call_operand.vmem [shape: f32[1,64], index: 21, kind: input, shape index: {}]   ;;  %s24797_s22 = inlined_call_operand.vmem [shape: f32[64,1], index: 22, kind: input, shape index: {}]   ;;  %s24798_s23 = inlined_call_operand.<no memory space> [shape: f32[1,1], index: 23, kind: input, shape index: {}]   ;;  %s24799_s24 = inlined_call_operand.vmem [shape: f32[16,1], index: 24, kind: output, shape index: {}]  }
   0x1   :  { %24828 = sst [smem:[#allocation25_spill]] %s24775_s0  ;;  %v29_v0 = vstv %s24798_s23 }
   0x2   :  { %24829 = sst [smem:[#allocation26_spill]] %s24776_s1  ;;  %30 = vst [vmem:[#allocation2] sm:$0x1] %v29_v0 }
   0x3   :  { %24830 = sst [smem:[#allocation27_spill]] %s24777_s2 }
   0x4   :  { %24831 = sst [smem:[#allocation28_spill]] %s24778_s3 }
   0x5   :  { %24832 = sst [smem:[#allocation29_spill]] %s24779_s4 }
   0x6   :  { %24833 = sst [smem:[#allocation30_spill]] %s24780_s5 }
   0x7   :  { %24834 = sst [smem:[#allocation31_spill]] %s24781_s6 }
   0x8   :  { %24835 = sst [smem:[#allocation32_spill]] %s24782_s7 }
   0x9   :  { %24836 = sst [smem:[#allocation33_spill]] %s24783_s8 }
   0xa LB: > { %24837 = sst [smem:[#allocation3_spill]] %s20922_s27  ;;  %s21068_s28 = sadd.s32 4294967295, %s20922_s27   ;;  %s20922_s27 = sphi %s21062_s27, %s36_s27  }
   0xb   : > { %p17465_p0 = scmp.ge.s32.totalorder %s20922_s27, 1  ;;  %p665_p1 = scmp.lt.s32.totalorder %s20922_s27, 3 }
   0xd   : > { %p666_p2 = pnand %p17465_p0, %p665_p1 }
   0xf   : > { %669 = sbr.rel (%p666_p2) target bundleno = 5631 (0x15ff), region = 116 }
  0x16   : > { %s17466_s6 = sshll.u32 %s21068_s28, 3  ;;  %v20924_v1 = vmov 0   ;;  %s24838_s0 = sld [smem:[#allocation25_spill]]  ;;  %v20925_v45 = vmov 683565275  }
  0x17   : > { %20561 = vset.pattern.permute.xlu1 %v20924_v1  ;;  %20560 = vset.pattern.permute.xlu0 %v20924_v1  ;;  %p731_p3 = scmp.lt.s32.totalorder %s17466_s6, 15  ;;  %s24839_s25 = sld [smem:[#allocation26_spill]]  ;;  %v20926_v47 = vmov 2475754826   ;;  %v20927_v49 = vmov 2131351028  }
  0x18   : > { %s24840_s1 = sld [smem:[#allocation27_spill]]  ;;  %v20928_v51 = vmov 2102212464   ;;  %v20929_v53 = vmov 920167782   ;;  %s24860_s29 = sld [smem:[#allocation33_spill]] }
  0x19   : > { %s24946_s6 = smov (!%p731_p3, %s17466_s6), 15  ;;  %v20930_v62 = vmov 1326507024   ;;  %s24867_s2 = sld [smem:[#allocation32_spill]] }
  0x1a   : > { %s17467_s23 = sshll.u32 %s24946_s6, 3  ;;  %s24849_s6 = sld [smem:[#allocation28_spill]] }
  0x1b   : > { %s24868_s3 = sld [smem:[#allocation30_spill]]  ;;  %p736_p4 = scmp.lt.s32.totalorder %s21068_s28, 1 }
  0x1c   : > { %s734_s7 = scalar_lea.vmem %s24838_s0, %s17467_s23 }
  0x1d   : > { %v742_v2 = vld [vmem:[%s734_s7 + $0x10] sm:$0xff]  ;;  %v740_v3 = vld [vmem:[%s734_s7] sm:$0xff]  ;;  %v743_v4 = vld [vmem:[%s734_s7 + $0x18] sm:$0xff]  ;;  %s24948_s28 = smov (!%p736_p4, %s21068_s28), 1 }
  0x1e   : > { %763 = vperm.xlu1 %20561, %v742_v2   ;;  %753 = vperm.xlu0 %20560, %v740_v3   ;;  %v741_v5 = vld [vmem:[%s734_s7 + $0x8] sm:$0xff]  ;;  %v744_v7 = vld [vmem:[%s734_s7 + $0x20] sm:$0xff]  ;;  %v747_v8 = vld [vmem:[%s734_s7 + $0x38] sm:$0xff]  ;;  %s17468_s5 = sshll.u32 %s24948_s28, 3 }
  0x1f   : > { %v745_v6 = vld [vmem:[%s734_s7 + $0x28] sm:$0xff]  ;;  %v746_v9 = vld [vmem:[%s734_s7 + $0x30] sm:$0xff]  ;;  %v21079_v10 = vld [vmem:[%s24839_s25] ss:$0 sm:$0xff]  ;;  %s24853_s7 = sld [smem:[#allocation29_spill]]  ;;  %s739_s0 = scalar_lea.vmem %s24799_s24, %s17468_s5 }
  0x20   : > { %v21084_v11 = vld [vmem:[%s24840_s1] ss:$0 sm:$0xff] }
  0x22   : > { %768 = vperm.xlu1 %20561, %v743_v4   ;;  %758 = vperm.xlu0 %20560, %v741_v5  }
  0x26   : > { %778 = vperm.xlu1 %20561, %v745_v6   ;;  %773 = vperm.xlu0 %20560, %v744_v7  }
  0x2a   : > { %788 = vperm.xlu1 %20561, %v747_v8   ;;  %783 = vperm.xlu0 %20560, %v746_v9  }
  0x9d   : > { %v764_v12 = vpop.permute.xlu1 %763  ;;  %v754_v13 = vpop.permute.xlu0 %753 }
  0x9e   : > { %v799_v14 = vmul.f32 %v21079_v10, %v764_v12  ;;  %v797_v15 = vmul.f32 %v21079_v10, %v754_v13 }
  0xa0   : > { %v21089_v16 = vadd.f32 %v21084_v11, %v799_v14  ;;  %v21092_v17 = vadd.f32 %v21084_v11, %v797_v15 }
  0xa1   : > { %v769_v18 = vpop.permute.xlu1 %768 }
  0xa2   : > { %v1027_v19 = vand.u32 2147483647, %v21089_v16  ;;  %v1030_v20 = vand.u32 2139095040, %v21089_v16  ;;  %v819_v21 = vand.u32 2147483647, %v21092_v17  ;;  %v822_v22 = vand.u32 2139095040, %v21092_v17 }
  0xa3   : > { %v800_v24 = vmul.f32 %v21079_v10, %v769_v18  ;;  %vm1029_vm13 = vcmp.lt.s32.totalorder %v21089_v16, 0 }
  0xa4   : > { %v1031_v23 = vshrl.u32 %v1030_v20, 23  ;;  %v1034_v25 = vand.u32 8388607, %v1027_v19  ;;  %v823_v26 = vshrl.u32 %v822_v22, 23  ;;  %v826_v27 = vand.u32 8388607, %v819_v21 }
  0xa5   : > { %v21104_v29 = vadd.f32 %v21084_v11, %v800_v24 }
  0xa6   : > { %v17479_v28 = vadd.s32 4294967169, %v1031_v23  ;;  %v17471_v30 = vadd.s32 4294967169, %v823_v26  ;;  %v1035_v32 = vor.u32 8388608, %v1034_v25  ;;  %v827_v33 = vor.u32 8388608, %v826_v27 }
  0xa7   : > { %v1134_v35 = vand.u32 2139095040, %v21104_v29 }
  0xa8   : > { %v1037_v31 = vadd.s32 1, %v17479_v28  ;;  %v829_v34 = vadd.s32 1, %v17471_v30  ;;  %v21107_v41 = vshll.u32 %v1035_v32, 8  ;;  %v21109_v43 = vshll.u32 %v827_v33, 8 }
  0xa9   : > { %v1135_v37 = vshrl.u32 %v1134_v35, 23 }
  0xaa   : > { %vm1038_vm0 = vcmp.gt.s32.totalorder %v1037_v31, 0  ;;  %vm830_vm1 = vcmp.gt.s32.totalorder %v829_v34, 0 }
  0xab   : > { %v1039_v36 = vsel %vm1038_vm0, %v1037_v31, 0  ;;  %v831_v39 = vsel %vm830_vm1, %v829_v34, 0  ;;  %v21118_v56 = vadd.s32 4294967169, %v1135_v37 }
  0xac   : > { %v1041_v38 = vand.u32 31, %v1039_v36  ;;  %v1040_v40 = vshrl.u32 %v1039_v36, 5  ;;  %v833_v42 = vand.u32 31, %v831_v39  ;;  %v21116_v55 = vshrl.u32 %v831_v39, 5 }
  0xae   : > { %v1042_v44 = vsub.s32 32, %v1041_v38  ;;  %v1044_v46 = vshll.u32 %v20925_v45, %v1041_v38  ;;  %v1047_v48 = vshll.u32 %v20926_v47, %v1041_v38  ;;  %v1050_v50 = vshll.u32 %v20927_v49, %v1041_v38 }
  0xaf   : > { %v1053_v52 = vshll.u32 %v20928_v51, %v1041_v38  ;;  %v1056_v54 = vshll.u32 %v20929_v53, %v1041_v38  ;;  %vm1059_vm2 = vcmp.lt.s32.totalorder %v1040_v40, 1  ;;  %vm1060_vm3 = vcmp.lt.s32.totalorder %v1040_v40, 2 }
  0xb0   : > { %v1043_v57 = vshrl.u32 %v20925_v45, %v1042_v44  ;;  %v1045_v58 = vshrl.u32 %v20926_v47, %v1042_v44  ;;  %v1048_v59 = vshrl.u32 %v20927_v49, %v1042_v44  ;;  %v1051_v60 = vshrl.u32 %v20928_v51, %v1042_v44 }
  0xb1   : > { %v1054_v61 = vshrl.u32 %v20929_v53, %v1042_v44  ;;  %v1057_v63 = vshrl.u32 %v20930_v62, %v1042_v44  ;;  %v834_v3 = vsub.s32 32, %v833_v42  ;;  %vm1061_vm4 = vcmp.lt.s32.totalorder %v1040_v40, 3 }
  0xb2   : > { %v1046_v0 = vor.u32 %v1045_v58, %v1044_v46  ;;  %v1049_v1 = vor.u32 %v1048_v59, %v1047_v48  ;;  %v1052_v2 = vor.u32 %v1051_v60, %v1050_v50  ;;  %vm1062_vm5 = vcmp.lt.s32.totalorder %v1040_v40, 4 }
  0xb3   : > { %v1055_v4 = vor.u32 %v1054_v61, %v1053_v52  ;;  %v1058_v5 = vor.u32 %v1057_v63, %v1056_v54  ;;  %v836_v15 = vshll.u32 %v20925_v45, %v833_v42  ;;  %v837_v22 = vshrl.u32 %v20926_v47, %v834_v3 }
  0xb4   : > { %v1063_v6 = vsel %vm1059_vm2, %v1043_v57, %v1046_v0  ;;  %v1064_v7 = vsel %vm1062_vm5, %v1052_v2, 2102212464  ;;  %v1067_v8 = vsel %vm1059_vm2, %v1046_v0, %v1049_v1  ;;  %v1071_v9 = vsel %vm1059_vm2, %v1049_v1, %v1052_v2 }
  0xb5   : > { %v1065_v12 = vsel %vm1061_vm4, %v1049_v1, %v1064_v7  ;;  %v1068_v13 = vsel %vm1062_vm5, %v1055_v4, 920167782  ;;  %v1072_v14 = vsel %vm1062_vm5, %v1058_v5, 1326507024  ;;  %v839_v23 = vshll.u32 %v20926_v47, %v833_v42  ;;  %v759_v5 = vpop.permute.xlu0 %758 }
  0xb6   : > { %v1069_v18 = vsel %vm1061_vm4, %v1052_v2, %v1068_v13  ;;  %v1073_v20 = vsel %vm1061_vm4, %v1055_v4, %v1072_v14  ;;  %v1066_v24 = vsel %vm1060_vm3, %v1063_v6, %v1065_v12  ;;  %v840_v27 = vshrl.u32 %v20927_v49, %v834_v3 }
  0xb7   : > { %v1070_v25 = vsel %vm1060_vm3, %v1067_v8, %v1069_v18  ;;  %v1074_v26 = vsel %vm1060_vm3, %v1071_v9, %v1073_v20  ;;  %v838_v33 = vor.u32 %v837_v22, %v836_v15  ;;  %v842_v35 = vshll.u32 %v20927_v49, %v833_v42 }
  0xb8   : > { %v21134_v28 = vmul.u32.u64.low %v21107_v41, %v1074_v26  ;;  %v21135_v30 = vmul.u32.u64.high %v21107_v41, %v1074_v26, %v21134_v28  ;;  %v21138_v31 = vmul.u32.u64.low %v21107_v41, %v1070_v25  ;;  %v21139_v32 = vmul.u32.u64.high %v21107_v41, %v1070_v25, %v21138_v31 }
  0xb9   : > { %v841_v34 = vor.u32 %v840_v27, %v839_v23  ;;  %v843_v36 = vshrl.u32 %v20928_v51, %v834_v3  ;;  %v835_v37 = vshrl.u32 %v20925_v45, %v834_v3  ;;  %v845_v38 = vshll.u32 %v20928_v51, %v833_v42 }
  0xba   : > { %v846_v39 = vshrl.u32 %v20929_v53, %v834_v3  ;;  %v849_v40 = vshrl.u32 %v20930_v62, %v834_v3  ;;  %v1082_v44 = vmul.u32 %v21107_v41, %v1066_v24  ;;  %v848_v48 = vshll.u32 %v20929_v53, %v833_v42 }
  0xbb   : > { %v844_v46 = vor.u32 %v843_v36, %v842_v35  ;;  %vm851_vm6 = vcmp.lt.s32.totalorder %v21116_v55, 1  ;;  %vm1084_vm7 = vc.u32 %v21135_v30, %v21138_v31  ;;  %v1085_v50 = vadd.s32 1, %v21139_v32 }
  0xbc   : > { %v847_v52 = vor.u32 %v846_v39, %v845_v38  ;;  %vm852_vm8 = vcmp.lt.s32.totalorder %v21116_v55, 2  ;;  %v850_v54 = vor.u32 %v849_v40, %v848_v48  ;;  %vm853_vm9 = vcmp.lt.s32.totalorder %v21116_v55, 3 }
  0xbd   : > { %vm854_vm10 = vcmp.lt.s32.totalorder %v21116_v55, 4  ;;  %v859_v57 = vsel %vm851_vm6, %v838_v33, %v841_v34  ;;  %v1086_v41 = vsel %vm1084_vm7, %v1085_v50, %v21139_v32  ;;  %v863_v42 = vsel %vm851_vm6, %v841_v34, %v844_v46 }
  0xbe   : > { %v856_v58 = vsel %vm854_vm10, %v844_v46, 2102212464  ;;  %v860_v59 = vsel %vm854_vm10, %v847_v52, 920167782  ;;  %v1087_v60 = vadd.s32 %v1086_v41, %v1082_v44  ;;  %v855_v61 = vsel %vm851_vm6, %v835_v37, %v838_v33 }
  0xbf   : > { %v861_v63 = vsel %vm853_vm9, %v844_v46, %v860_v59  ;;  %v864_v0 = vsel %vm854_vm10, %v850_v54, 1326507024  ;;  %v857_v1 = vsel %vm853_vm9, %v841_v34, %v856_v58  ;;  %v1141_v4 = vadd.s32 1, %v21118_v56 }
  0xc0   : > { %v862_v2 = vsel %vm852_vm8, %v859_v57, %v861_v63  ;;  %v865_v3 = vsel %vm853_vm9, %v847_v52, %v864_v0  ;;  %v1088_v6 = vadd.s32 536870912, %v1087_v60  ;;  %v1131_v14 = vand.u32 2147483647, %v21104_v29 }
  0xc1   : > { %v866_v7 = vsel %vm852_vm8, %v863_v42, %v865_v3  ;;  %v21162_v8 = vmul.u32.u64.low %v21109_v43, %v862_v2  ;;  %v21163_v9 = vmul.u32.u64.high %v21109_v43, %v862_v2, %v21162_v8  ;;  %vm1142_vm11 = vcmp.gt.s32.totalorder %v1141_v4, 0 }
  0xc2   : > { %v21167_v12 = vmul.u32.u64.low %v21109_v43, %v866_v7  ;;  %v21168_v13 = vmul.u32.u64.high %v21109_v43, %v866_v7, %v21167_v12  ;;  %v21171_v15 = vshrl.u32 %v1088_v6, 30  ;;  %v858_v56 = vsel %vm852_vm8, %v855_v61, %v857_v1 }
  0xc3   : > { %v1143_v18 = vsel %vm1142_vm11, %v1141_v4, 0  ;;  %v798_v20 = vmul.f32 %v21079_v10, %v759_v5  ;;  %v877_v24 = vadd.s32 1, %v21163_v9  ;;  %v874_v25 = vmul.u32 %v21109_v43, %v858_v56 }
  0xc4   : > { %v1145_v22 = vand.u32 31, %v1143_v18  ;;  %v1090_v23 = vshll.u32 %v21171_v15, 30  ;;  %vm876_vm12 = vc.u32 %v21168_v13, %v21162_v8  ;;  %v1138_v26 = vand.u32 8388607, %v1131_v14 }
  0xc5   : > { %v878_v55 = vsel %vm876_vm12, %v877_v24, %v21163_v9  ;;  %v21185_v32 = vadd.f32 %v21084_v11, %v798_v20  ;;  %v1083_v35 = vadd.s32 %v21138_v31, %v21135_v30  ;;  %v1144_v48 = vshrl.u32 %v1143_v18, 5 }
  0xc6   : > { %v1146_v27 = vsub.s32 32, %v1145_v22  ;;  %v1091_v28 = vsub.s32 %v1087_v60, %v1090_v23  ;;  %v879_v33 = vadd.s32 %v878_v55, %v874_v25  ;;  %v1139_v37 = vor.u32 8388608, %v1138_v26 }
  0xc7   : > { %v926_v44 = vand.u32 2139095040, %v21185_v32  ;;  %v1148_v50 = vshll.u32 %v20925_v45, %v1145_v22  ;;  %v1151_v30 = vshll.u32 %v20926_v47, %v1145_v22  ;;  %v1154_v31 = vshll.u32 %v20927_v49, %v1145_v22 }
  0xc8   : > { %v1093_v34 = vsub.s32 0, %v1091_v28  ;;  %v880_v36 = vadd.s32 536870912, %v879_v33  ;;  %v1149_v43 = vshrl.u32 %v20926_v47, %v1146_v27  ;;  %v1152_v39 = vshrl.u32 %v20927_v49, %v1146_v27 }
  0xc9   : > { %v1155_v40 = vshrl.u32 %v20928_v51, %v1146_v27  ;;  %v1158_v52 = vshrl.u32 %v20929_v53, %v1146_v27  ;;  %v1161_v57 = vshrl.u32 %v20930_v62, %v1146_v27  ;;  %v1157_v59 = vshll.u32 %v20928_v51, %v1145_v22 }
  0xca   : > { %v17480_v38 = vmin.u32 %v1093_v34, %v1091_v28  ;;  %v21192_v46 = vshrl.u32 %v880_v36, 30  ;;  %v1150_v58 = vor.u32 %v1149_v43, %v1148_v50  ;;  %v21201_v42 = vshll.u32 %v1139_v37, 8 }
  0xcb   : > { %v1153_v61 = vor.u32 %v1152_v39, %v1151_v30  ;;  %v1156_v63 = vor.u32 %v1155_v40, %v1154_v31  ;;  %v1160_v0 = vshll.u32 %v20929_v53, %v1145_v22  ;;  %v1113_v1 = vsub.s32 4, %v21171_v15 }
  0xcc   : > { %v1095_v54 = vclz %v17480_v38  ;;  %v882_v41 = vshll.u32 %v21192_v46, 30  ;;  %v1159_v3 = vor.u32 %v1158_v52, %v1157_v59  ;;  %v927_v4 = vshrl.u32 %v926_v44, 23 }
  0xcd   : > { %v1147_v5 = vshrl.u32 %v20925_v45, %v1146_v27  ;;  %v1162_v6 = vor.u32 %v1161_v57, %v1160_v0  ;;  %vm1163_vm15 = vcmp.lt.s32.totalorder %v1144_v48, 1  ;;  %vm1165_vm0 = vcmp.lt.s32.totalorder %v1144_v48, 3 }
  0xce   : > { %v17481_v60 = vadd.s32 4294967294, %v1095_v54  ;;  %v21206_v2 = vsub.s32 %v879_v33, %v882_v41  ;;  %vm1166_vm1 = vcmp.lt.s32.totalorder %v1144_v48, 4  ;;  %v1171_v20 = vsel %vm1163_vm15, %v1150_v58, %v1153_v61 }
  0xcf   : > { %v1168_v18 = vsel %vm1166_vm1, %v1156_v63, 2102212464  ;;  %v1172_v24 = vsel %vm1166_vm1, %v1159_v3, 920167782  ;;  %v1175_v25 = vsel %vm1163_vm15, %v1153_v61, %v1156_v63  ;;  %v1176_v33 = vsel %vm1166_vm1, %v1162_v6, 1326507024 }
  0xd0   : > { %vm17482_vm14 = vcmp.lt.s32.totalorder %v17481_v60, 0  ;;  %v885_v9 = vsub.s32 0, %v21206_v2  ;;  %v1173_v55 = vsel %vm1165_vm0, %v1156_v63, %v1172_v24  ;;  %vm1164_vm2 = vcmp.lt.s32.totalorder %v1144_v48, 2 }
  0xd1   : > { %v1098_v7 = vsel %vm17482_vm14, 0, %v17481_v60  ;;  %v1167_v36 = vsel %vm1163_vm15, %v1147_v5, %v1150_v58  ;;  %v1169_v37 = vsel %vm1165_vm0, %v1153_v61, %v1168_v18  ;;  %v1174_v39 = vsel %vm1164_vm2, %v1171_v20, %v1173_v55  ;;  %v774_v55 = vpop.permute.xlu0 %773 }
  0xd2   : > { %v1099_v12 = vsub.s32 32, %v1098_v7  ;;  %v1103_v56 = vsub.s32 4294967266, %v1098_v7  ;;  %v1100_v22 = vshll.u32 %v1091_v28, %v1098_v7  ;;  %v17472_v23 = vmin.u32 %v885_v9, %v21206_v2 }
  0xd3   : > { %v1177_v28 = vsel %vm1165_vm0, %v1159_v3, %v1176_v33  ;;  %v1114_v54 = vsel %vm1029_vm13, %v1113_v1, %v21171_v15  ;;  %vm21231_vm3 = vcmp.le.f32.partialorder %v1027_v19, 0.7853982  ;;  %v1170_v57 = vsel %vm1164_vm2, %v1167_v36, %v1169_v37 }
  0xd4   : > { %v1101_v26 = vshrl.u32 %v1083_v35, %v1099_v12  ;;  %v1104_v27 = vadd.s32 127, %v1103_v56  ;;  %v887_v34 = vclz %v17472_v23  ;;  %v1178_v44 = vsel %vm1164_vm2, %v1175_v25, %v1177_v28  ;;  %v779_v25 = vpop.permute.xlu1 %778 }
  0xd5   : > { %v21218_v50 = vmul.u32.u64.low %v21201_v42, %v1174_v39  ;;  %v21219_v35 = vmul.u32.u64.high %v21201_v42, %v1174_v39, %v21218_v50  ;;  %v21226_v30 = vmul.u32.u64.low %v21201_v42, %v1178_v44  ;;  %v21227_v31 = vmul.u32.u64.high %v21201_v42, %v1178_v44, %v21226_v30 }
  0xd6   : > { %v1102_v43 = vor.u32 %v1101_v26, %v1100_v22  ;;  %v1105_v38 = vshll.u32 %v1104_v27, 23  ;;  %v17473_v40 = vadd.s32 4294967294, %v887_v34  ;;  %v17475_v41 = vadd.s32 4294967169, %v927_v4 }
  0xd7   : > { %v875_v60 = vadd.s32 %v21162_v8, %v21168_v13  ;;  %v1116_v15 = vsel %vm21231_vm3, 0, %v1114_v54  ;;  %v1189_v1 = vadd.s32 1, %v21219_v35  ;;  %v1186_v3 = vmul.u32 %v21201_v42, %v1170_v57 }
  0xd8   : > { %v1106_v52 = vor.u32 4788187, %v1105_v38  ;;  %vm17474_vm4 = vcmp.lt.s32.totalorder %v17473_v40, 0  ;;  %v1109_v59 = vcvt.s32.f32 %v1102_v43  ;;  %vm1188_vm5 = vc.u32 %v21227_v31, %v21218_v50 }
  0xd9   : > { %v890_v61 = vsel %vm17474_vm4, 0, %v17473_v40  ;;  %v933_v4 = vadd.s32 1, %v17475_v41  ;;  %v1190_v8 = vsel %vm1188_vm5, %v1189_v1, %v21219_v35  ;;  %v923_v12 = vand.u32 2147483647, %v21185_v32 }
  0xda   : > { %v1107_v58 = vand.u32 2147483647, %v1106_v52  ;;  %v891_v63 = vsub.s32 32, %v890_v61  ;;  %v895_v0 = vsub.s32 4294967266, %v890_v61  ;;  %v892_v5 = vshll.u32 %v21206_v2, %v890_v61 }
  0xdb   : > { %v1191_v9 = vadd.s32 %v1190_v8, %v1186_v3  ;;  %vm934_vm6 = vcmp.gt.s32.totalorder %v933_v4, 0  ;;  %v905_v20 = vsub.s32 4, %v21192_v46  ;;  %v1120_v23 = vadd.s32 3, %v1116_v15 }
  0xdc   : > { %v1110_v19 = vmul.f32 %v1109_v59, %v1107_v58  ;;  %v893_v6 = vshrl.u32 %v875_v60, %v891_v63  ;;  %v896_v7 = vadd.s32 127, %v895_v0  ;;  %v935_v42 = vsel %vm934_vm6, %v933_v4, 0 }
  0xdd   : > { %v1192_v24 = vadd.s32 536870912, %v1191_v9  ;;  %v937_v2 = vand.u32 31, %v935_v42  ;;  %vm821_vm7 = vcmp.lt.s32.totalorder %v21092_v17, 0  ;;  %vm21255_vm8 = vcmp.le.f32.partialorder %v819_v21, 0.7853982 }
  0xde   : > { %v1111_v13 = vxor.u32 2147483648, %v1110_v19  ;;  %v894_v56 = vor.u32 %v893_v6, %v892_v5  ;;  %v897_v18 = vshll.u32 %v896_v7, 23  ;;  %v930_v36 = vand.u32 8388607, %v923_v12 }
  0xdf   : > { %v21259_v34 = vshrl.u32 %v1192_v24, 30  ;;  %v938_v37 = vsub.s32 32, %v937_v2  ;;  %v906_v39 = vsel %vm821_vm7, %v905_v20, %v21192_v46  ;;  %v802_v28 = vmul.f32 %v21079_v10, %v779_v25 }
  0xe0   : > { %v1112_v22 = vsel %vm1029_vm13, %v1111_v13, %v1110_v19  ;;  %v898_v27 = vor.u32 4788187, %v897_v18  ;;  %v901_v38 = vcvt.s32.f32 %v894_v56  ;;  %v21267_v40 = vand.u32 3, %v1120_v23 }
  0xe1   : > { %v1115_v26 = vsel %vm21231_vm3, %v21089_v16, %v1112_v22  ;;  %v1194_v21 = vshll.u32 %v21259_v34, 30  ;;  %v21271_v44 = vmul.f32 %v21079_v10, %v774_v55  ;;  %v941_v52 = vshrl.u32 %v20926_v47, %v938_v37 }
  0xe2   : > { %v899_v43 = vand.u32 2147483647, %v898_v27  ;;  %20562 = vcosq.f32 %v1115_v26  ;;  %v944_v54 = vshrl.u32 %v20927_v49, %v938_v37  ;;  %v908_v30 = vsel %vm21255_vm8, 0, %v906_v39 }
  0xe3   : > { %20564 = vsinq.f32 %v1115_v26  ;;  %v21277_v46 = vsub.s32 %v1191_v9, %v1194_v21  ;;  %v931_v48 = vor.u32 8388608, %v930_v36  ;;  %v950_v57 = vshrl.u32 %v20929_v53, %v938_v37 }
  0xe4   : > { %v902_v35 = vmul.f32 %v901_v38, %v899_v43  ;;  %v940_v58 = vshll.u32 %v20925_v45, %v937_v2  ;;  %v943_v59 = vshll.u32 %v20926_v47, %v937_v2  ;;  %v947_v60 = vshrl.u32 %v20928_v51, %v938_v37 }
  0xe5   : > { %v1197_v61 = vsub.s32 0, %v21277_v46  ;;  %v21284_v15 = vshrl.u32 %v935_v42, 5  ;;  %v946_v63 = vshll.u32 %v20927_v49, %v937_v2  ;;  %v949_v0 = vshll.u32 %v20928_v51, %v937_v2 }
  0xe6   : > { %v903_v41 = vxor.u32 2147483648, %v902_v35  ;;  %v942_v19 = vor.u32 %v941_v52, %v940_v58  ;;  %v945_v3 = vor.u32 %v944_v54, %v943_v59  ;;  %v953_v4 = vshrl.u32 %v20930_v62, %v938_v37 }
  0xe7   : > { %v17484_v6 = vmin.u32 %v1197_v61, %v21277_v46  ;;  %v951_v7 = vor.u32 %v950_v57, %v949_v0  ;;  %v952_v8 = vshll.u32 %v20929_v53, %v937_v2  ;;  %v912_v13 = vadd.s32 3, %v908_v30 }
  0xe8   : > { %v904_v1 = vsel %vm821_vm7, %v903_v41, %v902_v35  ;;  %v1187_v9 = vadd.s32 %v21218_v50, %v21227_v31  ;;  %v948_v56 = vor.u32 %v947_v60, %v946_v63  ;;  %v21299_v18 = vadd.f32 %v21084_v11, %v802_v28 }
  0xe9   : > { %v907_v5 = vsel %vm21255_vm8, %v21092_v17, %v904_v1  ;;  %v1199_v20 = vclz %v17484_v6  ;;  %v954_v42 = vor.u32 %v953_v4, %v952_v8  ;;  %vm955_vm9 = vcmp.lt.s32.totalorder %v21284_v15, 1 }
  0xea   : > { %v21302_v22 = vshll.u32 %v931_v48, 8  ;;  %20566 = vcosq.f32 %v907_v5  ;;  %vm1133_vm10 = vcmp.lt.s32.totalorder %v21104_v29, 0  ;;  %v1217_v23 = vsub.s32 4, %v21259_v34 }
  0xeb   : > { %vm958_vm11 = vcmp.lt.s32.totalorder %v21284_v15, 4  ;;  %v963_v50 = vsel %vm955_vm9, %v942_v19, %v945_v3  ;;  %20568 = vsinq.f32 %v907_v5  ;;  %v17485_v24 = vadd.s32 4294967294, %v1199_v20 }
  0xec   : > { %v20563_v31 = vpop.eup %20562  ;;  %vm957_vm12 = vcmp.lt.s32.totalorder %v21284_v15, 3  ;;  %v964_v2 = vsel %vm958_vm11, %v951_v7, 920167782  ;;  %v939_v26 = vshrl.u32 %v20925_v45, %v938_v37  ;;  %vm956_vm13 = vcmp.lt.s32.totalorder %v21284_v15, 2 }
  0xed   : > { %v20565_v25 = vpop.eup %20564  ;;  %v960_v27 = vsel %vm958_vm11, %v948_v56, 2102212464  ;;  %v965_v55 = vsel %vm957_vm12, %v948_v56, %v964_v2  ;;  %vm21320_vm14 = vcmp.le.f32.partialorder %v1131_v14, 0.7853982  ;;  %vm17486_vm15 = vcmp.lt.s32.totalorder %v17485_v24, 0 }
  0xee   : > { %v966_v36 = vsel %vm956_vm13, %v963_v50, %v965_v55  ;;  %v967_v37 = vsel %vm955_vm9, %v945_v3, %v948_v56  ;;  %v968_v43 = vsel %vm958_vm11, %v954_v42, 1326507024  ;;  %v1127_v38 = vxor.u32 2147483648, %v20563_v31 }
  0xef   : > { %v1202_v39 = vsel %vm17486_vm15, 0, %v17485_v24  ;;  %v959_v28 = vsel %vm955_vm9, %v939_v26, %v942_v19  ;;  %v969_v14 = vsel %vm957_vm12, %v951_v7, %v968_v43  ;;  %v1124_v21 = vxor.u32 2147483648, %v20565_v25 }
  0xf0   : > { %v1203_v35 = vsub.s32 32, %v1202_v39  ;;  %v1207_v52 = vsub.s32 4294967266, %v1202_v39  ;;  %v961_v54 = vsel %vm957_vm12, %v945_v3, %v960_v27  ;;  %v1204_v30 = vshll.u32 %v21277_v46, %v1202_v39 }
  0xf1   : > { %v970_v48 = vsel %vm956_vm13, %v967_v37, %v969_v14  ;;  %v21340_v57 = vmul.u32.u64.low %v21302_v22, %v966_v36  ;;  %v21341_v41 = vmul.u32.u64.high %v21302_v22, %v966_v36, %v21340_v57  ;;  %vm1119_vm0 = vweird.f32 %v21089_v16 }
  0xf2   : > { %v1205_v58 = vshrl.u32 %v1187_v9, %v1203_v35  ;;  %v1208_v59 = vadd.s32 127, %v1207_v52  ;;  %v21345_v60 = vmul.u32.u64.low %v21302_v22, %v970_v48  ;;  %v21346_v61 = vmul.u32.u64.high %v21302_v22, %v970_v48, %v21345_v60 }
  0xf3   : > { %vm1122_vm1 = vcmp.lt.s32.totalorder %v21267_v40, 2  ;;  %vm1123_vm2 = vcmp.eq.s32.totalorder %v21267_v40, 0  ;;  %vm1126_vm3 = vcmp.eq.s32.totalorder %v21267_v40, 2  ;;  %v1342_v46 = vand.u32 2139095040, %v21299_v18 }
  0xf4   : > { %v1206_v63 = vor.u32 %v1205_v58, %v1204_v30  ;;  %v1209_v0 = vshll.u32 %v1208_v59, 23  ;;  %v1218_v1 = vsel %vm1133_vm10, %v1217_v23, %v21259_v34  ;;  %v962_v19 = vsel %vm956_vm13, %v959_v28, %v961_v54  ;;  %v20567_v3 = vpop.eup %20566 }
  0xf5   : > { %v1125_v4 = vsel %vm1123_vm2, %v20563_v31, %v1124_v21  ;;  %v1128_v5 = vsel %vm1126_vm3, %v1127_v38, %v20565_v25  ;;  %v981_v6 = vadd.s32 1, %v21341_v41  ;;  %v1343_v7 = vshrl.u32 %v1342_v46, 23  ;;  %v20569_v8 = vpop.eup %20568 }
  0xf6   : > { %v913_v9 = vand.u32 3, %v912_v13  ;;  %v1210_v56 = vor.u32 4788187, %v1209_v0  ;;  %v1339_v20 = vand.u32 2147483647, %v21299_v18  ;;  %v21361_v42 = vadd.f32 %v21084_v11, %v21271_v44 }
  0xf7   : > { %v1220_v34 = vsel %vm21320_vm14, 0, %v1218_v1  ;;  %v978_v15 = vmul.u32 %v21302_v22, %v962_v19  ;;  %vm980_vm4 = vc.u32 %v21346_v61, %v21340_v57  ;;  %v17491_v23 = vadd.s32 4294967169, %v1343_v7 }
  0xf8   : > { %v1129_v50 = vsel %vm1122_vm1, %v1125_v4, %v1128_v5  ;;  %v1211_v31 = vand.u32 2147483647, %v1210_v56  ;;  %v1213_v13 = vcvt.s32.f32 %v1206_v63  ;;  %v982_v24 = vsel %vm980_vm4, %v981_v6, %v21341_v41 }
  0xf9   : > { %v916_v2 = vxor.u32 2147483648, %v20569_v8  ;;  %v919_v25 = vxor.u32 2147483648, %v20567_v3  ;;  %v983_v26 = vadd.s32 %v982_v24, %v978_v15  ;;  %v1349_v11 = vadd.s32 1, %v17491_v23 }
  0xfa   : > { %vm914_vm5 = vcmp.lt.s32.totalorder %v913_v9, 2  ;;  %vm915_vm6 = vcmp.eq.s32.totalorder %v913_v9, 0  ;;  %v1214_v44 = vmul.f32 %v1213_v13, %v1211_v31  ;;  %v1224_v27 = vadd.s32 3, %v1220_v34 }
  0xfb   : > { %v21372_v22 = vsel %vm1119_vm0, nan, %v1129_v50  ;;  %vm918_vm7 = vcmp.eq.s32.totalorder %v913_v9, 2  ;;  %vm925_vm8 = vcmp.lt.s32.totalorder %v21185_v32, 0  ;;  %v984_v40 = vadd.s32 536870912, %v983_v26 }
  0xfc   : > { %vm1350_vm9 = vcmp.gt.s32.totalorder %v1349_v11, 0  ;;  %v1215_v55 = vxor.u32 2147483648, %v1214_v44  ;;  %v21377_v36 = vand.u32 8388607, %v1339_v20  ;;  %v1238_v43 = vand.u32 2139095040, %v21361_v42 }
  0xfd   : > { %v1351_v37 = vsel %vm1350_vm9, %v1349_v11, 0  ;;  %vm911_vm11 = vweird.f32 %v21092_v17  ;;  %v917_v38 = vsel %vm915_vm6, %v20567_v3, %v916_v2  ;;  %v920_v39 = vsel %vm918_vm7, %v919_v25, %v20569_v8 }
  0xfe   : > { %v985_v28 = vshrl.u32 %v984_v40, 30  ;;  %v1353_v14 = vand.u32 31, %v1351_v37  ;;  %v1653_v21 = vsub.f32 %v21372_v22, %v21089_v16  ;;  %v1216_v35 = vsel %vm1133_vm10, %v1215_v55, %v1214_v44 }
  0xff   : > { %v21385_v52 = vand.u32 3, %v1224_v27  ;;  %vm21389_vm12 = vcmp.le.f32.partialorder %v923_v12, 0.7853982  ;;  %v1235_v30 = vand.u32 2147483647, %v21361_v42  ;;  %v1219_v48 = vsel %vm21320_vm14, %v21104_v29, %v1216_v35 }
 0x100   : > { %v21398_v41 = vadd.s32 %v21340_v57, %v21346_v61  ;;  %v986_v58 = vshll.u32 %v985_v28, 30  ;;  %v1354_v59 = vsub.s32 32, %v1353_v14  ;;  %v921_v60 = vsel %vm914_vm5, %v917_v38, %v920_v39 }
 0x101   : > { %v1009_v46 = vsub.s32 4, %v985_v28  ;;  %v1347_v63 = vor.u32 8388608, %v21377_v36  ;;  %v1239_v12 = vshrl.u32 %v1238_v43, 23  ;;  %20570 = vcosq.f32 %v1219_v48 }
 0x102   : > { %v21402_v0 = vsub.s32 %v983_v26, %v986_v58  ;;  %v1352_v1 = vshrl.u32 %v1351_v37, 5  ;;  %v1356_v19 = vshll.u32 %v20925_v45, %v1353_v14  ;;  %v1357_v33 = vshrl.u32 %v20926_v47, %v1354_v59 }
 0x103   : > { %v1360_v3 = vshrl.u32 %v20927_v49, %v1354_v59  ;;  %v1362_v57 = vshll.u32 %v20927_v49, %v1353_v14  ;;  %v1363_v61 = vshrl.u32 %v20928_v51, %v1354_v59  ;;  %v1359_v5 = vshll.u32 %v20926_v47, %v1353_v14 }
 0x104   : > { %v989_v4 = vsub.s32 0, %v21402_v0  ;;  %v1365_v6 = vshll.u32 %v20928_v51, %v1353_v14  ;;  %v1366_v7 = vshrl.u32 %v20929_v53, %v1354_v59  ;;  %20572 = vsinq.f32 %v1219_v48 }
 0x105   : > { %v1010_v8 = vsel %vm925_vm8, %v1009_v46, %v985_v28  ;;  %v1358_v9 = vor.u32 %v1357_v33, %v1356_v19  ;;  %v1364_v56 = vor.u32 %v1363_v61, %v1362_v57  ;;  %v1361_v15 = vor.u32 %v1360_v3, %v1359_v5 }
 0x106   : > { %v17476_v34 = vmin.u32 %v989_v4, %v21402_v0  ;;  %v1367_v23 = vor.u32 %v1366_v7, %v1365_v6  ;;  %v1369_v50 = vshrl.u32 %v20930_v62, %v1354_v59  ;;  %v21419_v31 = vsel %vm911_vm11, nan, %v921_v60 }
 0x107   : > { %v1355_v13 = vshrl.u32 %v20925_v45, %v1354_v59  ;;  %v1368_v24 = vshll.u32 %v20929_v53, %v1353_v14  ;;  %v17487_v2 = vadd.s32 4294967169, %v1239_v12  ;;  %v1012_v26 = vsel %vm21389_vm12, 0, %v1010_v8  ;;  %v21433_v12 = vld [vmem:[%s24849_s6] ss:$0 sm:$0xff]  ;;  %s24858_s6 = sld [smem:[#allocation31_spill]] }
 0x108   : > { %v991_v25 = vclz %v17476_v34  ;;  %vm1371_vm10 = vcmp.lt.s32.totalorder %v1352_v1, 1  ;;  %vm1374_vm13 = vcmp.lt.s32.totalorder %v1352_v1, 4  ;;  %vm1373_vm14 = vcmp.lt.s32.totalorder %v1352_v1, 3 }
 0x109   : > { %v1370_v11 = vor.u32 %v1369_v50, %v1368_v24  ;;  %v1375_v44 = vsel %vm1371_vm10, %v1355_v13, %v1358_v9  ;;  %v1376_v27 = vsel %vm1374_vm13, %v1364_v56, 2102212464  ;;  %v1379_v55 = vsel %vm1371_vm10, %v1358_v9, %v1361_v15  ;;  %v789_v9 = vpop.permute.xlu1 %788 }
 0x10a   : > { %v17477_v40 = vadd.s32 4294967294, %v991_v25  ;;  %v1380_v36 = vsel %vm1374_vm13, %v1367_v23, 920167782  ;;  %v1383_v37 = vsel %vm1371_vm10, %v1361_v15, %v1364_v56  ;;  %vm1230_vm15 = vcmp.eq.s32.totalorder %v21385_v52, 2 }
 0x10b   : > { %v1377_v43 = vsel %vm1373_vm14, %v1361_v15, %v1376_v27  ;;  %v1381_v38 = vsel %vm1373_vm14, %v1364_v56, %v1380_v36  ;;  %v1384_v39 = vsel %vm1374_vm13, %v1370_v11, 1326507024  ;;  %v1245_v28 = vadd.s32 1, %v17487_v2  ;;  %v20571_v14 = vpop.eup %20570 }
 0x10c   : > { %vm17478_vm0 = vcmp.lt.s32.totalorder %v17477_v40, 0  ;;  %vm1372_vm1 = vcmp.lt.s32.totalorder %v1352_v1, 2  ;;  %v1385_v35 = vsel %vm1373_vm14, %v1367_v23, %v1384_v39  ;;  %v1387_v48 = vshll.u32 %v1347_v63, 8 }
 0x10d   : > { %v994_v58 = vsel %vm17478_vm0, 0, %v17477_v40  ;;  %v1016_v59 = vadd.s32 3, %v1012_v26  ;;  %v1386_v60 = vsel %vm1372_vm1, %v1383_v37, %v1385_v35  ;;  %v21428_v46 = vand.u32 8388607, %v1235_v30 }
 0x10e   : > { %v995_v19 = vsub.s32 32, %v994_v58  ;;  %v999_v33 = vsub.s32 4294967266, %v994_v58  ;;  %v1378_v3 = vsel %vm1372_vm1, %v1375_v44, %v1377_v43  ;;  %v1382_v57 = vsel %vm1372_vm1, %v1379_v55, %v1381_v38  ;;  %v20573_v61 = vpop.eup %20572 }
 0x10f   : > { %v1231_v1 = vxor.u32 2147483648, %v20571_v14  ;;  %v21435_v4 = vmul.u32.u64.low %v1387_v48, %v1386_v60  ;;  %v21436_v63 = vmul.u32.u64.high %v1387_v48, %v1386_v60, %v21435_v4  ;;  %vm1246_vm2 = vcmp.gt.s32.totalorder %v1245_v28, 0 }
 0x110   : > { %v996_v5 = vshll.u32 %v21402_v0, %v994_v58  ;;  %v997_v6 = vshrl.u32 %v21398_v41, %v995_v19  ;;  %v1000_v7 = vadd.s32 127, %v999_v33  ;;  %v1247_v8 = vsel %vm1246_vm2, %v1245_v28, 0 }
 0x111   : > { %v21444_v56 = vmul.f32 %v21433_v12, %v1653_v21  ;;  %v1651_v34 = vsub.f32 %v21419_v31, %v21092_v17  ;;  %vm1227_vm3 = vcmp.eq.s32.totalorder %v21385_v52, 0  ;;  %v1243_v50 = vor.u32 8388608, %v21428_v46 }
 0x112   : > { %v21449_v15 = vmul.u32.u64.low %v1387_v48, %v1382_v57  ;;  %v21450_v23 = vmul.u32.u64.high %v1387_v48, %v1382_v57, %v21449_v15  ;;  %v998_v0 = vor.u32 %v997_v6, %v996_v5  ;;  %v1001_v41 = vshll.u32 %v1000_v7, 23 }
 0x113   : > { %v1249_v13 = vand.u32 31, %v1247_v8  ;;  %v1228_v24 = vxor.u32 2147483648, %v20573_v61  ;;  %v21454_v2 = vand.u32 3, %v1016_v59  ;;  %v1394_v22 = vmul.u32 %v1387_v48, %v1378_v3 }
 0x114   : > { %v804_v21 = vmul.f32 %v21079_v10, %v789_v9  ;;  %v1232_v25 = vsel %vm1230_vm15, %v1231_v1, %v20573_v61  ;;  %v1002_v26 = vor.u32 4788187, %v1001_v41  ;;  %vm1396_vm4 = vc.u32 %v21436_v63, %v21449_v15 }
 0x115   : > { %v1250_v11 = vsub.s32 32, %v1249_v13  ;;  %v1005_v44 = vcvt.s32.f32 %v998_v0  ;;  %v1397_v27 = vadd.s32 1, %v21450_v23  ;;  %v21462_v40 = vshrl.u32 %v1247_v8, 5 }
 0x116   : > { %v1252_v55 = vshll.u32 %v20925_v45, %v1249_v13  ;;  %v1003_v36 = vand.u32 2147483647, %v1002_v26  ;;  %v1255_v10 = vshll.u32 %v20926_v47, %v1249_v13  ;;  %v1258_v43 = vshll.u32 %v20927_v49, %v1249_v13 }
 0x117   : > { %v1253_v37 = vshrl.u32 %v20926_v47, %v1250_v11  ;;  %v1398_v38 = vsel %vm1396_vm4, %v1397_v27, %v21450_v23  ;;  %v1256_v39 = vshrl.u32 %v20927_v49, %v1250_v11  ;;  %v1259_v28 = vshrl.u32 %v20928_v51, %v1250_v11 }
 0x118   : > { %v1261_v35 = vshll.u32 %v20928_v51, %v1249_v13  ;;  %v1006_v48 = vmul.f32 %v1005_v44, %v1003_v36  ;;  %v1399_v58 = vadd.s32 %v1398_v38, %v1394_v22  ;;  %v1262_v60 = vshrl.u32 %v20929_v53, %v1250_v11 }
 0x119   : > { %v1254_v59 = vor.u32 %v1253_v37, %v1252_v55  ;;  %v1257_v46 = vor.u32 %v1256_v39, %v1255_v10  ;;  %v1260_v19 = vor.u32 %v1259_v28, %v1258_v43  ;;  %v1264_v33 = vshll.u32 %v20929_v53, %v1249_v13  ;;  %v21511_v55 = vld [vmem:[%s24840_s1] ss:$0 sm:$0xff] }
 0x11a   : > { %v1265_v3 = vshrl.u32 %v20930_v62, %v1250_v11  ;;  %v1229_v57 = vsel %vm1227_vm3, %v20571_v14, %v1228_v24  ;;  %v1007_v61 = vxor.u32 2147483648, %v1006_v48  ;;  %v1400_v1 = vadd.s32 536870912, %v1399_v58 }
 0x11b   : > { %v1263_v4 = vor.u32 %v1262_v60, %v1261_v35  ;;  %vm1267_vm5 = vcmp.lt.s32.totalorder %v21462_v40, 1  ;;  %vm1269_vm6 = vcmp.lt.s32.totalorder %v21462_v40, 3  ;;  %vm1270_vm7 = vcmp.lt.s32.totalorder %v21462_v40, 4 }
 0x11c   : > { %v1266_v5 = vor.u32 %v1265_v3, %v1264_v33  ;;  %v1008_v6 = vsel %vm925_vm8, %v1007_v61, %v1006_v48  ;;  %v1401_v7 = vshrl.u32 %v1400_v1, 30  ;;  %v1275_v8 = vsel %vm1267_vm5, %v1254_v59, %v1257_v46 }
 0x11d   : > { %v1276_v14 = vsel %vm1270_vm7, %v1263_v4, 920167782  ;;  %vm1223_vm9 = vweird.f32 %v21104_v29  ;;  %v1011_v9 = vsel %vm21389_vm12, %v21185_v32, %v1008_v6  ;;  %v1251_v23 = vshrl.u32 %v20925_v45, %v1250_v11 }
 0x11e   : > { %vm1268_vm11 = vcmp.lt.s32.totalorder %v21462_v40, 2  ;;  %v1277_v0 = vsel %vm1269_vm6, %v1260_v19, %v1276_v14  ;;  %20574 = vcosq.f32 %v1011_v9  ;;  %v1402_v41 = vshll.u32 %v1401_v7, 30 }
 0x11f   : > { %v1272_v13 = vsel %vm1270_vm7, %v1260_v19, 2102212464  ;;  %v1279_v24 = vsel %vm1267_vm5, %v1257_v46, %v1260_v19  ;;  %20576 = vsinq.f32 %v1011_v9  ;;  %v1278_v54 = vsel %vm1268_vm11, %v1275_v8, %v1277_v0 }
 0x120   : > { %v1280_v22 = vsel %vm1270_vm7, %v1266_v5, 1326507024  ;;  %v1283_v26 = vshll.u32 %v1243_v50, 8  ;;  %v21502_v11 = vsub.s32 %v1399_v58, %v1402_v41  ;;  %v1271_v44 = vsel %vm1267_vm5, %v1251_v23, %v1254_v59 }
 0x121   : > { %v1281_v27 = vsel %vm1269_vm6, %v1263_v4, %v1280_v22  ;;  %v21514_v36 = vadd.f32 %v21511_v55, %v804_v21  ;;  %v1273_v37 = vsel %vm1269_vm6, %v1257_v46, %v1272_v13  ;;  %vm1226_vm8 = vcmp.lt.s32.totalorder %v21385_v52, 2  ;;  %v1682_v46 = vld [vmem:[%s24853_s7 + $0x8] sm:$0xff] }
 0x122   : > { %v1282_v50 = vsel %vm1268_vm11, %v1279_v24, %v1281_v27  ;;  %v21520_v10 = vmul.u32.u64.low %v1283_v26, %v1278_v54  ;;  %v21521_v43 = vmul.u32.u64.high %v1283_v26, %v1278_v54, %v21520_v10  ;;  %v1405_v38 = vsub.s32 0, %v21502_v11 }
 0x123   : > { %v21526_v39 = vmul.u32.u64.low %v1283_v26, %v1282_v50  ;;  %v21527_v28 = vmul.u32.u64.high %v1283_v26, %v1282_v50, %v21526_v39  ;;  %v1233_v35 = vsel %vm1226_vm8, %v1229_v57, %v1232_v25  ;;  %vm1341_vm12 = vcmp.lt.s32.totalorder %v21299_v18, 0 }
 0x124   : > { %v1425_v21 = vsub.s32 4, %v1401_v7  ;;  %v1550_v48 = vand.u32 2139095040, %v21514_v36  ;;  %v21533_v58 = vadd.f32 %v21444_v56, %v21089_v16  ;;  %vm21537_vm10 = vcmp.le.f32.partialorder %v1339_v20, 0.7853982  ;;  %v1681_v20 = vld [vmem:[%s24853_s7] sm:$0xff] }
 0x125   : > { %v17492_v52 = vmin.u32 %v1405_v38, %v21502_v11  ;;  %v1274_v25 = vsel %vm1268_vm11, %v1271_v44, %v1273_v37  ;;  %v1665_v60 = vmul.f32 %v21433_v12, %v1651_v34  ;;  %vm1018_vm13 = vcmp.lt.s32.totalorder %v21454_v2, 2 }
 0x126   : > { %24850 = vst [vmem:[#allocation4_spill] sm:$0xff] %v21533_v58  ;;  %v1293_v16 = vadd.s32 1, %v21521_v43  ;;  %v1551_v56 = vshrl.u32 %v1550_v48, 23  ;;  %v1234_v40 = vsel %vm1223_vm9, nan, %v1233_v35  ;;  %vm1015_vm14 = vweird.f32 %v21185_v32 }
 0x127   : > { %vm1019_vm15 = vcmp.eq.s32.totalorder %v21454_v2, 0  ;;  %vm1022_vm0 = vcmp.eq.s32.totalorder %v21454_v2, 2  ;;  %v1407_v31 = vclz %v17492_v52  ;;  %v1426_v34 = vsel %vm1341_vm12, %v1425_v21, %v1401_v7 }
 0x128   : > { %v1290_v19 = vmul.u32 %v1283_v26, %v1274_v25  ;;  %vm1292_vm1 = vc.u32 %v21527_v28, %v21520_v10  ;;  %v17499_v33 = vadd.s32 4294967169, %v1551_v56  ;;  %v20575_v3 = vpop.eup %20574  ;;  %v1547_v1 = vand.u32 2147483647, %v21514_v36  ;;  %v20915_v25 = vld [vmem:[%s24839_s25] ss:$0 sm:$0xff] }
 0x129   : > { %v17493_v57 = vadd.s32 4294967294, %v1407_v31  ;;  %v1294_v61 = vsel %vm1292_vm1, %v1293_v16, %v21521_v43  ;;  %v20194_v4 = vpack.c.bf16 %v1682_v46, %v1681_v20  ;;  %v20577_v5 = vpop.eup %20576  ;;  %v1654_v6 = vsub.f32 %v1234_v40, %v21104_v29 }
 0x12a   : > { %v1023_v8 = vxor.u32 2147483648, %v20575_v3  ;;  %v1295_v14 = vadd.s32 %v1294_v61, %v1290_v19  ;;  %v1557_v9 = vadd.s32 1, %v17499_v33  ;;  %v1020_v23 = vxor.u32 2147483648, %v20577_v5 }
 0x12b   : > { %v1395_v7 = vadd.s32 %v21449_v15, %v21436_v63  ;;  %vm17494_vm2 = vcmp.lt.s32.totalorder %v17493_v57, 0  ;;  %v1428_v0 = vsel %vm21537_vm10, 0, %v1426_v34  ;;  %20195 = vmatprep.subr.bf16.mxu0 %v20194_v4  ;;  %v1554_v63 = vand.u32 8388607, %v1547_v1  ;;  %v784_v15 = vpop.permute.xlu0 %783 }
 0x12c   : > { %v1024_v41 = vsel %vm1022_vm0, %v1023_v8, %v20577_v5  ;;  %v1410_v13 = vsel %vm17494_vm2, 0, %v17493_v57  ;;  %v1296_v24 = vadd.s32 536870912, %v1295_v14  ;;  %vm1558_vm3 = vcmp.gt.s32.totalorder %v1557_v9, 0  ;;  %20197 = vmatpush3.bf16.msra.mxu0 %v20194_v4 }
 0x12d   : > { %v1021_v54 = vsel %vm1019_vm15, %v20575_v3, %v1020_v23  ;;  %v1411_v22 = vsub.s32 32, %v1410_v13  ;;  %v1415_v26 = vsub.s32 4294967266, %v1410_v13  ;;  %v1668_v44 = vmul.f32 %v21433_v12, %v1654_v6 }
 0x12e   : > { %v1025_v27 = vsel %vm1018_vm13, %v1021_v54, %v1024_v41  ;;  %v1297_v37 = vshrl.u32 %v1296_v24, 30  ;;  %v1559_v50 = vsel %vm1558_vm3, %v1557_v9, 0  ;;  %v1412_v43 = vshll.u32 %v21502_v11, %v1410_v13 }
 0x12f   : > { %v1413_v38 = vshrl.u32 %v1395_v7, %v1411_v22  ;;  %v1416_v39 = vadd.s32 127, %v1415_v26  ;;  %v1432_v35 = vadd.s32 3, %v1428_v0  ;;  %v1026_v21 = vsel %vm1015_vm14, nan, %v1025_v27 }
 0x130   : > { %v1298_v48 = vshll.u32 %v1297_v37, 30  ;;  %v1561_v52 = vand.u32 31, %v1559_v50  ;;  %v803_v16 = vmul.f32 %v20915_v25, %v784_v15  ;;  %vm1237_vm4 = vcmp.lt.s32.totalorder %v21361_v42, 0 }
 0x131   : > { %v1414_v56 = vor.u32 %v1413_v38, %v1412_v43  ;;  %v1417_v2 = vshll.u32 %v1416_v39, 23  ;;  %v1555_v20 = vor.u32 8388608, %v1554_v63  ;;  %v21589_v11 = vadd.f32 %v1665_v60, %v21092_v17 }
 0x132   : > { %v21592_v46 = vadd.f32 %v1668_v44, %v21104_v29  ;;  %v21594_v40 = vsub.s32 %v1295_v14, %v1298_v48  ;;  %v1562_v31 = vsub.s32 32, %v1561_v52  ;;  %v1652_v34 = vsub.f32 %v1026_v21, %v21185_v32 }
 0x133   : > { %24854 = vst [vmem:[#allocation5_spill] sm:$0xff] %v21589_v11  ;;  %v1418_v19 = vor.u32 4788187, %v1417_v2  ;;  %v21597_v33 = vand.u32 3, %v1432_v35  ;;  %v21599_v3 = vshrl.u32 %v1559_v50, 5  ;;  %v1291_v57 = vadd.s32 %v21520_v10, %v21527_v28 }
 0x134   : > { %24855 = vst [vmem:[#allocation6_spill] sm:$0xff] %v21592_v46  ;;  %v1301_v61 = vsub.s32 0, %v21594_v40  ;;  %v1321_v17 = vsub.s32 4, %v1297_v37  ;;  %v21605_v60 = vadd.f32 %v21511_v55, %v803_v16  ;;  %v1421_v4 = vcvt.s32.f32 %v1414_v56 }
 0x135   : > { %v1419_v29 = vand.u32 2147483647, %v1418_v19  ;;  %v1565_v5 = vshrl.u32 %v20926_v47, %v1562_v31  ;;  %v21608_v6 = vshll.u32 %v1555_v20, 8  ;;  %v1564_v14 = vshll.u32 %v20925_v45, %v1561_v52 }
 0x136   : > { %v17488_v8 = vmin.u32 %v1301_v61, %v21594_v40  ;;  %v1568_v9 = vshrl.u32 %v20927_v49, %v1562_v31  ;;  %v1571_v10 = vshrl.u32 %v20928_v51, %v1562_v31  ;;  %v1666_v28 = vmul.f32 %v21433_v12, %v1652_v34 }
 0x137   : > { %v1422_v23 = vmul.f32 %v1421_v4, %v1419_v29  ;;  %v1570_v55 = vshll.u32 %v20927_v49, %v1561_v52  ;;  %vm1579_vm5 = vcmp.lt.s32.totalorder %v21599_v3, 1  ;;  %v21619_v0 = vsel %vm1237_vm4, %v1321_v17, %v1297_v37 }
 0x138   : > { %v1303_v7 = vclz %v17488_v8  ;;  %v1566_v41 = vor.u32 %v1565_v5, %v1564_v14  ;;  %v1567_v13 = vshll.u32 %v20926_v47, %v1561_v52  ;;  %vm1580_vm6 = vcmp.lt.s32.totalorder %v21599_v3, 2  ;;  %v1823_v5 = vld [vmem:[%s24858_s6 + $0x8] sm:$0xff] }
 0x139   : > { %v1423_v24 = vxor.u32 2147483648, %v1422_v23  ;;  %v1572_v54 = vor.u32 %v1571_v10, %v1570_v55  ;;  %v1573_v22 = vshll.u32 %v20928_v51, %v1561_v52  ;;  %v1574_v26 = vshrl.u32 %v20929_v53, %v1562_v31  ;;  %v1684_v55 = vld [vmem:[%s24853_s7 + $0x18] sm:$0xff] }
 0x13a   : > { %v17489_v63 = vadd.s32 4294967294, %v1303_v7  ;;  %v1569_v15 = vor.u32 %v1568_v9, %v1567_v13  ;;  %v1576_v44 = vshll.u32 %v20929_v53, %v1561_v52  ;;  %v1577_v27 = vshrl.u32 %v20930_v62, %v1562_v31 }
 0x13b   : > { %v1424_v37 = vsel %vm1341_vm12, %v1423_v24, %v1422_v23  ;;  %vm21631_vm7 = vcmp.le.f32.partialorder %v1235_v30, 0.7853982  ;;  %v1563_v43 = vshrl.u32 %v20925_v45, %v1562_v31  ;;  %v1575_v38 = vor.u32 %v1574_v26, %v1573_v22  ;;  %v1683_v23 = vld [vmem:[%s24853_s7 + $0x10] sm:$0xff]  ;;  %v1825_v22 = vld [vmem:[%s24858_s6 + $0x18] sm:$0xff] }
 0x13c   : > { %vm1581_vm9 = vcmp.lt.s32.totalorder %v21599_v3, 3  ;;  %v1427_v39 = vsel %vm21537_vm10, %v21299_v18, %v1424_v37  ;;  %vm17490_vm11 = vcmp.lt.s32.totalorder %v17489_v63, 0  ;;  %v1578_v35 = vor.u32 %v1577_v27, %v1576_v44  ;;  %v1938_v27 = vld [vmem:[%s24860_s29] sm:$0xff]  ;;  %v1939_v37 = vld [vmem:[%s24860_s29 + $0x8] sm:$0xff] }
 0x13d   : > { %vm1582_vm8 = vcmp.lt.s32.totalorder %v21599_v3, 4  ;;  %20578 = vcosq.f32 %v1427_v39  ;;  %v1306_v21 = vsel %vm17490_vm11, 0, %v17489_v63  ;;  %v1583_v30 = vsel %vm1579_vm5, %v1563_v43, %v1566_v41 }
 0x13e   : > { %v1584_v48 = vsel %vm1582_vm8, %v1572_v54, 2102212464  ;;  %20580 = vsinq.f32 %v1427_v39  ;;  %v1307_v52 = vsub.s32 32, %v1306_v21  ;;  %v1311_v25 = vsub.s32 4294967266, %v1306_v21 }
 0x13f   : > { %v1587_v16 = vsel %vm1579_vm5, %v1566_v41, %v1569_v15  ;;  %v1308_v56 = vshll.u32 %v21594_v40, %v1306_v21  ;;  %v1588_v59 = vsel %vm1582_vm8, %v1575_v38, 920167782  ;;  %v1591_v2 = vsel %vm1579_vm5, %v1569_v15, %v1572_v54  ;;  %v1940_v21 = vld [vmem:[%s24860_s29 + $0x10] sm:$0xff] }
 0x140   : > { %v1592_v20 = vsel %vm1582_vm8, %v1578_v35, 1326507024  ;;  %v1309_v31 = vshrl.u32 %v1291_v57, %v1307_v52  ;;  %v1312_v34 = vadd.s32 127, %v1311_v25  ;;  %v1589_v19 = vsel %vm1581_vm9, %v1572_v54, %v1588_v59  ;;  %v1822_v57 = vld [vmem:[%s24858_s6] sm:$0xff]  ;;  %v1824_v54 = vld [vmem:[%s24858_s6 + $0x10] sm:$0xff] }
 0x141   : > { %v1593_v61 = vsel %vm1581_vm9, %v1575_v38, %v1592_v20  ;;  %v1585_v17 = vsel %vm1581_vm9, %v1569_v15, %v1584_v48  ;;  %v1590_v29 = vsel %vm1580_vm6, %v1587_v16, %v1589_v19  ;;  %v1446_v4 = vand.u32 2139095040, %v21605_v60 }
 0x142   : > { %v1594_v40 = vsel %vm1580_vm6, %v1591_v2, %v1593_v61  ;;  %v1310_v8 = vor.u32 %v1309_v31, %v1308_v56  ;;  %v1313_v14 = vshll.u32 %v1312_v34, 23  ;;  %v1443_v13 = vand.u32 2147483647, %v21605_v60 }
 0x143   : > { %v21666_v9 = vmul.u32.u64.low %v21608_v6, %v1594_v40  ;;  %v21667_v10 = vmul.u32.u64.high %v21608_v6, %v1594_v40, %v21666_v9  ;;  %v21676_v7 = vmul.u32.u64.low %v21608_v6, %v1590_v29  ;;  %v21677_v41 = vmul.u32.u64.high %v21608_v6, %v1590_v29, %v21676_v7  ;;  %v17534_v29 = vld [vmem:[%s24853_s7 + $0x38] sm:$0xff] }
 0x144   : > { %v1447_v24 = vshrl.u32 %v1446_v4, 23  ;;  %v21688_v26 = vadd.f32 %v1666_v28, %v21185_v32  ;;  %v1314_v63 = vor.u32 4788187, %v1313_v14  ;;  %v1324_v15 = vsel %vm21631_vm7, 0, %v21619_v0  ;;  %v17531_v28 = vld [vmem:[%s24853_s7 + $0x20] sm:$0xff]  ;;  %v17532_v0 = vld [vmem:[%s24853_s7 + $0x28] sm:$0xff] }
 0x145   : > { %v20202_v44 = vpack.c.bf16 %v1823_v5, %v1822_v57  ;;  %v1586_v43 = vsel %vm1580_vm6, %v1583_v30, %v1585_v17  ;;  %v20198_v32 = vpack.c.bf16 %v1684_v55, %v1683_v23  ;;  %vm1692_vm12 = vcmask 261120   ;;  %v1941_v30 = vld [vmem:[%s24860_s29 + $0x18] sm:$0xff]  ;;  %v17546_v14 = vld [vmem:[%s24858_s6 + $0x28] sm:$0xff] }
 0x146   : > { %24859 = vst [vmem:[#allocation7_spill] sm:$0xff] %v21688_v26  ;;  %v17495_v38 = vadd.s32 4294967169, %v1447_v24  ;;  %v1315_v39 = vand.u32 2147483647, %v1314_v63  ;;  %v1317_v35 = vcvt.s32.f32 %v1310_v8  ;;  %vm1604_vm10 = vc.u32 %v21667_v10, %v21676_v7  ;;  %18850 = vmatprep.mubr.msk.f32.mxu0 %vm1692_vm12, %v21589_v11  ;;  %18870 = vmatprep.mubr.msk.f32.mxu1 %vm1692_vm12, %v21589_v11  ;;  %v17545_v8 = vld [vmem:[%s24858_s6 + $0x20] sm:$0xff] }
 0x147   : > { %20203 = vmatprep.subr.bf16.mxu1 %v20202_v44  ;;  %v20206_v3 = vpack.c.bf16 %v1825_v22, %v1824_v54  ;;  %v20579_v48 = vpop.eup %20578  ;;  %v1328_v52 = vadd.s32 3, %v1324_v15  ;;  %v1605_v25 = vadd.s32 1, %v21677_v41  ;;  %20199 = vmatprep.subr.bf16.mxu0 %v20198_v32  ;;  %v20210_v56 = vpack.c.bf16 %v1939_v37, %v1938_v27  ;;  %v17560_v27 = vld [vmem:[%s24860_s29 + $0x28] sm:$0xff] }
 0x148   : > { %v1453_v16 = vadd.s32 1, %v17495_v38  ;;  %20205 = vmatpush3.bf16.msra.mxu1 %v20202_v44  ;;  %v20581_v59 = vpop.eup %20580  ;;  %v1318_v2 = vmul.f32 %v1317_v35, %v1315_v39  ;;  %v1602_v20 = vmul.u32 %v21608_v6, %v1586_v43  ;;  %v21721_v31 = vand.u32 8388607, %v1443_v13  ;;  %20201 = vmatpush3.bf16.msra.mxu0 %v20198_v32  ;;  %v17533_v6 = vld [vmem:[%s24853_s7 + $0x30] sm:$0xff]  ;;  %v17559_v44 = vld [vmem:[%s24860_s29 + $0x20] sm:$0xff] }
 0x149   : > { %20207 = vmatprep.subr.bf16.mxu1 %v20206_v3  ;;  %v20218_v34 = vpack.c.bf16 %v17532_v0, %v17531_v28  ;;  %v1439_v19 = vxor.u32 2147483648, %v20579_v48  ;;  %v1606_v61 = vsel %vm1604_vm10, %v1605_v25, %v21677_v41  ;;  %v20214_v17 = vpack.c.bf16 %v1941_v30, %v1940_v21  ;;  %20211 = vmatprep.subr.bf16.mxu0 %v20210_v56 }
 0x14a   : > { %vm1454_vm13 = vcmp.gt.s32.totalorder %v1453_v16, 0  ;;  %v1436_v40 = vxor.u32 2147483648, %v20581_v59  ;;  %v1319_v4 = vxor.u32 2147483648, %v1318_v2  ;;  %v1607_v57 = vadd.s32 %v1606_v61, %v1602_v20 }
 0x14b   : > { %v1455_v5 = vsel %vm1454_vm13, %v1453_v16, 0  ;;  %vm1434_vm14 = vcmp.lt.s32.totalorder %v21597_v33, 2  ;;  %vm1435_vm15 = vcmp.eq.s32.totalorder %v21597_v33, 0  ;;  %vm1438_vm0 = vcmp.eq.s32.totalorder %v21597_v33, 2  ;;  %18851 = vmatmul.mubr.msk.f32.vlgmr.msra.gmra.mrb[0].mxu0 %vm1692_vm12, %v21688_v26 }
 0x14c   : > { %v1457_v9 = vand.u32 31, %v1455_v5  ;;  %20209 = vmatpush3.bf16.msra.mxu1 %v20206_v3  ;;  %v1320_v23 = vsel %vm1237_vm4, %v1319_v4, %v1318_v2  ;;  %v21746_v55 = vand.u32 3, %v1328_v52  ;;  %v1608_v41 = vadd.s32 536870912, %v1607_v57  ;;  %18853 = vmatprep.mubr.msk.f32.mxu0 %vm1692_vm12, %v21533_v58 }
 0x14d   : > { %20219 = vmatprep.subr.bf16.mxu1 %v20218_v34  ;;  %v20222_v24 = vpack.c.bf16 %v17534_v29, %v17533_v6  ;;  %v1323_v54 = vsel %vm21631_vm7, %v21361_v42, %v1320_v23  ;;  %v1451_v22 = vor.u32 8388608, %v21721_v31  ;;  %20213 = vmatpush3.bf16.msra.mxu0 %v20210_v56  ;;  %v21756_v15 = vpack.c.bf16 %v17546_v14, %v17545_v8 }
 0x14e   : > { %v1458_v63 = vsub.s32 32, %v1457_v9  ;;  %v1437_v50 = vsel %vm1435_vm15, %v20579_v48, %v1436_v40  ;;  %v1440_v37 = vsel %vm1438_vm0, %v1439_v19, %v20581_v59  ;;  %20582 = vcosq.f32 %v1323_v54  ;;  %20215 = vmatprep.subr.bf16.mxu0 %v20214_v17 }
 0x14f   : > { %v21768_v43 = vshrl.u32 %v1608_v41, 30  ;;  %18871 = vmatmul.mubr.msk.f32.vlgmr.msra.gmra.mrb[0].mxu1 %vm1692_vm12, %v21688_v26  ;;  %20584 = vsinq.f32 %v1323_v54  ;;  %v1460_v38 = vshll.u32 %v20925_v45, %v1457_v9  ;;  %v21778_v39 = vshrl.u32 %v1455_v5, 5  ;;  %18854 = vmatmul.mubr.msk.f32.gmra.mrb[2].mxu0 %vm1692_vm12, %v21592_v46 }
 0x150   : > { %v1461_v32 = vshrl.u32 %v20926_v47, %v1458_v63  ;;  %v1464_v28 = vshrl.u32 %v20927_v49, %v1458_v63  ;;  %18873 = vmatprep.mubr.msk.f32.mxu1 %vm1692_vm12, %v21533_v58  ;;  %20221 = vmatpush3.bf16.msra.mxu1 %v20218_v34  ;;  %v1463_v35 = vshll.u32 %v20926_v47, %v1457_v9  ;;  %vm1431_vm1 = vweird.f32 %v21299_v18 }
 0x151   : > { %v1610_v0 = vshll.u32 %v21768_v43, 30  ;;  %20223 = vmatprep.subr.bf16.mxu1 %v20222_v24  ;;  %v21783_v3 = vpack.c.bf16 %v17560_v27, %v17559_v44  ;;  %v1441_v21 = vsel %vm1434_vm14, %v1437_v50, %v1440_v37  ;;  %v1466_v48 = vshll.u32 %v20927_v49, %v1457_v9  ;;  %20217 = vmatpush3.bf16.msra.mxu0 %v20214_v17 }
 0x152   : > { %v1462_v30 = vor.u32 %v1461_v32, %v1460_v38  ;;  %v1467_v52 = vshrl.u32 %v20928_v51, %v1458_v63  ;;  %v1465_v16 = vor.u32 %v1464_v28, %v1463_v35  ;;  %v1469_v47 = vshll.u32 %v20928_v51, %v1457_v9  ;;  %20227 = vmatprep.subr.bf16.mxu0 %v21756_v15 }
 0x153   : > { %v21789_v25 = vsub.s32 %v1607_v57, %v1610_v0  ;;  %v1470_v56 = vshrl.u32 %v20929_v53, %v1458_v63  ;;  %18874 = vmatmul.mubr.msk.f32.gmra.mrb[2].mxu1 %vm1692_vm12, %v21592_v46  ;;  %v1472_v59 = vshll.u32 %v20929_v53, %v1457_v9  ;;  %v1473_v49 = vshrl.u32 %v20930_v62, %v1458_v63 }
 0x154   : > { %v1468_v33 = vor.u32 %v1467_v52, %v1466_v48  ;;  %20225 = vmatpush3.bf16.msra.mxu1 %v20222_v24  ;;  %v1442_v2 = vsel %vm1431_vm1, nan, %v1441_v21  ;;  %vm1330_vm2 = vcmp.lt.s32.totalorder %v21746_v55, 2  ;;  %vm1331_vm3 = vcmp.eq.s32.totalorder %v21746_v55, 0 }
 0x155   : > { %v1613_v51 = vsub.s32 0, %v21789_v25  ;;  %v1471_v20 = vor.u32 %v1470_v56, %v1469_v47  ;;  %20235 = vmatprep.subr.bf16.mxu1 %v21783_v3  ;;  %vm1334_vm4 = vcmp.eq.s32.totalorder %v21746_v55, 2  ;;  %v1474_v31 = vor.u32 %v1473_v49, %v1472_v59 }
 0x156   : > { %vm1478_vm5 = vcmp.lt.s32.totalorder %v21778_v39, 4  ;;  %v1491_v53 = vshll.u32 %v1451_v22, 8  ;;  %v1459_v34 = vshrl.u32 %v20925_v45, %v1458_v63  ;;  %vm1475_vm6 = vcmp.lt.s32.totalorder %v21778_v39, 1 }
 0x157   : > { %v17500_v62 = vmin.u32 %v1613_v51, %v21789_v25  ;;  %v1480_v19 = vsel %vm1478_vm5, %v1468_v33, 2102212464  ;;  %v1656_v61 = vsub.f32 %v1442_v2, %v21299_v18  ;;  %vm1476_vm7 = vcmp.lt.s32.totalorder %v21778_v39, 2 }
 0x158   : > { %v1483_v17 = vsel %vm1475_vm6, %v1462_v30, %v1465_v16  ;;  %v1484_v6 = vsel %vm1478_vm5, %v1471_v20, 920167782  ;;  %v20583_v29 = vpop.eup %20582  ;;  %vm1477_vm9 = vcmp.lt.s32.totalorder %v21778_v39, 3  ;;  %v1479_v4 = vsel %vm1475_vm6, %v1459_v34, %v1462_v30 }
 0x159   : > { %v1615_v40 = vclz %v17500_v62  ;;  %v1487_v57 = vsel %vm1475_vm6, %v1465_v16, %v1468_v33  ;;  %v20585_v45 = vpop.eup %20584  ;;  %v1335_v5 = vxor.u32 2147483648, %v20583_v29  ;;  %v1481_v8 = vsel %vm1477_vm9, %v1465_v16, %v1480_v19 }
 0x15a   : > { %v1485_v14 = vsel %vm1477_vm9, %v1468_v33, %v1484_v6  ;;  %v1488_v9 = vsel %vm1478_vm5, %v1474_v31, 1326507024  ;;  %v1332_v23 = vxor.u32 2147483648, %v20585_v45  ;;  %vm1327_vm8 = vweird.f32 %v21361_v42 }
 0x15b   : > { %v17501_v41 = vadd.s32 4294967294, %v1615_v40  ;;  %v1486_v24 = vsel %vm1476_vm7, %v1483_v17, %v1485_v14  ;;  %v1489_v54 = vsel %vm1477_vm9, %v1471_v20, %v1488_v9  ;;  %v1336_v22 = vsel %vm1334_vm4, %v1335_v5, %v20585_v45 }
 0x15c   : > { %v1490_v63 = vsel %vm1476_vm7, %v1487_v57, %v1489_v54  ;;  %v21823_v44 = vmul.u32.u64.low %v1491_v53, %v1486_v24  ;;  %v21824_v27 = vmul.u32.u64.high %v1491_v53, %v1486_v24, %v21823_v44  ;;  %v1333_v50 = vsel %vm1331_vm3, %v20583_v29, %v1332_v23  ;;  %v17573_v57 = vld [vmem:[%s24853_s7 + $0x40] sm:$0xff] }
 0x15d   : > { %vm17502_vm11 = vcmp.lt.s32.totalorder %v17501_v41, 0  ;;  %v21828_v37 = vmul.u32.u64.low %v1491_v53, %v1490_v63  ;;  %v21829_v38 = vmul.u32.u64.high %v1491_v53, %v1490_v63, %v21828_v37  ;;  %v1337_v32 = vsel %vm1330_vm2, %v1333_v50, %v1336_v22 }
 0x15e   : > { %v1618_v28 = vsel %vm17502_vm11, 0, %v17501_v41  ;;  %v1482_v0 = vsel %vm1476_vm7, %v1479_v4, %v1481_v8  ;;  %v1338_v35 = vsel %vm1327_vm8, nan, %v1337_v32  ;;  %v1603_v52 = vadd.s32 %v21676_v7, %v21667_v10 }
 0x15f   : > { %v1619_v21 = vsub.s32 32, %v1618_v28  ;;  %v1623_v30 = vsub.s32 4294967266, %v1618_v28  ;;  %v1655_v48 = vsub.f32 %v1338_v35, %v21361_v42  ;;  %v1501_v16 = vadd.s32 1, %v21824_v27 }
 0x160   : > { %v1670_v47 = vmul.f32 %v21433_v12, %v1656_v61  ;;  %v1498_v33 = vmul.u32 %v1491_v53, %v1482_v0  ;;  %vm1500_vm10 = vc.u32 %v21829_v38, %v21823_v44  ;;  %v1620_v10 = vshll.u32 %v21789_v25, %v1618_v28 }
 0x161   : > { %v1624_v56 = vadd.s32 127, %v1623_v30  ;;  %v1669_v55 = vmul.f32 %v21433_v12, %v1655_v48  ;;  %v1621_v39 = vshrl.u32 %v1603_v52, %v1619_v21  ;;  %v1502_v59 = vsel %vm1500_vm10, %v1501_v16, %v21824_v27 }
 0x162   : > { %v1503_v2 = vadd.s32 %v1502_v59, %v1498_v33  ;;  %v21849_v7 = vadd.f32 %v1670_v47, %v21299_v18  ;;  %vm1549_vm13 = vcmp.lt.s32.totalorder %v21514_v36, 0  ;;  %vm21864_vm15 = vcmp.le.f32.partialorder %v1547_v1, 0.7853982 }
 0x163   : > { %v1625_v49 = vshll.u32 %v1624_v56, 23  ;;  %v21845_v51 = vadd.f32 %v1669_v55, %v21361_v42  ;;  %v1622_v53 = vor.u32 %v1621_v39, %v1620_v10  ;;  %v1499_v8 = vadd.s32 %v21823_v44, %v21829_v38 }
 0x164   : > { %24862 = vst [vmem:[#allocation9_spill] sm:$0xff] %v21849_v7  ;;  %v1504_v31 = vadd.s32 536870912, %v1503_v2  ;;  %v1633_v23 = vsub.s32 4, %v21768_v43  ;;  %vm1445_vm0 = vcmp.lt.s32.totalorder %v21605_v60, 0  ;;  %vm1444_vm1 = vcmp.le.f32.partialorder %v1443_v13, 0.7853982 }
 0x165   : > { %24861 = vst [vmem:[#allocation8_spill] sm:$0xff] %v21845_v51  ;;  %v1626_v20 = vor.u32 4788187, %v1625_v49  ;;  %18856 = vmatprep.mubr.msk.f32.mxu0 %vm1692_vm12, %v21845_v51  ;;  %18876 = vmatprep.mubr.msk.f32.mxu1 %vm1692_vm12, %v21845_v51  ;;  %v1629_v18 = vcvt.s32.f32 %v1622_v53  ;;  %vm1639_vm5 = vweird.f32 %v21514_v36  ;;  %vm1535_vm11 = vweird.f32 %v21605_v60 }
 0x166   : > { %v1505_v62 = vshrl.u32 %v1504_v31, 30  ;;  %18857 = vmatmul.mubr.msk.f32.gmra.mrb[4].mxu0 %vm1692_vm12, %v21849_v7  ;;  %18877 = vmatmul.mubr.msk.f32.gmra.mrb[4].mxu1 %vm1692_vm12, %v21849_v7  ;;  %v1634_v63 = vsel %vm1549_vm13, %v1633_v23, %v21768_v43  ;;  %v17589_v23 = vld [vmem:[%s24858_s6 + $0x50] sm:$0xff]  ;;  %vm20932_vm8 = vmmov 0   ;;  %vm3116_vm10 = vcmask 64512  }
 0x167   : > { %v1627_v42 = vand.u32 2147483647, %v1626_v20  ;;  %v1636_v44 = vsel %vm21864_vm15, 0, %v1634_v63  ;;  %v17615_v63 = vld [vmem:[%s24853_s7 + $0x60] sm:$0xff] }
 0x168   : > { %v1506_v25 = vshll.u32 %v1505_v62, 30  ;;  %v1529_v32 = vsub.s32 4, %v1505_v62  ;;  %v1640_v28 = vadd.s32 3, %v1636_v44  ;;  %v17603_v44 = vld [vmem:[%s24860_s29 + $0x50] sm:$0xff] }
 0x169   : > { %v1630_v19 = vmul.f32 %v1629_v18, %v1627_v42 }
 0x16a   : > { %v1507_v34 = vsub.s32 %v1503_v2, %v1506_v25  ;;  %v1530_v48 = vsel %vm1445_vm0, %v1529_v32, %v1505_v62  ;;  %v1641_v52 = vand.u32 3, %v1640_v28  ;;  %v17617_v32 = vld [vmem:[%s24853_s7 + $0x70] sm:$0xff]  ;;  %v17618_v28 = vld [vmem:[%s24853_s7 + $0x78] sm:$0xff] }
 0x16b   : > { %v1631_v6 = vxor.u32 2147483648, %v1630_v19  ;;  %v1532_v56 = vsel %vm1444_vm1, 0, %v1530_v48  ;;  %v17643_v48 = vld [vmem:[%s24860_s29 + $0x60] sm:$0xff] }
 0x16c   : > { %v1509_v61 = vsub.s32 0, %v1507_v34  ;;  %vm1643_vm2 = vcmp.eq.s32.totalorder %v1641_v52, 0  ;;  %vm1646_vm3 = vcmp.eq.s32.totalorder %v1641_v52, 2  ;;  %v1536_v33 = vadd.s32 3, %v1532_v56  ;;  %v17632_v56 = vld [vmem:[%s24858_s6 + $0x78] sm:$0xff] }
 0x16d   : > { %v1632_v4 = vsel %vm1549_vm13, %v1631_v6, %v1630_v19  ;;  %vm1642_vm4 = vcmp.lt.s32.totalorder %v1641_v52, 2  ;;  %vm9137_vm13 = vcmask 523264  }
 0x16e   : > { %v17496_v17 = vmin.u32 %v1509_v61, %v1507_v34  ;;  %v1635_v5 = vsel %vm21864_vm15, %v21514_v36, %v1632_v4  ;;  %v1537_v49 = vand.u32 3, %v1536_v33  ;;  %v17645_v33 = vld [vmem:[%s24860_s29 + $0x70] sm:$0xff]  ;;  %vm17235_vm15 = vcmask 1043459  }
 0x16f   : > { %20586 = vcosq.f32 %v1635_v5 }
 0x170   : > { %v1511_v29 = vclz %v17496_v17  ;;  %20588 = vsinq.f32 %v1635_v5  ;;  %vm1542_vm6 = vcmp.eq.s32.totalorder %v1537_v49, 2  ;;  %vm1539_vm7 = vcmp.eq.s32.totalorder %v1537_v49, 0  ;;  %v17587_v5 = vld [vmem:[%s24858_s6 + $0x40] sm:$0xff] }
 0x171   : > { %vm1538_vm9 = vcmp.lt.s32.totalorder %v1537_v49, 2  ;;  %v24807_v49 = vmov 0.0  }
 0x172   : > { %v17497_v40 = vadd.s32 4294967294, %v1511_v29  ;;  %v17547_v29 = vld [vmem:[%s24858_s6 + $0x30] sm:$0xff] }
 0x174   : > { %vm17498_vm14 = vcmp.lt.s32.totalorder %v17497_v40, 0 }
 0x175   : > { %v1514_v45 = vsel %vm17498_vm14, 0, %v17497_v40  ;;  %vm17233_vm14 = vcmask 1042434  }
 0x176   : > { %v1515_v14 = vsub.s32 32, %v1514_v45  ;;  %v1519_v9 = vsub.s32 4294967266, %v1514_v45  ;;  %v1516_v41 = vshll.u32 %v1507_v34, %v1514_v45  ;;  %v17574_v45 = vld [vmem:[%s24853_s7 + $0x48] sm:$0xff] }
 0x178   : > { %v1517_v24 = vshrl.u32 %v1499_v8, %v1515_v14  ;;  %v1520_v54 = vadd.s32 127, %v1519_v9  ;;  %v17588_v8 = vld [vmem:[%s24858_s6 + $0x48] sm:$0xff]  ;;  %v20242_v14 = vpack.c.bf16 %v17574_v45, %v17573_v57 }
 0x179   : > { %v20587_v35 = vpop.eup %20586  ;;  %v20250_v9 = vpack.c.bf16 %v17588_v8, %v17587_v5 }
 0x17a   : > { %v1518_v1 = vor.u32 %v1517_v24, %v1516_v41  ;;  %v1521_v22 = vshll.u32 %v1520_v54, 23  ;;  %v20589_v21 = vpop.eup %20588  ;;  %v1647_v47 = vxor.u32 2147483648, %v20587_v35  ;;  %v17590_v41 = vld [vmem:[%s24858_s6 + $0x58] sm:$0xff] }
 0x17b   : > { %v1644_v16 = vxor.u32 2147483648, %v20589_v21  ;;  %v20254_v54 = vpack.c.bf16 %v17590_v41, %v17589_v23 }
 0x17c   : > { %v1522_v27 = vor.u32 4788187, %v1521_v22  ;;  %v1525_v37 = vcvt.s32.f32 %v1518_v1  ;;  %v1648_v39 = vsel %vm1646_vm3, %v1647_v47, %v20589_v21  ;;  %v17601_v1 = vld [vmem:[%s24860_s29 + $0x40] sm:$0xff]  ;;  %v17602_v22 = vld [vmem:[%s24860_s29 + $0x48] sm:$0xff]  ;;  %v17631_v47 = vld [vmem:[%s24858_s6 + $0x70] sm:$0xff]  ;;  %vm17243_vm3 = vcmask 1047559  }
 0x17d   : > { %v1645_v55 = vsel %vm1643_vm2, %v20587_v35, %v1644_v16  ;;  %v20270_v35 = vpack.c.bf16 %v17618_v28, %v17617_v32  ;;  %v17629_v21 = vld [vmem:[%s24858_s6 + $0x60] sm:$0xff]  ;;  %vm17241_vm2 = vcmask 1046534  }
 0x17e   : > { %v1523_v50 = vand.u32 2147483647, %v1522_v27  ;;  %v1649_v59 = vsel %vm1642_vm4, %v1645_v55, %v1648_v39  ;;  %v17616_v27 = vld [vmem:[%s24853_s7 + $0x68] sm:$0xff]  ;;  %v17646_v55 = vld [vmem:[%s24860_s29 + $0x78] sm:$0xff]  ;;  %v20278_v39 = vpack.c.bf16 %v17632_v56, %v17631_v47  ;;  %vm17406_vm4 = vcmask 7168  }
 0x17f   : > { %v1650_v10 = vsel %vm1639_vm5, nan, %v1649_v59  ;;  %v20286_v59 = vpack.c.bf16 %v17646_v55, %v17645_v33 }
 0x180   : > { %v1526_v38 = vmul.f32 %v1525_v37, %v1523_v50  ;;  %v1658_v62 = vsub.f32 %v1650_v10, %v21514_v36  ;;  %v20258_v50 = vpack.c.bf16 %v17602_v22, %v17601_v1  ;;  %v20266_v37 = vpack.c.bf16 %v17616_v27, %v17615_v63 }
 0x182   : > { %v1527_v0 = vxor.u32 2147483648, %v1526_v38  ;;  %v1672_v19 = vmul.f32 %v21433_v12, %v1658_v62 }
 0x184   : > { %v1528_v30 = vsel %vm1445_vm0, %v1527_v0, %v1526_v38  ;;  %v21892_v6 = vadd.f32 %v1672_v19, %v21514_v36  ;;  %v17561_v36 = vld [vmem:[%s24860_s29 + $0x30] sm:$0xff]  ;;  %v17604_v38 = vld [vmem:[%s24860_s29 + $0x58] sm:$0xff]  ;;  %vm17237_vm0 = vcmask 1044484  }
 0x185   : > { %v1531_v43 = vsel %vm1444_vm1, %v21605_v60, %v1528_v30  ;;  %v20262_v0 = vpack.c.bf16 %v17604_v38, %v17603_v44  ;;  %v17630_v30 = vld [vmem:[%s24858_s6 + $0x68] sm:$0xff]  ;;  %v22205_v38 = vld [vmem:[%s24784_s9] ss:$0 sm:$0xff]  ;;  %vm17239_vm1 = vcmask 1045509  }
 0x186   : > { %20590 = vcosq.f32 %v1531_v43  ;;  %24866 = vst [vmem:[#allocation11_spill] sm:$0xff] %v21892_v6  ;;  %v20274_v52 = vpack.c.bf16 %v17630_v30, %v17629_v21 }
 0x187   : > { %20592 = vsinq.f32 %v1531_v43  ;;  %v17644_v43 = vld [vmem:[%s24860_s29 + $0x68] sm:$0xff] }
 0x188   : > { %v20282_v16 = vpack.c.bf16 %v17644_v43, %v17643_v48 }
 0x190   : > { %v20591_v2 = vpop.eup %20590 }
 0x191   : > { %v20593_v13 = vpop.eup %20592  ;;  %v1543_v20 = vxor.u32 2147483648, %v20591_v2 }
 0x192   : > { %v1540_v31 = vxor.u32 2147483648, %v20593_v13 }
 0x193   : > { %v1544_v53 = vsel %vm1542_vm6, %v1543_v20, %v20593_v13  ;;  %v17513_v13 = vld [vmem:[%s24867_s2] ss:$0 sm:$0xff] }
 0x194   : > { %v1541_v42 = vsel %vm1539_vm7, %v20591_v2, %v1540_v31  ;;  %v17504_v31 = vld [vmem:[%s24868_s3] ss:$0 sm:$0xff] }
 0x195   : > { %v1545_v25 = vsel %vm1538_vm9, %v1541_v42, %v1544_v53 }
 0x196   : > { %v1546_v18 = vsel %vm1535_vm11, nan, %v1545_v25 }
 0x197   : > { %v1657_v34 = vsub.f32 %v1546_v18, %v21605_v60 }
 0x199   : > { %v1671_v61 = vmul.f32 %v21433_v12, %v1657_v34  ;;  %v17548_v12 = vld [vmem:[%s24858_s6 + $0x38] sm:$0xff] }
 0x19a   : > { %v20230_v40 = vpack.c.bf16 %v17548_v12, %v17547_v29 }
 0x19b   : > { %v21889_v17 = vadd.f32 %v1671_v61, %v21605_v60  ;;  %v17562_v60 = vld [vmem:[%s24860_s29 + $0x38] sm:$0xff] }
 0x19c   : > { %v20238_v4 = vpack.c.bf16 %v17562_v60, %v17561_v36 }
 0x19d   : > { %24865 = vst [vmem:[#allocation10_spill] sm:$0xff] %v21889_v17  ;;  %18859 = vmatprep.mubr.msk.f32.mxu0 %vm1692_vm12, %v21889_v17  ;;  %18879 = vmatprep.mubr.msk.f32.mxu1 %vm1692_vm12, %v21889_v17 }
 0x19e   : > { %18860 = vmatmul.mubr.msk.f32.gmra.mrb[6].mxu0 %vm1692_vm12, %v21892_v6  ;;  %18880 = vmatmul.mubr.msk.f32.gmra.mrb[6].mxu1 %vm1692_vm12, %v21892_v6 }
 0x19f   : > { %18890 = vmatprep.mubr.msk.f32.mxu0 %vm1692_vm12, %v21589_v11  ;;  %18910 = vmatprep.mubr.msk.f32.mxu1 %vm1692_vm12, %v21589_v11 }
 0x1a2   : > { %18891 = vmatmul.mubr.msk.f32.vlgmr.msra.gmra.mrb[8].mxu0 %vm1692_vm12, %v21688_v26  ;;  %18911 = vmatmul.mubr.msk.f32.vlgmr.msra.gmra.mrb[8].mxu1 %vm1692_vm12, %v21688_v26 }
 0x1a3   : > { %18893 = vmatprep.mubr.msk.f32.mxu0 %vm1692_vm12, %v21533_v58  ;;  %18913 = vmatprep.mubr.msk.f32.mxu1 %vm1692_vm12, %v21533_v58 }
 0x1a4   : > { %20229 = vmatpush3.bf16.msra.mxu0 %v21756_v15  ;;  %20237 = vmatpush3.bf16.msra.mxu1 %v21783_v3  ;;  %v17575_v15 = vld [vmem:[%s24853_s7 + $0x50] sm:$0xff]  ;;  %v17576_v3 = vld [vmem:[%s24853_s7 + $0x58] sm:$0xff] }
 0x1a5   : > { %20231 = vmatprep.subr.bf16.mxu0 %v20230_v40  ;;  %20239 = vmatprep.subr.bf16.mxu1 %v20238_v4  ;;  %v20246_v24 = vpack.c.bf16 %v17576_v3, %v17575_v15 }
 0x1a6   : > { %18894 = vmatmul.mubr.msk.f32.gmra.mrb[10].mxu0 %vm1692_vm12, %v21592_v46  ;;  %18914 = vmatmul.mubr.msk.f32.gmra.mrb[10].mxu1 %vm1692_vm12, %v21592_v46 }
 0x1a7   : > { %18896 = vmatprep.mubr.msk.f32.mxu0 %vm1692_vm12, %v21845_v51  ;;  %18916 = vmatprep.mubr.msk.f32.mxu1 %vm1692_vm12, %v21845_v51 }
 0x1a8   : > { %20233 = vmatpush3.bf16.msra.mxu0 %v20230_v40  ;;  %20241 = vmatpush3.bf16.msra.mxu1 %v20238_v4 }
 0x1a9   : > { %20243 = vmatprep.subr.bf16.mxu0 %v20242_v14  ;;  %20251 = vmatprep.subr.bf16.mxu1 %v20250_v9 }
 0x1aa   : > { %18897 = vmatmul.mubr.msk.f32.gmra.mrb[12].mxu0 %vm1692_vm12, %v21849_v7  ;;  %18917 = vmatmul.mubr.msk.f32.gmra.mrb[12].mxu1 %vm1692_vm12, %v21849_v7 }
 0x1ab   : > { %18899 = vmatprep.mubr.msk.f32.mxu0 %vm1692_vm12, %v21889_v17  ;;  %18919 = vmatprep.mubr.msk.f32.mxu1 %vm1692_vm12, %v21889_v17 }
 0x1ae   : > { %18900 = vmatmul.mubr.msk.f32.gmra.mrb[14].mxu0 %vm1692_vm12, %v21892_v6  ;;  %18920 = vmatmul.mubr.msk.f32.gmra.mrb[14].mxu1 %vm1692_vm12, %v21892_v6 }
 0x1af   : > { %18930 = vmatprep.mubr.msk.f32.mxu0 %vm1692_vm12, %v21589_v11  ;;  %18950 = vmatprep.mubr.msk.f32.mxu1 %vm1692_vm12, %v21589_v11 }
 0x1b2   : > { %18931 = vmatmul.mubr.msk.f32.vlgmr.msra.gmra.mrb[16].mxu0 %vm1692_vm12, %v21688_v26  ;;  %18951 = vmatmul.mubr.msk.f32.vlgmr.msra.gmra.mrb[16].mxu1 %vm1692_vm12, %v21688_v26 }
 0x1b3   : > { %18933 = vmatprep.mubr.msk.f32.mxu0 %vm1692_vm12, %v21533_v58  ;;  %18953 = vmatprep.mubr.msk.f32.mxu1 %vm1692_vm12, %v21533_v58 }
 0x1b4   : > { %20245 = vmatpush3.bf16.msra.mxu0 %v20242_v14  ;;  %20253 = vmatpush3.bf16.msra.mxu1 %v20250_v9 }
 0x1b5   : > { %20247 = vmatprep.subr.bf16.mxu0 %v20246_v24  ;;  %20255 = vmatprep.subr.bf16.mxu1 %v20254_v54 }
 0x1b6   : > { %18934 = vmatmul.mubr.msk.f32.gmra.mrb[18].mxu0 %vm1692_vm12, %v21592_v46  ;;  %18954 = vmatmul.mubr.msk.f32.gmra.mrb[18].mxu1 %vm1692_vm12, %v21592_v46 }
 0x1b7   : > { %18936 = vmatprep.mubr.msk.f32.mxu0 %vm1692_vm12, %v21845_v51  ;;  %18956 = vmatprep.mubr.msk.f32.mxu1 %vm1692_vm12, %v21845_v51 }
 0x1b8   : > { %20249 = vmatpush3.bf16.msra.mxu0 %v20246_v24  ;;  %20257 = vmatpush3.bf16.msra.mxu1 %v20254_v54 }
 0x1b9   : > { %20259 = vmatprep.subr.bf16.mxu0 %v20258_v50  ;;  %20267 = vmatprep.subr.bf16.mxu1 %v20266_v37 }
 0x1ba   : > { %18937 = vmatmul.mubr.msk.f32.gmra.mrb[20].mxu0 %vm1692_vm12, %v21849_v7  ;;  %18957 = vmatmul.mubr.msk.f32.gmra.mrb[20].mxu1 %vm1692_vm12, %v21849_v7 }
 0x1bb   : > { %18939 = vmatprep.mubr.msk.f32.mxu0 %vm1692_vm12, %v21889_v17  ;;  %18959 = vmatprep.mubr.msk.f32.mxu1 %vm1692_vm12, %v21889_v17 }
 0x1be   : > { %18940 = vmatmul.mubr.msk.f32.gmra.mrb[22].mxu0 %vm1692_vm12, %v21892_v6  ;;  %18960 = vmatmul.mubr.msk.f32.gmra.mrb[22].mxu1 %vm1692_vm12, %v21892_v6 }
 0x1bf   : > { %18970 = vmatprep.mubr.msk.f32.mxu0 %vm1692_vm12, %v21589_v11  ;;  %18990 = vmatprep.mubr.msk.f32.mxu1 %vm1692_vm12, %v21589_v11 }
 0x1c2   : > { %18971 = vmatmul.mubr.msk.f32.vlgmr.msra.gmra.mrb[24].mxu0 %vm1692_vm12, %v21688_v26  ;;  %18991 = vmatmul.mubr.msk.f32.vlgmr.msra.gmra.mrb[24].mxu1 %vm1692_vm12, %v21688_v26 }
 0x1c3   : > { %18973 = vmatprep.mubr.msk.f32.mxu0 %vm1692_vm12, %v21533_v58  ;;  %18993 = vmatprep.mubr.msk.f32.mxu1 %vm1692_vm12, %v21533_v58 }
 0x1c4   : > { %20261 = vmatpush3.bf16.msra.mxu0 %v20258_v50  ;;  %20269 = vmatpush3.bf16.msra.mxu1 %v20266_v37 }
 0x1c5   : > { %20263 = vmatprep.subr.bf16.mxu0 %v20262_v0  ;;  %20271 = vmatprep.subr.bf16.mxu1 %v20270_v35 }
 0x1c6   : > { %18974 = vmatmul.mubr.msk.f32.gmra.mrb[26].mxu0 %vm1692_vm12, %v21592_v46  ;;  %18994 = vmatmul.mubr.msk.f32.gmra.mrb[26].mxu1 %vm1692_vm12, %v21592_v46 }
 0x1c7   : > { %18976 = vmatprep.mubr.msk.f32.mxu0 %vm1692_vm12, %v21845_v51  ;;  %18996 = vmatprep.mubr.msk.f32.mxu1 %vm1692_vm12, %v21845_v51 }
 0x1c8   : > { %20265 = vmatpush3.bf16.msra.mxu0 %v20262_v0  ;;  %20273 = vmatpush3.bf16.msra.mxu1 %v20270_v35 }
 0x1c9   : > { %20275 = vmatprep.subr.bf16.mxu0 %v20274_v52  ;;  %20283 = vmatprep.subr.bf16.mxu1 %v20282_v16 }
 0x1ca   : > { %18977 = vmatmul.mubr.msk.f32.gmra.mrb[28].mxu0 %vm1692_vm12, %v21849_v7  ;;  %18997 = vmatmul.mubr.msk.f32.gmra.mrb[28].mxu1 %vm1692_vm12, %v21849_v7 }
 0x1cb   : > { %18979 = vmatprep.mubr.msk.f32.mxu0 %vm1692_vm12, %v21889_v17  ;;  %18999 = vmatprep.mubr.msk.f32.mxu1 %vm1692_vm12, %v21889_v17 }
 0x1ce   : > { %18980 = vmatmul.mubr.msk.f32.gmra.mrb[30].mxu0 %vm1692_vm12, %v21892_v6  ;;  %19000 = vmatmul.mubr.msk.f32.gmra.mrb[30].mxu1 %vm1692_vm12, %v21892_v6 }
 0x1cf   : > { %19010 = vmatprep.mubr.msk.f32.mxu0 %vm1692_vm12, %v21589_v11  ;;  %19030 = vmatprep.mubr.msk.f32.mxu1 %vm1692_vm12, %v21589_v11 }
 0x1d2   : > { %19011 = vmatmul.mubr.msk.f32.vlgmr.msra.gmra.mrb[32].mxu0 %vm1692_vm12, %v21688_v26  ;;  %19031 = vmatmul.mubr.msk.f32.vlgmr.msra.gmra.mrb[32].mxu1 %vm1692_vm12, %v21688_v26 }
 0x1d3   : > { %19013 = vmatprep.mubr.msk.f32.mxu0 %vm1692_vm12, %v21533_v58  ;;  %19033 = vmatprep.mubr.msk.f32.mxu1 %vm1692_vm12, %v21533_v58 }
 0x1d4   : > { %20277 = vmatpush3.bf16.msra.mxu0 %v20274_v52  ;;  %20285 = vmatpush3.bf16.msra.mxu1 %v20282_v16 }
 0x1d5   : > { %20279 = vmatprep.subr.bf16.mxu0 %v20278_v39  ;;  %20287 = vmatprep.subr.bf16.mxu1 %v20286_v59 }
 0x1d6   : > { %19014 = vmatmul.mubr.msk.f32.gmra.mrb[34].mxu0 %vm1692_vm12, %v21592_v46  ;;  %19034 = vmatmul.mubr.msk.f32.gmra.mrb[34].mxu1 %vm1692_vm12, %v21592_v46 }
 0x1d7   : > { %19016 = vmatprep.mubr.msk.f32.mxu0 %vm1692_vm12, %v21845_v51  ;;  %19036 = vmatprep.mubr.msk.f32.mxu1 %vm1692_vm12, %v21845_v51 }
 0x1d8   : > { %20281 = vmatpush3.bf16.msra.mxu0 %v20278_v39  ;;  %20289 = vmatpush3.bf16.msra.mxu1 %v20286_v59 }
 0x1d9   : > { %19087 = vmatprep.subr.mxu1 %v24807_v49  ;;  %19082 = vmatprep.subr.mxu0 %v24807_v49 }
 0x1da   : > { %19017 = vmatmul.mubr.msk.f32.gmra.mrb[36].mxu0 %vm1692_vm12, %v21849_v7  ;;  %19037 = vmatmul.mubr.msk.f32.gmra.mrb[36].mxu1 %vm1692_vm12, %v21849_v7 }
 0x1db   : > { %19019 = vmatprep.mubr.msk.f32.mxu0 %vm1692_vm12, %v21889_v17  ;;  %19039 = vmatprep.mubr.msk.f32.mxu1 %vm1692_vm12, %v21889_v17 }
 0x1de   : > { %19020 = vmatmul.mubr.msk.f32.gmra.mrb[38].mxu0 %vm1692_vm12, %v21892_v6  ;;  %19040 = vmatmul.mubr.msk.f32.gmra.mrb[38].mxu1 %vm1692_vm12, %v21892_v6 }
 0x1df   : > { %19050 = vmatprep.mubr.msk.f32.mxu0 %vm1692_vm12, %v21589_v11  ;;  %19070 = vmatprep.mubr.msk.f32.mxu1 %vm1692_vm12, %v21589_v11 }
 0x1e2   : > { %19051 = vmatmul.mubr.msk.f32.vlgmr.msra.gmra.mrb[40].mxu0 %vm1692_vm12, %v21688_v26  ;;  %19071 = vmatmul.mubr.msk.f32.vlgmr.msra.gmra.mrb[40].mxu1 %vm1692_vm12, %v21688_v26 }
 0x1e3   : > { %19053 = vmatprep.mubr.msk.f32.mxu0 %vm1692_vm12, %v21533_v58  ;;  %19073 = vmatprep.mubr.msk.f32.mxu1 %vm1692_vm12, %v21533_v58 }
 0x1e6   : > { %19054 = vmatmul.mubr.msk.f32.gmra.mrb[42].mxu0 %vm1692_vm12, %v21592_v46  ;;  %19074 = vmatmul.mubr.msk.f32.gmra.mrb[42].mxu1 %vm1692_vm12, %v21592_v46 }
 0x1e7   : > { %19056 = vmatprep.mubr.msk.f32.mxu0 %vm1692_vm12, %v21845_v51  ;;  %19076 = vmatprep.mubr.msk.f32.mxu1 %vm1692_vm12, %v21845_v51 }
 0x1ea   : > { %19057 = vmatmul.mubr.msk.f32.gmra.mrb[44].mxu0 %vm1692_vm12, %v21849_v7  ;;  %19077 = vmatmul.mubr.msk.f32.gmra.mrb[44].mxu1 %vm1692_vm12, %v21849_v7 }
 0x1eb   : > { %19059 = vmatprep.mubr.msk.f32.mxu0 %vm1692_vm12, %v21889_v17  ;;  %19079 = vmatprep.mubr.msk.f32.mxu1 %vm1692_vm12, %v21889_v17 }
 0x1ee   : > { %19060 = vmatmul.mubr.msk.f32.gmra.mrb[46].mxu0 %vm1692_vm12, %v21892_v6  ;;  %19080 = vmatmul.mubr.msk.f32.gmra.mrb[46].mxu1 %vm1692_vm12, %v21892_v6 }
 0x1ef   : > { %19089 = vmatprep.mubr.msk.f32.mxu1 %vm20932_vm8, %v24807_v49  ;;  %19084 = vmatprep.mubr.msk.f32.mxu0 %vm20932_vm8, %v24807_v49 }
 0x21e   : > { %v18852_v2 = vpop.f32.mrb[0].mxu0 }
 0x21f   : > { %v1783_v10 = vpop.f32.mrb[1].mxu0  ;;  %v1789_v34 = vadd.f32 %v18852_v2, %v17504_v31 }
 0x220   : > { %v1784_v61 = vadd.f32 %v17504_v31, %v1783_v10  ;;  %v17550_v10 = vld [vmem:[%s24867_s2 + $0x1] ss:$0 sm:$0xff] }
 0x222   : > { %v18872_v20 = vpop.f32.mrb[0].mxu1  ;;  %v18855_v25 = vpop.f32.mrb[2].mxu0 }
 0x223   : > { %v1905_v53 = vadd.f32 %v18872_v20, %v17513_v13  ;;  %v1899_v62 = vpop.f32.mrb[1].mxu1  ;;  %v1793_v18 = vpop.f32.mrb[3].mxu0  ;;  %v1799_v60 = vadd.f32 %v18855_v25, %v17504_v31 }
 0x224   : > { %v1900_v42 = vadd.f32 %v17513_v13, %v1899_v62  ;;  %v1794_v40 = vadd.f32 %v17504_v31, %v1793_v18 }
 0x225   : > { %19088 = vmatpush3.xpose.msk.msra.mxu1 %vm3116_vm10, %v1905_v53  ;;  %v17536_v53 = vld [vmem:[%s24868_s3 + $0x1] ss:$0 sm:$0xff] }
 0x226   : > { %v18875_v19 = vpop.f32.mrb[2].mxu1  ;;  %19083 = vmatpush3.xpose.msk.msra.mxu0 %vm3116_vm10, %v1900_v42  ;;  %19097 = vmatprep.subr.mxu1 %v24807_v49 }
 0x227   : > { %v1915_v29 = vadd.f32 %v18875_v19, %v17513_v13  ;;  %v1909_v12 = vpop.f32.mrb[3].mxu1  ;;  %19092 = vmatprep.subr.mxu0 %v24807_v49 }
 0x228   : > { %v1910_v36 = vadd.f32 %v17513_v13, %v1909_v12  ;;  %19090 = vmatmul.mubr.msk.f32.vlgmr.msra.gmra.mrb[48].mxu1 %vm3116_vm10, %v1789_v34 }
 0x229   : > { %19085 = vmatmul.mubr.msk.f32.vlgmr.msra.gmra.mrb[48].mxu0 %vm3116_vm10, %v1784_v61  ;;  %19098 = vmatpush3.xpose.msk.msra.mxu1 %vm3116_vm10, %v1915_v29 }
 0x22a   : > { %19093 = vmatpush3.xpose.msk.msra.mxu0 %vm3116_vm10, %v1910_v36  ;;  %19099 = vmatprep.mubr.msk.f32.mxu1 %vm20932_vm8, %v24807_v49 }
 0x22b   : > { %19094 = vmatprep.mubr.msk.f32.mxu0 %vm20932_vm8, %v24807_v49  ;;  %19107 = vmatprep.subr.mxu1 %v24807_v49 }
 0x22c   : > { %19100 = vmatmul.mubr.msk.f32.vlgmr.msra.gmra.mrb[50].mxu1 %vm3116_vm10, %v1799_v60  ;;  %19102 = vmatprep.subr.mxu0 %v24807_v49 }
 0x22d   : > { %19095 = vmatmul.mubr.msk.f32.vlgmr.msra.gmra.mrb[50].mxu0 %vm3116_vm10, %v1794_v40  ;;  %19109 = vmatprep.mubr.msk.f32.mxu1 %vm20932_vm8, %v24807_v49 }
 0x22e   : > { %19104 = vmatprep.mubr.msk.f32.mxu0 %vm20932_vm8, %v24807_v49 }
 0x239   : > { %v18858_v4 = vpop.f32.mrb[4].mxu0  ;;  %v18878_v57 = vpop.f32.mrb[4].mxu1 }
 0x23a   : > { %v1925_v45 = vadd.f32 %v18878_v57, %v17513_v13  ;;  %v1803_v5 = vpop.f32.mrb[5].mxu0  ;;  %v1919_v8 = vpop.f32.mrb[5].mxu1  ;;  %v1809_v9 = vadd.f32 %v18858_v4, %v17504_v31 }
 0x23b   : > { %v1920_v14 = vadd.f32 %v17513_v13, %v1919_v8  ;;  %v1804_v15 = vadd.f32 %v17504_v31, %v1803_v5 }
 0x23c   : > { %19108 = vmatpush3.xpose.msk.msra.mxu1 %vm3116_vm10, %v1925_v45 }
 0x23d   : > { %19103 = vmatpush3.xpose.msk.msra.mxu0 %vm3116_vm10, %v1920_v14  ;;  %19117 = vmatprep.subr.mxu1 %v24807_v49 }
 0x23e   : > { %19112 = vmatprep.subr.mxu0 %v24807_v49 }
 0x23f   : > { %19110 = vmatmul.mubr.msk.f32.vlgmr.msra.gmra.mrb[52].mxu1 %vm3116_vm10, %v1809_v9 }
 0x240   : > { %19105 = vmatmul.mubr.msk.f32.vlgmr.msra.gmra.mrb[52].mxu0 %vm3116_vm10, %v1804_v15  ;;  %19119 = vmatprep.mubr.msk.f32.mxu1 %vm20932_vm8, %v24807_v49 }
 0x241   : > { %19114 = vmatprep.mubr.msk.f32.mxu0 %vm20932_vm8, %v24807_v49 }
 0x271   : > { %v18861_v3 = vpop.f32.mrb[6].mxu0  ;;  %v18881_v23 = vpop.f32.mrb[6].mxu1 }
 0x272   : > { %v1935_v41 = vadd.f32 %v18881_v23, %v17513_v13  ;;  %v1813_v24 = vpop.f32.mrb[7].mxu0  ;;  %v1929_v54 = vpop.f32.mrb[7].mxu1  ;;  %v1819_v22 = vadd.f32 %v18861_v3, %v17504_v31 }
 0x273   : > { %v1930_v1 = vadd.f32 %v17513_v13, %v1929_v54  ;;  %v1814_v50 = vadd.f32 %v17504_v31, %v1813_v24 }
 0x274   : > { %19118 = vmatpush3.xpose.msk.msra.mxu1 %vm3116_vm10, %v1935_v41 }
 0x275   : > { %v22191_v63 = vpop.f32.mrb[8].mxu0  ;;  %v18912_v27 = vpop.f32.mrb[8].mxu1  ;;  %19113 = vmatpush3.xpose.msk.msra.mxu0 %vm3116_vm10, %v1930_v1  ;;  %19127 = vmatprep.subr.mxu1 %v24807_v49 }
 0x276   : > { %v22195_v37 = vpop.f32.mrb[9].mxu0  ;;  %v2133_v44 = vpop.f32.mrb[9].mxu1  ;;  %19122 = vmatprep.subr.mxu0 %v24807_v49  ;;  %v2139_v34 = vadd.f32 %v18912_v27, %v17536_v53 }
 0x277   : > { %19120 = vmatmul.mubr.msk.f32.vlgmr.msra.gmra.mrb[54].mxu1 %vm3116_vm10, %v1819_v22  ;;  %v2134_v29 = vadd.f32 %v17536_v53, %v2133_v44 }
 0x278   : > { %19115 = vmatmul.mubr.msk.f32.vlgmr.msra.gmra.mrb[54].mxu0 %vm3116_vm10, %v1814_v50  ;;  %19129 = vmatprep.mubr.msk.f32.mxu1 %vm20932_vm8, %v24807_v49  ;;  %v22279_v50 = vld [vmem:[%s24867_s2 + $0x2] ss:$0 sm:$0xff] }
 0x279   : > { %v18895_v32 = vpop.f32.mrb[10].mxu0  ;;  %v18915_v28 = vpop.f32.mrb[10].mxu1  ;;  %19124 = vmatprep.mubr.msk.f32.mxu0 %vm20932_vm8, %v24807_v49 }
 0x27a   : > { %v22210_v0 = vadd.f32 %v18895_v32, %v22205_v38  ;;  %v2025_v35 = vpop.f32.mrb[11].mxu0  ;;  %v2143_v21 = vpop.f32.mrb[11].mxu1  ;;  %v2149_v4 = vadd.f32 %v18915_v28, %v17536_v53 }
 0x27b   : > { %v22213_v30 = vadd.f32 %v22205_v38, %v2025_v35  ;;  %v2144_v5 = vadd.f32 %v17536_v53, %v2143_v21  ;;  %v22290_v21 = vld [vmem:[%s24868_s3 + $0x2] ss:$0 sm:$0xff] }
 0x27d   : > { %v18898_v48 = vpop.f32.mrb[12].mxu0  ;;  %v18918_v43 = vpop.f32.mrb[12].mxu1 }
 0x27e   : > { %v22216_v52 = vadd.f32 %v18898_v48, %v22205_v38  ;;  %v2035_v16 = vpop.f32.mrb[13].mxu0  ;;  %v2153_v47 = vpop.f32.mrb[13].mxu1  ;;  %v2159_v3 = vadd.f32 %v18918_v43, %v17536_v53 }
 0x27f   : > { %v22219_v56 = vadd.f32 %v22205_v38, %v2035_v16  ;;  %v2154_v24 = vadd.f32 %v17536_v53, %v2153_v47 }
 0x281   : > { %v18901_v33 = vpop.f32.mrb[14].mxu0  ;;  %v18921_v55 = vpop.f32.mrb[14].mxu1 }
 0x282   : > { %v22222_v39 = vadd.f32 %v18901_v33, %v22205_v38  ;;  %v2045_v59 = vpop.f32.mrb[15].mxu0  ;;  %v22224_v2 = vpop.f32.mrb[15].mxu1  ;;  %v2169_v44 = vadd.f32 %v18921_v55, %v17536_v53 }
 0x283   : > { %v22227_v13 = vadd.f32 %v22205_v38, %v2045_v59  ;;  %v2164_v35 = vadd.f32 %v17536_v53, %v22224_v2 }
 0x285   : > { %v18932_v20 = vpop.f32.mrb[16].mxu0  ;;  %v22232_v31 = vpop.f32.mrb[16].mxu1 }
 0x286   : > { %v2257_v62 = vadd.f32 %v18932_v20, %v17550_v10  ;;  %v2251_v42 = vpop.f32.mrb[17].mxu0  ;;  %v22237_v25 = vpop.f32.mrb[17].mxu1 }
 0x287   : > { %v2252_v18 = vadd.f32 %v17550_v10, %v2251_v42 }
 0x288   : > { %19128 = vmatpush3.xpose.msk.msra.mxu1 %vm3116_vm10, %v2257_v62 }
 0x289   : > { %v18935_v19 = vpop.f32.mrb[18].mxu0  ;;  %v22240_v61 = vpop.f32.mrb[18].mxu1  ;;  %19123 = vmatpush3.xpose.msk.msra.mxu0 %vm3116_vm10, %v2252_v18  ;;  %19137 = vmatprep.subr.mxu1 %v24807_v49 }
 0x28a   : > { %v2267_v12 = vadd.f32 %v18935_v19, %v17550_v10  ;;  %v2261_v36 = vpop.f32.mrb[19].mxu0  ;;  %v22244_v60 = vpop.f32.mrb[19].mxu1  ;;  %19132 = vmatprep.subr.mxu0 %v24807_v49 }
 0x28b   : > { %v2262_v40 = vadd.f32 %v17550_v10, %v2261_v36  ;;  %19130 = vmatmul.mubr.msk.f32.vlgmr.msra.gmra.mrb[56].mxu1 %vm3116_vm10, %v2139_v34 }
 0x28c   : > { %19125 = vmatmul.mubr.msk.f32.vlgmr.msra.gmra.mrb[56].mxu0 %vm3116_vm10, %v2134_v29  ;;  %19138 = vmatpush3.xpose.msk.msra.mxu1 %vm3116_vm10, %v2267_v12 }
 0x28d   : > { %v18938_v57 = vpop.f32.mrb[20].mxu0  ;;  %v22250_v45 = vpop.f32.mrb[20].mxu1  ;;  %19133 = vmatpush3.xpose.msk.msra.mxu0 %vm3116_vm10, %v2262_v40  ;;  %19139 = vmatprep.mubr.msk.f32.mxu1 %vm20932_vm8, %v24807_v49 }
 0x28e   : > { %v2277_v8 = vadd.f32 %v18938_v57, %v17550_v10  ;;  %v2271_v14 = vpop.f32.mrb[21].mxu0  ;;  %v22255_v9 = vpop.f32.mrb[21].mxu1  ;;  %19134 = vmatprep.mubr.msk.f32.mxu0 %vm20932_vm8, %v24807_v49  ;;  %19147 = vmatprep.subr.mxu1 %v24807_v49 }
 0x28f   : > { %v2272_v15 = vadd.f32 %v17550_v10, %v2271_v14  ;;  %19140 = vmatmul.mubr.msk.f32.vlgmr.msra.gmra.mrb[58].mxu1 %vm3116_vm10, %v2149_v4  ;;  %19142 = vmatprep.subr.mxu0 %v24807_v49 }
 0x290   : > { %19135 = vmatmul.mubr.msk.f32.vlgmr.msra.gmra.mrb[58].mxu0 %vm3116_vm10, %v2144_v5  ;;  %19148 = vmatpush3.xpose.msk.msra.mxu1 %vm3116_vm10, %v2277_v8 }
 0x291   : > { %v18941_v23 = vpop.f32.mrb[22].mxu0  ;;  %v22264_v41 = vpop.f32.mrb[22].mxu1  ;;  %19143 = vmatpush3.xpose.msk.msra.mxu0 %vm3116_vm10, %v2272_v15  ;;  %19149 = vmatprep.mubr.msk.f32.mxu1 %vm20932_vm8, %v24807_v49 }
 0x292   : > { %v2287_v54 = vadd.f32 %v18941_v23, %v17550_v10  ;;  %v2281_v1 = vpop.f32.mrb[23].mxu0  ;;  %v22269_v22 = vpop.f32.mrb[23].mxu1  ;;  %19144 = vmatprep.mubr.msk.f32.mxu0 %vm20932_vm8, %v24807_v49  ;;  %19157 = vmatprep.subr.mxu1 %v24807_v49 }
 0x293   : > { %v2282_v27 = vadd.f32 %v17550_v10, %v2281_v1  ;;  %19150 = vmatmul.mubr.msk.f32.vlgmr.msra.gmra.mrb[60].mxu1 %vm3116_vm10, %v2159_v3  ;;  %19152 = vmatprep.subr.mxu0 %v24807_v49 }
 0x294   : > { %19145 = vmatmul.mubr.msk.f32.vlgmr.msra.gmra.mrb[60].mxu0 %vm3116_vm10, %v2154_v24  ;;  %19158 = vmatpush3.xpose.msk.msra.mxu1 %vm3116_vm10, %v2287_v54 }
 0x295   : > { %v18972_v32 = vpop.f32.mrb[24].mxu0  ;;  %v18992_v28 = vpop.f32.mrb[24].mxu1  ;;  %19153 = vmatpush3.xpose.msk.msra.mxu0 %vm3116_vm10, %v2282_v27  ;;  %19159 = vmatprep.mubr.msk.f32.mxu1 %vm20932_vm8, %v24807_v49 }
 0x296   : > { %v2611_v48 = vadd.f32 %v18992_v28, %v22279_v50  ;;  %v2487_v43 = vpop.f32.mrb[25].mxu0  ;;  %v2605_v16 = vpop.f32.mrb[25].mxu1  ;;  %19154 = vmatprep.mubr.msk.f32.mxu0 %vm20932_vm8, %v24807_v49  ;;  %19167 = vmatprep.subr.mxu1 %v24807_v49  ;;  %v2493_v33 = vadd.f32 %v18972_v32, %v22290_v21 }
 0x297   : > { %v2606_v47 = vadd.f32 %v22279_v50, %v2605_v16  ;;  %19160 = vmatmul.mubr.msk.f32.vlgmr.msra.gmra.mrb[62].mxu1 %vm3116_vm10, %v2169_v44  ;;  %19162 = vmatprep.subr.mxu0 %v24807_v49  ;;  %v2488_v2 = vadd.f32 %v22290_v21, %v2487_v43 }
 0x298   : > { %19155 = vmatmul.mubr.msk.f32.vlgmr.msra.gmra.mrb[62].mxu0 %vm3116_vm10, %v2164_v35  ;;  %19168 = vmatpush3.xpose.msk.msra.mxu1 %vm3116_vm10, %v2611_v48 }
 0x299   : > { %v18975_v55 = vpop.f32.mrb[26].mxu0  ;;  %v18995_v59 = vpop.f32.mrb[26].mxu1  ;;  %19163 = vmatpush3.xpose.msk.msra.mxu0 %vm3116_vm10, %v2606_v47  ;;  %19169 = vmatprep.mubr.msk.f32.mxu1 %vm20932_vm8, %v24807_v49 }
 0x29a   : > { %v2621_v10 = vadd.f32 %v18995_v59, %v22279_v50  ;;  %v2497_v20 = vpop.f32.mrb[27].mxu0  ;;  %v2615_v53 = vpop.f32.mrb[27].mxu1  ;;  %19164 = vmatprep.mubr.msk.f32.mxu0 %vm20932_vm8, %v24807_v49  ;;  %19177 = vmatprep.subr.mxu1 %v24807_v49  ;;  %v2503_v42 = vadd.f32 %v18975_v55, %v22290_v21 }
 0x29b   : > { %v2616_v62 = vadd.f32 %v22279_v50, %v2615_v53  ;;  %19170 = vmatmul.mubr.msk.f32.vlgmr.msra.gmra.mrb[64].mxu1 %vm3116_vm10, %v2493_v33  ;;  %19172 = vmatprep.subr.mxu0 %v24807_v49  ;;  %v2498_v19 = vadd.f32 %v22290_v21, %v2497_v20 }
 0x29c   : > { %19165 = vmatmul.mubr.msk.f32.vlgmr.msra.gmra.mrb[64].mxu0 %vm3116_vm10, %v2488_v2  ;;  %19178 = vmatpush3.xpose.msk.msra.mxu1 %vm3116_vm10, %v2621_v10  ;;  %v17634_v10 = vld [vmem:[%s24867_s2 + $0x3] ss:$0 sm:$0xff] }
 0x29d   : > { %v18978_v18 = vpop.f32.mrb[28].mxu0  ;;  %v18998_v34 = vpop.f32.mrb[28].mxu1  ;;  %19173 = vmatpush3.xpose.msk.msra.mxu0 %vm3116_vm10, %v2616_v62  ;;  %19179 = vmatprep.mubr.msk.f32.mxu1 %vm20932_vm8, %v24807_v49  ;;  %v17620_v62 = vld [vmem:[%s24868_s3 + $0x3] ss:$0 sm:$0xff] }
 0x29e   : > { %v2631_v29 = vadd.f32 %v18998_v34, %v22279_v50  ;;  %v2507_v12 = vpop.f32.mrb[29].mxu0  ;;  %v2625_v36 = vpop.f32.mrb[29].mxu1  ;;  %19174 = vmatprep.mubr.msk.f32.mxu0 %vm20932_vm8, %v24807_v49  ;;  %19187 = vmatprep.subr.mxu1 %v24807_v49  ;;  %v2513_v4 = vadd.f32 %v18978_v18, %v22290_v21 }
 0x29f   : > { %v2626_v40 = vadd.f32 %v22279_v50, %v2625_v36  ;;  %19180 = vmatmul.mubr.msk.f32.vlgmr.msra.gmra.mrb[66].mxu1 %vm3116_vm10, %v2503_v42  ;;  %19182 = vmatprep.subr.mxu0 %v24807_v49  ;;  %v2508_v8 = vadd.f32 %v22290_v21, %v2507_v12 }
 0x2a0   : > { %19175 = vmatmul.mubr.msk.f32.vlgmr.msra.gmra.mrb[66].mxu0 %vm3116_vm10, %v2498_v19  ;;  %19188 = vmatpush3.xpose.msk.msra.mxu1 %vm3116_vm10, %v2631_v29 }
 0x2a1   : > { %v18981_v57 = vpop.f32.mrb[30].mxu0  ;;  %v19001_v5 = vpop.f32.mrb[30].mxu1  ;;  %19183 = vmatpush3.xpose.msk.msra.mxu0 %vm3116_vm10, %v2626_v40  ;;  %19189 = vmatprep.mubr.msk.f32.mxu1 %vm20932_vm8, %v24807_v49 }
 0x2a2   : > { %v2641_v14 = vadd.f32 %v19001_v5, %v22279_v50  ;;  %v2517_v15 = vpop.f32.mrb[31].mxu0  ;;  %v2635_v3 = vpop.f32.mrb[31].mxu1  ;;  %19184 = vmatprep.mubr.msk.f32.mxu0 %vm20932_vm8, %v24807_v49  ;;  %19197 = vmatprep.subr.mxu1 %v24807_v49  ;;  %v2523_v24 = vadd.f32 %v18981_v57, %v22290_v21 }
 0x2a3   : > { %v2636_v23 = vadd.f32 %v22279_v50, %v2635_v3  ;;  %19190 = vmatmul.mubr.msk.f32.vlgmr.msra.gmra.mrb[68].mxu1 %vm3116_vm10, %v2513_v4  ;;  %19192 = vmatprep.subr.mxu0 %v24807_v49  ;;  %v2518_v27 = vadd.f32 %v22290_v21, %v2517_v15 }
 0x2a4   : > { %19185 = vmatmul.mubr.msk.f32.vlgmr.msra.gmra.mrb[68].mxu0 %vm3116_vm10, %v2508_v8  ;;  %19198 = vmatpush3.xpose.msk.msra.mxu1 %vm3116_vm10, %v2641_v14 }
 0x2a5   : > { %v22344_v54 = vpop.f32.mrb[32].mxu0  ;;  %v19032_v1 = vpop.f32.mrb[32].mxu1  ;;  %19193 = vmatpush3.xpose.msk.msra.mxu0 %vm3116_vm10, %v2636_v23  ;;  %19199 = vmatprep.mubr.msk.f32.mxu1 %vm20932_vm8, %v24807_v49 }
 0x2a6   : > { %v22350_v50 = vpop.f32.mrb[33].mxu0  ;;  %v2841_v44 = vpop.f32.mrb[33].mxu1  ;;  %19194 = vmatprep.mubr.msk.f32.mxu0 %vm20932_vm8, %v24807_v49  ;;  %19207 = vmatprep.subr.mxu1 %v24807_v49  ;;  %v2847_v29 = vadd.f32 %v19032_v1, %v17620_v62 }
 0x2a7   : > { %19200 = vmatmul.mubr.msk.f32.vlgmr.msra.gmra.mrb[70].mxu1 %vm3116_vm10, %v2523_v24  ;;  %19202 = vmatprep.subr.mxu0 %v24807_v49  ;;  %v2842_v40 = vadd.f32 %v17620_v62, %v2841_v44 }
 0x2a8   : > { %19195 = vmatmul.mubr.msk.f32.vlgmr.msra.gmra.mrb[70].mxu0 %vm3116_vm10, %v2518_v27  ;;  %19209 = vmatprep.mubr.msk.f32.mxu1 %vm20932_vm8, %v24807_v49 }
 0x2a9   : > { %v22360_v32 = vpop.f32.mrb[34].mxu0  ;;  %v19035_v28 = vpop.f32.mrb[34].mxu1  ;;  %19204 = vmatprep.mubr.msk.f32.mxu0 %vm20932_vm8, %v24807_v49 }
 0x2aa   : > { %v22364_v35 = vpop.f32.mrb[35].mxu0  ;;  %v2851_v21 = vpop.f32.mrb[35].mxu1  ;;  %v2857_v14 = vadd.f32 %v19035_v28, %v17620_v62 }
 0x2ab   : > { %v2852_v23 = vadd.f32 %v17620_v62, %v2851_v21 }
 0x2ad   : > { %v22366_v48 = vpop.f32.mrb[36].mxu0  ;;  %v19038_v43 = vpop.f32.mrb[36].mxu1 }
 0x2ae   : > { %24869 = vst [vmem:[#allocation12_spill] sm:$0xff] %v22366_v48  ;;  %v22368_v16 = vpop.f32.mrb[37].mxu0  ;;  %v2861_v47 = vpop.f32.mrb[37].mxu1  ;;  %v2867_v28 = vadd.f32 %v19038_v43, %v17620_v62 }
 0x2af   : > { %24870 = vst [vmem:[#allocation13_spill] sm:$0xff] %v22368_v16 }
 0x2b1   : > { %v22370_v33 = vpop.f32.mrb[38].mxu0  ;;  %v19041_v55 = vpop.f32.mrb[38].mxu1 }
 0x2b2   : > { %24871 = vst [vmem:[#allocation14_spill] sm:$0xff] %v22370_v33  ;;  %v22372_v59 = vpop.f32.mrb[39].mxu0  ;;  %v2871_v2 = vpop.f32.mrb[39].mxu1  ;;  %v2877_v43 = vadd.f32 %v19041_v55, %v17620_v62 }
 0x2b3   : > { %24872 = vst [vmem:[#allocation15_spill] sm:$0xff] %v22372_v59 }
 0x2b5   : > { %v19052_v20 = vpop.f32.mrb[40].mxu0  ;;  %v22377_v53 = vpop.f32.mrb[40].mxu1 }
 0x2b6   : > { %24873 = vst [vmem:[#allocation16_spill] sm:$0xff] %v22377_v53  ;;  %v2965_v42 = vadd.f32 %v19052_v20, %v17634_v10  ;;  %v2959_v18 = vpop.f32.mrb[41].mxu0  ;;  %v22382_v34 = vpop.f32.mrb[41].mxu1 }
 0x2b7   : > { %24874 = vst [vmem:[#allocation17_spill] sm:$0xff] %v22382_v34  ;;  %v2960_v19 = vadd.f32 %v17634_v10, %v2959_v18 }
 0x2b8   : > { %19208 = vmatpush3.xpose.msk.msra.mxu1 %vm3116_vm10, %v2965_v42  ;;  %v2862_v42 = vadd.f32 %v17620_v62, %v2861_v47  ;;  %v2021_v47 = vadd.f32 %v22191_v63, %v22205_v38 }
 0x2b9   : > { %v19055_v12 = vpop.f32.mrb[42].mxu0  ;;  %v22385_v36 = vpop.f32.mrb[42].mxu1  ;;  %19203 = vmatpush3.xpose.msk.msra.mxu0 %vm3116_vm10, %v2960_v19  ;;  %19217 = vmatprep.subr.mxu1 %v24807_v49 }
 0x2ba   : > { %24875 = vst [vmem:[#allocation18_spill] sm:$0xff] %v22385_v36  ;;  %v2975_v4 = vadd.f32 %v19055_v12, %v17634_v10  ;;  %v2969_v57 = vpop.f32.mrb[43].mxu0  ;;  %v22389_v5 = vpop.f32.mrb[43].mxu1  ;;  %19212 = vmatprep.subr.mxu0 %v24807_v49 }
 0x2bb   : > { %24876 = vst [vmem:[#allocation19_spill] sm:$0xff] %v22389_v5  ;;  %v2970_v8 = vadd.f32 %v17634_v10, %v2969_v57  ;;  %19210 = vmatmul.mubr.msk.f32.vlgmr.msra.gmra.mrb[72].mxu1 %vm3116_vm10, %v2847_v29 }
 0x2bc   : > { %19205 = vmatmul.mubr.msk.f32.vlgmr.msra.gmra.mrb[72].mxu0 %vm3116_vm10, %v2842_v40  ;;  %19218 = vmatpush3.xpose.msk.msra.mxu1 %vm3116_vm10, %v2975_v4  ;;  %v2872_v40 = vadd.f32 %v17620_v62, %v2871_v2 }
 0x2bd   : > { %v19058_v15 = vpop.f32.mrb[44].mxu0  ;;  %v22395_v3 = vpop.f32.mrb[44].mxu1  ;;  %19213 = vmatpush3.xpose.msk.msra.mxu0 %vm3116_vm10, %v2970_v8  ;;  %19219 = vmatprep.mubr.msk.f32.mxu1 %vm20932_vm8, %v24807_v49 }
 0x2be   : > { %24877 = vst [vmem:[#allocation20_spill] sm:$0xff] %v22395_v3  ;;  %v2985_v24 = vadd.f32 %v19058_v15, %v17634_v10  ;;  %v2979_v1 = vpop.f32.mrb[45].mxu0  ;;  %v22400_v27 = vpop.f32.mrb[45].mxu1  ;;  %19214 = vmatprep.mubr.msk.f32.mxu0 %vm20932_vm8, %v24807_v49  ;;  %19227 = vmatprep.subr.mxu1 %v24807_v49 }
 0x2bf   : > { %24878 = vst [vmem:[#allocation21_spill] sm:$0xff] %v22400_v27  ;;  %v2980_v44 = vadd.f32 %v17634_v10, %v2979_v1  ;;  %19220 = vmatmul.mubr.msk.f32.vlgmr.msra.gmra.mrb[74].mxu1 %vm3116_vm10, %v2857_v14  ;;  %19222 = vmatprep.subr.mxu0 %v24807_v49 }
 0x2c0   : > { %19215 = vmatmul.mubr.msk.f32.vlgmr.msra.gmra.mrb[74].mxu0 %vm3116_vm10, %v2852_v23  ;;  %19228 = vmatpush3.xpose.msk.msra.mxu1 %vm3116_vm10, %v2985_v24 }
 0x2c1   : > { %v19061_v21 = vpop.f32.mrb[46].mxu0  ;;  %v22409_v20 = vpop.f32.mrb[46].mxu1  ;;  %19223 = vmatpush3.xpose.msk.msra.mxu0 %vm3116_vm10, %v2980_v44  ;;  %19229 = vmatprep.mubr.msk.f32.mxu1 %vm20932_vm8, %v24807_v49 }
 0x2c2   : > { %24879 = vst [vmem:[#allocation22_spill] sm:$0xff] %v22409_v20  ;;  %v2995_v18 = vadd.f32 %v19061_v21, %v17634_v10  ;;  %v2989_v19 = vpop.f32.mrb[47].mxu0  ;;  %v22414_v29 = vpop.f32.mrb[47].mxu1  ;;  %19224 = vmatprep.mubr.msk.f32.mxu0 %vm20932_vm8, %v24807_v49  ;;  %19237 = vmatprep.subr.mxu1 %v24807_v49 }
 0x2c3   : > { %24880 = vst [vmem:[#allocation23_spill] sm:$0xff] %v22414_v29  ;;  %v2990_v12 = vadd.f32 %v17634_v10, %v2989_v19  ;;  %19230 = vmatmul.mubr.msk.f32.vlgmr.msra.gmra.mrb[76].mxu1 %vm3116_vm10, %v2867_v28  ;;  %19232 = vmatprep.subr.mxu0 %v24807_v49  ;;  %v2016_v10 = vadd.f32 %v22205_v38, %v22195_v37 }
 0x2c4   : > { %19225 = vmatmul.mubr.msk.f32.vlgmr.msra.gmra.mrb[76].mxu0 %vm3116_vm10, %v2862_v42  ;;  %19238 = vmatpush3.xpose.msk.msra.mxu1 %vm3116_vm10, %v2995_v18 }
 0x2c5   : > { %19233 = vmatpush3.xpose.msk.msra.mxu0 %vm3116_vm10, %v2990_v12  ;;  %19239 = vmatprep.mubr.msk.f32.mxu1 %vm20932_vm8, %v24807_v49 }
 0x2c6   : > { %19234 = vmatprep.mubr.msk.f32.mxu0 %vm20932_vm8, %v24807_v49  ;;  %19247 = vmatprep.subr.mxu1 %v24807_v49 }
 0x2c7   : > { %19240 = vmatmul.mubr.msk.f32.vlgmr.msra.gmra.mrb[78].mxu1 %vm3116_vm10, %v2877_v43  ;;  %19242 = vmatprep.subr.mxu0 %v24807_v49 }
 0x2c8   : > { %19235 = vmatmul.mubr.msk.f32.vlgmr.msra.gmra.mrb[78].mxu0 %vm3116_vm10, %v2872_v40  ;;  %19248 = vmatpush3.msra.mxu1 %v2021_v47 }
 0x2c9   : > { %19243 = vmatpush3.msra.mxu0 %v2016_v10  ;;  %19249 = vmatprep.mubr.msk.f32.mxu1 %vm20932_vm8, %v24807_v49 }
 0x2ca   : > { %19257 = vmatprep.subr.mxu1 %v24807_v49  ;;  %19244 = vmatprep.mubr.msk.f32.mxu0 %vm20932_vm8, %v24807_v49 }
 0x2cb   : > { %19252 = vmatprep.subr.mxu0 %v24807_v49 }
 0x2fb   : > { %v3265_v63 = vpop.f32.mrb[48].mxu1 }
 0x2fc   : > { %v22442_v37 = vmul.f32 0.35355338, %v3265_v63  ;;  %v3189_v38 = vpop.f32.mrb[48].mxu0  ;;  %v19091_v55 = vpop.f32.mrb[49].mxu1 }
 0x2fd   : > { %v22444_v2 = vmul.f32 0.35355338, %v3189_v38  ;;  %v19086_v62 = vpop.f32.mrb[49].mxu0 }
 0x2fe   : > { %v5584_v4 = vsel %vm3116_vm10, %v22442_v37, -inf }
 0x2ff   : > { %5585 = vmax.xlane.f32.xlu1 %v5584_v4  ;;  %v3417_v57 = vpop.f32.mrb[50].mxu1  ;;  %v5581_v8 = vsel %vm3116_vm10, %v22444_v2, -inf }
 0x300   : > { %v19101_v14 = vpop.f32.mrb[51].mxu1  ;;  %5582 = vmax.xlane.f32.xlu0 %v5581_v8  ;;  %v3341_v15 = vpop.f32.mrb[50].mxu0  ;;  %v22452_v1 = vmul.f32 0.35355338, %v3417_v57 }
 0x301   : > { %v22450_v23 = vmul.f32 0.35355338, %v3341_v15  ;;  %v19096_v24 = vpop.f32.mrb[51].mxu0 }
 0x302   : > { %v5590_v28 = vsel %vm3116_vm10, %v22452_v1, -inf }
 0x303   : > { %v5587_v44 = vsel %vm3116_vm10, %v22450_v23, -inf }
 0x304   : > { %5588 = vmax.xlane.f32.xlu0 %v5587_v44 }
 0x308   : > { %5591 = vmax.xlane.f32.xlu0 %v5590_v28 }
 0x312   : > { %v3569_v21 = vpop.f32.mrb[52].mxu1 }
 0x313   : > { %v22458_v42 = vmul.f32 0.35355338, %v3569_v21  ;;  %v19111_v18 = vpop.f32.mrb[53].mxu1  ;;  %v3493_v19 = vpop.f32.mrb[52].mxu0 }
 0x314   : > { %v22460_v12 = vmul.f32 0.35355338, %v3493_v19  ;;  %v19106_v43 = vpop.f32.mrb[53].mxu0 }
 0x315   : > { %v5596_v47 = vsel %vm3116_vm10, %v22458_v42, -inf }
 0x316   : > { %v5593_v40 = vsel %vm3116_vm10, %v22460_v12, -inf  ;;  %5597 = vmax.xlane.f32.xlu0 %v5596_v47 }
 0x317   : > { %5594 = vmax.xlane.f32.xlu1 %v5593_v40 }
 0x34a   : > { %v3721_v10 = vpop.f32.mrb[54].mxu1 }
 0x34b   : > { %v22466_v63 = vmul.f32 0.35355338, %v3721_v10  ;;  %v19121_v38 = vpop.f32.mrb[55].mxu1  ;;  %v3645_v55 = vpop.f32.mrb[54].mxu0 }
 0x34c   : > { %v22468_v62 = vmul.f32 0.35355338, %v3645_v55  ;;  %v19116_v4 = vpop.f32.mrb[55].mxu0 }
 0x34d   : > { %v5602_v57 = vsel %vm3116_vm10, %v22466_v63, -inf }
 0x34e   : > { %v5599_v8 = vsel %vm3116_vm10, %v22468_v62, -inf  ;;  %5603 = vmax.xlane.f32.xlu0 %v5602_v57 }
 0x34f   : > { %5600 = vmax.xlane.f32.xlu1 %v5599_v8 }
 0x35e   : > { %v3873_v14 = vpop.f32.mrb[56].mxu1 }
 0x35f   : > { %v22474_v15 = vmul.f32 0.35355338, %v3873_v14  ;;  %v3797_v24 = vpop.f32.mrb[56].mxu0  ;;  %v19131_v44 = vpop.f32.mrb[57].mxu1 }
 0x360   : > { %v22476_v28 = vmul.f32 0.35355338, %v3797_v24  ;;  %v19126_v21 = vpop.f32.mrb[57].mxu0 }
 0x361   : > { %v5608_v18 = vsel %vm3116_vm10, %v22474_v15, -inf }
 0x362   : > { %v4025_v19 = vpop.f32.mrb[58].mxu1  ;;  %5609 = vmax.xlane.f32.xlu0 %v5608_v18  ;;  %v5605_v43 = vsel %vm3116_vm10, %v22476_v28, -inf }
 0x363   : > { %v22482_v47 = vmul.f32 0.35355338, %v4025_v19  ;;  %v19141_v40 = vpop.f32.mrb[59].mxu1  ;;  %5606 = vmax.xlane.f32.xlu1 %v5605_v43  ;;  %v3949_v10 = vpop.f32.mrb[58].mxu0 }
 0x364   : > { %v22484_v38 = vmul.f32 0.35355338, %v3949_v10  ;;  %v19136_v55 = vpop.f32.mrb[59].mxu0 }
 0x365   : > { %v5614_v4 = vsel %vm3116_vm10, %v22482_v47, -inf }
 0x366   : > { %v4177_v57 = vpop.f32.mrb[60].mxu1  ;;  %5615 = vmax.xlane.f32.xlu0 %v5614_v4  ;;  %v5611_v8 = vsel %vm3116_vm10, %v22484_v38, -inf }
 0x367   : > { %v22490_v14 = vmul.f32 0.35355338, %v4177_v57  ;;  %v19151_v24 = vpop.f32.mrb[61].mxu1  ;;  %5612 = vmax.xlane.f32.xlu1 %v5611_v8  ;;  %v4101_v44 = vpop.f32.mrb[60].mxu0 }
 0x368   : > { %v22492_v21 = vmul.f32 0.35355338, %v4101_v44  ;;  %v19146_v18 = vpop.f32.mrb[61].mxu0 }
 0x369   : > { %v5620_v19 = vsel %vm3116_vm10, %v22490_v14, -inf }
 0x36a   : > { %v4329_v43 = vpop.f32.mrb[62].mxu1  ;;  %5621 = vmax.xlane.f32.xlu0 %v5620_v19  ;;  %v5617_v40 = vsel %vm3116_vm10, %v22492_v21, -inf }
 0x36b   : > { %v22498_v10 = vmul.f32 0.35355338, %v4329_v43  ;;  %v19161_v55 = vpop.f32.mrb[63].mxu1  ;;  %5618 = vmax.xlane.f32.xlu1 %v5617_v40  ;;  %v4253_v4 = vpop.f32.mrb[62].mxu0 }
 0x36c   : > { %v22500_v57 = vmul.f32 0.35355338, %v4253_v4  ;;  %v19156_v8 = vpop.f32.mrb[63].mxu0 }
 0x36d   : > { %v5626_v24 = vsel %vm3116_vm10, %v22498_v10, -inf }
 0x36e   : > { %v4481_v44 = vpop.f32.mrb[64].mxu1  ;;  %5627 = vmax.xlane.f32.xlu0 %v5626_v24  ;;  %v5623_v18 = vsel %vm3116_vm10, %v22500_v57, -inf }
 0x36f   : > { %v22506_v19 = vmul.f32 0.35355338, %v4481_v44  ;;  %v19171_v49 = vpop.f32.mrb[65].mxu1  ;;  %5624 = vmax.xlane.f32.xlu1 %v5623_v18  ;;  %v4405_v43 = vpop.f32.mrb[64].mxu0 }
 0x370   : > { %v22508_v17 = vmul.f32 0.35355338, %v4405_v43  ;;  %v19166_v40 = vpop.f32.mrb[65].mxu0 }
 0x371   : > { %v5632_v55 = vsel %vm3116_vm10, %v22506_v19, -inf }
 0x372   : > { %v4633_v4 = vpop.f32.mrb[66].mxu1  ;;  %5633 = vmax.xlane.f32.xlu0 %v5632_v55  ;;  %v5629_v8 = vsel %vm3116_vm10, %v22508_v17, -inf }
 0x373   : > { %v22514_v24 = vmul.f32 0.35355338, %v4633_v4  ;;  %v19181_v6 = vpop.f32.mrb[67].mxu1  ;;  %5630 = vmax.xlane.f32.xlu1 %v5629_v8  ;;  %v4557_v44 = vpop.f32.mrb[66].mxu0 }
 0x374   : > { %v22516_v51 = vmul.f32 0.35355338, %v4557_v44  ;;  %v19176_v49 = vpop.f32.mrb[67].mxu0 }
 0x375   : > { %v5638_v18 = vsel %vm3116_vm10, %v22514_v24, -inf }
 0x376   : > { %v4785_v43 = vpop.f32.mrb[68].mxu1  ;;  %5639 = vmax.xlane.f32.xlu0 %v5638_v18  ;;  %v5635_v40 = vsel %vm3116_vm10, %v22516_v51, -inf }
 0x377   : > { %v22522_v55 = vmul.f32 0.35355338, %v4785_v43  ;;  %v19191_v7 = vpop.f32.mrb[69].mxu1  ;;  %5636 = vmax.xlane.f32.xlu1 %v5635_v40  ;;  %v4709_v4 = vpop.f32.mrb[68].mxu0 }
 0x378   : > { %v22524_v58 = vmul.f32 0.35355338, %v4709_v4  ;;  %v19186_v6 = vpop.f32.mrb[69].mxu0 }
 0x379   : > { %v5644_v8 = vsel %vm3116_vm10, %v22522_v55, -inf }
 0x37a   : > { %v4937_v44 = vpop.f32.mrb[70].mxu1  ;;  %5645 = vmax.xlane.f32.xlu0 %v5644_v8  ;;  %v5641_v49 = vsel %vm3116_vm10, %v22524_v58, -inf }
 0x37b   : > { %v22530_v18 = vmul.f32 0.35355338, %v4937_v44  ;;  %v19201_v46 = vpop.f32.mrb[71].mxu1  ;;  %5642 = vmax.xlane.f32.xlu1 %v5641_v49  ;;  %v4861_v43 = vpop.f32.mrb[70].mxu0 }
 0x37c   : > { %v22532_v11 = vmul.f32 0.35355338, %v4861_v43  ;;  %v19196_v7 = vpop.f32.mrb[71].mxu0 }
 0x37d   : > { %v5650_v40 = vsel %vm3116_vm10, %v22530_v18, -inf }
 0x37e   : > { %5651 = vmax.xlane.f32.xlu0 %v5650_v40  ;;  %v5647_v4 = vsel %vm3116_vm10, %v22532_v11, -inf }
 0x37f   : > { %5648 = vmax.xlane.f32.xlu1 %v5647_v4 }
 0x38c   : > { %v5586_v6 = vpop.xlane.xlu1 %5585 }
 0x38d   : > { %v5678_v8 = vsub.f32 %v22442_v37, %v5586_v6  ;;  %v5583_v26 = vpop.xlane.xlu0 %5582 }
 0x38e   : > { %v5677_v44 = vsub.f32 %v22444_v2, %v5583_v26  ;;  %v5089_v46 = vpop.f32.mrb[72].mxu1 }
 0x38f   : > { %v5711_v49 = vmul.f32 1.442695, %v5678_v8  ;;  %v22540_v29 = vmul.f32 0.35355338, %v5089_v46  ;;  %v5013_v43 = vpop.f32.mrb[72].mxu0  ;;  %v19211_v7 = vpop.f32.mrb[73].mxu1 }
 0x390   : > { %v5709_v20 = vmul.f32 1.442695, %v5677_v44  ;;  %v22542_v27 = vmul.f32 0.35355338, %v5013_v43  ;;  %v19206_v40 = vpop.f32.mrb[73].mxu0 }
 0x391   : > { %v5589_v3 = vpop.xlane.xlu0 %5588  ;;  %v5656_v4 = vsel %vm3116_vm10, %v22540_v29, -inf  ;;  %20594 = vpow2.f32 %v5711_v49 }
 0x392   : > { %v5679_v5 = vsub.f32 %v22450_v23, %v5589_v3  ;;  %v5241_v37 = vpop.f32.mrb[74].mxu1  ;;  %5657 = vmax.xlane.f32.xlu0 %v5656_v4  ;;  %v5653_v26 = vsel %vm3116_vm10, %v22542_v27, -inf  ;;  %20596 = vpow2.f32 %v5709_v20 }
 0x393   : > { %v22549_v2 = vmul.f32 0.35355338, %v5241_v37  ;;  %v19221_v6 = vpop.f32.mrb[75].mxu1  ;;  %5654 = vmax.xlane.f32.xlu1 %v5653_v26  ;;  %v5165_v8 = vpop.f32.mrb[74].mxu0 }
 0x394   : > { %v5713_v44 = vmul.f32 1.442695, %v5679_v5  ;;  %v22551_v46 = vmul.f32 0.35355338, %v5165_v8  ;;  %v19216_v43 = vpop.f32.mrb[75].mxu0 }
 0x395   : > { %v5592_v7 = vpop.xlane.xlu0 %5591  ;;  %v5662_v3 = vsel %vm3116_vm10, %v22549_v2, -inf }
 0x396   : > { %v5680_v23 = vsub.f32 %v22452_v1, %v5592_v7  ;;  %v5393_v40 = vpop.f32.mrb[76].mxu1  ;;  %5663 = vmax.xlane.f32.xlu0 %v5662_v3  ;;  %v5659_v49 = vsel %vm3116_vm10, %v22551_v46, -inf  ;;  %20598 = vpow2.f32 %v5713_v44 }
 0x397   : > { %v22558_v4 = vmul.f32 0.35355338, %v5393_v40  ;;  %v19231_v37 = vpop.f32.mrb[77].mxu1  ;;  %5660 = vmax.xlane.f32.xlu1 %v5659_v49  ;;  %v5317_v20 = vpop.f32.mrb[76].mxu0 }
 0x398   : > { %v5715_v5 = vmul.f32 1.442695, %v5680_v23  ;;  %v22560_v26 = vmul.f32 0.35355338, %v5317_v20  ;;  %v19226_v6 = vpop.f32.mrb[77].mxu0 }
 0x399   : > { %v5668_v8 = vsel %vm3116_vm10, %v22558_v4, -inf }
 0x39a   : > { %20600 = vpow2.f32 %v5715_v5  ;;  %v5545_v1 = vpop.f32.mrb[78].mxu1  ;;  %5669 = vmax.xlane.f32.xlu0 %v5668_v8  ;;  %v5665_v43 = vsel %vm3116_vm10, %v22560_v26, -inf }
 0x39b   : > { %v22566_v7 = vmul.f32 0.35355338, %v5545_v1  ;;  %v19241_v3 = vpop.f32.mrb[79].mxu1  ;;  %5666 = vmax.xlane.f32.xlu1 %v5665_v43  ;;  %v5469_v40 = vpop.f32.mrb[78].mxu0 }
 0x39c   : > { %v22568_v49 = vpop.eup %20594  ;;  %v22570_v44 = vmul.f32 0.35355338, %v5469_v40  ;;  %v19236_v23 = vpop.f32.mrb[79].mxu0 }
 0x39d   : > { %v22572_v37 = vpop.eup %20596  ;;  %v5674_v20 = vsel %vm3116_vm10, %v22566_v7, -inf  ;;  %v5776_v6 = vsel %vm3116_vm10, %v22568_v49, 0.0 }
 0x39e   : > { %5675 = vmax.xlane.f32.xlu0 %v5674_v20  ;;  %v5671_v5 = vsel %vm3116_vm10, %v22570_v44, -inf  ;;  %v5773_v8 = vsel %vm3116_vm10, %v22572_v37, 0.0 }
 0x39f   : > { %5672 = vmax.xlane.f32.xlu1 %v5671_v5 }
 0x3a0   : > { %v22582_v1 = vpop.eup %20598 }
 0x3a1   : > { %v5779_v20 = vsel %vm3116_vm10, %v22582_v1, 0.0 }
 0x3a2   : > { %5777 = vadd.xlane.f32.xlu0 %v5776_v6 }
 0x3a3   : > { %v5598_v3 = vpop.xlane.xlu0 %5597  ;;  %5774 = vadd.xlane.f32.xlu1 %v5773_v8 }
 0x3a4   : > { %v22584_v43 = vpop.eup %20600  ;;  %v5595_v40 = vpop.xlane.xlu1 %5594  ;;  %v5682_v23 = vsub.f32 %v22458_v42, %v5598_v3 }
 0x3a5   : > { %v5782_v5 = vsel %vm3116_vm10, %v22584_v43, 0.0  ;;  %v5681_v36 = vsub.f32 %v22460_v12, %v5595_v40 }
 0x3a6   : > { %v5719_v34 = vmul.f32 1.442695, %v5682_v23  ;;  %5783 = vadd.xlane.f32.xlu0 %v5782_v5 }
 0x3a7   : > { %v5717_v53 = vmul.f32 1.442695, %v5681_v36  ;;  %5780 = vadd.xlane.f32.xlu1 %v5779_v20 }
 0x3a8   : > { %20602 = vpow2.f32 %v5719_v34 }
 0x3a9   : > { %20604 = vpow2.f32 %v5717_v53 }
 0x3b2   : > { %v22592_v6 = vpop.eup %20602 }
 0x3b3   : > { %v22594_v8 = vpop.eup %20604  ;;  %v5788_v42 = vsel %vm3116_vm10, %v22592_v6, 0.0 }
 0x3b4   : > { %v5785_v3 = vsel %vm3116_vm10, %v22594_v8, 0.0  ;;  %5789 = vadd.xlane.f32.xlu0 %v5788_v42 }
 0x3b5   : > { %5786 = vadd.xlane.f32.xlu1 %v5785_v3 }
 0x3db   : > { %v5604_v59 = vpop.xlane.xlu0 %5603 }
 0x3dc   : > { %v5601_v12 = vpop.xlane.xlu1 %5600  ;;  %v5684_v40 = vsub.f32 %v22466_v63, %v5604_v59 }
 0x3dd   : > { %v5683_v36 = vsub.f32 %v22468_v62, %v5601_v12 }
 0x3de   : > { %v5723_v34 = vmul.f32 1.442695, %v5684_v40 }
 0x3df   : > { %v5721_v53 = vmul.f32 1.442695, %v5683_v36 }
 0x3e0   : > { %20606 = vpow2.f32 %v5723_v34 }
 0x3e1   : > { %20608 = vpow2.f32 %v5721_v53 }
 0x3ea   : > { %v22602_v23 = vpop.eup %20606 }
 0x3eb   : > { %v22604_v20 = vpop.eup %20608  ;;  %v5794_v5 = vsel %vm3116_vm10, %v22602_v23, 0.0 }
 0x3ec   : > { %v5791_v42 = vsel %vm3116_vm10, %v22604_v20, 0.0  ;;  %5795 = vadd.xlane.f32.xlu0 %v5794_v5 }
 0x3ed   : > { %5792 = vadd.xlane.f32.xlu1 %v5791_v42 }
 0x3ef   : > { %v5610_v3 = vpop.xlane.xlu0 %5609 }
 0x3f0   : > { %v5686_v59 = vsub.f32 %v22474_v15, %v5610_v3  ;;  %v5607_v63 = vpop.xlane.xlu1 %5606 }
 0x3f1   : > { %v5685_v62 = vsub.f32 %v22476_v28, %v5607_v63 }
 0x3f2   : > { %v5727_v12 = vmul.f32 1.442695, %v5686_v59 }
 0x3f3   : > { %v5725_v40 = vmul.f32 1.442695, %v5685_v62  ;;  %v5616_v36 = vpop.xlane.xlu0 %5615 }
 0x3f4   : > { %20610 = vpow2.f32 %v5727_v12  ;;  %v5688_v34 = vsub.f32 %v22482_v47, %v5616_v36  ;;  %v5613_v53 = vpop.xlane.xlu1 %5612 }
 0x3f5   : > { %20612 = vpow2.f32 %v5725_v40  ;;  %v5687_v33 = vsub.f32 %v22484_v38, %v5613_v53 }
 0x3f6   : > { %v5731_v16 = vmul.f32 1.442695, %v5688_v34 }
 0x3f7   : > { %v5729_v48 = vmul.f32 1.442695, %v5687_v33  ;;  %v5622_v5 = vpop.xlane.xlu0 %5621 }
 0x3f8   : > { %20614 = vpow2.f32 %v5731_v16  ;;  %v5690_v42 = vsub.f32 %v22490_v14, %v5622_v5  ;;  %v5619_v15 = vpop.xlane.xlu1 %5618 }
 0x3f9   : > { %20616 = vpow2.f32 %v5729_v48  ;;  %v5689_v28 = vsub.f32 %v22492_v21, %v5619_v15 }
 0x3fa   : > { %v5735_v3 = vmul.f32 1.442695, %v5690_v42 }
 0x3fb   : > { %v5733_v59 = vmul.f32 1.442695, %v5689_v28  ;;  %v5628_v63 = vpop.xlane.xlu0 %5627 }
 0x3fc   : > { %20618 = vpow2.f32 %v5735_v3  ;;  %v5692_v47 = vsub.f32 %v22498_v10, %v5628_v63  ;;  %v5625_v62 = vpop.xlane.xlu1 %5624 }
 0x3fd   : > { %20620 = vpow2.f32 %v5733_v59  ;;  %v5691_v38 = vsub.f32 %v22500_v57, %v5625_v62 }
 0x3fe   : > { %v22618_v12 = vpop.eup %20610  ;;  %v5739_v33 = vmul.f32 1.442695, %v5692_v47 }
 0x3ff   : > { %v22620_v16 = vpop.eup %20612  ;;  %v5737_v14 = vmul.f32 1.442695, %v5691_v38  ;;  %v5634_v40 = vpop.xlane.xlu0 %5633  ;;  %v5800_v48 = vsel %vm3116_vm10, %v22618_v12, 0.0 }
 0x400   : > { %20622 = vpow2.f32 %v5739_v33  ;;  %v5694_v21 = vsub.f32 %v22506_v19, %v5634_v40  ;;  %5801 = vadd.xlane.f32.xlu0 %v5800_v48  ;;  %v5631_v36 = vpop.xlane.xlu1 %5630  ;;  %v5797_v10 = vsel %vm3116_vm10, %v22620_v16, 0.0 }
 0x401   : > { %20624 = vpow2.f32 %v5737_v14  ;;  %v5693_v57 = vsub.f32 %v22508_v17, %v5631_v36  ;;  %5798 = vadd.xlane.f32.xlu1 %v5797_v10 }
 0x402   : > { %v22628_v34 = vpop.eup %20614  ;;  %v5743_v53 = vmul.f32 1.442695, %v5694_v21 }
 0x403   : > { %v22630_v5 = vpop.eup %20616  ;;  %v5741_v42 = vmul.f32 1.442695, %v5693_v57  ;;  %v5640_v15 = vpop.xlane.xlu0 %5639  ;;  %v5806_v28 = vsel %vm3116_vm10, %v22628_v34, 0.0 }
 0x404   : > { %20626 = vpow2.f32 %v5743_v53  ;;  %v5696_v19 = vsub.f32 %v22514_v24, %v5640_v15  ;;  %5807 = vadd.xlane.f32.xlu0 %v5806_v28  ;;  %v5637_v3 = vpop.xlane.xlu1 %5636  ;;  %v5803_v59 = vsel %vm3116_vm10, %v22630_v5, 0.0 }
 0x405   : > { %20628 = vpow2.f32 %v5741_v42  ;;  %v5695_v17 = vsub.f32 %v22516_v51, %v5637_v3  ;;  %5804 = vadd.xlane.f32.xlu1 %v5803_v59 }
 0x406   : > { %v22638_v63 = vpop.eup %20618  ;;  %v5747_v47 = vmul.f32 1.442695, %v5696_v19 }
 0x407   : > { %v22640_v62 = vpop.eup %20620  ;;  %v5745_v38 = vmul.f32 1.442695, %v5695_v17  ;;  %v5646_v33 = vpop.xlane.xlu0 %5645  ;;  %v5812_v14 = vsel %vm3116_vm10, %v22638_v63, 0.0 }
 0x408   : > { %20630 = vpow2.f32 %v5747_v47  ;;  %v5698_v24 = vsub.f32 %v22522_v55, %v5646_v33  ;;  %5813 = vadd.xlane.f32.xlu0 %v5812_v14  ;;  %v5643_v40 = vpop.xlane.xlu1 %5642  ;;  %v5809_v48 = vsel %vm3116_vm10, %v22640_v62, 0.0 }
 0x409   : > { %20632 = vpow2.f32 %v5745_v38  ;;  %v5697_v51 = vsub.f32 %v22524_v58, %v5643_v40  ;;  %5810 = vadd.xlane.f32.xlu1 %v5809_v48 }
 0x40a   : > { %v22648_v21 = vpop.eup %20622  ;;  %v5751_v36 = vmul.f32 1.442695, %v5698_v24 }
 0x40b   : > { %v22650_v10 = vpop.eup %20624  ;;  %v5749_v57 = vmul.f32 1.442695, %v5697_v51  ;;  %v5652_v53 = vpop.xlane.xlu0 %5651  ;;  %v5818_v42 = vsel %vm3116_vm10, %v22648_v21, 0.0 }
 0x40c   : > { %20634 = vpow2.f32 %v5751_v36  ;;  %v5700_v55 = vsub.f32 %v22530_v18, %v5652_v53  ;;  %5819 = vadd.xlane.f32.xlu0 %v5818_v42  ;;  %v5649_v15 = vpop.xlane.xlu1 %5648  ;;  %v5815_v28 = vsel %vm3116_vm10, %v22650_v10, 0.0 }
 0x40d   : > { %20636 = vpow2.f32 %v5749_v57  ;;  %v5699_v58 = vsub.f32 %v22532_v11, %v5649_v15  ;;  %5816 = vadd.xlane.f32.xlu1 %v5815_v28 }
 0x40e   : > { %v22658_v19 = vpop.eup %20626  ;;  %v5755_v3 = vmul.f32 1.442695, %v5700_v55 }
 0x40f   : > { %v22660_v59 = vpop.eup %20628  ;;  %v5753_v17 = vmul.f32 1.442695, %v5699_v58  ;;  %v5824_v47 = vsel %vm3116_vm10, %v22658_v19, 0.0 }
 0x410   : > { %20638 = vpow2.f32 %v5755_v3  ;;  %5825 = vadd.xlane.f32.xlu0 %v5824_v47  ;;  %v5821_v18 = vsel %vm3116_vm10, %v22660_v59, 0.0 }
 0x411   : > { %20640 = vpow2.f32 %v5753_v17  ;;  %5822 = vadd.xlane.f32.xlu1 %v5821_v18 }
 0x412   : > { %v22666_v38 = vpop.eup %20630 }
 0x413   : > { %v22668_v11 = vpop.eup %20632  ;;  %v5830_v33 = vsel %vm3116_vm10, %v22666_v38, 0.0 }
 0x414   : > { %5831 = vadd.xlane.f32.xlu0 %v5830_v33  ;;  %v5827_v14 = vsel %vm3116_vm10, %v22668_v11, 0.0 }
 0x415   : > { %5828 = vadd.xlane.f32.xlu1 %v5827_v14 }
 0x416   : > { %v22674_v24 = vpop.eup %20634 }
 0x417   : > { %v22676_v40 = vpop.eup %20636  ;;  %v5836_v48 = vsel %vm3116_vm10, %v22674_v24, 0.0 }
 0x418   : > { %5837 = vadd.xlane.f32.xlu0 %v5836_v48  ;;  %v5833_v51 = vsel %vm3116_vm10, %v22676_v40, 0.0 }
 0x419   : > { %5834 = vadd.xlane.f32.xlu1 %v5833_v51 }
 0x41a   : > { %v22682_v36 = vpop.eup %20638 }
 0x41b   : > { %v22684_v57 = vpop.eup %20640  ;;  %v5842_v53 = vsel %vm3116_vm10, %v22682_v36, 0.0 }
 0x41c   : > { %5843 = vadd.xlane.f32.xlu0 %v5842_v53  ;;  %v5839_v42 = vsel %vm3116_vm10, %v22684_v57, 0.0 }
 0x41d   : > { %5840 = vadd.xlane.f32.xlu1 %v5839_v42 }
 0x41f   : > { %v5658_v55 = vpop.xlane.xlu0 %5657 }
 0x420   : > { %v5702_v15 = vsub.f32 %v22540_v29, %v5658_v55  ;;  %v5655_v28 = vpop.xlane.xlu1 %5654 }
 0x421   : > { %v5701_v58 = vsub.f32 %v22542_v27, %v5655_v28 }
 0x422   : > { %v5759_v3 = vmul.f32 1.442695, %v5702_v15 }
 0x423   : > { %v5757_v17 = vmul.f32 1.442695, %v5701_v58  ;;  %v5664_v47 = vpop.xlane.xlu0 %5663 }
 0x424   : > { %20642 = vpow2.f32 %v5759_v3  ;;  %v5704_v18 = vsub.f32 %v22549_v2, %v5664_v47  ;;  %v5661_v33 = vpop.xlane.xlu1 %5660 }
 0x425   : > { %20644 = vpow2.f32 %v5757_v17  ;;  %v5703_v14 = vsub.f32 %v22551_v46, %v5661_v33 }
 0x426   : > { %v5763_v48 = vmul.f32 1.442695, %v5704_v18 }
 0x427   : > { %v5761_v51 = vmul.f32 1.442695, %v5703_v14  ;;  %v5670_v53 = vpop.xlane.xlu0 %5669 }
 0x428   : > { %20646 = vpow2.f32 %v5763_v48  ;;  %v5706_v42 = vsub.f32 %v22558_v4, %v5670_v53  ;;  %v5667_v29 = vpop.xlane.xlu1 %5666 }
 0x429   : > { %20648 = vpow2.f32 %v5761_v51  ;;  %v5705_v27 = vsub.f32 %v22560_v26, %v5667_v29 }
 0x42a   : > { %v5767_v55 = vmul.f32 1.442695, %v5706_v42 }
 0x42b   : > { %v5765_v15 = vmul.f32 1.442695, %v5705_v27  ;;  %v5676_v28 = vpop.xlane.xlu0 %5675 }
 0x42c   : > { %20650 = vpow2.f32 %v5767_v55  ;;  %v5708_v2 = vsub.f32 %v22566_v7, %v5676_v28  ;;  %v5673_v58 = vpop.xlane.xlu1 %5672 }
 0x42d   : > { %20652 = vpow2.f32 %v5765_v15  ;;  %v5707_v46 = vsub.f32 %v22570_v44, %v5673_v58 }
 0x42e   : > { %v22698_v3 = vpop.eup %20642  ;;  %v5771_v17 = vmul.f32 1.442695, %v5708_v2 }
 0x42f   : > { %v22700_v47 = vpop.eup %20644  ;;  %v5769_v4 = vmul.f32 1.442695, %v5707_v46  ;;  %v5848_v18 = vsel %vm3116_vm10, %v22698_v3, 0.0  ;;  %v5778_v26 = vpop.xlane.xlu0 %5777 }
 0x430   : > { %20654 = vpow2.f32 %v5771_v17  ;;  %5849 = vadd.xlane.f32.xlu0 %v5848_v18  ;;  %v5845_v33 = vsel %vm3116_vm10, %v22700_v47, 0.0  ;;  %v5775_v7 = vpop.xlane.xlu1 %5774 }
 0x431   : > { %20656 = vpow2.f32 %v5769_v4  ;;  %5846 = vadd.xlane.f32.xlu1 %v5845_v33 }
 0x432   : > { %v22706_v14 = vpop.eup %20646  ;;  %20658 = vrcp.f32 %v5778_v26 }
 0x433   : > { %v22708_v44 = vpop.eup %20648  ;;  %v5854_v48 = vsel %vm3116_vm10, %v22706_v14, 0.0  ;;  %20660 = vrcp.f32 %v5775_v7  ;;  %v5784_v51 = vpop.xlane.xlu0 %5783 }
 0x434   : > { %5855 = vadd.xlane.f32.xlu0 %v5854_v48  ;;  %v5851_v53 = vsel %vm3116_vm10, %v22708_v44, 0.0  ;;  %v5781_v42 = vpop.xlane.xlu1 %5780  ;;  %20662 = vrcp.f32 %v5784_v51 }
 0x435   : > { %5852 = vadd.xlane.f32.xlu1 %v5851_v53  ;;  %20664 = vrcp.f32 %v5781_v42  ;;  %v24881_v42 = vmov 0.0  }
 0x436   : > { %v22714_v29 = vpop.eup %20650 }
 0x437   : > { %v22716_v27 = vpop.eup %20652  ;;  %v5860_v55 = vsel %vm3116_vm10, %v22714_v29, 0.0 }
 0x438   : > { %5861 = vadd.xlane.f32.xlu0 %v5860_v55  ;;  %v5857_v15 = vsel %vm3116_vm10, %v22716_v27, 0.0 }
 0x439   : > { %5858 = vadd.xlane.f32.xlu1 %v5857_v15 }
 0x43a   : > { %v22722_v28 = vpop.eup %20654 }
 0x43b   : > { %v22724_v2 = vpop.eup %20656  ;;  %v5866_v58 = vsel %vm3116_vm10, %v22722_v28, 0.0 }
 0x43c   : > { %v20659_v46 = vpop.eup %20658  ;;  %5867 = vadd.xlane.f32.xlu0 %v5866_v58  ;;  %v5863_v17 = vsel %vm3116_vm10, %v22724_v2, 0.0 }
 0x43d   : > { %v20661_v4 = vpop.eup %20660  ;;  %5864 = vadd.xlane.f32.xlu1 %v5863_v17  ;;  %v5902_v18 = vmul.f32 %v20659_v46, %v22568_v49 }
 0x43e   : > { %v20663_v26 = vpop.eup %20662  ;;  %v5901_v33 = vmul.f32 %v20661_v4, %v22572_v37 }
 0x43f   : > { %v20665_v7 = vpop.eup %20664  ;;  %19250 = vmatmul.mubr.msk.f32.vlgmr.msra.gmra.mrb[80].mxu1 %vm3116_vm10, %v5902_v18  ;;  %v5904_v48 = vmul.f32 %v20663_v26, %v22584_v43 }
 0x440   : > { %19258 = vmatpush3.msra.mxu1 %v22210_v0  ;;  %19245 = vmatmul.mubr.msk.f32.vlgmr.msra.gmra.mrb[80].mxu0 %vm3116_vm10, %v5901_v33  ;;  %v5903_v51 = vmul.f32 %v20665_v7, %v22582_v1 }
 0x441   : > { %v5790_v53 = vpop.xlane.xlu0 %5789  ;;  %19253 = vmatpush3.msra.mxu0 %v22213_v30  ;;  %19254 = vmatprep.mubr.msk.f32.mxu0 %vm20932_vm8, %v24881_v42 }
 0x442   : > { %v5787_v49 = vpop.xlane.xlu1 %5786  ;;  %20666 = vrcp.f32 %v5790_v53  ;;  %19262 = vmatprep.subr.mxu0 %v24881_v42  ;;  %19259 = vmatprep.mubr.msk.f32.mxu1 %vm20932_vm8, %v24881_v42 }
 0x443   : > { %20668 = vrcp.f32 %v5787_v49  ;;  %19267 = vmatprep.subr.mxu1 %v24881_v42  ;;  %19260 = vmatmul.mubr.msk.f32.vlgmr.msra.gmra.mrb[82].mxu1 %vm3116_vm10, %v5904_v48 }
 0x444   : > { %19255 = vmatmul.mubr.msk.f32.vlgmr.msra.gmra.mrb[82].mxu0 %vm3116_vm10, %v5903_v51  ;;  %19268 = vmatpush3.msra.mxu1 %v22216_v52 }
 0x445   : > { %19263 = vmatpush3.msra.mxu0 %v22219_v56  ;;  %19264 = vmatprep.mubr.msk.f32.mxu0 %vm20932_vm8, %v24881_v42 }
 0x446   : > { %19272 = vmatprep.subr.mxu0 %v24881_v42  ;;  %19269 = vmatprep.mubr.msk.f32.mxu1 %vm20932_vm8, %v24881_v42 }
 0x447   : > { %19277 = vmatprep.subr.mxu1 %v24881_v42 }
 0x44c   : > { %v20667_v0 = vpop.eup %20666 }
 0x44d   : > { %v20669_v30 = vpop.eup %20668  ;;  %v5906_v37 = vmul.f32 %v20667_v0, %v22592_v6 }
 0x44e   : > { %v5905_v1 = vmul.f32 %v20669_v30, %v22594_v8 }
 0x44f   : > { %19270 = vmatmul.mubr.msk.f32.vlgmr.msra.gmra.mrb[84].mxu1 %vm3116_vm10, %v5906_v37 }
 0x450   : > { %19265 = vmatmul.mubr.msk.f32.vlgmr.msra.gmra.mrb[84].mxu0 %vm3116_vm10, %v5905_v1  ;;  %19278 = vmatpush3.msra.mxu1 %v22222_v39  ;;  %v22769_v39 = vld [vmem:[%s24784_s9 + $0x1] ss:$0 sm:$0xff] }
 0x451   : > { %19273 = vmatpush3.msra.mxu0 %v22227_v13  ;;  %19274 = vmatprep.mubr.msk.f32.mxu0 %vm20932_vm8, %v24881_v42  ;;  %v2375_v8 = vadd.f32 %v22232_v31, %v22769_v39  ;;  %v2370_v15 = vadd.f32 %v22769_v39, %v22237_v25  ;;  %v2385_v33 = vadd.f32 %v22240_v61, %v22769_v39 }
 0x452   : > { %19282 = vmatprep.subr.mxu0 %v24881_v42  ;;  %19279 = vmatprep.mubr.msk.f32.mxu1 %vm20932_vm8, %v24881_v42  ;;  %v2380_v51 = vadd.f32 %v22769_v39, %v22244_v60  ;;  %v2390_v30 = vadd.f32 %v22769_v39, %v22255_v9  ;;  %v2405_v9 = vadd.f32 %v22264_v41, %v22769_v39 }
 0x453   : > { %19287 = vmatprep.subr.mxu1 %v24881_v42 }
 0x479   : > { %v5796_v52 = vpop.xlane.xlu0 %5795 }
 0x47a   : > { %v5793_v56 = vpop.xlane.xlu1 %5792  ;;  %20670 = vrcp.f32 %v5796_v52 }
 0x47b   : > { %20672 = vrcp.f32 %v5793_v56  ;;  %v2400_v56 = vadd.f32 %v22769_v39, %v22269_v22 }
 0x484   : > { %v20671_v13 = vpop.eup %20670 }
 0x485   : > { %v20673_v43 = vpop.eup %20672  ;;  %v5908_v6 = vmul.f32 %v20671_v13, %v22602_v23  ;;  %v22821_v13 = vld [vmem:[%s24784_s9 + $0x2] ss:$0 sm:$0xff] }
 0x486   : > { %v5907_v55 = vmul.f32 %v20673_v43, %v22604_v20 }
 0x487   : > { %19280 = vmatmul.mubr.msk.f32.vlgmr.msra.gmra.mrb[86].mxu1 %vm3116_vm10, %v5908_v6 }
 0x488   : > { %19275 = vmatmul.mubr.msk.f32.vlgmr.msra.gmra.mrb[86].mxu0 %vm3116_vm10, %v5907_v55  ;;  %19288 = vmatpush3.msra.mxu1 %v2375_v8  ;;  %v2724_v8 = vadd.f32 %v22821_v13, %v22350_v50  ;;  %v2739_v50 = vadd.f32 %v22360_v32, %v22821_v13 }
 0x489   : > { %19283 = vmatpush3.msra.mxu0 %v2370_v15  ;;  %19289 = vmatprep.mubr.msk.f32.mxu1 %vm20932_vm8, %v24881_v42 }
 0x48a   : > { %19297 = vmatprep.subr.mxu1 %v24881_v42  ;;  %19284 = vmatprep.mubr.msk.f32.mxu0 %vm20932_vm8, %v24881_v42 }
 0x48b   : > { %19292 = vmatprep.subr.mxu0 %v24881_v42 }
 0x48d   : > { %v5802_v31 = vpop.xlane.xlu0 %5801 }
 0x48e   : > { %20674 = vrcp.f32 %v5802_v31  ;;  %v5799_v23 = vpop.xlane.xlu1 %5798 }
 0x48f   : > { %20676 = vrcp.f32 %v5799_v23  ;;  %v2734_v23 = vadd.f32 %v22821_v13, %v22364_v35 }
 0x491   : > { %v5808_v25 = vpop.xlane.xlu0 %5807 }
 0x492   : > { %20678 = vrcp.f32 %v5808_v25  ;;  %v5805_v20 = vpop.xlane.xlu1 %5804 }
 0x493   : > { %20680 = vrcp.f32 %v5805_v20 }
 0x495   : > { %v5814_v58 = vpop.xlane.xlu0 %5813 }
 0x496   : > { %20682 = vrcp.f32 %v5814_v58  ;;  %v5811_v46 = vpop.xlane.xlu1 %5810  ;;  %v24883_v58 = vld [vmem:[#allocation13_spill] sm:$0xff] }
 0x497   : > { %20684 = vrcp.f32 %v5811_v46  ;;  %v2744_v46 = vadd.f32 %v22821_v13, %v24883_v58 }
 0x498   : > { %v20675_v17 = vpop.eup %20674 }
 0x499   : > { %v20677_v4 = vpop.eup %20676  ;;  %v5820_v18 = vpop.xlane.xlu0 %5819  ;;  %v5910_v26 = vmul.f32 %v20675_v17, %v22618_v12 }
 0x49a   : > { %20686 = vrcp.f32 %v5820_v18  ;;  %v5817_v7 = vpop.xlane.xlu1 %5816  ;;  %v5909_v48 = vmul.f32 %v20677_v4, %v22620_v16  ;;  %v2395_v16 = vadd.f32 %v22250_v45, %v22769_v39  ;;  %v2729_v39 = vadd.f32 %v22344_v54, %v22821_v13 }
 0x49b   : > { %20688 = vrcp.f32 %v5817_v7  ;;  %19290 = vmatmul.mubr.msk.f32.vlgmr.msra.gmra.mrb[88].mxu1 %vm3116_vm10, %v5910_v26 }
 0x49c   : > { %v20679_v53 = vpop.eup %20678  ;;  %19298 = vmatpush3.msra.mxu1 %v2385_v33  ;;  %19285 = vmatmul.mubr.msk.f32.vlgmr.msra.gmra.mrb[88].mxu0 %vm3116_vm10, %v5909_v48  ;;  %v24885_v33 = vld [vmem:[#allocation15_spill] sm:$0xff]  ;;  %v22882_v48 = vld [vmem:[%s24784_s9 + $0x3] ss:$0 sm:$0xff] }
 0x49d   : > { %v20681_v49 = vpop.eup %20680  ;;  %19293 = vmatpush3.msra.mxu0 %v2380_v51  ;;  %v5826_v12 = vpop.xlane.xlu0 %5825  ;;  %19299 = vmatprep.mubr.msk.f32.mxu1 %vm20932_vm8, %v24881_v42  ;;  %v5912_v61 = vmul.f32 %v20679_v53, %v22628_v34  ;;  %v2754_v7 = vadd.f32 %v22821_v13, %v24885_v33  ;;  %v24886_v53 = vld [vmem:[#allocation16_spill] sm:$0xff] }
 0x49e   : > { %20690 = vrcp.f32 %v5826_v12  ;;  %19307 = vmatprep.subr.mxu1 %v24881_v42  ;;  %v5823_v60 = vpop.xlane.xlu1 %5822  ;;  %19294 = vmatprep.mubr.msk.f32.mxu0 %vm20932_vm8, %v24881_v42  ;;  %v5911_v0 = vmul.f32 %v20681_v49, %v22630_v5  ;;  %v3083_v49 = vadd.f32 %v24886_v53, %v22882_v48 }
 0x49f   : > { %20692 = vrcp.f32 %v5823_v60  ;;  %19300 = vmatmul.mubr.msk.f32.vlgmr.msra.gmra.mrb[90].mxu1 %vm3116_vm10, %v5912_v61  ;;  %19302 = vmatprep.subr.mxu0 %v24881_v42  ;;  %v24887_v61 = vld [vmem:[#allocation17_spill] sm:$0xff] }
 0x4a0   : > { %v20683_v34 = vpop.eup %20682  ;;  %19308 = vmatpush3.msra.mxu1 %v2395_v16  ;;  %19295 = vmatmul.mubr.msk.f32.vlgmr.msra.gmra.mrb[90].mxu0 %vm3116_vm10, %v5911_v0  ;;  %v3078_v16 = vadd.f32 %v22882_v48, %v24887_v61 }
 0x4a1   : > { %v20685_v45 = vpop.eup %20684  ;;  %19303 = vmatpush3.msra.mxu0 %v2390_v30  ;;  %v5832_v37 = vpop.xlane.xlu0 %5831  ;;  %19309 = vmatprep.mubr.msk.f32.mxu1 %vm20932_vm8, %v24881_v42  ;;  %v5914_v5 = vmul.f32 %v20683_v34, %v22638_v63 }
 0x4a2   : > { %20694 = vrcp.f32 %v5832_v37  ;;  %19317 = vmatprep.subr.mxu1 %v24881_v42  ;;  %v5829_v1 = vpop.xlane.xlu1 %5828  ;;  %19304 = vmatprep.mubr.msk.f32.mxu0 %vm20932_vm8, %v24881_v42  ;;  %v5913_v52 = vmul.f32 %v20685_v45, %v22640_v62 }
 0x4a3   : > { %20696 = vrcp.f32 %v5829_v1  ;;  %19310 = vmatmul.mubr.msk.f32.vlgmr.msra.gmra.mrb[92].mxu1 %vm3116_vm10, %v5914_v5  ;;  %19312 = vmatprep.subr.mxu0 %v24881_v42  ;;  %v24888_v1 = vld [vmem:[#allocation18_spill] sm:$0xff] }
 0x4a4   : > { %v20687_v41 = vpop.eup %20686  ;;  %19318 = vmatpush3.msra.mxu1 %v2405_v9  ;;  %19305 = vmatmul.mubr.msk.f32.vlgmr.msra.gmra.mrb[92].mxu0 %vm3116_vm10, %v5913_v52  ;;  %v3093_v52 = vadd.f32 %v24888_v1, %v22882_v48 }
 0x4a5   : > { %v20689_v63 = vpop.eup %20688  ;;  %19313 = vmatpush3.msra.mxu0 %v2400_v56  ;;  %v5838_v62 = vpop.xlane.xlu0 %5837  ;;  %19319 = vmatprep.mubr.msk.f32.mxu1 %vm20932_vm8, %v24881_v42  ;;  %v5916_v22 = vmul.f32 %v20687_v41, %v22648_v21  ;;  %v24889_v41 = vld [vmem:[#allocation19_spill] sm:$0xff] }
 0x4a6   : > { %20698 = vrcp.f32 %v5838_v62  ;;  %19327 = vmatprep.subr.mxu1 %v24881_v42  ;;  %v5835_v43 = vpop.xlane.xlu1 %5834  ;;  %19314 = vmatprep.mubr.msk.f32.mxu0 %vm20932_vm8, %v24881_v42  ;;  %v5915_v6 = vmul.f32 %v20689_v63, %v22650_v10  ;;  %v3088_v63 = vadd.f32 %v22882_v48, %v24889_v41 }
 0x4a7   : > { %20700 = vrcp.f32 %v5835_v43  ;;  %19320 = vmatmul.mubr.msk.f32.vlgmr.msra.gmra.mrb[94].mxu1 %vm3116_vm10, %v5916_v22  ;;  %19322 = vmatprep.subr.mxu0 %v24881_v42 }
 0x4a8   : > { %v20691_v21 = vpop.eup %20690  ;;  %19328 = vmatpush3.msra.mxu1 %v2729_v39  ;;  %19315 = vmatmul.mubr.msk.f32.vlgmr.msra.gmra.mrb[94].mxu0 %vm3116_vm10, %v5915_v6  ;;  %v24890_v39 = vld [vmem:[#allocation20_spill] sm:$0xff]  ;;  %v24891_v6 = vld [vmem:[#allocation21_spill] sm:$0xff] }
 0x4a9   : > { %v20693_v54 = vpop.eup %20692  ;;  %19323 = vmatpush3.msra.mxu0 %v2724_v8  ;;  %v5844_v55 = vpop.xlane.xlu0 %5843  ;;  %19329 = vmatprep.mubr.msk.f32.mxu1 %vm20932_vm8, %v24881_v42  ;;  %v5918_v10 = vmul.f32 %v20691_v21, %v22658_v19  ;;  %v3098_v8 = vadd.f32 %v22882_v48, %v24891_v6 }
 0x4aa   : > { %20702 = vrcp.f32 %v5844_v55  ;;  %19337 = vmatprep.subr.mxu1 %v24881_v42  ;;  %v5841_v15 = vpop.xlane.xlu1 %5840  ;;  %19324 = vmatprep.mubr.msk.f32.mxu0 %vm20932_vm8, %v24881_v42  ;;  %v5917_v31 = vmul.f32 %v20693_v54, %v22660_v59  ;;  %v24882_v59 = vld [vmem:[#allocation12_spill] sm:$0xff] }
 0x4ab   : > { %20704 = vrcp.f32 %v5841_v15  ;;  %19330 = vmatmul.mubr.msk.f32.vlgmr.msra.gmra.mrb[96].mxu1 %vm3116_vm10, %v5918_v10  ;;  %19332 = vmatprep.subr.mxu0 %v24881_v42  ;;  %v2749_v20 = vadd.f32 %v24882_v59, %v22821_v13 }
 0x4ac   : > { %v20695_v19 = vpop.eup %20694  ;;  %19338 = vmatpush3.msra.mxu1 %v2739_v50  ;;  %19325 = vmatmul.mubr.msk.f32.vlgmr.msra.gmra.mrb[96].mxu0 %vm3116_vm10, %v5917_v31  ;;  %v24893_v50 = vld [vmem:[#allocation23_spill] sm:$0xff] }
 0x4ad   : > { %v20697_v32 = vpop.eup %20696  ;;  %19333 = vmatpush3.msra.mxu0 %v2734_v23  ;;  %19339 = vmatprep.mubr.msk.f32.mxu1 %vm20932_vm8, %v24881_v42  ;;  %v5920_v25 = vmul.f32 %v20695_v19, %v22666_v38  ;;  %v3108_v15 = vadd.f32 %v22882_v48, %v24893_v50 }
 0x4ae   : > { %19347 = vmatprep.subr.mxu1 %v24881_v42  ;;  %19334 = vmatprep.mubr.msk.f32.mxu0 %vm20932_vm8, %v24881_v42  ;;  %v5919_v35 = vmul.f32 %v20697_v32, %v22668_v11  ;;  %v24884_v11 = vld [vmem:[#allocation14_spill] sm:$0xff]  ;;  %v17762_v32 = vld [vmem:[%s24785_s10 + $0x8] sm:$0xff] }
 0x4af   : > { %19340 = vmatmul.mubr.msk.f32.vlgmr.msra.gmra.mrb[98].mxu1 %vm3116_vm10, %v5920_v25  ;;  %19342 = vmatprep.subr.mxu0 %v24881_v42  ;;  %v2759_v18 = vadd.f32 %v24884_v11, %v22821_v13 }
 0x4b0   : > { %v20699_v17 = vpop.eup %20698  ;;  %19348 = vmatpush3.msra.mxu1 %v2749_v20  ;;  %19335 = vmatmul.mubr.msk.f32.vlgmr.msra.gmra.mrb[98].mxu0 %vm3116_vm10, %v5919_v35 }
 0x4b1   : > { %v20701_v38 = vpop.eup %20700  ;;  %19343 = vmatpush3.msra.mxu0 %v2744_v46  ;;  %19349 = vmatprep.mubr.msk.f32.mxu1 %vm20932_vm8, %v24881_v42  ;;  %v5922_v4 = vmul.f32 %v20699_v17, %v22674_v24 }
 0x4b2   : > { %19357 = vmatprep.subr.mxu1 %v24881_v42  ;;  %19344 = vmatprep.mubr.msk.f32.mxu0 %vm20932_vm8, %v24881_v42  ;;  %v5921_v26 = vmul.f32 %v20701_v38, %v22676_v40 }
 0x4b3   : > { %19350 = vmatmul.mubr.msk.f32.vlgmr.msra.gmra.mrb[100].mxu1 %vm3116_vm10, %v5922_v4  ;;  %19352 = vmatprep.subr.mxu0 %v24881_v42 }
 0x4b4   : > { %v20703_v24 = vpop.eup %20702  ;;  %19358 = vmatpush3.msra.mxu1 %v2759_v18  ;;  %19345 = vmatmul.mubr.msk.f32.vlgmr.msra.gmra.mrb[100].mxu0 %vm3116_vm10, %v5921_v26 }
 0x4b5   : > { %v20705_v51 = vpop.eup %20704  ;;  %19353 = vmatpush3.msra.mxu0 %v2754_v7  ;;  %19359 = vmatprep.mubr.msk.f32.mxu1 %vm20932_vm8, %v24881_v42  ;;  %v5924_v40 = vmul.f32 %v20703_v24, %v22682_v36 }
 0x4b6   : > { %19367 = vmatprep.subr.mxu1 %v24881_v42  ;;  %19354 = vmatprep.mubr.msk.f32.mxu0 %vm20932_vm8, %v24881_v42  ;;  %v5923_v12 = vmul.f32 %v20705_v51, %v22684_v57 }
 0x4b7   : > { %19360 = vmatmul.mubr.msk.f32.vlgmr.msra.gmra.mrb[102].mxu1 %vm3116_vm10, %v5924_v40  ;;  %19362 = vmatprep.subr.mxu0 %v24881_v42 }
 0x4b8   : > { %19368 = vmatpush3.msra.mxu1 %v3083_v49  ;;  %19355 = vmatmul.mubr.msk.f32.vlgmr.msra.gmra.mrb[102].mxu0 %vm3116_vm10, %v5923_v12  ;;  %v17780_v49 = vld [vmem:[%s24785_s10 + $0x18] sm:$0xff] }
 0x4b9   : > { %19363 = vmatpush3.msra.mxu0 %v3078_v16  ;;  %19369 = vmatprep.mubr.msk.f32.mxu1 %vm20932_vm8, %v24881_v42 }
 0x4ba   : > { %19377 = vmatprep.subr.mxu1 %v24881_v42  ;;  %19364 = vmatprep.mubr.msk.f32.mxu0 %vm20932_vm8, %v24881_v42 }
 0x4bb   : > { %19372 = vmatprep.subr.mxu0 %v24881_v42 }
 0x4bd   : > { %v5850_v36 = vpop.xlane.xlu0 %5849 }
 0x4be   : > { %20706 = vrcp.f32 %v5850_v36  ;;  %v5847_v57 = vpop.xlane.xlu1 %5846 }
 0x4bf   : > { %20708 = vrcp.f32 %v5847_v57 }
 0x4c1   : > { %v5856_v60 = vpop.xlane.xlu0 %5855 }
 0x4c2   : > { %20710 = vrcp.f32 %v5856_v60  ;;  %v5853_v0 = vpop.xlane.xlu1 %5852 }
 0x4c3   : > { %20712 = vrcp.f32 %v5853_v0 }
 0x4c5   : > { %v5862_v30 = vpop.xlane.xlu0 %5861 }
 0x4c6   : > { %20714 = vrcp.f32 %v5862_v30  ;;  %v5859_v34 = vpop.xlane.xlu1 %5858 }
 0x4c7   : > { %20716 = vrcp.f32 %v5859_v34 }
 0x4c8   : > { %v20707_v45 = vpop.eup %20706 }
 0x4c9   : > { %v20709_v37 = vpop.eup %20708  ;;  %v5868_v5 = vpop.xlane.xlu0 %5867  ;;  %v5926_v9 = vmul.f32 %v20707_v45, %v22698_v3 }
 0x4ca   : > { %20718 = vrcp.f32 %v5868_v5  ;;  %v5865_v56 = vpop.xlane.xlu1 %5864  ;;  %v5925_v13 = vmul.f32 %v20709_v37, %v22700_v47  ;;  %v3103_v47 = vadd.f32 %v24890_v39, %v22882_v48 }
 0x4cb   : > { %20720 = vrcp.f32 %v5865_v56  ;;  %19370 = vmatmul.mubr.msk.f32.vlgmr.msra.gmra.mrb[104].mxu1 %vm3116_vm10, %v5926_v9 }
 0x4cc   : > { %v20711_v62 = vpop.eup %20710  ;;  %19378 = vmatpush3.msra.mxu1 %v3093_v52  ;;  %19365 = vmatmul.mubr.msk.f32.vlgmr.msra.gmra.mrb[104].mxu0 %vm3116_vm10, %v5925_v13 }
 0x4cd   : > { %v20713_v22 = vpop.eup %20712  ;;  %19373 = vmatpush3.msra.mxu0 %v3088_v63  ;;  %19379 = vmatprep.mubr.msk.f32.mxu1 %vm20932_vm8, %v24881_v42  ;;  %v5928_v3 = vmul.f32 %v20711_v62, %v22706_v14 }
 0x4ce   : > { %19387 = vmatprep.subr.mxu1 %v24881_v42  ;;  %19374 = vmatprep.mubr.msk.f32.mxu0 %vm20932_vm8, %v24881_v42  ;;  %v5927_v43 = vmul.f32 %v20713_v22, %v22708_v44  ;;  %v24892_v44 = vld [vmem:[#allocation22_spill] sm:$0xff] }
 0x4cf   : > { %19380 = vmatmul.mubr.msk.f32.vlgmr.msra.gmra.mrb[106].mxu1 %vm3116_vm10, %v5928_v3  ;;  %19382 = vmatprep.subr.mxu0 %v24881_v42  ;;  %v3113_v55 = vadd.f32 %v24892_v44, %v22882_v48 }
 0x4d0   : > { %v20715_v21 = vpop.eup %20714  ;;  %19388 = vmatpush3.msra.mxu1 %v3103_v47  ;;  %19375 = vmatmul.mubr.msk.f32.vlgmr.msra.gmra.mrb[106].mxu0 %vm3116_vm10, %v5927_v43 }
 0x4d1   : > { %v20717_v14 = vpop.eup %20716  ;;  %19383 = vmatpush3.msra.mxu0 %v3098_v8  ;;  %19389 = vmatprep.mubr.msk.f32.mxu1 %vm20932_vm8, %v24881_v42  ;;  %v5930_v54 = vmul.f32 %v20715_v21, %v22714_v29  ;;  %v8270_v29 = vld [vmem:[%s24785_s10] sm:$0xff] }
 0x4d2   : > { %19397 = vmatprep.subr.mxu1 %v24881_v42  ;;  %19384 = vmatprep.mubr.msk.f32.mxu0 %vm20932_vm8, %v24881_v42  ;;  %v5929_v10 = vmul.f32 %v20717_v14, %v22716_v27 }
 0x4d3   : > { %19390 = vmatmul.mubr.msk.f32.vlgmr.msra.gmra.mrb[108].mxu1 %vm3116_vm10, %v5930_v54  ;;  %19392 = vmatprep.subr.mxu0 %v24881_v42 }
 0x4d4   : > { %v20719_v31 = vpop.eup %20718  ;;  %19398 = vmatpush3.msra.mxu1 %v3113_v55  ;;  %19385 = vmatmul.mubr.msk.f32.vlgmr.msra.gmra.mrb[108].mxu0 %vm3116_vm10, %v5929_v10 }
 0x4d5   : > { %v20721_v23 = vpop.eup %20720  ;;  %19393 = vmatpush3.msra.mxu0 %v3108_v15  ;;  %19399 = vmatprep.mubr.msk.f32.mxu1 %vm20932_vm8, %v24881_v42  ;;  %v5932_v27 = vmul.f32 %v20719_v31, %v22722_v28 }
 0x4d6   : > { %19394 = vmatprep.mubr.msk.f32.mxu0 %vm20932_vm8, %v24881_v42  ;;  %v5931_v19 = vmul.f32 %v20721_v23, %v22724_v2  ;;  %19402 = vmatprep.subr.mxu0 %v8270_v29  ;;  %v17771_v2 = vld [vmem:[%s24785_s10 + $0x10] sm:$0xff] }
 0x4d7   : > { %19400 = vmatmul.mubr.msk.f32.vlgmr.msra.gmra.mrb[110].mxu1 %vm3116_vm10, %v5932_v27 }
 0x4d8   : > { %19395 = vmatmul.mubr.msk.f32.vlgmr.msra.gmra.mrb[110].mxu0 %vm3116_vm10, %v5931_v19 }
 0x4d9   : > { %19403 = vmatpush3.msra.mxu0 %v8270_v29 }
 0x4da   : > { %19416 = vmatprep.subr.mxu0 %v17762_v32 }
 0x512   : > { %v6075_v25 = vpop.f32.mrb[80].mxu1 }
 0x513   : > { %v6002_v59 = vpop.f32.mrb[80].mxu0  ;;  %v19251_v20 = vpop.f32.mrb[81].mxu1 }
 0x514   : > { %v19246_v28 = vpop.f32.mrb[81].mxu0  ;;  %19404 = vmatprep.mubr.msk.f32.mxu0 %vm3116_vm10, %v6002_v59 }
 0x515   : > { %19405 = vmatmul.mubr.msk.f32.vlgmr.msra.gmra.mrb[112].mxu0 %vm3116_vm10, %v6075_v25  ;;  %v17761_v28 = vld [vmem:[%s24786_s11] ss:$0 sm:$0xff] }
 0x516   : > { %v6221_v35 = vpop.f32.mrb[82].mxu1  ;;  %19417 = vmatpush3.msra.mxu0 %v17762_v32 }
 0x517   : > { %v6148_v58 = vpop.f32.mrb[82].mxu0  ;;  %v19261_v46 = vpop.f32.mrb[83].mxu1  ;;  %19430 = vmatprep.subr.mxu0 %v17771_v2 }
 0x518   : > { %v19256_v17 = vpop.f32.mrb[83].mxu0  ;;  %19407 = vmatprep.mubr.msk.f32.mxu0 %vm3116_vm10, %v6148_v58 }
 0x519   : > { %19408 = vmatmul.mubr.msk.f32.gmra.mrb[114].mxu0 %vm3116_vm10, %v6221_v35  ;;  %v24894_v17 = vld [vmem:[#allocation7_spill] sm:$0xff] }
 0x522   : > { %v6367_v38 = vpop.f32.mrb[84].mxu1 }
 0x523   : > { %v6294_v4 = vpop.f32.mrb[84].mxu0  ;;  %v19271_v11 = vpop.f32.mrb[85].mxu1 }
 0x524   : > { %v19266_v18 = vpop.f32.mrb[85].mxu0  ;;  %19410 = vmatprep.mubr.msk.f32.mxu0 %vm3116_vm10, %v6294_v4  ;;  %v24895_v11 = vld [vmem:[#allocation5_spill] sm:$0xff] }
 0x525   : > { %19411 = vmatmul.mubr.msk.f32.gmra.mrb[116].mxu0 %vm3116_vm10, %v6367_v38 }
 0x55a   : > { %v6513_v26 = vpop.f32.mrb[86].mxu1 }
 0x55b   : > { %v6440_v33 = vpop.f32.mrb[86].mxu0  ;;  %v19281_v7 = vpop.f32.mrb[87].mxu1 }
 0x55c   : > { %v19276_v48 = vpop.f32.mrb[87].mxu0  ;;  %19413 = vmatprep.mubr.msk.f32.mxu0 %vm3116_vm10, %v6440_v33 }
 0x55d   : > { %19414 = vmatmul.mubr.msk.f32.gmra.mrb[118].mxu0 %vm3116_vm10, %v6513_v26 }
 0x56e   : > { %v6659_v24 = vpop.f32.mrb[88].mxu1 }
 0x56f   : > { %v6586_v51 = vpop.f32.mrb[88].mxu0  ;;  %v19291_v40 = vpop.f32.mrb[89].mxu1 }
 0x570   : > { %v19286_v53 = vpop.f32.mrb[89].mxu0  ;;  %19418 = vmatprep.mubr.msk.f32.mxu0 %vm3116_vm10, %v6586_v51  ;;  %v24896_v51 = vld [vmem:[#allocation6_spill] sm:$0xff] }
 0x571   : > { %19419 = vmatmul.mubr.msk.f32.vlgmr.msra.gmra.mrb[112].mxu0 %vm3116_vm10, %v6659_v24 }
 0x572   : > { %v6805_v12 = vpop.f32.mrb[90].mxu1  ;;  %19431 = vmatpush3.msra.mxu0 %v17771_v2 }
 0x573   : > { %v6732_v61 = vpop.f32.mrb[90].mxu0  ;;  %v19301_v16 = vpop.f32.mrb[91].mxu1  ;;  %19444 = vmatprep.subr.mxu0 %v17780_v49 }
 0x574   : > { %v19296_v36 = vpop.f32.mrb[91].mxu0  ;;  %19421 = vmatprep.mubr.msk.f32.mxu0 %vm3116_vm10, %v6732_v61 }
 0x575   : > { %19422 = vmatmul.mubr.msk.f32.gmra.mrb[114].mxu0 %vm3116_vm10, %v6805_v12 }
 0x576   : > { %v6951_v57 = vpop.f32.mrb[92].mxu1 }
 0x577   : > { %v6878_v60 = vpop.f32.mrb[92].mxu0  ;;  %v19311_v0 = vpop.f32.mrb[93].mxu1 }
 0x578   : > { %v19306_v30 = vpop.f32.mrb[93].mxu0  ;;  %19424 = vmatprep.mubr.msk.f32.mxu0 %vm3116_vm10, %v6878_v60  ;;  %v24898_v0 = vld [vmem:[#allocation9_spill] sm:$0xff] }
 0x579   : > { %19425 = vmatmul.mubr.msk.f32.gmra.mrb[116].mxu0 %vm3116_vm10, %v6951_v57 }
 0x57a   : > { %v7097_v34 = vpop.f32.mrb[94].mxu1 }
 0x57b   : > { %v7024_v45 = vpop.f32.mrb[94].mxu0  ;;  %v19321_v37 = vpop.f32.mrb[95].mxu1 }
 0x57c   : > { %v19316_v5 = vpop.f32.mrb[95].mxu0  ;;  %19427 = vmatprep.mubr.msk.f32.mxu0 %vm3116_vm10, %v7024_v45  ;;  %v24899_v45 = vld [vmem:[#allocation8_spill] sm:$0xff] }
 0x57d   : > { %19428 = vmatmul.mubr.msk.f32.gmra.mrb[118].mxu0 %vm3116_vm10, %v7097_v34 }
 0x57e   : > { %v7243_v9 = vpop.f32.mrb[96].mxu1 }
 0x57f   : > { %v7170_v1 = vpop.f32.mrb[96].mxu0  ;;  %v19331_v52 = vpop.f32.mrb[97].mxu1 }
 0x580   : > { %v19326_v56 = vpop.f32.mrb[97].mxu0  ;;  %19432 = vmatprep.mubr.msk.f32.mxu0 %vm3116_vm10, %v7170_v1 }
 0x581   : > { %19433 = vmatmul.mubr.msk.f32.vlgmr.msra.gmra.mrb[112].mxu0 %vm3116_vm10, %v7243_v9 }
 0x582   : > { %v7389_v13 = vpop.f32.mrb[98].mxu1  ;;  %19445 = vmatpush3.msra.mxu0 %v17780_v49  ;;  %v24897_v49 = vld [vmem:[#allocation4_spill] sm:$0xff] }
 0x583   : > { %v7316_v41 = vpop.f32.mrb[98].mxu0  ;;  %v19341_v63 = vpop.f32.mrb[99].mxu1 }
 0x584   : > { %v19336_v62 = vpop.f32.mrb[99].mxu0  ;;  %19435 = vmatprep.mubr.msk.f32.mxu0 %vm3116_vm10, %v7316_v41  ;;  %v24901_v63 = vld [vmem:[#allocation10_spill] sm:$0xff] }
 0x585   : > { %19436 = vmatmul.mubr.msk.f32.gmra.mrb[114].mxu0 %vm3116_vm10, %v7389_v13  ;;  %v24900_v13 = vld [vmem:[#allocation11_spill] sm:$0xff] }
 0x586   : > { %v7535_v22 = vpop.f32.mrb[100].mxu1 }
 0x587   : > { %v7462_v3 = vpop.f32.mrb[100].mxu0  ;;  %v19351_v39 = vpop.f32.mrb[101].mxu1 }
 0x588   : > { %v19346_v47 = vpop.f32.mrb[101].mxu0  ;;  %19438 = vmatprep.mubr.msk.f32.mxu0 %vm3116_vm10, %v7462_v3 }
 0x589   : > { %19439 = vmatmul.mubr.msk.f32.gmra.mrb[116].mxu0 %vm3116_vm10, %v7535_v22 }
 0x58a   : > { %v7681_v43 = vpop.f32.mrb[102].mxu1 }
 0x58b   : > { %v7608_v6 = vpop.f32.mrb[102].mxu0  ;;  %v19361_v8 = vpop.f32.mrb[103].mxu1 }
 0x58c   : > { %v19356_v21 = vpop.f32.mrb[103].mxu0  ;;  %19441 = vmatprep.mubr.msk.f32.mxu0 %vm3116_vm10, %v7608_v6 }
 0x58d   : > { %19442 = vmatmul.mubr.msk.f32.gmra.mrb[118].mxu0 %vm3116_vm10, %v7681_v43 }
 0x59e   : > { %v7827_v14 = vpop.f32.mrb[104].mxu1 }
 0x59f   : > { %v7754_v54 = vpop.f32.mrb[104].mxu0  ;;  %v19371_v44 = vpop.f32.mrb[105].mxu1 }
 0x5a0   : > { %v19366_v55 = vpop.f32.mrb[105].mxu0  ;;  %19446 = vmatprep.mubr.msk.f32.mxu0 %vm3116_vm10, %v7754_v54 }
 0x5a1   : > { %19447 = vmatmul.mubr.msk.f32.vlgmr.msra.gmra.mrb[112].mxu0 %vm3116_vm10, %v7827_v14 }
 0x5a2   : > { %v7973_v10 = vpop.f32.mrb[106].mxu1 }
 0x5a3   : > { %v7900_v50 = vpop.f32.mrb[106].mxu0  ;;  %v19381_v15 = vpop.f32.mrb[107].mxu1 }
 0x5a4   : > { %v19376_v29 = vpop.f32.mrb[107].mxu0  ;;  %19449 = vmatprep.mubr.msk.f32.mxu0 %vm3116_vm10, %v7900_v50 }
 0x5a5   : > { %19450 = vmatmul.mubr.msk.f32.gmra.mrb[114].mxu0 %vm3116_vm10, %v7973_v10 }
 0x5a6   : > { %v8119_v31 = vpop.f32.mrb[108].mxu1 }
 0x5a7   : > { %v8046_v23 = vpop.f32.mrb[108].mxu0  ;;  %v19391_v27 = vpop.f32.mrb[109].mxu1 }
 0x5a8   : > { %v19386_v19 = vpop.f32.mrb[109].mxu0  ;;  %19452 = vmatprep.mubr.msk.f32.mxu0 %vm3116_vm10, %v8046_v23 }
 0x5a9   : > { %19453 = vmatmul.mubr.msk.f32.gmra.mrb[116].mxu0 %vm3116_vm10, %v8119_v31 }
 0x5aa   : > { %v8265_v32 = vpop.f32.mrb[110].mxu1 }
 0x5ab   : > { %v8192_v25 = vpop.f32.mrb[110].mxu0  ;;  %v19401_v59 = vpop.f32.mrb[111].mxu1 }
 0x5ac   : > { %v19396_v20 = vpop.f32.mrb[111].mxu0  ;;  %19455 = vmatprep.mubr.msk.f32.mxu0 %vm3116_vm10, %v8192_v25 }
 0x5ad   : > { %19456 = vmatmul.mubr.msk.f32.gmra.mrb[118].mxu0 %vm3116_vm10, %v8265_v32 }
 0x674   : > { %v19448_v2 = vpop.f32.mrb[112].mxu0 }
 0x675   : > { %v20446_v35 = vadd.f32 %v19448_v2, %v17761_v28  ;;  %v8784_v58 = vpop.f32.mrb[113].mxu0 }
 0x676   : > { %v20447_v46 = vadd.f32 %v17761_v28, %v8784_v58 }
 0x677   : > { %v8832_v38 = vadd.f32 %v20446_v35, %v24894_v17 }
 0x678   : > { %v19451_v4 = vpop.f32.mrb[114].mxu0  ;;  %v8831_v18 = vadd.f32 %v20447_v46, %v24895_v11 }
 0x679   : > { %v20448_v26 = vadd.f32 %v19451_v4, %v17761_v28  ;;  %v8794_v33 = vpop.f32.mrb[115].mxu0  ;;  %v8844_v7 = vsel %vm1692_vm12, %v8832_v38, 0.0 }
 0x67a   : > { %v20449_v48 = vadd.f32 %v17761_v28, %v8794_v33  ;;  %8845 = vadd.xlane.f32.xlu0 %v8844_v7  ;;  %v8841_v24 = vsel %vm1692_vm12, %v8831_v18, 0.0 }
 0x67b   : > { %8842 = vadd.xlane.f32.xlu1 %v8841_v24  ;;  %v8834_v40 = vadd.f32 %v20448_v26, %v24896_v51 }
 0x67c   : > { %v19454_v53 = vpop.f32.mrb[116].mxu0  ;;  %v8833_v12 = vadd.f32 %v20449_v48, %v24897_v49  ;;  %v8974_v49 = vld [vmem:[%s24789_s14] sm:$0xff] }
 0x67d   : > { %v20450_v61 = vadd.f32 %v19454_v53, %v17761_v28  ;;  %v8804_v16 = vpop.f32.mrb[117].mxu0  ;;  %v8850_v36 = vsel %vm1692_vm12, %v8834_v40, 0.0 }
 0x67e   : > { %v20451_v57 = vadd.f32 %v17761_v28, %v8804_v16  ;;  %8851 = vadd.xlane.f32.xlu0 %v8850_v36  ;;  %v8847_v60 = vsel %vm1692_vm12, %v8833_v12, 0.0  ;;  %v8977_v36 = vld [vmem:[%s24789_s14 + $0x18] sm:$0xff] }
 0x67f   : > { %8848 = vadd.xlane.f32.xlu1 %v8847_v60  ;;  %v8836_v30 = vadd.f32 %v20450_v61, %v24898_v0  ;;  %v8976_v61 = vld [vmem:[%s24789_s14 + $0x10] sm:$0xff]  ;;  %v9122_v60 = vld [vmem:[%s24791_s16] sm:$0xff]  ;;  %v9123_v0 = vld [vmem:[%s24791_s16 + $0x8] sm:$0xff] }
 0x680   : > { %v19457_v34 = vpop.f32.mrb[118].mxu0  ;;  %v8835_v37 = vadd.f32 %v20451_v57, %v24899_v45  ;;  %v20294_v57 = vpack.c.bf16 %v8977_v36, %v8976_v61 }
 0x681   : > { %v20452_v5 = vadd.f32 %v19457_v34, %v17761_v28  ;;  %v8814_v9 = vpop.f32.mrb[119].mxu0  ;;  %v8856_v1 = vsel %vm1692_vm12, %v8836_v30, 0.0 }
 0x682   : > { %v20453_v52 = vadd.f32 %v17761_v28, %v8814_v9  ;;  %8857 = vadd.xlane.f32.xlu0 %v8856_v1  ;;  %v8853_v56 = vsel %vm1692_vm12, %v8835_v37, 0.0 }
 0x683   : > { %8854 = vadd.xlane.f32.xlu1 %v8853_v56  ;;  %v8838_v41 = vadd.f32 %v20452_v5, %v24900_v13 }
 0x684   : > { %v8837_v62 = vadd.f32 %v20453_v52, %v24901_v63 }
 0x685   : > { %v8862_v22 = vsel %vm1692_vm12, %v8838_v41, 0.0 }
 0x686   : > { %8863 = vadd.xlane.f32.xlu0 %v8862_v22  ;;  %v8859_v3 = vsel %vm1692_vm12, %v8837_v62, 0.0 }
 0x687   : > { %8860 = vadd.xlane.f32.xlu1 %v8859_v3 }
 0x707   : > { %v8846_v39 = vpop.xlane.xlu0 %8845 }
 0x708   : > { %v8867_v47 = vmul.f32 0.03125, %v8846_v39  ;;  %v8843_v43 = vpop.xlane.xlu1 %8842 }
 0x709   : > { %v8866_v6 = vmul.f32 0.03125, %v8843_v43 }
 0x70a   : > { %v23014_v8 = vsub.f32 %v8832_v38, %v8867_v47 }
 0x70b   : > { %v23016_v21 = vsub.f32 %v8831_v18, %v8866_v6  ;;  %v8852_v14 = vpop.xlane.xlu0 %8851 }
 0x70c   : > { %v8869_v54 = vmul.f32 0.03125, %v8852_v14  ;;  %v8849_v44 = vpop.xlane.xlu1 %8848  ;;  %v8883_v55 = vmul.f32 %v23014_v8, %v23014_v8 }
 0x70d   : > { %v8868_v10 = vmul.f32 0.03125, %v8849_v44  ;;  %v8882_v50 = vmul.f32 %v23016_v21, %v23016_v21 }
 0x70e   : > { %v23022_v15 = vsub.f32 %v8834_v40, %v8869_v54  ;;  %v8893_v29 = vsel %vm1692_vm12, %v8883_v55, 0.0 }
 0x70f   : > { %v23025_v31 = vsub.f32 %v8833_v12, %v8868_v10  ;;  %v8858_v23 = vpop.xlane.xlu0 %8857  ;;  %8894 = vadd.xlane.f32.xlu0 %v8893_v29  ;;  %v8890_v27 = vsel %vm1692_vm12, %v8882_v50, 0.0  ;;  %v8975_v12 = vld [vmem:[%s24789_s14 + $0x8] sm:$0xff]  ;;  %v17789_v29 = vld [vmem:[%s24787_s12] ss:$0 sm:$0xff] }
 0x710   : > { %v8871_v19 = vmul.f32 0.03125, %v8858_v23  ;;  %v8855_v32 = vpop.xlane.xlu1 %8854  ;;  %8891 = vadd.xlane.f32.xlu1 %v8890_v27  ;;  %v8885_v25 = vmul.f32 %v23022_v15, %v23022_v15  ;;  %v20290_v16 = vpack.c.bf16 %v8975_v12, %v8974_v49 }
 0x711   : > { %v8870_v59 = vmul.f32 0.03125, %v8855_v32  ;;  %v8884_v20 = vmul.f32 %v23025_v31, %v23025_v31 }
 0x712   : > { %v23032_v28 = vsub.f32 %v8836_v30, %v8871_v19  ;;  %v8899_v2 = vsel %vm1692_vm12, %v8885_v25, 0.0  ;;  %20291 = vmatprep.subr.bf16.mxu1 %v20290_v16  ;;  %v20298_v30 = vpack.c.bf16 %v9123_v0, %v9122_v60  ;;  %v17790_v25 = vld [vmem:[%s24788_s13] ss:$0 sm:$0xff] }
 0x713   : > { %v23035_v35 = vsub.f32 %v8835_v37, %v8870_v59  ;;  %8900 = vadd.xlane.f32.xlu0 %v8899_v2  ;;  %v8864_v58 = vpop.xlane.xlu0 %8863  ;;  %v8896_v46 = vsel %vm1692_vm12, %v8884_v20, 0.0  ;;  %20293 = vmatpush3.bf16.msra.mxu1 %v20290_v16 }
 0x714   : > { %v8873_v17 = vmul.f32 0.03125, %v8864_v58  ;;  %8897 = vadd.xlane.f32.xlu1 %v8896_v46  ;;  %v8861_v38 = vpop.xlane.xlu1 %8860  ;;  %v8887_v4 = vmul.f32 %v23032_v28, %v23032_v28  ;;  %20295 = vmatprep.subr.bf16.mxu1 %v20294_v57  ;;  %v9124_v58 = vld [vmem:[%s24791_s16 + $0x10] sm:$0xff] }
 0x715   : > { %v8872_v11 = vmul.f32 0.03125, %v8861_v38  ;;  %v8886_v18 = vmul.f32 %v23035_v35, %v23035_v35 }
 0x716   : > { %v23042_v26 = vsub.f32 %v8838_v41, %v8873_v17  ;;  %v8905_v33 = vsel %vm1692_vm12, %v8887_v4, 0.0 }
 0x717   : > { %v23045_v7 = vsub.f32 %v8837_v62, %v8872_v11  ;;  %8906 = vadd.xlane.f32.xlu0 %v8905_v33  ;;  %v8902_v48 = vsel %vm1692_vm12, %v8886_v18, 0.0  ;;  %20297 = vmatpush3.bf16.msra.mxu1 %v20294_v57 }
 0x718   : > { %8903 = vadd.xlane.f32.xlu1 %v8902_v48  ;;  %v8889_v24 = vmul.f32 %v23042_v26, %v23042_v26  ;;  %20299 = vmatprep.subr.bf16.mxu1 %v20298_v30 }
 0x719   : > { %v8888_v51 = vmul.f32 %v23045_v7, %v23045_v7 }
 0x71a   : > { %v8911_v40 = vsel %vm1692_vm12, %v8889_v24, 0.0  ;;  %v9126_v24 = vld [vmem:[%s24791_s16 + $0x20] sm:$0xff] }
 0x71b   : > { %8912 = vadd.xlane.f32.xlu0 %v8911_v40  ;;  %v8908_v53 = vsel %vm1692_vm12, %v8888_v51, 0.0 }
 0x71c   : > { %8909 = vadd.xlane.f32.xlu1 %v8908_v53 }
 0x79c   : > { %v8895_v34 = vpop.xlane.xlu0 %8894 }
 0x79d   : > { %v8915_v45 = vmul.f32 0.03125, %v8895_v34  ;;  %v8892_v37 = vpop.xlane.xlu1 %8891 }
 0x79e   : > { %v8914_v5 = vmul.f32 0.03125, %v8892_v37  ;;  %v9129_v37 = vld [vmem:[%s24791_s16 + $0x38] sm:$0xff] }
 0x79f   : > { %v8923_v9 = vadd.f32 1e-05, %v8915_v45 }
 0x7a0   : > { %v8922_v1 = vadd.f32 1e-05, %v8914_v5  ;;  %v8901_v52 = vpop.xlane.xlu0 %8900 }
 0x7a1   : > { %20722 = vrsqrt.f32 %v8923_v9  ;;  %v8917_v56 = vmul.f32 0.03125, %v8901_v52  ;;  %v8898_v13 = vpop.xlane.xlu1 %8897  ;;  %v17791_v9 = vld [vmem:[%s24790_s15] ss:$0 sm:$0xff] }
 0x7a2   : > { %20724 = vrsqrt.f32 %v8922_v1  ;;  %v8916_v41 = vmul.f32 0.03125, %v8898_v13 }
 0x7a3   : > { %v8925_v63 = vadd.f32 1e-05, %v8917_v56 }
 0x7a4   : > { %v8924_v62 = vadd.f32 1e-05, %v8916_v41  ;;  %v8907_v22 = vpop.xlane.xlu0 %8906 }
 0x7a5   : > { %20726 = vrsqrt.f32 %v8925_v63  ;;  %v8919_v3 = vmul.f32 0.03125, %v8907_v22  ;;  %v8904_v39 = vpop.xlane.xlu1 %8903 }
 0x7a6   : > { %20728 = vrsqrt.f32 %v8924_v62  ;;  %v8918_v47 = vmul.f32 0.03125, %v8904_v39 }
 0x7a7   : > { %v8927_v43 = vadd.f32 1e-05, %v8919_v3 }
 0x7a8   : > { %v8926_v6 = vadd.f32 1e-05, %v8918_v47  ;;  %v8913_v14 = vpop.xlane.xlu0 %8912 }
 0x7a9   : > { %20730 = vrsqrt.f32 %v8927_v43  ;;  %v8921_v54 = vmul.f32 0.03125, %v8913_v14  ;;  %v8910_v44 = vpop.xlane.xlu1 %8909 }
 0x7aa   : > { %20732 = vrsqrt.f32 %v8926_v6  ;;  %v8920_v55 = vmul.f32 0.03125, %v8910_v44 }
 0x7ab   : > { %v20723_v10 = vpop.eup %20722  ;;  %v8929_v50 = vadd.f32 1e-05, %v8921_v54 }
 0x7ac   : > { %v20725_v23 = vpop.eup %20724  ;;  %v8939_v27 = vmul.f32 %v20723_v10, %v23014_v8  ;;  %v8928_v19 = vadd.f32 1e-05, %v8920_v55  ;;  %v9125_v8 = vld [vmem:[%s24791_s16 + $0x18] sm:$0xff] }
 0x7ad   : > { %20734 = vrsqrt.f32 %v8929_v50  ;;  %v8938_v32 = vmul.f32 %v20725_v23, %v23016_v21  ;;  %v20302_v18 = vpack.c.bf16 %v9125_v8, %v9124_v58 }
 0x7ae   : > { %20736 = vrsqrt.f32 %v8928_v19  ;;  %v8953_v59 = vmul.f32 %v17789_v29, %v8939_v27 }
 0x7af   : > { %v20727_v20 = vpop.eup %20726  ;;  %v8952_v2 = vmul.f32 %v17789_v29, %v8938_v32 }
 0x7b0   : > { %v20729_v46 = vpop.eup %20728  ;;  %v8941_v17 = vmul.f32 %v20727_v20, %v23022_v15  ;;  %v23090_v4 = vadd.f32 %v17790_v25, %v8953_v59  ;;  %v9127_v15 = vld [vmem:[%s24791_s16 + $0x28] sm:$0xff] }
 0x7b1   : > { %v23087_v21 = vadd.f32 %v17790_v25, %v8952_v2  ;;  %v8940_v38 = vmul.f32 %v20729_v46, %v23025_v31  ;;  %v20306_v61 = vpack.c.bf16 %v9127_v15, %v9126_v24 }
 0x7b2   : > { %v8955_v11 = vmul.f32 %v17789_v29, %v8941_v17 }
 0x7b3   : > { %v20731_v33 = vpop.eup %20730  ;;  %19466 = vmatprep.mubr.msk.f32.mxu1 %vm1692_vm12, %v23087_v21  ;;  %v8954_v48 = vmul.f32 %v17789_v29, %v8940_v38 }
 0x7b4   : > { %v20733_v51 = vpop.eup %20732  ;;  %19467 = vmatmul.mubr.msk.f32.vlgmr.msra.gmra.mrb[112].mxu1 %vm1692_vm12, %v23090_v4  ;;  %v8943_v31 = vmul.f32 %v20731_v33, %v23032_v28  ;;  %v23106_v49 = vadd.f32 %v17790_v25, %v8955_v11 }
 0x7b5   : > { %v23103_v40 = vadd.f32 %v17790_v25, %v8954_v48  ;;  %v8942_v53 = vmul.f32 %v20733_v51, %v23035_v35  ;;  %20301 = vmatpush3.bf16.msra.mxu1 %v20298_v30 }
 0x7b6   : > { %v8957_v12 = vmul.f32 %v17789_v29, %v8943_v31  ;;  %20303 = vmatprep.subr.bf16.mxu1 %v20302_v18 }
 0x7b7   : > { %v20735_v16 = vpop.eup %20734  ;;  %19469 = vmatprep.mubr.msk.f32.mxu1 %vm1692_vm12, %v23103_v40  ;;  %v8956_v36 = vmul.f32 %v17789_v29, %v8942_v53 }
 0x7b8   : > { %v20737_v57 = vpop.eup %20736  ;;  %19470 = vmatmul.mubr.msk.f32.gmra.mrb[114].mxu1 %vm1692_vm12, %v23106_v49  ;;  %v8945_v28 = vmul.f32 %v20735_v16, %v23042_v26  ;;  %v23116_v0 = vadd.f32 %v17790_v25, %v8957_v12 }
 0x7b9   : > { %v23113_v60 = vadd.f32 %v17790_v25, %v8956_v36  ;;  %v8944_v35 = vmul.f32 %v20737_v57, %v23045_v7  ;;  %20305 = vmatpush3.bf16.msra.mxu1 %v20302_v18  ;;  %v9128_v7 = vld [vmem:[%s24791_s16 + $0x30] sm:$0xff] }
 0x7ba   : > { %v8959_v30 = vmul.f32 %v17789_v29, %v8945_v28  ;;  %20307 = vmatprep.subr.bf16.mxu1 %v20306_v61  ;;  %v20310_v5 = vpack.c.bf16 %v9129_v37, %v9128_v7 }
 0x7bb   : > { %19472 = vmatprep.mubr.msk.f32.mxu1 %vm1692_vm12, %v23113_v60  ;;  %v8958_v34 = vmul.f32 %v17789_v29, %v8944_v35 }
 0x7bc   : > { %19473 = vmatmul.mubr.msk.f32.gmra.mrb[116].mxu1 %vm1692_vm12, %v23116_v0  ;;  %v23124_v26 = vadd.f32 %v17790_v25, %v8959_v30 }
 0x7bd   : > { %v23122_v45 = vadd.f32 %v17790_v25, %v8958_v34  ;;  %20309 = vmatpush3.bf16.msra.mxu1 %v20306_v61  ;;  %v17800_v25 = vld [vmem:[%s24792_s17] ss:$0 sm:$0xff] }
 0x7be   : > { %20311 = vmatprep.subr.bf16.mxu1 %v20310_v5 }
 0x7bf   : > { %19475 = vmatprep.mubr.msk.f32.mxu1 %vm1692_vm12, %v23122_v45 }
 0x7c0   : > { %19476 = vmatmul.mubr.msk.f32.gmra.mrb[118].mxu1 %vm1692_vm12, %v23124_v26 }
 0x7c1   : > { %20313 = vmatpush3.bf16.msra.mxu1 %v20310_v5 }
 0x887   : > { %v19468_v1 = vpop.f32.mrb[112].mxu1 }
 0x888   : > { %v9081_v52 = vadd.f32 %v19468_v1, %v17791_v9  ;;  %v9075_v56 = vpop.f32.mrb[113].mxu1 }
 0x889   : > { %v9076_v13 = vadd.f32 %v17791_v9, %v9075_v56 }
 0x88a   : > { %v9115_v62 = vmax.f32 %v9081_v52, 0.0 }
 0x88b   : > { %v9114_v41 = vmax.f32 %v9076_v13, 0.0  ;;  %v19471_v63 = vpop.f32.mrb[114].mxu1 }
 0x88c   : > { %v9091_v22 = vadd.f32 %v19471_v63, %v17791_v9  ;;  %v9085_v3 = vpop.f32.mrb[115].mxu1 }
 0x88d   : > { %v9086_v39 = vadd.f32 %v17791_v9, %v9085_v3  ;;  %19494 = vmatprep.mubr.msk.f32.mxu1 %vm9137_vm13, %v9114_v41 }
 0x88e   : > { %19495 = vmatmul.mubr.msk.f32.vlgmr.msra.gmra.mrb[120].mxu1 %vm9137_vm13, %v9115_v62  ;;  %v9117_v6 = vmax.f32 %v9091_v22, 0.0 }
 0x88f   : > { %v9116_v47 = vmax.f32 %v9086_v39, 0.0  ;;  %v19474_v43 = vpop.f32.mrb[116].mxu1 }
 0x890   : > { %v9101_v14 = vadd.f32 %v19474_v43, %v17791_v9  ;;  %v9095_v54 = vpop.f32.mrb[117].mxu1 }
 0x891   : > { %v9096_v44 = vadd.f32 %v17791_v9, %v9095_v54  ;;  %19497 = vmatprep.mubr.msk.f32.mxu1 %vm9137_vm13, %v9116_v47 }
 0x892   : > { %19498 = vmatmul.mubr.msk.f32.gmra.mrb[122].mxu1 %vm9137_vm13, %v9117_v6  ;;  %v9119_v50 = vmax.f32 %v9101_v14, 0.0 }
 0x893   : > { %v9118_v55 = vmax.f32 %v9096_v44, 0.0  ;;  %v19477_v10 = vpop.f32.mrb[118].mxu1 }
 0x894   : > { %v9111_v29 = vadd.f32 %v19477_v10, %v17791_v9  ;;  %v9105_v23 = vpop.f32.mrb[119].mxu1 }
 0x895   : > { %v9106_v27 = vadd.f32 %v17791_v9, %v9105_v23  ;;  %19500 = vmatprep.mubr.msk.f32.mxu1 %vm9137_vm13, %v9118_v55 }
 0x896   : > { %19501 = vmatmul.mubr.msk.f32.gmra.mrb[124].mxu1 %vm9137_vm13, %v9119_v50  ;;  %v9121_v32 = vmax.f32 %v9111_v29, 0.0 }
 0x897   : > { %v9120_v19 = vmax.f32 %v9106_v27, 0.0 }
 0x899   : > { %19503 = vmatprep.mubr.msk.f32.mxu1 %vm9137_vm13, %v9120_v19 }
 0x89a   : > { %19504 = vmatmul.mubr.msk.f32.gmra.mrb[126].mxu1 %vm9137_vm13, %v9121_v32 }
 0x961   : > { %v19496_v59 = vpop.f32.mrb[120].mxu1 }
 0x962   : > { %v9234_v20 = vadd.f32 %v19496_v59, %v17800_v25  ;;  %v9228_v2 = vpop.f32.mrb[121].mxu1 }
 0x963   : > { %v9229_v58 = vadd.f32 %v17800_v25, %v9228_v2 }
 0x964   : > { %v9268_v8 = vadd.f32 %v9234_v20, %v23090_v4 }
 0x965   : > { %v19499_v46 = vpop.f32.mrb[122].mxu1  ;;  %v9267_v17 = vadd.f32 %v9229_v58, %v23087_v21 }
 0x966   : > { %v9244_v38 = vadd.f32 %v19499_v46, %v17800_v25  ;;  %v9238_v11 = vpop.f32.mrb[123].mxu1  ;;  %v9280_v18 = vsel %vm1692_vm12, %v9268_v8, 0.0 }
 0x967   : > { %v9239_v33 = vadd.f32 %v17800_v25, %v9238_v11  ;;  %9281 = vadd.xlane.f32.xlu0 %v9280_v18  ;;  %v9277_v48 = vsel %vm1692_vm12, %v9267_v17, 0.0  ;;  %v17811_v18 = vld [vmem:[%s24853_s7 + $0x80] sm:$0xff] }
 0x968   : > { %9278 = vadd.xlane.f32.xlu1 %v9277_v48  ;;  %v9270_v24 = vadd.f32 %v9244_v38, %v23106_v49  ;;  %v17839_v48 = vld [vmem:[%s24860_s29 + $0x80] sm:$0xff] }
 0x969   : > { %v19502_v15 = vpop.f32.mrb[124].mxu1  ;;  %v9269_v51 = vadd.f32 %v9239_v33, %v23103_v40  ;;  %v17812_v33 = vld [vmem:[%s24853_s7 + $0x88] sm:$0xff] }
 0x96a   : > { %v9254_v31 = vadd.f32 %v19502_v15, %v17800_v25  ;;  %v9248_v53 = vpop.f32.mrb[125].mxu1  ;;  %v9286_v4 = vsel %vm1692_vm12, %v9270_v24, 0.0  ;;  %v17840_v15 = vld [vmem:[%s24860_s29 + $0x88] sm:$0xff] }
 0x96b   : > { %v9249_v12 = vadd.f32 %v17800_v25, %v9248_v53  ;;  %9287 = vadd.xlane.f32.xlu0 %v9286_v4  ;;  %v9283_v21 = vsel %vm1692_vm12, %v9269_v51, 0.0  ;;  %v17814_v53 = vld [vmem:[%s24853_s7 + $0x98] sm:$0xff]  ;;  %v17841_v4 = vld [vmem:[%s24860_s29 + $0x90] sm:$0xff] }
 0x96c   : > { %9284 = vadd.xlane.f32.xlu1 %v9283_v21  ;;  %v9272_v61 = vadd.f32 %v9254_v31, %v23116_v0  ;;  %v17813_v31 = vld [vmem:[%s24853_s7 + $0x90] sm:$0xff]  ;;  %v17842_v21 = vld [vmem:[%s24860_s29 + $0x98] sm:$0xff] }
 0x96d   : > { %v19505_v16 = vpop.f32.mrb[126].mxu1  ;;  %v9271_v36 = vadd.f32 %v9249_v12, %v23113_v60  ;;  %v20318_v12 = vpack.c.bf16 %v17814_v53, %v17813_v31  ;;  %v17853_v31 = vld [vmem:[%s24853_s7 + $0xa0] sm:$0xff]  ;;  %v17854_v53 = vld [vmem:[%s24853_s7 + $0xa8] sm:$0xff] }
 0x96e   : > { %v9264_v57 = vadd.f32 %v19505_v16, %v17800_v25  ;;  %v9258_v28 = vpop.f32.mrb[127].mxu1  ;;  %v9292_v49 = vsel %vm1692_vm12, %v9272_v61, 0.0  ;;  %v17825_v16 = vld [vmem:[%s24858_s6 + $0x80] sm:$0xff] }
 0x96f   : > { %v9259_v35 = vadd.f32 %v17800_v25, %v9258_v28  ;;  %9293 = vadd.xlane.f32.xlu0 %v9292_v49  ;;  %v9289_v40 = vsel %vm1692_vm12, %v9271_v36, 0.0  ;;  %v17867_v28 = vld [vmem:[%s24858_s6 + $0xa0] sm:$0xff]  ;;  %v17868_v49 = vld [vmem:[%s24858_s6 + $0xa8] sm:$0xff] }
 0x970   : > { %9290 = vadd.xlane.f32.xlu1 %v9289_v40  ;;  %v9274_v30 = vadd.f32 %v9264_v57, %v23124_v26 }
 0x971   : > { %v9273_v34 = vadd.f32 %v9259_v35, %v23122_v45  ;;  %v23244_v35 = vpack.c.bf16 %v17868_v49, %v17867_v28  ;;  %v20338_v28 = vpack.c.bf16 %v17854_v53, %v17853_v31  ;;  %v17965_v31 = vld [vmem:[%s24860_s29 + $0xe0] sm:$0xff]  ;;  %v17966_v53 = vld [vmem:[%s24860_s29 + $0xe8] sm:$0xff] }
 0x972   : > { %v9298_v7 = vsel %vm1692_vm12, %v9274_v30, 0.0 }
 0x973   : > { %9299 = vadd.xlane.f32.xlu0 %v9298_v7  ;;  %v9295_v0 = vsel %vm1692_vm12, %v9273_v34, 0.0 }
 0x974   : > { %9296 = vadd.xlane.f32.xlu1 %v9295_v0 }
 0x9f4   : > { %v9282_v60 = vpop.xlane.xlu0 %9281 }
 0x9f5   : > { %v9302_v37 = vmul.f32 0.03125, %v9282_v60  ;;  %v9279_v5 = vpop.xlane.xlu1 %9278 }
 0x9f6   : > { %v9301_v9 = vmul.f32 0.03125, %v9279_v5 }
 0x9f7   : > { %v23166_v1 = vsub.f32 %v9268_v8, %v9302_v37 }
 0x9f8   : > { %v23168_v52 = vsub.f32 %v9267_v17, %v9301_v9  ;;  %v9288_v56 = vpop.xlane.xlu0 %9287 }
 0x9f9   : > { %v9304_v13 = vmul.f32 0.03125, %v9288_v56  ;;  %v9285_v41 = vpop.xlane.xlu1 %9284  ;;  %v9318_v45 = vmul.f32 %v23166_v1, %v23166_v1 }
 0x9fa   : > { %v9303_v26 = vmul.f32 0.03125, %v9285_v41  ;;  %v9317_v63 = vmul.f32 %v23168_v52, %v23168_v52 }
 0x9fb   : > { %v23174_v62 = vsub.f32 %v9270_v24, %v9304_v13  ;;  %v9328_v22 = vsel %vm1692_vm12, %v9318_v45, 0.0  ;;  %v20314_v24 = vpack.c.bf16 %v17812_v33, %v17811_v18 }
 0x9fc   : > { %v23177_v3 = vsub.f32 %v9269_v51, %v9303_v26  ;;  %v9294_v39 = vpop.xlane.xlu0 %9293  ;;  %9329 = vadd.xlane.f32.xlu0 %v9328_v22  ;;  %v9325_v47 = vsel %vm1692_vm12, %v9317_v63, 0.0  ;;  %v20330_v51 = vpack.c.bf16 %v17840_v15, %v17839_v48 }
 0x9fd   : > { %v9306_v43 = vmul.f32 0.03125, %v9294_v39  ;;  %v9291_v6 = vpop.xlane.xlu1 %9290  ;;  %9326 = vadd.xlane.f32.xlu1 %v9325_v47  ;;  %v9320_v14 = vmul.f32 %v23174_v62, %v23174_v62  ;;  %20315 = vmatprep.subr.bf16.mxu1 %v20314_v24 }
 0x9fe   : > { %v9305_v54 = vmul.f32 0.03125, %v9291_v6  ;;  %v9319_v44 = vmul.f32 %v23177_v3, %v23177_v3  ;;  %20317 = vmatpush3.bf16.msra.mxu1 %v20314_v24  ;;  %20331 = vmatprep.subr.bf16.mxu0 %v20330_v51 }
 0x9ff   : > { %v23184_v55 = vsub.f32 %v9272_v61, %v9306_v43  ;;  %v9334_v10 = vsel %vm1692_vm12, %v9320_v14, 0.0  ;;  %20333 = vmatpush3.bf16.msra.mxu0 %v20330_v51  ;;  %v20334_v61 = vpack.c.bf16 %v17842_v21, %v17841_v4  ;;  %20319 = vmatprep.subr.bf16.mxu1 %v20318_v12 }
 0xa00   : > { %v23187_v50 = vsub.f32 %v9271_v36, %v9305_v54  ;;  %9335 = vadd.xlane.f32.xlu0 %v9334_v10  ;;  %v9300_v29 = vpop.xlane.xlu0 %9299  ;;  %v9331_v23 = vsel %vm1692_vm12, %v9319_v44, 0.0  ;;  %v17826_v36 = vld [vmem:[%s24858_s6 + $0x88] sm:$0xff]  ;;  %v17809_v10 = vld [vmem:[%s24793_s18] ss:$0 sm:$0xff] }
 0xa01   : > { %v9308_v27 = vmul.f32 0.03125, %v9300_v29  ;;  %9332 = vadd.xlane.f32.xlu1 %v9331_v23  ;;  %v9297_v19 = vpop.xlane.xlu1 %9296  ;;  %v9322_v32 = vmul.f32 %v23184_v55, %v23184_v55  ;;  %20335 = vmatprep.subr.bf16.mxu0 %v20334_v61  ;;  %v23236_v57 = vpack.c.bf16 %v17826_v36, %v17825_v16 }
 0xa02   : > { %v9307_v25 = vmul.f32 0.03125, %v9297_v19  ;;  %v9321_v59 = vmul.f32 %v23187_v50, %v23187_v50  ;;  %20321 = vmatpush3.bf16.msra.mxu1 %v20318_v12 }
 0xa03   : > { %v23194_v20 = vsub.f32 %v9274_v30, %v9308_v27  ;;  %v9340_v2 = vsel %vm1692_vm12, %v9322_v32, 0.0  ;;  %20337 = vmatpush3.bf16.msra.mxu0 %v20334_v61  ;;  %20323 = vmatprep.subr.bf16.mxu1 %v23236_v57 }
 0xa04   : > { %v23197_v58 = vsub.f32 %v9273_v34, %v9307_v25  ;;  %9341 = vadd.xlane.f32.xlu0 %v9340_v2  ;;  %v9337_v8 = vsel %vm1692_vm12, %v9321_v59, 0.0  ;;  %20347 = vmatprep.subr.bf16.mxu0 %v23244_v35  ;;  %v17810_v25 = vld [vmem:[%s24794_s19] ss:$0 sm:$0xff]  ;;  %v17827_v2 = vld [vmem:[%s24858_s6 + $0x90] sm:$0xff] }
 0xa05   : > { %9338 = vadd.xlane.f32.xlu1 %v9337_v8  ;;  %v9324_v46 = vmul.f32 %v23194_v20, %v23194_v20 }
 0xa06   : > { %v9323_v17 = vmul.f32 %v23197_v58, %v23197_v58 }
 0xa07   : > { %v9346_v38 = vsel %vm1692_vm12, %v9324_v46, 0.0 }
 0xa08   : > { %9347 = vadd.xlane.f32.xlu0 %v9346_v38  ;;  %v9343_v11 = vsel %vm1692_vm12, %v9323_v17, 0.0  ;;  %v17870_v17 = vld [vmem:[%s24858_s6 + $0xb8] sm:$0xff] }
 0xa09   : > { %9344 = vadd.xlane.f32.xlu1 %v9343_v11 }
 0xa89   : > { %v9330_v40 = vpop.xlane.xlu0 %9329 }
 0xa8a   : > { %v9350_v30 = vmul.f32 0.03125, %v9330_v40  ;;  %v9327_v34 = vpop.xlane.xlu1 %9326 }
 0xa8b   : > { %v9349_v7 = vmul.f32 0.03125, %v9327_v34 }
 0xa8c   : > { %v9358_v0 = vadd.f32 1e-05, %v9350_v30 }
 0xa8d   : > { %v9357_v60 = vadd.f32 1e-05, %v9349_v7  ;;  %v9336_v37 = vpop.xlane.xlu0 %9335 }
 0xa8e   : > { %20738 = vrsqrt.f32 %v9358_v0  ;;  %v9352_v5 = vmul.f32 0.03125, %v9336_v37  ;;  %v9333_v9 = vpop.xlane.xlu1 %9332 }
 0xa8f   : > { %20740 = vrsqrt.f32 %v9357_v60  ;;  %v9351_v56 = vmul.f32 0.03125, %v9333_v9  ;;  %v17856_v9 = vld [vmem:[%s24853_s7 + $0xb8] sm:$0xff] }
 0xa90   : > { %v9360_v13 = vadd.f32 1e-05, %v9352_v5  ;;  %v17855_v5 = vld [vmem:[%s24853_s7 + $0xb0] sm:$0xff] }
 0xa91   : > { %v9359_v41 = vadd.f32 1e-05, %v9351_v56  ;;  %v9342_v45 = vpop.xlane.xlu0 %9341  ;;  %v20342_v56 = vpack.c.bf16 %v17856_v9, %v17855_v5 }
 0xa92   : > { %20742 = vrsqrt.f32 %v9360_v13  ;;  %v9354_v26 = vmul.f32 0.03125, %v9342_v45  ;;  %v9339_v63 = vpop.xlane.xlu1 %9338  ;;  %v17897_v13 = vld [vmem:[%s24853_s7 + $0xd0] sm:$0xff]  ;;  %v17881_v45 = vld [vmem:[%s24860_s29 + $0xa0] sm:$0xff] }
 0xa93   : > { %20744 = vrsqrt.f32 %v9359_v41  ;;  %v9353_v22 = vmul.f32 0.03125, %v9339_v63  ;;  %v17898_v41 = vld [vmem:[%s24853_s7 + $0xd8] sm:$0xff] }
 0xa94   : > { %v9362_v39 = vadd.f32 1e-05, %v9354_v26  ;;  %v17882_v26 = vld [vmem:[%s24860_s29 + $0xa8] sm:$0xff]  ;;  %v20366_v63 = vpack.c.bf16 %v17898_v41, %v17897_v13 }
 0xa95   : > { %v9361_v47 = vadd.f32 1e-05, %v9353_v22  ;;  %v9348_v43 = vpop.xlane.xlu0 %9347  ;;  %v20354_v22 = vpack.c.bf16 %v17882_v26, %v17881_v45 }
 0xa96   : > { %20746 = vrsqrt.f32 %v9362_v39  ;;  %v9356_v6 = vmul.f32 0.03125, %v9348_v43  ;;  %v9345_v14 = vpop.xlane.xlu1 %9344  ;;  %v17923_v39 = vld [vmem:[%s24860_s29 + $0xc0] sm:$0xff] }
 0xa97   : > { %20748 = vrsqrt.f32 %v9361_v47  ;;  %v9355_v54 = vmul.f32 0.03125, %v9345_v14  ;;  %v17924_v47 = vld [vmem:[%s24860_s29 + $0xc8] sm:$0xff]  ;;  %v17884_v14 = vld [vmem:[%s24860_s29 + $0xb8] sm:$0xff] }
 0xa98   : > { %v20739_v44 = vpop.eup %20738  ;;  %v9364_v29 = vadd.f32 1e-05, %v9356_v6  ;;  %v20378_v43 = vpack.c.bf16 %v17924_v47, %v17923_v39  ;;  %v17883_v6 = vld [vmem:[%s24860_s29 + $0xb0] sm:$0xff]  ;;  %v17830_v47 = vld [vmem:[%s24867_s2 + $0x4] ss:$0 sm:$0xff] }
 0xa99   : > { %v20741_v23 = vpop.eup %20740  ;;  %v9374_v27 = vmul.f32 %v20739_v44, %v23166_v1  ;;  %v9363_v19 = vadd.f32 1e-05, %v9355_v54  ;;  %v17828_v1 = vld [vmem:[%s24858_s6 + $0x98] sm:$0xff]  ;;  %v20358_v54 = vpack.c.bf16 %v17884_v14, %v17883_v6  ;;  %v17925_v44 = vld [vmem:[%s24860_s29 + $0xd0] sm:$0xff] }
 0xa9a   : > { %v9373_v32 = vmul.f32 %v20741_v23, %v23168_v52  ;;  %20750 = vrsqrt.f32 %v9364_v29  ;;  %v17869_v52 = vld [vmem:[%s24858_s6 + $0xb0] sm:$0xff]  ;;  %v20326_v15 = vpack.c.bf16 %v17828_v1, %v17827_v2  ;;  %v17909_v29 = vld [vmem:[%s24858_s6 + $0xc0] sm:$0xff]  ;;  %v17910_v23 = vld [vmem:[%s24858_s6 + $0xc8] sm:$0xff] }
 0xa9b   : > { %v9388_v59 = vmul.f32 %v17809_v10, %v9374_v27  ;;  %20752 = vrsqrt.f32 %v9363_v19  ;;  %v20350_v51 = vpack.c.bf16 %v17870_v17, %v17869_v52  ;;  %v20370_v19 = vpack.c.bf16 %v17910_v23, %v17909_v29  ;;  %v17911_v2 = vld [vmem:[%s24858_s6 + $0xd0] sm:$0xff]  ;;  %v17954_v52 = vld [vmem:[%s24858_s6 + $0xf8] sm:$0xff]  ;;  %v17937_v17 = vld [vmem:[%s24853_s7 + $0xe0] sm:$0xff] }
 0xa9c   : > { %v20743_v8 = vpop.eup %20742  ;;  %v9387_v46 = vmul.f32 %v17809_v10, %v9373_v32  ;;  %v17951_v32 = vld [vmem:[%s24858_s6 + $0xe0] sm:$0xff]  ;;  %v17953_v1 = vld [vmem:[%s24858_s6 + $0xf0] sm:$0xff] }
 0xa9d   : > { %v20745_v38 = vpop.eup %20744  ;;  %v9376_v11 = vmul.f32 %v20743_v8, %v23174_v62  ;;  %v23272_v48 = vadd.f32 %v17810_v25, %v9388_v59  ;;  %v17895_v62 = vld [vmem:[%s24853_s7 + $0xc0] sm:$0xff]  ;;  %v17912_v8 = vld [vmem:[%s24858_s6 + $0xd8] sm:$0xff] }
 0xa9e   : > { %v23269_v18 = vadd.f32 %v17810_v25, %v9387_v46  ;;  %v9375_v33 = vmul.f32 %v20745_v38, %v23177_v3  ;;  %v17896_v3 = vld [vmem:[%s24853_s7 + $0xc8] sm:$0xff]  ;;  %v20374_v46 = vpack.c.bf16 %v17912_v8, %v17911_v2 }
 0xa9f   : > { %24903 = vst [vmem:[#allocation13_spill] sm:$0xff] %v23272_v48  ;;  %v9390_v24 = vmul.f32 %v17809_v10, %v9376_v11  ;;  %v17938_v38 = vld [vmem:[%s24853_s7 + $0xe8] sm:$0xff]  ;;  %v20398_v11 = vpack.c.bf16 %v17954_v52, %v17953_v1 }
 0xaa0   : > { %24902 = vst [vmem:[#allocation12_spill] sm:$0xff] %v23269_v18  ;;  %v20747_v4 = vpop.eup %20746  ;;  %v9389_v12 = vmul.f32 %v17809_v10, %v9375_v33  ;;  %19514 = vmatprep.mubr.msk.f32.mxu1 %vm1692_vm12, %v23269_v18  ;;  %19554 = vmatprep.mubr.msk.f32.mxu0 %vm1692_vm12, %v23269_v18  ;;  %v20386_v33 = vpack.c.bf16 %v17938_v38, %v17937_v17 }
 0xaa1   : > { %v20749_v21 = vpop.eup %20748  ;;  %v9378_v61 = vmul.f32 %v20747_v4, %v23184_v55  ;;  %19515 = vmatmul.mubr.msk.f32.vlgmr.msra.gmra.mrb[128].mxu1 %vm1692_vm12, %v23272_v48  ;;  %19555 = vmatmul.mubr.msk.f32.vlgmr.msra.gmra.mrb[120].mxu0 %vm1692_vm12, %v23272_v48  ;;  %v23300_v49 = vadd.f32 %v17810_v25, %v9390_v24  ;;  %v20362_v55 = vpack.c.bf16 %v17896_v3, %v17895_v62  ;;  %v17939_v24 = vld [vmem:[%s24853_s7 + $0xf0] sm:$0xff]  ;;  %v17968_v62 = vld [vmem:[%s24860_s29 + $0xf8] sm:$0xff] }
 0xaa2   : > { %v23295_v16 = vadd.f32 %v17810_v25, %v9389_v12  ;;  %v9377_v36 = vmul.f32 %v20749_v21, %v23187_v50  ;;  %20325 = vmatpush3.bf16.msra.mxu1 %v23236_v57  ;;  %20349 = vmatpush3.bf16.msra.mxu0 %v23244_v35  ;;  %v20402_v4 = vpack.c.bf16 %v17966_v53, %v17965_v31  ;;  %v17967_v12 = vld [vmem:[%s24860_s29 + $0xf0] sm:$0xff] }
 0xaa3   : > { %24905 = vst [vmem:[#allocation15_spill] sm:$0xff] %v23300_v49  ;;  %v9392_v40 = vmul.f32 %v17809_v10, %v9378_v61  ;;  %20327 = vmatprep.subr.bf16.mxu1 %v20326_v15  ;;  %20351 = vmatprep.subr.bf16.mxu0 %v20350_v51  ;;  %v20406_v3 = vpack.c.bf16 %v17968_v62, %v17967_v12  ;;  %v23666_v62 = vld [vmem:[%s24867_s2 + $0x5] ss:$0 sm:$0xff] }
 0xaa4   : > { %24904 = vst [vmem:[#allocation14_spill] sm:$0xff] %v23295_v16  ;;  %v20751_v30 = vpop.eup %20750  ;;  %v9391_v34 = vmul.f32 %v17809_v10, %v9377_v36  ;;  %19517 = vmatprep.mubr.msk.f32.mxu1 %vm1692_vm12, %v23295_v16  ;;  %19557 = vmatprep.mubr.msk.f32.mxu0 %vm1692_vm12, %v23295_v16 }
 0xaa5   : > { %v20753_v50 = vpop.eup %20752  ;;  %v9380_v57 = vmul.f32 %v20751_v30, %v23194_v20  ;;  %19518 = vmatmul.mubr.msk.f32.gmra.mrb[130].mxu1 %vm1692_vm12, %v23300_v49  ;;  %19558 = vmatmul.mubr.msk.f32.gmra.mrb[122].mxu0 %vm1692_vm12, %v23300_v49  ;;  %v23314_v0 = vadd.f32 %v17810_v25, %v9392_v40  ;;  %v23593_v40 = vld [vmem:[%s24784_s9 + $0x4] ss:$0 sm:$0xff] }
 0xaa6   : > { %v23311_v35 = vadd.f32 %v17810_v25, %v9391_v34  ;;  %v9379_v7 = vmul.f32 %v20753_v50, %v23197_v58  ;;  %20329 = vmatpush3.bf16.msra.mxu1 %v20326_v15  ;;  %20353 = vmatpush3.bf16.msra.mxu0 %v20350_v51  ;;  %v17940_v15 = vld [vmem:[%s24853_s7 + $0xf8] sm:$0xff] }
 0xaa7   : > { %24907 = vst [vmem:[#allocation17_spill] sm:$0xff] %v23314_v0  ;;  %v9394_v60 = vmul.f32 %v17809_v10, %v9380_v57  ;;  %20339 = vmatprep.subr.bf16.mxu1 %v20338_v28  ;;  %20363 = vmatprep.subr.bf16.mxu0 %v20362_v55  ;;  %v20390_v51 = vpack.c.bf16 %v17940_v15, %v17939_v24 }
 0xaa8   : > { %24906 = vst [vmem:[#allocation16_spill] sm:$0xff] %v23311_v35  ;;  %v9393_v37 = vmul.f32 %v17809_v10, %v9379_v7  ;;  %19520 = vmatprep.mubr.msk.f32.mxu1 %vm1692_vm12, %v23311_v35  ;;  %19560 = vmatprep.mubr.msk.f32.mxu0 %vm1692_vm12, %v23311_v35  ;;  %v17926_v10 = vld [vmem:[%s24860_s29 + $0xd8] sm:$0xff] }
 0xaa9   : > { %19521 = vmatmul.mubr.msk.f32.gmra.mrb[132].mxu1 %vm1692_vm12, %v23314_v0  ;;  %19561 = vmatmul.mubr.msk.f32.gmra.mrb[124].mxu0 %vm1692_vm12, %v23314_v0  ;;  %v23326_v58 = vadd.f32 %v17810_v25, %v9394_v60  ;;  %v20382_v27 = vpack.c.bf16 %v17926_v10, %v17925_v44  ;;  %v23625_v44 = vld [vmem:[%s24868_s3 + $0x4] ss:$0 sm:$0xff] }
 0xaaa   : > { %v23324_v20 = vadd.f32 %v17810_v25, %v9393_v37  ;;  %v17952_v25 = vld [vmem:[%s24858_s6 + $0xe8] sm:$0xff] }
 0xaab   : > { %24909 = vst [vmem:[#allocation19_spill] sm:$0xff] %v23326_v58  ;;  %v20394_v59 = vpack.c.bf16 %v17952_v25, %v17951_v32 }
 0xaac   : > { %24908 = vst [vmem:[#allocation18_spill] sm:$0xff] %v23324_v20  ;;  %19523 = vmatprep.mubr.msk.f32.mxu1 %vm1692_vm12, %v23324_v20  ;;  %19563 = vmatprep.mubr.msk.f32.mxu0 %vm1692_vm12, %v23324_v20 }
 0xaad   : > { %19524 = vmatmul.mubr.msk.f32.gmra.mrb[134].mxu1 %vm1692_vm12, %v23326_v58  ;;  %19564 = vmatmul.mubr.msk.f32.gmra.mrb[126].mxu0 %vm1692_vm12, %v23326_v58 }
 0xaae   : > { %19534 = vmatprep.mubr.msk.f32.mxu1 %vm1692_vm12, %v23269_v18  ;;  %19594 = vmatprep.mubr.msk.f32.mxu0 %vm1692_vm12, %v23269_v18 }
 0xab1   : > { %19535 = vmatmul.mubr.msk.f32.vlgmr.msra.gmra.mrb[136].mxu1 %vm1692_vm12, %v23272_v48  ;;  %19595 = vmatmul.mubr.msk.f32.vlgmr.msra.gmra.mrb[128].mxu0 %vm1692_vm12, %v23272_v48 }
 0xab2   : > { %19537 = vmatprep.mubr.msk.f32.mxu1 %vm1692_vm12, %v23295_v16  ;;  %20341 = vmatpush3.bf16.msra.mxu1 %v20338_v28 }
 0xab3   : > { %19597 = vmatprep.mubr.msk.f32.mxu0 %vm1692_vm12, %v23295_v16  ;;  %20343 = vmatprep.subr.bf16.mxu1 %v20342_v56 }
 0xab4   : > { %20365 = vmatpush3.bf16.msra.mxu0 %v20362_v55 }
 0xab5   : > { %19538 = vmatmul.mubr.msk.f32.gmra.mrb[138].mxu1 %vm1692_vm12, %v23300_v49  ;;  %19598 = vmatmul.mubr.msk.f32.gmra.mrb[130].mxu0 %vm1692_vm12, %v23300_v49 }
 0xab6   : > { %19540 = vmatprep.mubr.msk.f32.mxu1 %vm1692_vm12, %v23311_v35  ;;  %19600 = vmatprep.mubr.msk.f32.mxu0 %vm1692_vm12, %v23311_v35 }
 0xab7   : > { %20345 = vmatpush3.bf16.msra.mxu1 %v20342_v56  ;;  %20367 = vmatprep.subr.bf16.mxu0 %v20366_v63 }
 0xab8   : > { %20369 = vmatpush3.bf16.msra.mxu0 %v20366_v63  ;;  %20355 = vmatprep.subr.bf16.mxu1 %v20354_v22 }
 0xab9   : > { %19541 = vmatmul.mubr.msk.f32.gmra.mrb[140].mxu1 %vm1692_vm12, %v23314_v0  ;;  %19601 = vmatmul.mubr.msk.f32.gmra.mrb[132].mxu0 %vm1692_vm12, %v23314_v0 }
 0xaba   : > { %19543 = vmatprep.mubr.msk.f32.mxu1 %vm1692_vm12, %v23324_v20  ;;  %19603 = vmatprep.mubr.msk.f32.mxu0 %vm1692_vm12, %v23324_v20 }
 0xabb   : > { %20379 = vmatprep.subr.bf16.mxu0 %v20378_v43 }
 0xabd   : > { %19544 = vmatmul.mubr.msk.f32.gmra.mrb[142].mxu1 %vm1692_vm12, %v23326_v58  ;;  %19604 = vmatmul.mubr.msk.f32.gmra.mrb[134].mxu0 %vm1692_vm12, %v23326_v58 }
 0xabe   : > { %19574 = vmatprep.mubr.msk.f32.mxu1 %vm1692_vm12, %v23269_v18  ;;  %19634 = vmatprep.mubr.msk.f32.mxu0 %vm1692_vm12, %v23269_v18 }
 0xac1   : > { %19575 = vmatmul.mubr.msk.f32.vlgmr.msra.gmra.mrb[144].mxu1 %vm1692_vm12, %v23272_v48  ;;  %19635 = vmatmul.mubr.msk.f32.vlgmr.msra.gmra.mrb[136].mxu0 %vm1692_vm12, %v23272_v48 }
 0xac2   : > { %19577 = vmatprep.mubr.msk.f32.mxu1 %vm1692_vm12, %v23295_v16  ;;  %20357 = vmatpush3.bf16.msra.mxu1 %v20354_v22 }
 0xac3   : > { %19637 = vmatprep.mubr.msk.f32.mxu0 %vm1692_vm12, %v23295_v16  ;;  %20359 = vmatprep.subr.bf16.mxu1 %v20358_v54 }
 0xac4   : > { %20381 = vmatpush3.bf16.msra.mxu0 %v20378_v43 }
 0xac5   : > { %19578 = vmatmul.mubr.msk.f32.gmra.mrb[146].mxu1 %vm1692_vm12, %v23300_v49  ;;  %19638 = vmatmul.mubr.msk.f32.gmra.mrb[138].mxu0 %vm1692_vm12, %v23300_v49 }
 0xac6   : > { %19580 = vmatprep.mubr.msk.f32.mxu1 %vm1692_vm12, %v23311_v35  ;;  %19640 = vmatprep.mubr.msk.f32.mxu0 %vm1692_vm12, %v23311_v35 }
 0xac7   : > { %20361 = vmatpush3.bf16.msra.mxu1 %v20358_v54  ;;  %20383 = vmatprep.subr.bf16.mxu0 %v20382_v27 }
 0xac8   : > { %20385 = vmatpush3.bf16.msra.mxu0 %v20382_v27  ;;  %20371 = vmatprep.subr.bf16.mxu1 %v20370_v19 }
 0xac9   : > { %19581 = vmatmul.mubr.msk.f32.gmra.mrb[148].mxu1 %vm1692_vm12, %v23314_v0  ;;  %19641 = vmatmul.mubr.msk.f32.gmra.mrb[140].mxu0 %vm1692_vm12, %v23314_v0 }
 0xaca   : > { %19583 = vmatprep.mubr.msk.f32.mxu1 %vm1692_vm12, %v23324_v20  ;;  %19643 = vmatprep.mubr.msk.f32.mxu0 %vm1692_vm12, %v23324_v20 }
 0xacb   : > { %20395 = vmatprep.subr.bf16.mxu0 %v20394_v59 }
 0xacd   : > { %19584 = vmatmul.mubr.msk.f32.gmra.mrb[150].mxu1 %vm1692_vm12, %v23326_v58  ;;  %19644 = vmatmul.mubr.msk.f32.gmra.mrb[142].mxu0 %vm1692_vm12, %v23326_v58 }
 0xace   : > { %19614 = vmatprep.mubr.msk.f32.mxu1 %vm1692_vm12, %v23269_v18  ;;  %19674 = vmatprep.mubr.msk.f32.mxu0 %vm1692_vm12, %v23269_v18 }
 0xad1   : > { %19615 = vmatmul.mubr.msk.f32.vlgmr.msra.gmra.mrb[152].mxu1 %vm1692_vm12, %v23272_v48  ;;  %19675 = vmatmul.mubr.msk.f32.vlgmr.msra.gmra.mrb[144].mxu0 %vm1692_vm12, %v23272_v48 }
 0xad2   : > { %19617 = vmatprep.mubr.msk.f32.mxu1 %vm1692_vm12, %v23295_v16  ;;  %20373 = vmatpush3.bf16.msra.mxu1 %v20370_v19 }
 0xad3   : > { %19677 = vmatprep.mubr.msk.f32.mxu0 %vm1692_vm12, %v23295_v16  ;;  %20375 = vmatprep.subr.bf16.mxu1 %v20374_v46 }
 0xad4   : > { %20397 = vmatpush3.bf16.msra.mxu0 %v20394_v59 }
 0xad5   : > { %19618 = vmatmul.mubr.msk.f32.gmra.mrb[154].mxu1 %vm1692_vm12, %v23300_v49  ;;  %19678 = vmatmul.mubr.msk.f32.gmra.mrb[146].mxu0 %vm1692_vm12, %v23300_v49 }
 0xad6   : > { %19620 = vmatprep.mubr.msk.f32.mxu1 %vm1692_vm12, %v23311_v35  ;;  %19680 = vmatprep.mubr.msk.f32.mxu0 %vm1692_vm12, %v23311_v35 }
 0xad7   : > { %20377 = vmatpush3.bf16.msra.mxu1 %v20374_v46  ;;  %20399 = vmatprep.subr.bf16.mxu0 %v20398_v11 }
 0xad8   : > { %20401 = vmatpush3.bf16.msra.mxu0 %v20398_v11  ;;  %20387 = vmatprep.subr.bf16.mxu1 %v20386_v33 }
 0xad9   : > { %19621 = vmatmul.mubr.msk.f32.gmra.mrb[156].mxu1 %vm1692_vm12, %v23314_v0  ;;  %19681 = vmatmul.mubr.msk.f32.gmra.mrb[148].mxu0 %vm1692_vm12, %v23314_v0 }
 0xada   : > { %19623 = vmatprep.mubr.msk.f32.mxu1 %vm1692_vm12, %v23324_v20  ;;  %19683 = vmatprep.mubr.msk.f32.mxu0 %vm1692_vm12, %v23324_v20 }
 0xadb   : > { %19746 = vmatprep.subr.mxu0 %v24881_v42 }
 0xadd   : > { %19624 = vmatmul.mubr.msk.f32.gmra.mrb[158].mxu1 %vm1692_vm12, %v23326_v58  ;;  %19684 = vmatmul.mubr.msk.f32.gmra.mrb[150].mxu0 %vm1692_vm12, %v23326_v58 }
 0xade   : > { %19654 = vmatprep.mubr.msk.f32.mxu1 %vm1692_vm12, %v23269_v18  ;;  %19714 = vmatprep.mubr.msk.f32.mxu0 %vm1692_vm12, %v23269_v18 }
 0xae1   : > { %19655 = vmatmul.mubr.msk.f32.vlgmr.msra.gmra.mrb[160].mxu1 %vm1692_vm12, %v23272_v48  ;;  %19715 = vmatmul.mubr.msk.f32.vlgmr.msra.gmra.mrb[152].mxu0 %vm1692_vm12, %v23272_v48 }
 0xae2   : > { %19657 = vmatprep.mubr.msk.f32.mxu1 %vm1692_vm12, %v23295_v16  ;;  %19717 = vmatprep.mubr.msk.f32.mxu0 %vm1692_vm12, %v23295_v16 }
 0xae3   : > { %20389 = vmatpush3.bf16.msra.mxu1 %v20386_v33 }
 0xae4   : > { %20391 = vmatprep.subr.bf16.mxu1 %v20390_v51 }
 0xae5   : > { %19658 = vmatmul.mubr.msk.f32.gmra.mrb[162].mxu1 %vm1692_vm12, %v23300_v49  ;;  %19718 = vmatmul.mubr.msk.f32.gmra.mrb[154].mxu0 %vm1692_vm12, %v23300_v49 }
 0xae6   : > { %19660 = vmatprep.mubr.msk.f32.mxu1 %vm1692_vm12, %v23311_v35  ;;  %19720 = vmatprep.mubr.msk.f32.mxu0 %vm1692_vm12, %v23311_v35 }
 0xae7   : > { %20393 = vmatpush3.bf16.msra.mxu1 %v20390_v51 }
 0xae8   : > { %20403 = vmatprep.subr.bf16.mxu1 %v20402_v4 }
 0xae9   : > { %19661 = vmatmul.mubr.msk.f32.gmra.mrb[164].mxu1 %vm1692_vm12, %v23314_v0  ;;  %19721 = vmatmul.mubr.msk.f32.gmra.mrb[156].mxu0 %vm1692_vm12, %v23314_v0 }
 0xaea   : > { %19663 = vmatprep.mubr.msk.f32.mxu1 %vm1692_vm12, %v23324_v20  ;;  %19723 = vmatprep.mubr.msk.f32.mxu0 %vm1692_vm12, %v23324_v20 }
 0xaed   : > { %19664 = vmatmul.mubr.msk.f32.gmra.mrb[166].mxu1 %vm1692_vm12, %v23326_v58  ;;  %19724 = vmatmul.mubr.msk.f32.gmra.mrb[158].mxu0 %vm1692_vm12, %v23326_v58 }
 0xaee   : > { %19694 = vmatprep.mubr.msk.f32.mxu1 %vm1692_vm12, %v23269_v18  ;;  %19748 = vmatprep.mubr.msk.f32.mxu0 %vm20932_vm8, %v24881_v42 }
 0xaf1   : > { %19695 = vmatmul.mubr.msk.f32.vlgmr.msra.gmra.mrb[168].mxu1 %vm1692_vm12, %v23272_v48 }
 0xaf2   : > { %19697 = vmatprep.mubr.msk.f32.mxu1 %vm1692_vm12, %v23295_v16  ;;  %20405 = vmatpush3.bf16.msra.mxu1 %v20402_v4 }
 0xaf3   : > { %20407 = vmatprep.subr.bf16.mxu1 %v20406_v3 }
 0xaf5   : > { %19698 = vmatmul.mubr.msk.f32.gmra.mrb[170].mxu1 %vm1692_vm12, %v23300_v49 }
 0xaf6   : > { %19700 = vmatprep.mubr.msk.f32.mxu1 %vm1692_vm12, %v23311_v35  ;;  %20409 = vmatpush3.bf16.msra.mxu1 %v20406_v3 }
 0xaf7   : > { %19756 = vmatprep.subr.mxu1 %v24881_v42 }
 0xaf9   : > { %19701 = vmatmul.mubr.msk.f32.gmra.mrb[172].mxu1 %vm1692_vm12, %v23314_v0 }
 0xafa   : > { %19703 = vmatprep.mubr.msk.f32.mxu1 %vm1692_vm12, %v23324_v20 }
 0xafd   : > { %19704 = vmatmul.mubr.msk.f32.gmra.mrb[174].mxu1 %vm1692_vm12, %v23326_v58 }
 0xafe   : > { %19734 = vmatprep.mubr.msk.f32.mxu1 %vm1692_vm12, %v23269_v18 }
 0xb01   : > { %19735 = vmatmul.mubr.msk.f32.vlgmr.msra.gmra.mrb[176].mxu1 %vm1692_vm12, %v23272_v48 }
 0xb02   : > { %19737 = vmatprep.mubr.msk.f32.mxu1 %vm1692_vm12, %v23295_v16 }
 0xb05   : > { %19738 = vmatmul.mubr.msk.f32.gmra.mrb[178].mxu1 %vm1692_vm12, %v23300_v49 }
 0xb06   : > { %19740 = vmatprep.mubr.msk.f32.mxu1 %vm1692_vm12, %v23311_v35 }
 0xb09   : > { %19741 = vmatmul.mubr.msk.f32.gmra.mrb[180].mxu1 %vm1692_vm12, %v23314_v0 }
 0xb0a   : > { %19743 = vmatprep.mubr.msk.f32.mxu1 %vm1692_vm12, %v23324_v20 }
 0xb0d   : > { %19744 = vmatmul.mubr.msk.f32.gmra.mrb[182].mxu1 %vm1692_vm12, %v23326_v58 }
 0xb0e   : > { %19758 = vmatprep.mubr.msk.f32.mxu1 %vm20932_vm8, %v24881_v42 }
 0xb74   : > { %v19516_v21 = vpop.f32.mrb[128].mxu1  ;;  %v23586_v61 = vpop.f32.mrb[120].mxu0 }
 0xb75   : > { %v9512_v36 = vpop.f32.mrb[129].mxu1  ;;  %v23588_v28 = vpop.f32.mrb[121].mxu0  ;;  %v9518_v46 = vadd.f32 %v19516_v21, %v23625_v44 }
 0xb76   : > { %v9513_v27 = vadd.f32 %v23625_v44, %v9512_v36 }
 0xb78   : > { %v19519_v55 = vpop.f32.mrb[130].mxu1  ;;  %v19559_v30 = vpop.f32.mrb[122].mxu0 }
 0xb79   : > { %v23596_v34 = vadd.f32 %v19559_v30, %v23593_v40  ;;  %v9522_v50 = vpop.f32.mrb[131].mxu1  ;;  %v9758_v57 = vpop.f32.mrb[123].mxu0  ;;  %v9528_v15 = vadd.f32 %v19519_v55, %v23625_v44 }
 0xb7a   : > { %v23599_v7 = vadd.f32 %v23593_v40, %v9758_v57  ;;  %v9523_v1 = vadd.f32 %v23625_v44, %v9522_v50 }
 0xb7c   : > { %v23601_v60 = vpop.f32.mrb[132].mxu1  ;;  %v19562_v37 = vpop.f32.mrb[124].mxu0 }
 0xb7d   : > { %v23604_v5 = vadd.f32 %v19562_v37, %v23593_v40  ;;  %v9532_v9 = vpop.f32.mrb[133].mxu1  ;;  %v9768_v56 = vpop.f32.mrb[125].mxu0  ;;  %v9538_v36 = vadd.f32 %v23601_v60, %v23625_v44 }
 0xb7e   : > { %v23607_v13 = vadd.f32 %v23593_v40, %v9768_v56  ;;  %v9533_v51 = vadd.f32 %v23625_v44, %v9532_v9  ;;  %v23687_v9 = vld [vmem:[%s24868_s3 + $0x5] ss:$0 sm:$0xff] }
 0xb80   : > { %v23609_v41 = vpop.f32.mrb[134].mxu1  ;;  %v19565_v45 = vpop.f32.mrb[126].mxu0 }
 0xb81   : > { %v23612_v26 = vadd.f32 %v19565_v45, %v23593_v40  ;;  %v9542_v63 = vpop.f32.mrb[135].mxu1  ;;  %v9778_v22 = vpop.f32.mrb[127].mxu0  ;;  %v9548_v45 = vadd.f32 %v23609_v41, %v23625_v44 }
 0xb82   : > { %v23615_v39 = vadd.f32 %v23593_v40, %v9778_v22  ;;  %v9543_v55 = vadd.f32 %v23625_v44, %v9542_v63 }
 0xb84   : > { %v19536_v43 = vpop.f32.mrb[136].mxu1  ;;  %v23620_v6 = vpop.f32.mrb[128].mxu0 }
 0xb85   : > { %v9630_v14 = vpop.f32.mrb[137].mxu1  ;;  %v9984_v54 = vpop.f32.mrb[129].mxu0  ;;  %v9636_v25 = vadd.f32 %v19536_v43, %v17830_v47  ;;  %v9990_v43 = vadd.f32 %v23620_v6, %v23666_v62 }
 0xb86   : > { %v9631_v10 = vadd.f32 %v17830_v47, %v9630_v14  ;;  %v9985_v57 = vadd.f32 %v23666_v62, %v9984_v54 }
 0xb88   : > { %v19539_v29 = vpop.f32.mrb[138].mxu1  ;;  %v23627_v23 = vpop.f32.mrb[130].mxu0  ;;  %19747 = vmatpush3.xpose.msk.msra.mxu0 %vm3116_vm10, %v9631_v10 }
 0xb89   : > { %v9640_v19 = vpop.f32.mrb[139].mxu1  ;;  %v23631_v32 = vpop.f32.mrb[131].mxu0  ;;  %19751 = vmatprep.subr.mxu0 %v24881_v42  ;;  %v9646_v38 = vadd.f32 %v19539_v29, %v17830_v47 }
 0xb8a   : > { %v9641_v59 = vadd.f32 %v17830_v47, %v9640_v19  ;;  %v9995_v14 = vadd.f32 %v23666_v62, %v23631_v32 }
 0xb8b   : > { %19749 = vmatmul.mubr.msk.f32.vlgmr.msra.gmra.mrb[160].mxu0 %vm3116_vm10, %v9513_v27  ;;  %v10000_v27 = vadd.f32 %v23627_v23, %v23666_v62 }
 0xb8c   : > { %v19542_v2 = vpop.f32.mrb[140].mxu1  ;;  %v23635_v8 = vpop.f32.mrb[132].mxu0  ;;  %19752 = vmatpush3.xpose.msk.msra.mxu0 %vm3116_vm10, %v9636_v25  ;;  %19757 = vmatpush3.xpose.msk.msra.mxu1 %vm3116_vm10, %v9641_v59 }
 0xb8d   : > { %v9650_v52 = vpop.f32.mrb[141].mxu1  ;;  %v23641_v17 = vpop.f32.mrb[133].mxu0  ;;  %19753 = vmatprep.mubr.msk.f32.mxu0 %vm20932_vm8, %v24881_v42  ;;  %19761 = vmatprep.subr.mxu0 %v24881_v42  ;;  %v9656_v4 = vadd.f32 %v19542_v2, %v17830_v47 }
 0xb8e   : > { %v9651_v11 = vadd.f32 %v17830_v47, %v9650_v52  ;;  %19766 = vmatprep.subr.mxu1 %v24881_v42  ;;  %v10005_v19 = vadd.f32 %v23666_v62, %v23641_v17 }
 0xb8f   : > { %19754 = vmatmul.mubr.msk.f32.vlgmr.msra.gmra.mrb[162].mxu0 %vm3116_vm10, %v9518_v46  ;;  %19759 = vmatmul.mubr.msk.f32.vlgmr.msra.gmra.mrb[184].mxu1 %vm3116_vm10, %v9523_v1  ;;  %v10010_v1 = vadd.f32 %v23635_v8, %v23666_v62 }
 0xb90   : > { %v19545_v33 = vpop.f32.mrb[142].mxu1  ;;  %v23649_v24 = vpop.f32.mrb[134].mxu0  ;;  %19762 = vmatpush3.xpose.msk.msra.mxu0 %vm3116_vm10, %v9646_v38  ;;  %19767 = vmatpush3.xpose.msk.msra.mxu1 %vm3116_vm10, %v9651_v11 }
 0xb91   : > { %v9660_v31 = vpop.f32.mrb[143].mxu1  ;;  %v23655_v53 = vpop.f32.mrb[135].mxu0  ;;  %19763 = vmatprep.mubr.msk.f32.mxu0 %vm20932_vm8, %v24881_v42  ;;  %19768 = vmatprep.mubr.msk.f32.mxu1 %vm20932_vm8, %v24881_v42  ;;  %v9666_v37 = vadd.f32 %v19545_v33, %v17830_v47 }
 0xb92   : > { %v9661_v12 = vadd.f32 %v17830_v47, %v9660_v31  ;;  %19771 = vmatprep.subr.mxu0 %v24881_v42  ;;  %19776 = vmatprep.subr.mxu1 %v24881_v42  ;;  %v10015_v52 = vadd.f32 %v23666_v62, %v23655_v53 }
 0xb93   : > { %19764 = vmatmul.mubr.msk.f32.vlgmr.msra.gmra.mrb[164].mxu0 %vm3116_vm10, %v9528_v15  ;;  %19769 = vmatmul.mubr.msk.f32.vlgmr.msra.gmra.mrb[186].mxu1 %vm3116_vm10, %v9533_v51  ;;  %v10020_v51 = vadd.f32 %v23649_v24, %v23666_v62 }
 0xb94   : > { %v19576_v3 = vpop.f32.mrb[144].mxu1  ;;  %v23670_v21 = vpop.f32.mrb[136].mxu0  ;;  %19772 = vmatpush3.xpose.msk.msra.mxu0 %vm3116_vm10, %v9656_v4  ;;  %19777 = vmatpush3.xpose.msk.msra.mxu1 %vm3116_vm10, %v9661_v12 }
 0xb95   : > { %v9866_v30 = vpop.f32.mrb[145].mxu1  ;;  %v23677_v50 = vpop.f32.mrb[137].mxu0  ;;  %19773 = vmatprep.mubr.msk.f32.mxu0 %vm20932_vm8, %v24881_v42  ;;  %19778 = vmatprep.mubr.msk.f32.mxu1 %vm20932_vm8, %v24881_v42  ;;  %v9872_v6 = vadd.f32 %v19576_v3, %v23687_v9 }
 0xb96   : > { %19781 = vmatprep.subr.mxu0 %v24881_v42  ;;  %19786 = vmatprep.subr.mxu1 %v24881_v42  ;;  %v9867_v63 = vadd.f32 %v23687_v9, %v9866_v30 }
 0xb97   : > { %19774 = vmatmul.mubr.msk.f32.vlgmr.msra.gmra.mrb[166].mxu0 %vm3116_vm10, %v9538_v36  ;;  %19779 = vmatmul.mubr.msk.f32.vlgmr.msra.gmra.mrb[188].mxu1 %vm3116_vm10, %v9543_v55 }
 0xb98   : > { %v19579_v60 = vpop.f32.mrb[146].mxu1  ;;  %v23693_v56 = vpop.f32.mrb[138].mxu0  ;;  %19782 = vmatpush3.xpose.msk.msra.mxu0 %vm3116_vm10, %v9666_v37  ;;  %19787 = vmatpush3.xpose.msk.msra.mxu1 %vm3116_vm10, %v9985_v57 }
 0xb99   : > { %v9876_v22 = vpop.f32.mrb[147].mxu1  ;;  %v23700_v47 = vpop.f32.mrb[139].mxu0  ;;  %19783 = vmatprep.mubr.msk.f32.mxu0 %vm20932_vm8, %v24881_v42  ;;  %19788 = vmatprep.mubr.msk.f32.mxu1 %vm20932_vm8, %v24881_v42  ;;  %v9882_v23 = vadd.f32 %v19579_v60, %v23687_v9  ;;  %v17914_v60 = vld [vmem:[%s24867_s2 + $0x6] ss:$0 sm:$0xff] }
 0xb9a   : > { %19791 = vmatprep.subr.mxu0 %v24881_v42  ;;  %19796 = vmatprep.subr.mxu1 %v24881_v42  ;;  %v9877_v44 = vadd.f32 %v23687_v9, %v9876_v22  ;;  %v17900_v22 = vld [vmem:[%s24868_s3 + $0x6] ss:$0 sm:$0xff] }
 0xb9b   : > { %19784 = vmatmul.mubr.msk.f32.vlgmr.msra.gmra.mrb[168].mxu0 %vm3116_vm10, %v9548_v45  ;;  %19789 = vmatmul.mubr.msk.f32.vlgmr.msra.gmra.mrb[190].mxu1 %vm3116_vm10, %v9867_v63 }
 0xb9c   : > { %v19582_v41 = vpop.f32.mrb[148].mxu1  ;;  %v23714_v54 = vpop.f32.mrb[140].mxu0  ;;  %19792 = vmatpush3.xpose.msk.msra.mxu0 %vm3116_vm10, %v9990_v43  ;;  %19797 = vmatpush3.xpose.msk.msra.mxu1 %vm3116_vm10, %v9995_v14 }
 0xb9d   : > { %v9886_v10 = vpop.f32.mrb[149].mxu1  ;;  %v23720_v29 = vpop.f32.mrb[141].mxu0  ;;  %19793 = vmatprep.mubr.msk.f32.mxu0 %vm20932_vm8, %v24881_v42  ;;  %19798 = vmatprep.mubr.msk.f32.mxu1 %vm20932_vm8, %v24881_v42  ;;  %v9892_v8 = vadd.f32 %v19582_v41, %v23687_v9 }
 0xb9e   : > { %19801 = vmatprep.subr.mxu0 %v24881_v42  ;;  %19806 = vmatprep.subr.mxu1 %v24881_v42  ;;  %v9887_v59 = vadd.f32 %v23687_v9, %v9886_v10 }
 0xb9f   : > { %19794 = vmatmul.mubr.msk.f32.vlgmr.msra.gmra.mrb[170].mxu0 %vm3116_vm10, %v9872_v6  ;;  %19799 = vmatmul.mubr.msk.f32.vlgmr.msra.gmra.mrb[192].mxu1 %vm3116_vm10, %v9877_v44  ;;  %v10226_v44 = vadd.f32 %v23670_v21, %v17900_v22  ;;  %v10236_v21 = vadd.f32 %v23693_v56, %v17900_v22 }
 0xba0   : > { %v19585_v32 = vpop.f32.mrb[150].mxu1  ;;  %v23734_v25 = vpop.f32.mrb[142].mxu0  ;;  %19802 = vmatpush3.xpose.msk.msra.mxu0 %vm3116_vm10, %v10000_v27  ;;  %19807 = vmatpush3.xpose.msk.msra.mxu1 %vm3116_vm10, %v10005_v19  ;;  %v10221_v19 = vadd.f32 %v17900_v22, %v23677_v50  ;;  %v10231_v50 = vadd.f32 %v17900_v22, %v23700_v47  ;;  %v10246_v47 = vadd.f32 %v23714_v54, %v17900_v22  ;;  %v17956_v54 = vld [vmem:[%s24867_s2 + $0x7] ss:$0 sm:$0xff] }
 0xba1   : > { %v9896_v2 = vpop.f32.mrb[151].mxu1  ;;  %v23740_v46 = vpop.f32.mrb[143].mxu0  ;;  %19803 = vmatprep.mubr.msk.f32.mxu0 %vm20932_vm8, %v24881_v42  ;;  %19808 = vmatprep.mubr.msk.f32.mxu1 %vm20932_vm8, %v24881_v42  ;;  %v9902_v4 = vadd.f32 %v19585_v32, %v23687_v9 }
 0xba2   : > { %19811 = vmatprep.subr.mxu0 %v24881_v42  ;;  %19816 = vmatprep.subr.mxu1 %v24881_v42  ;;  %v9897_v11 = vadd.f32 %v23687_v9, %v9896_v2 }
 0xba3   : > { %19804 = vmatmul.mubr.msk.f32.vlgmr.msra.gmra.mrb[172].mxu0 %vm3116_vm10, %v9882_v23  ;;  %19809 = vmatmul.mubr.msk.f32.vlgmr.msra.gmra.mrb[194].mxu1 %vm3116_vm10, %v9887_v59 }
 0xba4   : > { %v23754_v17 = vpop.f32.mrb[152].mxu1  ;;  %v23756_v38 = vpop.f32.mrb[144].mxu0  ;;  %19812 = vmatpush3.xpose.msk.msra.mxu0 %vm3116_vm10, %v10010_v1  ;;  %19817 = vmatpush3.xpose.msk.msra.mxu1 %vm3116_vm10, %v10015_v52 }
 0xba5   : > { %v23762_v33 = vpop.f32.mrb[153].mxu1  ;;  %v23764_v15 = vpop.f32.mrb[145].mxu0  ;;  %19813 = vmatprep.mubr.msk.f32.mxu0 %vm20932_vm8, %v24881_v42  ;;  %19818 = vmatprep.mubr.msk.f32.mxu1 %vm20932_vm8, %v24881_v42 }
 0xba6   : > { %19821 = vmatprep.subr.mxu0 %v24881_v42  ;;  %19826 = vmatprep.subr.mxu1 %v24881_v42 }
 0xba7   : > { %19814 = vmatmul.mubr.msk.f32.vlgmr.msra.gmra.mrb[174].mxu0 %vm3116_vm10, %v9892_v8  ;;  %19819 = vmatmul.mubr.msk.f32.vlgmr.msra.gmra.mrb[196].mxu1 %vm3116_vm10, %v9897_v11 }
 0xba8   : > { %v23776_v31 = vpop.f32.mrb[154].mxu1  ;;  %v23778_v53 = vpop.f32.mrb[146].mxu0  ;;  %19822 = vmatpush3.xpose.msk.msra.mxu0 %vm3116_vm10, %v10020_v51  ;;  %19823 = vmatprep.mubr.msk.f32.mxu0 %vm20932_vm8, %v24881_v42 }
 0xba9   : > { %v23784_v24 = vpop.f32.mrb[155].mxu1  ;;  %v23786_v12 = vpop.f32.mrb[147].mxu0  ;;  %19831 = vmatprep.subr.mxu0 %v24881_v42  ;;  %19828 = vmatprep.mubr.msk.f32.mxu1 %vm20932_vm8, %v24881_v42 }
 0xbaa   : > { %24910 = vst [vmem:[#allocation20_spill] sm:$0xff] %v23786_v12 }
 0xbab   : > { %19824 = vmatmul.mubr.msk.f32.vlgmr.msra.gmra.mrb[176].mxu0 %vm3116_vm10, %v9902_v4 }
 0xbac   : > { %v23792_v62 = vpop.f32.mrb[156].mxu1  ;;  %v23794_v3 = vpop.f32.mrb[148].mxu0  ;;  %19833 = vmatprep.mubr.msk.f32.mxu0 %vm20932_vm8, %v24881_v42 }
 0xbad   : > { %24911 = vst [vmem:[#allocation21_spill] sm:$0xff] %v23794_v3  ;;  %v23798_v36 = vpop.f32.mrb[157].mxu1  ;;  %v23800_v55 = vpop.f32.mrb[149].mxu0 }
 0xbae   : > { %24912 = vst [vmem:[#allocation22_spill] sm:$0xff] %v23800_v55 }
 0xbb0   : > { %v23802_v30 = vpop.f32.mrb[158].mxu1  ;;  %v23804_v57 = vpop.f32.mrb[150].mxu0 }
 0xbb1   : > { %24913 = vst [vmem:[#allocation23_spill] sm:$0xff] %v23804_v57  ;;  %v23806_v37 = vpop.f32.mrb[159].mxu1  ;;  %v23808_v9 = vpop.f32.mrb[151].mxu0 }
 0xbb2   : > { %24914 = vst [vmem:[#allocation7_spill] sm:$0xff] %v23808_v9 }
 0xbb4   : > { %v19656_v45 = vpop.f32.mrb[160].mxu1  ;;  %v19716_v63 = vpop.f32.mrb[152].mxu0 }
 0xbb5   : > { %v10344_v43 = vadd.f32 %v19656_v45, %v17914_v60  ;;  %v10338_v14 = vpop.f32.mrb[161].mxu1  ;;  %v10692_v41 = vpop.f32.mrb[153].mxu0 }
 0xbb6   : > { %v10339_v6 = vadd.f32 %v17914_v60, %v10338_v14 }
 0xbb7   : > { %19832 = vmatpush3.xpose.msk.msra.mxu0 %vm3116_vm10, %v10344_v43  ;;  %v10241_v43 = vadd.f32 %v17900_v22, %v23720_v29  ;;  %v10256_v29 = vadd.f32 %v23734_v25, %v17900_v22  ;;  %v10693_v25 = vadd.f32 %v17956_v54, %v10692_v41 }
 0xbb8   : > { %v19659_v10 = vpop.f32.mrb[162].mxu1  ;;  %v23818_v27 = vpop.f32.mrb[154].mxu0  ;;  %19827 = vmatpush3.xpose.msk.msra.mxu1 %vm3116_vm10, %v10339_v6  ;;  %19841 = vmatprep.subr.mxu0 %v24881_v42 }
 0xbb9   : > { %v10354_v32 = vadd.f32 %v19659_v10, %v17914_v60  ;;  %v10348_v23 = vpop.f32.mrb[163].mxu1  ;;  %v23823_v59 = vpop.f32.mrb[155].mxu0  ;;  %19836 = vmatprep.subr.mxu1 %v24881_v42 }
 0xbba   : > { %v10349_v2 = vadd.f32 %v17914_v60, %v10348_v23  ;;  %19834 = vmatmul.mubr.msk.f32.vlgmr.msra.gmra.mrb[178].mxu0 %vm3116_vm10, %v10226_v44  ;;  %v10698_v23 = vadd.f32 %v19716_v63, %v17956_v54  ;;  %v10703_v41 = vadd.f32 %v17956_v54, %v23823_v59 }
 0xbbb   : > { %19829 = vmatmul.mubr.msk.f32.vlgmr.msra.gmra.mrb[198].mxu1 %vm3116_vm10, %v10221_v19  ;;  %19842 = vmatpush3.xpose.msk.msra.mxu0 %vm3116_vm10, %v10354_v32  ;;  %v10251_v32 = vadd.f32 %v17900_v22, %v23740_v46  ;;  %v10708_v22 = vadd.f32 %v23818_v27, %v17956_v54 }
 0xbbc   : > { %v19662_v1 = vpop.f32.mrb[164].mxu1  ;;  %v23830_v52 = vpop.f32.mrb[156].mxu0  ;;  %19837 = vmatpush3.xpose.msk.msra.mxu1 %vm3116_vm10, %v10349_v2  ;;  %19843 = vmatprep.mubr.msk.f32.mxu0 %vm20932_vm8, %v24881_v42 }
 0xbbd   : > { %v10364_v8 = vadd.f32 %v19662_v1, %v17914_v60  ;;  %v10358_v11 = vpop.f32.mrb[165].mxu1  ;;  %v23836_v51 = vpop.f32.mrb[157].mxu0  ;;  %19838 = vmatprep.mubr.msk.f32.mxu1 %vm20932_vm8, %v24881_v42  ;;  %19851 = vmatprep.subr.mxu0 %v24881_v42  ;;  %v10718_v27 = vadd.f32 %v23830_v52, %v17956_v54 }
 0xbbe   : > { %v10359_v56 = vadd.f32 %v17914_v60, %v10358_v11  ;;  %19844 = vmatmul.mubr.msk.f32.vlgmr.msra.gmra.mrb[180].mxu0 %vm3116_vm10, %v10236_v21  ;;  %19846 = vmatprep.subr.mxu1 %v24881_v42  ;;  %v10713_v59 = vadd.f32 %v17956_v54, %v23836_v51 }
 0xbbf   : > { %19839 = vmatmul.mubr.msk.f32.vlgmr.msra.gmra.mrb[200].mxu1 %vm3116_vm10, %v10231_v50  ;;  %19852 = vmatpush3.xpose.msk.msra.mxu0 %vm3116_vm10, %v10364_v8 }
 0xbc0   : > { %v19665_v4 = vpop.f32.mrb[166].mxu1  ;;  %v19725_v45 = vpop.f32.mrb[158].mxu0  ;;  %19847 = vmatpush3.xpose.msk.msra.mxu1 %vm3116_vm10, %v10359_v56  ;;  %19853 = vmatprep.mubr.msk.f32.mxu0 %vm20932_vm8, %v24881_v42 }
 0xbc1   : > { %v10374_v14 = vadd.f32 %v19665_v4, %v17914_v60  ;;  %v10368_v6 = vpop.f32.mrb[167].mxu1  ;;  %v10722_v44 = vpop.f32.mrb[159].mxu0  ;;  %19848 = vmatprep.mubr.msk.f32.mxu1 %vm20932_vm8, %v24881_v42  ;;  %19861 = vmatprep.subr.mxu0 %v24881_v42  ;;  %v10728_v52 = vadd.f32 %v19725_v45, %v17956_v54  ;;  %v9754_v45 = vadd.f32 %v23586_v61, %v23593_v40 }
 0xbc2   : > { %v10369_v10 = vadd.f32 %v17914_v60, %v10368_v6  ;;  %19854 = vmatmul.mubr.msk.f32.vlgmr.msra.gmra.mrb[182].mxu0 %vm3116_vm10, %v10246_v47  ;;  %19856 = vmatprep.subr.mxu1 %v24881_v42  ;;  %v17942_v60 = vld [vmem:[%s24868_s3 + $0x7] ss:$0 sm:$0xff]  ;;  %v10723_v51 = vadd.f32 %v17956_v54, %v10722_v44 }
 0xbc3   : > { %19849 = vmatmul.mubr.msk.f32.vlgmr.msra.gmra.mrb[202].mxu1 %vm3116_vm10, %v10241_v43  ;;  %19862 = vmatpush3.xpose.msk.msra.mxu0 %vm3116_vm10, %v10374_v14 }
 0xbc4   : > { %v19696_v19 = vpop.f32.mrb[168].mxu1  ;;  %19857 = vmatpush3.xpose.msk.msra.mxu1 %vm3116_vm10, %v10369_v10  ;;  %19863 = vmatprep.mubr.msk.f32.mxu0 %vm20932_vm8, %v24881_v42 }
 0xbc5   : > { %v10574_v2 = vpop.f32.mrb[169].mxu1  ;;  %19858 = vmatprep.mubr.msk.f32.mxu1 %vm20932_vm8, %v24881_v42  ;;  %19871 = vmatprep.subr.mxu0 %v24881_v42  ;;  %v10580_v46 = vadd.f32 %v19696_v19, %v17942_v60 }
 0xbc6   : > { %19864 = vmatmul.mubr.msk.f32.vlgmr.msra.gmra.mrb[184].mxu0 %vm3116_vm10, %v10256_v29  ;;  %19866 = vmatprep.subr.mxu1 %v24881_v42  ;;  %v10575_v21 = vadd.f32 %v17942_v60, %v10574_v2  ;;  %v9749_v29 = vadd.f32 %v23593_v40, %v23588_v28 }
 0xbc7   : > { %19859 = vmatmul.mubr.msk.f32.vlgmr.msra.gmra.mrb[204].mxu1 %vm3116_vm10, %v10251_v32  ;;  %19872 = vmatpush3.xpose.msk.msra.mxu0 %vm3116_vm10, %v10698_v23 }
 0xbc8   : > { %v19699_v63 = vpop.f32.mrb[170].mxu1  ;;  %19867 = vmatpush3.xpose.msk.msra.mxu1 %vm3116_vm10, %v10693_v25  ;;  %19873 = vmatprep.mubr.msk.f32.mxu0 %vm20932_vm8, %v24881_v42 }
 0xbc9   : > { %v10584_v1 = vpop.f32.mrb[171].mxu1  ;;  %19868 = vmatprep.mubr.msk.f32.mxu1 %vm20932_vm8, %v24881_v42  ;;  %19881 = vmatprep.subr.mxu0 %v24881_v42  ;;  %v10590_v50 = vadd.f32 %v19699_v63, %v17942_v60 }
 0xbca   : > { %19874 = vmatmul.mubr.msk.f32.vlgmr.msra.gmra.mrb[186].mxu0 %vm3116_vm10, %v10580_v46  ;;  %19876 = vmatprep.subr.mxu1 %v24881_v42  ;;  %v10585_v11 = vadd.f32 %v17942_v60, %v10584_v1 }
 0xbcb   : > { %19869 = vmatmul.mubr.msk.f32.vlgmr.msra.gmra.mrb[206].mxu1 %vm3116_vm10, %v10575_v21  ;;  %19882 = vmatpush3.xpose.msk.msra.mxu0 %vm3116_vm10, %v10708_v22 }
 0xbcc   : > { %v19702_v8 = vpop.f32.mrb[172].mxu1  ;;  %19877 = vmatpush3.xpose.msk.msra.mxu1 %vm3116_vm10, %v10703_v41  ;;  %19883 = vmatprep.mubr.msk.f32.mxu0 %vm20932_vm8, %v24881_v42 }
 0xbcd   : > { %v10594_v56 = vpop.f32.mrb[173].mxu1  ;;  %19878 = vmatprep.mubr.msk.f32.mxu1 %vm20932_vm8, %v24881_v42  ;;  %19891 = vmatprep.subr.mxu0 %v24881_v42  ;;  %v10600_v47 = vadd.f32 %v19702_v8, %v17942_v60 }
 0xbce   : > { %19884 = vmatmul.mubr.msk.f32.vlgmr.msra.gmra.mrb[188].mxu0 %vm3116_vm10, %v10590_v50  ;;  %19886 = vmatprep.subr.mxu1 %v24881_v42  ;;  %v10595_v43 = vadd.f32 %v17942_v60, %v10594_v56 }
 0xbcf   : > { %19879 = vmatmul.mubr.msk.f32.vlgmr.msra.gmra.mrb[208].mxu1 %vm3116_vm10, %v10585_v11  ;;  %19892 = vmatpush3.xpose.msk.msra.mxu0 %vm3116_vm10, %v10718_v27 }
 0xbd0   : > { %v19705_v4 = vpop.f32.mrb[174].mxu1  ;;  %19887 = vmatpush3.xpose.msk.msra.mxu1 %vm3116_vm10, %v10713_v59  ;;  %19893 = vmatprep.mubr.msk.f32.mxu0 %vm20932_vm8, %v24881_v42 }
 0xbd1   : > { %v10604_v14 = vpop.f32.mrb[175].mxu1  ;;  %19888 = vmatprep.mubr.msk.f32.mxu1 %vm20932_vm8, %v24881_v42  ;;  %19901 = vmatprep.subr.mxu0 %v24881_v42  ;;  %v10610_v6 = vadd.f32 %v19705_v4, %v17942_v60 }
 0xbd2   : > { %19894 = vmatmul.mubr.msk.f32.vlgmr.msra.gmra.mrb[190].mxu0 %vm3116_vm10, %v10600_v47  ;;  %19896 = vmatprep.subr.mxu1 %v24881_v42  ;;  %v10605_v44 = vadd.f32 %v17942_v60, %v10604_v14 }
 0xbd3   : > { %19889 = vmatmul.mubr.msk.f32.vlgmr.msra.gmra.mrb[210].mxu1 %vm3116_vm10, %v10595_v43  ;;  %19902 = vmatpush3.xpose.msk.msra.mxu0 %vm3116_vm10, %v10728_v52 }
 0xbd4   : > { %v23909_v10 = vpop.f32.mrb[176].mxu1  ;;  %19897 = vmatpush3.xpose.msk.msra.mxu1 %vm3116_vm10, %v10723_v51  ;;  %19903 = vmatprep.mubr.msk.f32.mxu0 %vm20932_vm8, %v24881_v42 }
 0xbd5   : > { %24915 = vst [vmem:[#allocation5_spill] sm:$0xff] %v23909_v10  ;;  %v23916_v54 = vpop.f32.mrb[177].mxu1  ;;  %19898 = vmatprep.mubr.msk.f32.mxu1 %vm20932_vm8, %v24881_v42  ;;  %19911 = vmatprep.subr.mxu0 %v24881_v42 }
 0xbd6   : > { %24916 = vst [vmem:[#allocation6_spill] sm:$0xff] %v23916_v54  ;;  %19904 = vmatmul.mubr.msk.f32.vlgmr.msra.gmra.mrb[192].mxu0 %vm3116_vm10, %v10610_v6  ;;  %19906 = vmatprep.subr.mxu1 %v24881_v42 }
 0xbd7   : > { %19899 = vmatmul.mubr.msk.f32.vlgmr.msra.gmra.mrb[212].mxu1 %vm3116_vm10, %v10605_v44  ;;  %19912 = vmatpush3.msra.mxu0 %v9754_v45 }
 0xbd8   : > { %v23926_v19 = vpop.f32.mrb[178].mxu1  ;;  %19907 = vmatpush3.msra.mxu1 %v9749_v29  ;;  %19908 = vmatprep.mubr.msk.f32.mxu1 %vm20932_vm8, %v24881_v42 }
 0xbd9   : > { %24917 = vst [vmem:[#allocation4_spill] sm:$0xff] %v23926_v19  ;;  %v23930_v61 = vpop.f32.mrb[179].mxu1  ;;  %19916 = vmatprep.subr.mxu1 %v24881_v42  ;;  %19913 = vmatprep.mubr.msk.f32.mxu0 %vm20932_vm8, %v24881_v42 }
 0xbda   : > { %24918 = vst [vmem:[#allocation9_spill] sm:$0xff] %v23930_v61  ;;  %19921 = vmatprep.subr.mxu0 %v24881_v42 }
 0xbdc   : > { %v23936_v28 = vpop.f32.mrb[180].mxu1 }
 0xbdd   : > { %24919 = vst [vmem:[#allocation8_spill] sm:$0xff] %v23936_v28  ;;  %v23938_v40 = vpop.f32.mrb[181].mxu1 }
 0xbde   : > { %24920 = vst [vmem:[#allocation11_spill] sm:$0xff] %v23938_v40 }
 0xbe0   : > { %v23940_v32 = vpop.f32.mrb[182].mxu1 }
 0xbe1   : > { %24921 = vst [vmem:[#allocation10_spill] sm:$0xff] %v23940_v32  ;;  %v23942_v23 = vpop.f32.mrb[183].mxu1 }
 0xbe2   : > { %24922 = vst [vmem:[#allocation24_spill] sm:$0xff] %v23942_v23 }
 0xc5e   : > { %v10921_v60 = vpop.f32.mrb[160].mxu0 }
 0xc5f   : > { %v23944_v2 = vmul.f32 0.35355338, %v10921_v60  ;;  %v19750_v25 = vpop.f32.mrb[161].mxu0 }
 0xc61   : > { %v13313_v46 = vsel %vm3116_vm10, %v23944_v2, -inf }
 0xc62   : > { %v11073_v63 = vpop.f32.mrb[184].mxu1  ;;  %13314 = vmax.xlane.f32.xlu1 %v13313_v46  ;;  %v10997_v22 = vpop.f32.mrb[162].mxu0 }
 0xc63   : > { %v23948_v21 = vmul.f32 0.35355338, %v11073_v63  ;;  %v23950_v1 = vmul.f32 0.35355338, %v10997_v22  ;;  %v19755_v41 = vpop.f32.mrb[163].mxu0  ;;  %v19760_v50 = vpop.f32.mrb[185].mxu1 }
 0xc65   : > { %v13319_v8 = vsel %vm3116_vm10, %v23948_v21, -inf  ;;  %v13316_v27 = vsel %vm3116_vm10, %v23950_v1, -inf }
 0xc66   : > { %v11225_v11 = vpop.f32.mrb[186].mxu1  ;;  %13320 = vmax.xlane.f32.xlu1 %v13319_v8  ;;  %13317 = vmax.xlane.f32.xlu0 %v13316_v27  ;;  %v11149_v56 = vpop.f32.mrb[164].mxu0 }
 0xc67   : > { %v23956_v59 = vmul.f32 0.35355338, %v11225_v11  ;;  %v23958_v47 = vmul.f32 0.35355338, %v11149_v56  ;;  %v19765_v4 = vpop.f32.mrb[165].mxu0  ;;  %v19770_v52 = vpop.f32.mrb[187].mxu1 }
 0xc69   : > { %v13325_v43 = vsel %vm3116_vm10, %v23956_v59, -inf  ;;  %v13322_v14 = vsel %vm3116_vm10, %v23958_v47, -inf }
 0xc6a   : > { %13326 = vmax.xlane.f32.xlu1 %v13325_v43  ;;  %13323 = vmax.xlane.f32.xlu0 %v13322_v14  ;;  %v11301_v51 = vpop.f32.mrb[166].mxu0  ;;  %v11377_v6 = vpop.f32.mrb[188].mxu1 }
 0xc6b   : > { %v23964_v45 = vmul.f32 0.35355338, %v11301_v51  ;;  %v23966_v44 = vmul.f32 0.35355338, %v11377_v6  ;;  %v19775_v29 = vpop.f32.mrb[167].mxu0  ;;  %v19780_v60 = vpop.f32.mrb[189].mxu1 }
 0xc6d   : > { %v13328_v25 = vsel %vm3116_vm10, %v23964_v45, -inf  ;;  %v13331_v46 = vsel %vm3116_vm10, %v23966_v44, -inf }
 0xc6e   : > { %13329 = vmax.xlane.f32.xlu0 %v13328_v25  ;;  %v11453_v63 = vpop.f32.mrb[168].mxu0  ;;  %13332 = vmax.xlane.f32.xlu1 %v13331_v46  ;;  %v11529_v22 = vpop.f32.mrb[190].mxu1 }
 0xc6f   : > { %v23972_v41 = vmul.f32 0.35355338, %v11453_v63  ;;  %v23974_v50 = vmul.f32 0.35355338, %v11529_v22  ;;  %v19785_v8 = vpop.f32.mrb[169].mxu0  ;;  %v19790_v27 = vpop.f32.mrb[191].mxu1 }
 0xc71   : > { %v13334_v11 = vsel %vm3116_vm10, %v23972_v41, -inf  ;;  %v13337_v56 = vsel %vm3116_vm10, %v23974_v50, -inf }
 0xc72   : > { %13335 = vmax.xlane.f32.xlu0 %v13334_v11  ;;  %v11605_v4 = vpop.f32.mrb[170].mxu0  ;;  %13338 = vmax.xlane.f32.xlu1 %v13337_v56  ;;  %v11681_v52 = vpop.f32.mrb[192].mxu1 }
 0xc73   : > { %v23980_v43 = vmul.f32 0.35355338, %v11605_v4  ;;  %v23982_v14 = vmul.f32 0.35355338, %v11681_v52  ;;  %v19795_v51 = vpop.f32.mrb[171].mxu0  ;;  %v19800_v6 = vpop.f32.mrb[193].mxu1 }
 0xc75   : > { %v13340_v29 = vsel %vm3116_vm10, %v23980_v43, -inf  ;;  %v13343_v60 = vsel %vm3116_vm10, %v23982_v14, -inf }
 0xc76   : > { %13341 = vmax.xlane.f32.xlu0 %v13340_v29  ;;  %v11757_v25 = vpop.f32.mrb[172].mxu0  ;;  %13344 = vmax.xlane.f32.xlu1 %v13343_v60  ;;  %v11833_v46 = vpop.f32.mrb[194].mxu1 }
 0xc77   : > { %v23988_v63 = vmul.f32 0.35355338, %v11757_v25  ;;  %v23990_v22 = vmul.f32 0.35355338, %v11833_v46  ;;  %v19805_v8 = vpop.f32.mrb[173].mxu0  ;;  %v19810_v27 = vpop.f32.mrb[195].mxu1 }
 0xc79   : > { %v13346_v11 = vsel %vm3116_vm10, %v23988_v63, -inf  ;;  %v13349_v56 = vsel %vm3116_vm10, %v23990_v22, -inf }
 0xc7a   : > { %13347 = vmax.xlane.f32.xlu0 %v13346_v11  ;;  %v11909_v4 = vpop.f32.mrb[174].mxu0  ;;  %13350 = vmax.xlane.f32.xlu1 %v13349_v56  ;;  %v11985_v52 = vpop.f32.mrb[196].mxu1 }
 0xc7b   : > { %v23996_v51 = vmul.f32 0.35355338, %v11909_v4  ;;  %v23998_v6 = vmul.f32 0.35355338, %v11985_v52  ;;  %v19815_v29 = vpop.f32.mrb[175].mxu0  ;;  %v19820_v60 = vpop.f32.mrb[197].mxu1 }
 0xc7d   : > { %v13352_v25 = vsel %vm3116_vm10, %v23996_v51, -inf  ;;  %v13355_v46 = vsel %vm3116_vm10, %v23998_v6, -inf }
 0xc7e   : > { %13353 = vmax.xlane.f32.xlu0 %v13352_v25  ;;  %v12061_v8 = vpop.f32.mrb[176].mxu0  ;;  %13356 = vmax.xlane.f32.xlu1 %v13355_v46 }
 0xc7f   : > { %v24004_v27 = vmul.f32 0.35355338, %v12061_v8  ;;  %v19825_v11 = vpop.f32.mrb[177].mxu0 }
 0xc81   : > { %v13358_v56 = vsel %vm3116_vm10, %v24004_v27, -inf }
 0xc82   : > { %13359 = vmax.xlane.f32.xlu0 %v13358_v56 }
 0xc8d   : > { %v12213_v4 = vpop.f32.mrb[178].mxu0 }
 0xc8e   : > { %v24008_v52 = vmul.f32 0.35355338, %v12213_v4  ;;  %v12137_v29 = vpop.f32.mrb[198].mxu1  ;;  %v19835_v60 = vpop.f32.mrb[179].mxu0 }
 0xc8f   : > { %v24010_v20 = vmul.f32 0.35355338, %v12137_v29  ;;  %v19830_v58 = vpop.f32.mrb[199].mxu1 }
 0xc90   : > { %v13364_v25 = vsel %vm3116_vm10, %v24008_v52, -inf }
 0xc91   : > { %13365 = vmax.xlane.f32.xlu0 %v13364_v25  ;;  %v12365_v46 = vpop.f32.mrb[180].mxu0  ;;  %v13361_v8 = vsel %vm3116_vm10, %v24010_v20, -inf }
 0xc92   : > { %v24016_v11 = vmul.f32 0.35355338, %v12365_v46  ;;  %v19845_v35 = vpop.f32.mrb[181].mxu0  ;;  %13362 = vmax.xlane.f32.xlu1 %v13361_v8  ;;  %v12289_v56 = vpop.f32.mrb[200].mxu1 }
 0xc93   : > { %v24018_v4 = vmul.f32 0.35355338, %v12289_v56  ;;  %v19840_v0 = vpop.f32.mrb[201].mxu1 }
 0xc94   : > { %v13370_v29 = vsel %vm3116_vm10, %v24016_v11, -inf }
 0xc95   : > { %13371 = vmax.xlane.f32.xlu0 %v13370_v29  ;;  %v12517_v58 = vpop.f32.mrb[182].mxu0  ;;  %v13367_v60 = vsel %vm3116_vm10, %v24018_v4, -inf }
 0xc96   : > { %v24024_v25 = vmul.f32 0.35355338, %v12517_v58  ;;  %v19855_v16 = vpop.f32.mrb[183].mxu0  ;;  %13368 = vmax.xlane.f32.xlu1 %v13367_v60  ;;  %v12441_v46 = vpop.f32.mrb[202].mxu1 }
 0xc97   : > { %v24026_v49 = vmul.f32 0.35355338, %v12441_v46  ;;  %v19850_v35 = vpop.f32.mrb[203].mxu1 }
 0xc98   : > { %v13376_v8 = vsel %vm3116_vm10, %v24024_v25, -inf }
 0xc99   : > { %13377 = vmax.xlane.f32.xlu0 %v13376_v8  ;;  %v12669_v0 = vpop.f32.mrb[184].mxu0  ;;  %v13373_v56 = vsel %vm3116_vm10, %v24026_v49, -inf }
 0xc9a   : > { %v24032_v29 = vmul.f32 0.35355338, %v12669_v0  ;;  %v19865_v18 = vpop.f32.mrb[185].mxu0  ;;  %13374 = vmax.xlane.f32.xlu1 %v13373_v56  ;;  %v12593_v58 = vpop.f32.mrb[204].mxu1 }
 0xc9b   : > { %v24034_v48 = vmul.f32 0.35355338, %v12593_v58  ;;  %v19860_v16 = vpop.f32.mrb[205].mxu1 }
 0xc9c   : > { %v13382_v60 = vsel %vm3116_vm10, %v24032_v29, -inf }
 0xc9d   : > { %13383 = vmax.xlane.f32.xlu0 %v13382_v60  ;;  %v12821_v46 = vpop.f32.mrb[186].mxu0  ;;  %v13379_v35 = vsel %vm3116_vm10, %v24034_v48, -inf }
 0xc9e   : > { %v24040_v8 = vmul.f32 0.35355338, %v12821_v46  ;;  %v19875_v23 = vpop.f32.mrb[187].mxu0  ;;  %13380 = vmax.xlane.f32.xlu1 %v13379_v35  ;;  %v12745_v0 = vpop.f32.mrb[206].mxu1 }
 0xc9f   : > { %v24042_v32 = vmul.f32 0.35355338, %v12745_v0  ;;  %v19870_v18 = vpop.f32.mrb[207].mxu1 }
 0xca0   : > { %v13388_v56 = vsel %vm3116_vm10, %v24040_v8, -inf }
 0xca1   : > { %13389 = vmax.xlane.f32.xlu0 %v13388_v56  ;;  %v12973_v58 = vpop.f32.mrb[188].mxu0  ;;  %v13385_v16 = vsel %vm3116_vm10, %v24042_v32, -inf }
 0xca2   : > { %v24048_v60 = vmul.f32 0.35355338, %v12973_v58  ;;  %v19885_v40 = vpop.f32.mrb[189].mxu0  ;;  %13386 = vmax.xlane.f32.xlu1 %v13385_v16  ;;  %v12897_v46 = vpop.f32.mrb[208].mxu1 }
 0xca3   : > { %v24050_v28 = vmul.f32 0.35355338, %v12897_v46  ;;  %v19880_v23 = vpop.f32.mrb[209].mxu1 }
 0xca4   : > { %v13394_v35 = vsel %vm3116_vm10, %v24048_v60, -inf }
 0xca5   : > { %13395 = vmax.xlane.f32.xlu0 %v13394_v35  ;;  %v13125_v0 = vpop.f32.mrb[190].mxu0  ;;  %v13391_v18 = vsel %vm3116_vm10, %v24050_v28, -inf }
 0xca6   : > { %v24056_v56 = vmul.f32 0.35355338, %v13125_v0  ;;  %v19895_v61 = vpop.f32.mrb[191].mxu0  ;;  %13392 = vmax.xlane.f32.xlu1 %v13391_v18  ;;  %v13049_v58 = vpop.f32.mrb[210].mxu1 }
 0xca7   : > { %v24058_v19 = vmul.f32 0.35355338, %v13049_v58  ;;  %v19890_v40 = vpop.f32.mrb[211].mxu1 }
 0xca8   : > { %v13400_v16 = vsel %vm3116_vm10, %v24056_v56, -inf }
 0xca9   : > { %13401 = vmax.xlane.f32.xlu0 %v13400_v16  ;;  %v13277_v46 = vpop.f32.mrb[192].mxu0  ;;  %v13397_v23 = vsel %vm3116_vm10, %v24058_v19, -inf }
 0xcaa   : > { %v24064_v35 = vmul.f32 0.35355338, %v13277_v46  ;;  %v19905_v54 = vpop.f32.mrb[193].mxu0  ;;  %13398 = vmax.xlane.f32.xlu1 %v13397_v23  ;;  %v13201_v0 = vpop.f32.mrb[212].mxu1 }
 0xcab   : > { %v24066_v10 = vmul.f32 0.35355338, %v13201_v0  ;;  %v19900_v61 = vpop.f32.mrb[213].mxu1 }
 0xcac   : > { %v13406_v18 = vsel %vm3116_vm10, %v24064_v35, -inf }
 0xcad   : > { %13407 = vmax.xlane.f32.xlu0 %v13406_v18  ;;  %v13403_v58 = vsel %vm3116_vm10, %v24066_v10, -inf }
 0xcae   : > { %13404 = vmax.xlane.f32.xlu1 %v13403_v58 }
 0xcef   : > { %v13315_v40 = vpop.xlane.xlu1 %13314 }
 0xcf0   : > { %v13409_v16 = vsub.f32 %v23944_v2, %v13315_v40 }
 0xcf2   : > { %v13441_v9 = vmul.f32 1.442695, %v13409_v16 }
 0xcf3   : > { %v13321_v46 = vpop.xlane.xlu1 %13320  ;;  %v13318_v57 = vpop.xlane.xlu0 %13317 }
 0xcf4   : > { %20754 = vpow2.f32 %v13441_v9  ;;  %v13411_v54 = vsub.f32 %v23948_v21, %v13321_v46  ;;  %v13410_v23 = vsub.f32 %v23950_v1, %v13318_v57 }
 0xcf6   : > { %v13445_v0 = vmul.f32 1.442695, %v13411_v54  ;;  %v13443_v61 = vmul.f32 1.442695, %v13410_v23 }
 0xcf7   : > { %v13327_v55 = vpop.xlane.xlu1 %13326  ;;  %v13324_v3 = vpop.xlane.xlu0 %13323 }
 0xcf8   : > { %20756 = vpow2.f32 %v13445_v0  ;;  %v13413_v18 = vsub.f32 %v23956_v59, %v13327_v55  ;;  %v13412_v58 = vsub.f32 %v23958_v47, %v13324_v3 }
 0xcf9   : > { %20758 = vpow2.f32 %v13443_v61 }
 0xcfa   : > { %v13449_v12 = vmul.f32 1.442695, %v13413_v18  ;;  %v13447_v2 = vmul.f32 1.442695, %v13412_v58 }
 0xcfb   : > { %v13330_v40 = vpop.xlane.xlu0 %13329  ;;  %v13333_v16 = vpop.xlane.xlu1 %13332 }
 0xcfc   : > { %20760 = vpow2.f32 %v13449_v12  ;;  %v13414_v9 = vsub.f32 %v23964_v45, %v13330_v40  ;;  %v13415_v21 = vsub.f32 %v23966_v44, %v13333_v16 }
 0xcfd   : > { %20762 = vpow2.f32 %v13447_v2 }
 0xcfe   : > { %v24079_v57 = vpop.eup %20754  ;;  %v13451_v1 = vmul.f32 1.442695, %v13414_v9  ;;  %v13453_v46 = vmul.f32 1.442695, %v13415_v21 }
 0xcff   : > { %v13336_v54 = vpop.xlane.xlu0 %13335  ;;  %v13339_v23 = vpop.xlane.xlu1 %13338  ;;  %v13505_v3 = vsel %vm3116_vm10, %v24079_v57, 0.0 }
 0xd00   : > { %20764 = vpow2.f32 %v13451_v1  ;;  %v13416_v55 = vsub.f32 %v23972_v41, %v13336_v54  ;;  %v13417_v59 = vsub.f32 %v23974_v50, %v13339_v23  ;;  %13506 = vadd.xlane.f32.xlu1 %v13505_v3 }
 0xd01   : > { %20766 = vpow2.f32 %v13453_v46 }
 0xd02   : > { %v24085_v12 = vpop.eup %20756  ;;  %v13455_v47 = vmul.f32 1.442695, %v13416_v55  ;;  %v13457_v45 = vmul.f32 1.442695, %v13417_v59 }
 0xd03   : > { %v24087_v44 = vpop.eup %20758  ;;  %v13342_v0 = vpop.xlane.xlu0 %13341  ;;  %v13511_v18 = vsel %vm3116_vm10, %v24085_v12, 0.0 }
 0xd04   : > { %v13345_v61 = vpop.xlane.xlu1 %13344  ;;  %20768 = vpow2.f32 %v13455_v47  ;;  %v13418_v58 = vsub.f32 %v23980_v43, %v13342_v0  ;;  %v13508_v50 = vsel %vm3116_vm10, %v24087_v44, 0.0  ;;  %13512 = vadd.xlane.f32.xlu1 %v13511_v18 }
 0xd05   : > { %v13419_v41 = vsub.f32 %v23982_v14, %v13345_v61  ;;  %20770 = vpow2.f32 %v13457_v45  ;;  %13509 = vadd.xlane.f32.xlu0 %v13508_v50 }
 0xd06   : > { %v24095_v2 = vpop.eup %20760  ;;  %v13459_v40 = vmul.f32 1.442695, %v13418_v58 }
 0xd07   : > { %v13461_v16 = vmul.f32 1.442695, %v13419_v41  ;;  %v24097_v9 = vpop.eup %20762  ;;  %v13348_v21 = vpop.xlane.xlu0 %13347  ;;  %v13517_v46 = vsel %vm3116_vm10, %v24095_v2, 0.0 }
 0xd08   : > { %v13351_v1 = vpop.xlane.xlu1 %13350  ;;  %20772 = vpow2.f32 %v13459_v40  ;;  %v13420_v43 = vsub.f32 %v23988_v63, %v13348_v21  ;;  %v13514_v54 = vsel %vm3116_vm10, %v24097_v9, 0.0  ;;  %13518 = vadd.xlane.f32.xlu1 %v13517_v46 }
 0xd09   : > { %v13421_v14 = vsub.f32 %v23990_v22, %v13351_v1  ;;  %20774 = vpow2.f32 %v13461_v16  ;;  %13515 = vadd.xlane.f32.xlu0 %v13514_v54 }
 0xd0a   : > { %v24105_v23 = vpop.eup %20764  ;;  %v13463_v3 = vmul.f32 1.442695, %v13420_v43 }
 0xd0b   : > { %v13465_v55 = vmul.f32 1.442695, %v13421_v14  ;;  %v24107_v59 = vpop.eup %20766  ;;  %v13354_v47 = vpop.xlane.xlu0 %13353  ;;  %v13520_v0 = vsel %vm3116_vm10, %v24105_v23, 0.0 }
 0xd0c   : > { %v13357_v45 = vpop.xlane.xlu1 %13356  ;;  %20776 = vpow2.f32 %v13463_v3  ;;  %v13422_v63 = vsub.f32 %v23996_v51, %v13354_v47  ;;  %v13523_v61 = vsel %vm3116_vm10, %v24107_v59, 0.0 }
 0xd0d   : > { %v13423_v22 = vsub.f32 %v23998_v6, %v13357_v45  ;;  %20778 = vpow2.f32 %v13465_v55  ;;  %13521 = vadd.xlane.f32.xlu0 %v13520_v0  ;;  %13524 = vadd.xlane.f32.xlu1 %v13523_v61 }
 0xd0e   : > { %v24115_v18 = vpop.eup %20768  ;;  %v13467_v58 = vmul.f32 1.442695, %v13422_v63 }
 0xd0f   : > { %v13469_v41 = vmul.f32 1.442695, %v13423_v22  ;;  %v24117_v50 = vpop.eup %20770  ;;  %v13360_v40 = vpop.xlane.xlu0 %13359  ;;  %v13526_v16 = vsel %vm3116_vm10, %v24115_v18, 0.0 }
 0xd10   : > { %20780 = vpow2.f32 %v13467_v58  ;;  %v13424_v51 = vsub.f32 %v24004_v27, %v13360_v40  ;;  %v13529_v6 = vsel %vm3116_vm10, %v24117_v50, 0.0 }
 0xd11   : > { %20782 = vpow2.f32 %v13469_v41  ;;  %13527 = vadd.xlane.f32.xlu0 %v13526_v16  ;;  %13530 = vadd.xlane.f32.xlu1 %v13529_v6 }
 0xd12   : > { %v24124_v21 = vpop.eup %20772  ;;  %v13471_v1 = vmul.f32 1.442695, %v13424_v51 }
 0xd13   : > { %v24126_v46 = vpop.eup %20774  ;;  %v13532_v43 = vsel %vm3116_vm10, %v24124_v21, 0.0 }
 0xd14   : > { %20784 = vpow2.f32 %v13471_v1  ;;  %v13535_v14 = vsel %vm3116_vm10, %v24126_v46, 0.0 }
 0xd15   : > { %13533 = vadd.xlane.f32.xlu0 %v13532_v43  ;;  %13536 = vadd.xlane.f32.xlu1 %v13535_v14 }
 0xd16   : > { %v24132_v27 = vpop.eup %20776 }
 0xd17   : > { %v24134_v54 = vpop.eup %20778  ;;  %v13538_v3 = vsel %vm3116_vm10, %v24132_v27, 0.0 }
 0xd18   : > { %v13541_v55 = vsel %vm3116_vm10, %v24134_v54, 0.0 }
 0xd19   : > { %13539 = vadd.xlane.f32.xlu0 %v13538_v3  ;;  %13542 = vadd.xlane.f32.xlu1 %v13541_v55 }
 0xd1a   : > { %v24140_v47 = vpop.eup %20780 }
 0xd1b   : > { %v24142_v45 = vpop.eup %20782  ;;  %v13544_v0 = vsel %vm3116_vm10, %v24140_v47, 0.0 }
 0xd1c   : > { %v13547_v63 = vsel %vm3116_vm10, %v24142_v45, 0.0 }
 0xd1d   : > { %13545 = vadd.xlane.f32.xlu0 %v13544_v0  ;;  %13548 = vadd.xlane.f32.xlu1 %v13547_v63 }
 0xd1e   : > { %v24148_v22 = vpop.eup %20784  ;;  %v13366_v61 = vpop.xlane.xlu0 %13365 }
 0xd1f   : > { %v13426_v58 = vsub.f32 %v24008_v52, %v13366_v61  ;;  %v13363_v41 = vpop.xlane.xlu1 %13362  ;;  %v13550_v40 = vsel %vm3116_vm10, %v24148_v22, 0.0 }
 0xd20   : > { %v13425_v16 = vsub.f32 %v24010_v20, %v13363_v41 }
 0xd21   : > { %v13475_v51 = vmul.f32 1.442695, %v13426_v58  ;;  %13551 = vadd.xlane.f32.xlu0 %v13550_v40 }
 0xd22   : > { %v13473_v6 = vmul.f32 1.442695, %v13425_v16  ;;  %v13372_v1 = vpop.xlane.xlu0 %13371 }
 0xd23   : > { %20786 = vpow2.f32 %v13475_v51  ;;  %v13428_v43 = vsub.f32 %v24016_v11, %v13372_v1  ;;  %v13369_v14 = vpop.xlane.xlu1 %13368 }
 0xd24   : > { %20788 = vpow2.f32 %v13473_v6  ;;  %v13427_v3 = vsub.f32 %v24018_v4, %v13369_v14 }
 0xd25   : > { %v13479_v55 = vmul.f32 1.442695, %v13428_v43 }
 0xd26   : > { %v13477_v0 = vmul.f32 1.442695, %v13427_v3  ;;  %v13378_v52 = vpop.xlane.xlu0 %13377 }
 0xd27   : > { %20790 = vpow2.f32 %v13479_v55  ;;  %v13430_v63 = vsub.f32 %v24024_v25, %v13378_v52  ;;  %v13375_v61 = vpop.xlane.xlu1 %13374 }
 0xd28   : > { %20792 = vpow2.f32 %v13477_v0  ;;  %v13429_v20 = vsub.f32 %v24026_v49, %v13375_v61 }
 0xd29   : > { %v13483_v58 = vmul.f32 1.442695, %v13430_v63 }
 0xd2a   : > { %v13481_v41 = vmul.f32 1.442695, %v13429_v20  ;;  %v13384_v40 = vpop.xlane.xlu0 %13383 }
 0xd2b   : > { %20794 = vpow2.f32 %v13483_v58  ;;  %v13432_v11 = vsub.f32 %v24032_v29, %v13384_v40  ;;  %v13381_v16 = vpop.xlane.xlu1 %13380 }
 0xd2c   : > { %20796 = vpow2.f32 %v13481_v41  ;;  %v13431_v4 = vsub.f32 %v24034_v48, %v13381_v16 }
 0xd2d   : > { %v24160_v51 = vpop.eup %20786  ;;  %v13487_v6 = vmul.f32 1.442695, %v13432_v11 }
 0xd2e   : > { %v24162_v1 = vpop.eup %20788  ;;  %v13485_v25 = vmul.f32 1.442695, %v13431_v4  ;;  %v13390_v43 = vpop.xlane.xlu0 %13389  ;;  %v13556_v49 = vsel %vm3116_vm10, %v24160_v51, 0.0 }
 0xd2f   : > { %20798 = vpow2.f32 %v13487_v6  ;;  %v13434_v14 = vsub.f32 %v24040_v8, %v13390_v43  ;;  %13557 = vadd.xlane.f32.xlu0 %v13556_v49  ;;  %v13387_v3 = vpop.xlane.xlu1 %13386  ;;  %v13553_v29 = vsel %vm3116_vm10, %v24162_v1, 0.0 }
 0xd30   : > { %20800 = vpow2.f32 %v13485_v25  ;;  %v13433_v48 = vsub.f32 %v24042_v32, %v13387_v3  ;;  %13554 = vadd.xlane.f32.xlu1 %v13553_v29 }
 0xd31   : > { %v24170_v55 = vpop.eup %20790  ;;  %v13491_v0 = vmul.f32 1.442695, %v13434_v14 }
 0xd32   : > { %v24172_v52 = vpop.eup %20792  ;;  %v13489_v63 = vmul.f32 1.442695, %v13433_v48  ;;  %v13396_v61 = vpop.xlane.xlu0 %13395  ;;  %v13562_v20 = vsel %vm3116_vm10, %v24170_v55, 0.0 }
 0xd33   : > { %20802 = vpow2.f32 %v13491_v0  ;;  %v13436_v8 = vsub.f32 %v24048_v60, %v13396_v61  ;;  %13563 = vadd.xlane.f32.xlu0 %v13562_v20  ;;  %v13393_v58 = vpop.xlane.xlu1 %13392  ;;  %v13559_v41 = vsel %vm3116_vm10, %v24172_v52, 0.0 }
 0xd34   : > { %20804 = vpow2.f32 %v13489_v63  ;;  %v13435_v32 = vsub.f32 %v24050_v28, %v13393_v58  ;;  %13560 = vadd.xlane.f32.xlu1 %v13559_v41 }
 0xd35   : > { %v24180_v40 = vpop.eup %20794  ;;  %v13495_v11 = vmul.f32 1.442695, %v13436_v8 }
 0xd36   : > { %v24182_v16 = vpop.eup %20796  ;;  %v13493_v4 = vmul.f32 1.442695, %v13435_v32  ;;  %v13402_v6 = vpop.xlane.xlu0 %13401  ;;  %v13568_v25 = vsel %vm3116_vm10, %v24180_v40, 0.0 }
 0xd37   : > { %20806 = vpow2.f32 %v13495_v11  ;;  %v13438_v60 = vsub.f32 %v24056_v56, %v13402_v6  ;;  %13569 = vadd.xlane.f32.xlu0 %v13568_v25  ;;  %v13399_v43 = vpop.xlane.xlu1 %13398  ;;  %v13565_v49 = vsel %vm3116_vm10, %v24182_v16, 0.0 }
 0xd38   : > { %20808 = vpow2.f32 %v13493_v4  ;;  %v13437_v28 = vsub.f32 %v24058_v19, %v13399_v43  ;;  %13566 = vadd.xlane.f32.xlu1 %v13565_v49 }
 0xd39   : > { %v24190_v14 = vpop.eup %20798  ;;  %v13499_v3 = vmul.f32 1.442695, %v13438_v60 }
 0xd3a   : > { %v24192_v29 = vpop.eup %20800  ;;  %v13497_v48 = vmul.f32 1.442695, %v13437_v28  ;;  %v13408_v0 = vpop.xlane.xlu0 %13407  ;;  %v13574_v63 = vsel %vm3116_vm10, %v24190_v14, 0.0 }
 0xd3b   : > { %20810 = vpow2.f32 %v13499_v3  ;;  %v13440_v56 = vsub.f32 %v24064_v35, %v13408_v0  ;;  %13575 = vadd.xlane.f32.xlu0 %v13574_v63  ;;  %v13405_v61 = vpop.xlane.xlu1 %13404  ;;  %v13571_v20 = vsel %vm3116_vm10, %v24192_v29, 0.0 }
 0xd3c   : > { %20812 = vpow2.f32 %v13497_v48  ;;  %v13439_v19 = vsub.f32 %v24066_v10, %v13405_v61  ;;  %13572 = vadd.xlane.f32.xlu1 %v13571_v20 }
 0xd3d   : > { %v24200_v8 = vpop.eup %20802  ;;  %v13503_v58 = vmul.f32 1.442695, %v13440_v56 }
 0xd3e   : > { %v24202_v41 = vpop.eup %20804  ;;  %v13501_v32 = vmul.f32 1.442695, %v13439_v19  ;;  %v13580_v11 = vsel %vm3116_vm10, %v24200_v8, 0.0 }
 0xd3f   : > { %20814 = vpow2.f32 %v13503_v58  ;;  %13581 = vadd.xlane.f32.xlu0 %v13580_v11  ;;  %v13577_v35 = vsel %vm3116_vm10, %v24202_v41, 0.0 }
 0xd40   : > { %20816 = vpow2.f32 %v13501_v32  ;;  %13578 = vadd.xlane.f32.xlu1 %v13577_v35 }
 0xd41   : > { %v24208_v4 = vpop.eup %20806 }
 0xd42   : > { %v24210_v10 = vpop.eup %20808  ;;  %v13586_v6 = vsel %vm3116_vm10, %v24208_v4, 0.0 }
 0xd43   : > { %13587 = vadd.xlane.f32.xlu0 %v13586_v6  ;;  %v13583_v25 = vsel %vm3116_vm10, %v24210_v10, 0.0 }
 0xd44   : > { %13584 = vadd.xlane.f32.xlu1 %v13583_v25 }
 0xd45   : > { %v24216_v60 = vpop.eup %20810 }
 0xd46   : > { %v24218_v43 = vpop.eup %20812  ;;  %v13592_v49 = vsel %vm3116_vm10, %v24216_v60, 0.0 }
 0xd47   : > { %13593 = vadd.xlane.f32.xlu0 %v13592_v49  ;;  %v13589_v28 = vsel %vm3116_vm10, %v24218_v43, 0.0 }
 0xd48   : > { %13590 = vadd.xlane.f32.xlu1 %v13589_v28 }
 0xd49   : > { %v24224_v3 = vpop.eup %20814 }
 0xd4a   : > { %v24226_v48 = vpop.eup %20816  ;;  %v13598_v0 = vsel %vm3116_vm10, %v24224_v3, 0.0 }
 0xd4b   : > { %13599 = vadd.xlane.f32.xlu0 %v13598_v0  ;;  %v13595_v63 = vsel %vm3116_vm10, %v24226_v48, 0.0 }
 0xd4c   : > { %13596 = vadd.xlane.f32.xlu1 %v13595_v63 }
 0xd8d   : > { %v13507_v56 = vpop.xlane.xlu1 %13506 }
 0xd8e   : > { %20818 = vrcp.f32 %v13507_v56 }
 0xd91   : > { %v13513_v61 = vpop.xlane.xlu1 %13512 }
 0xd92   : > { %v13510_v20 = vpop.xlane.xlu0 %13509  ;;  %20820 = vrcp.f32 %v13513_v61 }
 0xd93   : > { %20822 = vrcp.f32 %v13510_v20 }
 0xd95   : > { %v13519_v19 = vpop.xlane.xlu1 %13518 }
 0xd96   : > { %v13516_v58 = vpop.xlane.xlu0 %13515  ;;  %20824 = vrcp.f32 %v13519_v19 }
 0xd97   : > { %20826 = vrcp.f32 %v13516_v58 }
 0xd98   : > { %v20819_v32 = vpop.eup %20818 }
 0xd99   : > { %v13633_v11 = vmul.f32 %v20819_v32, %v24079_v57 }
 0xd9a   : > { %v13522_v35 = vpop.xlane.xlu0 %13521  ;;  %v13525_v6 = vpop.xlane.xlu1 %13524 }
 0xd9b   : > { %20828 = vrcp.f32 %v13522_v35  ;;  %19909 = vmatmul.mubr.msk.f32.vlgmr.msra.gmra.mrb[214].mxu1 %vm3116_vm10, %v13633_v11 }
 0xd9c   : > { %v20821_v25 = vpop.eup %20820  ;;  %20830 = vrcp.f32 %v13525_v6  ;;  %19917 = vmatpush3.msra.mxu1 %v23599_v7  ;;  %19918 = vmatprep.mubr.msk.f32.mxu1 %vm20932_vm8, %v24881_v42 }
 0xd9d   : > { %v20823_v49 = vpop.eup %20822  ;;  %v13635_v28 = vmul.f32 %v20821_v25, %v24085_v12  ;;  %19926 = vmatprep.subr.mxu1 %v24881_v42 }
 0xd9e   : > { %v13634_v0 = vmul.f32 %v20823_v49, %v24087_v44  ;;  %v13528_v57 = vpop.xlane.xlu0 %13527  ;;  %v13531_v63 = vpop.xlane.xlu1 %13530 }
 0xd9f   : > { %20832 = vrcp.f32 %v13528_v57  ;;  %19919 = vmatmul.mubr.msk.f32.vlgmr.msra.gmra.mrb[216].mxu1 %vm3116_vm10, %v13635_v28 }
 0xda0   : > { %v20825_v56 = vpop.eup %20824  ;;  %20834 = vrcp.f32 %v13531_v63  ;;  %19914 = vmatmul.mubr.msk.f32.vlgmr.msra.gmra.mrb[194].mxu0 %vm3116_vm10, %v13634_v0  ;;  %19927 = vmatpush3.msra.mxu1 %v23607_v13  ;;  %v24258_v13 = vld [vmem:[%s24784_s9 + $0x5] ss:$0 sm:$0xff]  ;;  %v24318_v63 = vld [vmem:[%s24784_s9 + $0x6] ss:$0 sm:$0xff] }
 0xda1   : > { %v20827_v7 = vpop.eup %20826  ;;  %v13637_v61 = vmul.f32 %v20825_v56, %v24095_v2  ;;  %19922 = vmatpush3.msra.mxu0 %v23596_v34  ;;  %19923 = vmatprep.mubr.msk.f32.mxu0 %vm20932_vm8, %v24881_v42  ;;  %v10123_v28 = vadd.f32 %v24258_v13, %v23798_v36  ;;  %v10128_v0 = vadd.f32 %v23792_v62, %v24258_v13 }
 0xda2   : > { %v13636_v12 = vmul.f32 %v20827_v7, %v24097_v9  ;;  %v13534_v44 = vpop.xlane.xlu0 %13533  ;;  %v13537_v20 = vpop.xlane.xlu1 %13536  ;;  %19928 = vmatprep.mubr.msk.f32.mxu1 %vm20932_vm8, %v24881_v42  ;;  %19931 = vmatprep.subr.mxu0 %v24881_v42  ;;  %v10133_v57 = vadd.f32 %v24258_v13, %v23806_v37  ;;  %v10138_v37 = vadd.f32 %v23802_v30, %v24258_v13 }
 0xda3   : > { %20836 = vrcp.f32 %v13534_v44  ;;  %19936 = vmatprep.subr.mxu1 %v24881_v42  ;;  %19929 = vmatmul.mubr.msk.f32.vlgmr.msra.gmra.mrb[218].mxu1 %vm3116_vm10, %v13637_v61  ;;  %v10457_v7 = vadd.f32 %v24318_v63, %v23764_v15 }
 0xda4   : > { %20838 = vrcp.f32 %v13537_v20  ;;  %19924 = vmatmul.mubr.msk.f32.vlgmr.msra.gmra.mrb[196].mxu0 %vm3116_vm10, %v13636_v12  ;;  %19937 = vmatpush3.msra.mxu1 %v23615_v39 }
 0xda5   : > { %v20829_v34 = vpop.eup %20828  ;;  %19932 = vmatpush3.msra.mxu0 %v23604_v5  ;;  %19933 = vmatprep.mubr.msk.f32.mxu0 %vm20932_vm8, %v24881_v42  ;;  %v10103_v5 = vadd.f32 %v24258_v13, %v23762_v33  ;;  %v10108_v33 = vadd.f32 %v23754_v17, %v24258_v13 }
 0xda6   : > { %v20831_v2 = vpop.eup %20830  ;;  %v13638_v9 = vmul.f32 %v20829_v34, %v24105_v23  ;;  %v13540_v19 = vpop.xlane.xlu0 %13539  ;;  %19938 = vmatprep.mubr.msk.f32.mxu1 %vm20932_vm8, %v24881_v42  ;;  %19941 = vmatprep.subr.mxu0 %v24881_v42 }
 0xda7   : > { %v13543_v58 = vpop.xlane.xlu1 %13542  ;;  %v13639_v39 = vmul.f32 %v20831_v2, %v24107_v59  ;;  %20840 = vrcp.f32 %v13540_v19  ;;  %19946 = vmatprep.subr.mxu1 %v24881_v42 }
 0xda8   : > { %20842 = vrcp.f32 %v13543_v58  ;;  %19934 = vmatmul.mubr.msk.f32.vlgmr.msra.gmra.mrb[198].mxu0 %vm3116_vm10, %v13638_v9  ;;  %v10472_v9 = vadd.f32 %v23778_v53, %v24318_v63  ;;  %v24924_v53 = vld [vmem:[#allocation21_spill] sm:$0xff] }
 0xda9   : > { %v20833_v32 = vpop.eup %20832  ;;  %19939 = vmatmul.mubr.msk.f32.vlgmr.msra.gmra.mrb[220].mxu1 %vm3116_vm10, %v13639_v39  ;;  %19942 = vmatpush3.msra.mxu0 %v23612_v26  ;;  %v10113_v26 = vadd.f32 %v24258_v13, %v23784_v24  ;;  %v10118_v24 = vadd.f32 %v23776_v31, %v24258_v13  ;;  %v24923_v39 = vld [vmem:[#allocation20_spill] sm:$0xff] }
 0xdaa   : > { %v20835_v23 = vpop.eup %20834  ;;  %v13640_v11 = vmul.f32 %v20833_v32, %v24115_v18  ;;  %19947 = vmatpush3.msra.mxu1 %v10103_v5  ;;  %v13546_v35 = vpop.xlane.xlu0 %13545  ;;  %19943 = vmatprep.mubr.msk.f32.mxu0 %vm20932_vm8, %v24881_v42  ;;  %v10467_v5 = vadd.f32 %v24318_v63, %v24923_v39 }
 0xdab   : > { %v13549_v59 = vpop.xlane.xlu1 %13548  ;;  %v13641_v6 = vmul.f32 %v20835_v23, %v24117_v50  ;;  %20844 = vrcp.f32 %v13546_v35  ;;  %19948 = vmatprep.mubr.msk.f32.mxu1 %vm20932_vm8, %v24881_v42  ;;  %19951 = vmatprep.subr.mxu0 %v24881_v42 }
 0xdac   : > { %20846 = vrcp.f32 %v13549_v59  ;;  %19956 = vmatprep.subr.mxu1 %v24881_v42  ;;  %19944 = vmatmul.mubr.msk.f32.vlgmr.msra.gmra.mrb[200].mxu0 %vm3116_vm10, %v13640_v11 }
 0xdad   : > { %v20837_v18 = vpop.eup %20836  ;;  %19949 = vmatmul.mubr.msk.f32.vlgmr.msra.gmra.mrb[222].mxu1 %vm3116_vm10, %v13641_v6  ;;  %19952 = vmatpush3.msra.mxu0 %v10108_v33  ;;  %v24925_v33 = vld [vmem:[#allocation22_spill] sm:$0xff] }
 0xdae   : > { %v20839_v17 = vpop.eup %20838  ;;  %v13642_v50 = vmul.f32 %v20837_v18, %v24124_v21  ;;  %19957 = vmatpush3.msra.mxu1 %v10113_v26  ;;  %v13552_v25 = vpop.xlane.xlu0 %13551  ;;  %19953 = vmatprep.mubr.msk.f32.mxu0 %vm20932_vm8, %v24881_v42 }
 0xdaf   : > { %v13643_v49 = vmul.f32 %v20839_v17, %v24126_v46  ;;  %20848 = vrcp.f32 %v13552_v25  ;;  %19958 = vmatprep.mubr.msk.f32.mxu1 %vm20932_vm8, %v24881_v42  ;;  %19961 = vmatprep.subr.mxu0 %v24881_v42  ;;  %v24926_v17 = vld [vmem:[#allocation23_spill] sm:$0xff] }
 0xdb0   : > { %19966 = vmatprep.subr.mxu1 %v24881_v42  ;;  %19954 = vmatmul.mubr.msk.f32.vlgmr.msra.gmra.mrb[202].mxu0 %vm3116_vm10, %v13642_v50  ;;  %v10492_v50 = vadd.f32 %v24926_v17, %v24318_v63 }
 0xdb1   : > { %v20841_v21 = vpop.eup %20840  ;;  %19959 = vmatmul.mubr.msk.f32.vlgmr.msra.gmra.mrb[224].mxu1 %vm3116_vm10, %v13643_v49  ;;  %19962 = vmatpush3.msra.mxu0 %v10118_v24  ;;  %v24927_v49 = vld [vmem:[#allocation7_spill] sm:$0xff] }
 0xdb2   : > { %v20843_v31 = vpop.eup %20842  ;;  %v13644_v46 = vmul.f32 %v20841_v21, %v24132_v27  ;;  %19967 = vmatpush3.msra.mxu1 %v10123_v28  ;;  %19963 = vmatprep.mubr.msk.f32.mxu0 %vm20932_vm8, %v24881_v42  ;;  %v24384_v28 = vld [vmem:[%s24784_s9 + $0x7] ss:$0 sm:$0xff] }
 0xdb3   : > { %v13645_v36 = vmul.f32 %v20843_v31, %v24134_v54  ;;  %19968 = vmatprep.mubr.msk.f32.mxu1 %vm20932_vm8, %v24881_v42  ;;  %19971 = vmatprep.subr.mxu0 %v24881_v42 }
 0xdb4   : > { %19976 = vmatprep.subr.mxu1 %v24881_v42  ;;  %19964 = vmatmul.mubr.msk.f32.vlgmr.msra.gmra.mrb[204].mxu0 %vm3116_vm10, %v13644_v46 }
 0xdb5   : > { %v20845_v27 = vpop.eup %20844  ;;  %19969 = vmatmul.mubr.msk.f32.vlgmr.msra.gmra.mrb[226].mxu1 %vm3116_vm10, %v13645_v36  ;;  %19972 = vmatpush3.msra.mxu0 %v10128_v0  ;;  %v24928_v0 = vld [vmem:[#allocation5_spill] sm:$0xff] }
 0xdb6   : > { %v20847_v62 = vpop.eup %20846  ;;  %v13646_v54 = vmul.f32 %v20845_v27, %v24140_v47  ;;  %19977 = vmatpush3.msra.mxu1 %v10133_v57  ;;  %19973 = vmatprep.mubr.msk.f32.mxu0 %vm20932_vm8, %v24881_v42  ;;  %v10816_v36 = vadd.f32 %v24928_v0, %v24384_v28 }
 0xdb7   : > { %v13647_v56 = vmul.f32 %v20847_v62, %v24142_v45  ;;  %19978 = vmatprep.mubr.msk.f32.mxu1 %vm20932_vm8, %v24881_v42  ;;  %19981 = vmatprep.subr.mxu0 %v24881_v42  ;;  %v10462_v45 = vadd.f32 %v23756_v38, %v24318_v63 }
 0xdb8   : > { %19986 = vmatprep.subr.mxu1 %v24881_v42  ;;  %19974 = vmatmul.mubr.msk.f32.vlgmr.msra.gmra.mrb[206].mxu0 %vm3116_vm10, %v13646_v54 }
 0xdb9   : > { %v20849_v47 = vpop.eup %20848  ;;  %19979 = vmatmul.mubr.msk.f32.vlgmr.msra.gmra.mrb[228].mxu1 %vm3116_vm10, %v13647_v56  ;;  %19982 = vmatpush3.msra.mxu0 %v10138_v37  ;;  %v24930_v56 = vld [vmem:[#allocation4_spill] sm:$0xff] }
 0xdba   : > { %v13648_v30 = vmul.f32 %v20849_v47, %v24148_v22  ;;  %19987 = vmatpush3.msra.mxu1 %v10457_v7  ;;  %19983 = vmatprep.mubr.msk.f32.mxu0 %vm20932_vm8, %v24881_v42  ;;  %v10826_v7 = vadd.f32 %v24930_v56, %v24384_v28 }
 0xdbb   : > { %19991 = vmatprep.subr.mxu0 %v24881_v42  ;;  %19988 = vmatprep.mubr.msk.f32.mxu1 %vm20932_vm8, %v24881_v42 }
 0xdbc   : > { %19984 = vmatmul.mubr.msk.f32.vlgmr.msra.gmra.mrb[208].mxu0 %vm3116_vm10, %v13648_v30  ;;  %v13558_v15 = vpop.xlane.xlu0 %13557  ;;  %19996 = vmatprep.subr.mxu1 %v24881_v42 }
 0xdbd   : > { %19992 = vmatpush3.msra.mxu0 %v10462_v45  ;;  %20850 = vrcp.f32 %v13558_v15  ;;  %v13555_v22 = vpop.xlane.xlu1 %13554  ;;  %19993 = vmatprep.mubr.msk.f32.mxu0 %vm20932_vm8, %v24881_v42  ;;  %v24931_v45 = vld [vmem:[#allocation9_spill] sm:$0xff] }
 0xdbe   : > { %20852 = vrcp.f32 %v13555_v22  ;;  %20001 = vmatprep.subr.mxu0 %v24881_v42 }
 0xdc0   : > { %v13564_v38 = vpop.xlane.xlu0 %13563 }
 0xdc1   : > { %20854 = vrcp.f32 %v13564_v38  ;;  %v13561_v61 = vpop.xlane.xlu1 %13560  ;;  %v24932_v38 = vld [vmem:[#allocation8_spill] sm:$0xff] }
 0xdc2   : > { %20856 = vrcp.f32 %v13561_v61  ;;  %v10836_v61 = vadd.f32 %v24932_v38, %v24384_v28 }
 0xdc4   : > { %v13570_v12 = vpop.xlane.xlu0 %13569 }
 0xdc5   : > { %20858 = vrcp.f32 %v13570_v12  ;;  %v13567_v44 = vpop.xlane.xlu1 %13566 }
 0xdc6   : > { %20860 = vrcp.f32 %v13567_v44  ;;  %v24933_v44 = vld [vmem:[#allocation11_spill] sm:$0xff] }
 0xdc7   : > { %v20851_v20 = vpop.eup %20850 }
 0xdc8   : > { %v20853_v34 = vpop.eup %20852  ;;  %v13650_v13 = vmul.f32 %v20851_v20, %v24160_v51  ;;  %v13576_v2 = vpop.xlane.xlu0 %13575  ;;  %v10831_v20 = vadd.f32 %v24384_v28, %v24933_v44 }
 0xdc9   : > { %v13649_v19 = vmul.f32 %v20853_v34, %v24162_v1  ;;  %20862 = vrcp.f32 %v13576_v2  ;;  %v13573_v58 = vpop.xlane.xlu1 %13572  ;;  %v10482_v1 = vadd.f32 %v24924_v53, %v24318_v63 }
 0xdca   : > { %20864 = vrcp.f32 %v13573_v58  ;;  %19994 = vmatmul.mubr.msk.f32.vlgmr.msra.gmra.mrb[210].mxu0 %vm3116_vm10, %v13650_v13 }
 0xdcb   : > { %v20855_v32 = vpop.eup %20854  ;;  %20002 = vmatpush3.msra.mxu0 %v10472_v9  ;;  %19989 = vmatmul.mubr.msk.f32.vlgmr.msra.gmra.mrb[230].mxu1 %vm3116_vm10, %v13649_v19  ;;  %v24935_v19 = vld [vmem:[#allocation24_spill] sm:$0xff] }
 0xdcc   : > { %v20857_v23 = vpop.eup %20856  ;;  %v13652_v51 = vmul.f32 %v20855_v32, %v24170_v55  ;;  %19997 = vmatpush3.msra.mxu1 %v10467_v5  ;;  %v13582_v11 = vpop.xlane.xlu0 %13581  ;;  %20003 = vmatprep.mubr.msk.f32.mxu0 %vm20932_vm8, %v24881_v42  ;;  %v10477_v55 = vadd.f32 %v24318_v63, %v24925_v33  ;;  %v10841_v58 = vadd.f32 %v24384_v28, %v24935_v19  ;;  %v18076_v32 = vld [vmem:[%s24785_s10 + $0x20] sm:$0xff] }
 0xdcd   : > { %v13651_v35 = vmul.f32 %v20857_v23, %v24172_v52  ;;  %20866 = vrcp.f32 %v13582_v11  ;;  %20011 = vmatprep.subr.mxu0 %v24881_v42  ;;  %v13579_v59 = vpop.xlane.xlu1 %13578  ;;  %19998 = vmatprep.mubr.msk.f32.mxu1 %vm20932_vm8, %v24881_v42 }
 0xdce   : > { %20868 = vrcp.f32 %v13579_v59  ;;  %20004 = vmatmul.mubr.msk.f32.vlgmr.msra.gmra.mrb[212].mxu0 %vm3116_vm10, %v13652_v51  ;;  %20006 = vmatprep.subr.mxu1 %v24881_v42 }
 0xdcf   : > { %v20859_v6 = vpop.eup %20858  ;;  %20012 = vmatpush3.msra.mxu0 %v10482_v1  ;;  %19999 = vmatmul.mubr.msk.f32.vlgmr.msra.gmra.mrb[232].mxu1 %vm3116_vm10, %v13651_v35  ;;  %v18095_v1 = vld [vmem:[%s24785_s10 + $0x30] sm:$0xff] }
 0xdd0   : > { %v20861_v52 = vpop.eup %20860  ;;  %v13654_v26 = vmul.f32 %v20859_v6, %v24180_v40  ;;  %20007 = vmatpush3.msra.mxu1 %v10477_v55  ;;  %v13588_v18 = vpop.xlane.xlu0 %13587  ;;  %20013 = vmatprep.mubr.msk.f32.mxu0 %vm20932_vm8, %v24881_v42  ;;  %v10487_v40 = vadd.f32 %v24318_v63, %v24927_v49  ;;  %v24929_v63 = vld [vmem:[#allocation6_spill] sm:$0xff] }
 0xdd1   : > { %v13653_v25 = vmul.f32 %v20861_v52, %v24182_v16  ;;  %20870 = vrcp.f32 %v13588_v18  ;;  %20021 = vmatprep.subr.mxu0 %v24881_v42  ;;  %v13585_v24 = vpop.xlane.xlu1 %13584  ;;  %20008 = vmatprep.mubr.msk.f32.mxu1 %vm20932_vm8, %v24881_v42 }
 0xdd2   : > { %20872 = vrcp.f32 %v13585_v24  ;;  %20014 = vmatmul.mubr.msk.f32.vlgmr.msra.gmra.mrb[214].mxu0 %vm3116_vm10, %v13654_v26  ;;  %20016 = vmatprep.subr.mxu1 %v24881_v42 }
 0xdd3   : > { %v20863_v16 = vpop.eup %20862  ;;  %20022 = vmatpush3.msra.mxu0 %v10492_v50  ;;  %20009 = vmatmul.mubr.msk.f32.vlgmr.msra.gmra.mrb[234].mxu1 %vm3116_vm10, %v13653_v25 }
 0xdd4   : > { %v20865_v21 = vpop.eup %20864  ;;  %v13656_v31 = vmul.f32 %v20863_v16, %v24190_v14  ;;  %20017 = vmatpush3.msra.mxu1 %v10487_v40  ;;  %v13594_v46 = vpop.xlane.xlu0 %13593  ;;  %20023 = vmatprep.mubr.msk.f32.mxu0 %vm20932_vm8, %v24881_v42  ;;  %v10811_v14 = vadd.f32 %v24384_v28, %v24929_v63 }
 0xdd5   : > { %v13655_v57 = vmul.f32 %v20865_v21, %v24192_v29  ;;  %20874 = vrcp.f32 %v13594_v46  ;;  %20031 = vmatprep.subr.mxu0 %v24881_v42  ;;  %v13591_v27 = vpop.xlane.xlu1 %13590  ;;  %20018 = vmatprep.mubr.msk.f32.mxu1 %vm20932_vm8, %v24881_v42 }
 0xdd6   : > { %20876 = vrcp.f32 %v13591_v27  ;;  %20024 = vmatmul.mubr.msk.f32.vlgmr.msra.gmra.mrb[216].mxu0 %vm3116_vm10, %v13656_v31  ;;  %20026 = vmatprep.subr.mxu1 %v24881_v42 }
 0xdd7   : > { %v20867_v62 = vpop.eup %20866  ;;  %20032 = vmatpush3.msra.mxu0 %v10816_v36  ;;  %20019 = vmatmul.mubr.msk.f32.vlgmr.msra.gmra.mrb[236].mxu1 %vm3116_vm10, %v13655_v57 }
 0xdd8   : > { %v20869_v29 = vpop.eup %20868  ;;  %v13658_v54 = vmul.f32 %v20867_v62, %v24200_v8  ;;  %20027 = vmatpush3.msra.mxu1 %v10811_v14  ;;  %v13600_v37 = vpop.xlane.xlu0 %13599  ;;  %20033 = vmatprep.mubr.msk.f32.mxu0 %vm20932_vm8, %v24881_v42  ;;  %v10821_v8 = vadd.f32 %v24384_v28, %v24931_v45 }
 0xdd9   : > { %v13657_v47 = vmul.f32 %v20869_v29, %v24202_v41  ;;  %20878 = vrcp.f32 %v13600_v37  ;;  %20041 = vmatprep.subr.mxu0 %v24881_v42  ;;  %v13597_v30 = vpop.xlane.xlu1 %13596  ;;  %20028 = vmatprep.mubr.msk.f32.mxu1 %vm20932_vm8, %v24881_v42 }
 0xdda   : > { %20880 = vrcp.f32 %v13597_v30  ;;  %20034 = vmatmul.mubr.msk.f32.vlgmr.msra.gmra.mrb[218].mxu0 %vm3116_vm10, %v13658_v54  ;;  %20036 = vmatprep.subr.mxu1 %v24881_v42 }
 0xddb   : > { %v20871_v15 = vpop.eup %20870  ;;  %20042 = vmatpush3.msra.mxu0 %v10826_v7  ;;  %20029 = vmatmul.mubr.msk.f32.vlgmr.msra.gmra.mrb[238].mxu1 %vm3116_vm10, %v13657_v47 }
 0xddc   : > { %v20873_v41 = vpop.eup %20872  ;;  %v13660_v22 = vmul.f32 %v20871_v15, %v24208_v4  ;;  %20037 = vmatpush3.msra.mxu1 %v10821_v8  ;;  %20043 = vmatprep.mubr.msk.f32.mxu0 %vm20932_vm8, %v24881_v42 }
 0xddd   : > { %v13659_v12 = vmul.f32 %v20873_v41, %v24210_v10  ;;  %20051 = vmatprep.subr.mxu0 %v24881_v42  ;;  %20038 = vmatprep.mubr.msk.f32.mxu1 %vm20932_vm8, %v24881_v42  ;;  %v24934_v10 = vld [vmem:[#allocation10_spill] sm:$0xff] }
 0xdde   : > { %20044 = vmatmul.mubr.msk.f32.vlgmr.msra.gmra.mrb[220].mxu0 %vm3116_vm10, %v13660_v22  ;;  %20046 = vmatprep.subr.mxu1 %v24881_v42  ;;  %v10846_v2 = vadd.f32 %v24934_v10, %v24384_v28  ;;  %v18104_v28 = vld [vmem:[%s24785_s10 + $0x38] sm:$0xff] }
 0xddf   : > { %v20875_v4 = vpop.eup %20874  ;;  %20052 = vmatpush3.msra.mxu0 %v10836_v61  ;;  %20039 = vmatmul.mubr.msk.f32.vlgmr.msra.gmra.mrb[240].mxu1 %vm3116_vm10, %v13659_v12 }
 0xde0   : > { %v20877_v34 = vpop.eup %20876  ;;  %v13662_v13 = vmul.f32 %v20875_v4, %v24216_v60  ;;  %20047 = vmatpush3.msra.mxu1 %v10831_v20  ;;  %20053 = vmatprep.mubr.msk.f32.mxu0 %vm20932_vm8, %v24881_v42 }
 0xde1   : > { %v13661_v9 = vmul.f32 %v20877_v34, %v24218_v43  ;;  %20061 = vmatprep.subr.mxu0 %v24881_v42  ;;  %20048 = vmatprep.mubr.msk.f32.mxu1 %vm20932_vm8, %v24881_v42 }
 0xde2   : > { %20054 = vmatmul.mubr.msk.f32.vlgmr.msra.gmra.mrb[222].mxu0 %vm3116_vm10, %v13662_v13  ;;  %20056 = vmatprep.subr.mxu1 %v24881_v42 }
 0xde3   : > { %v20879_v60 = vpop.eup %20878  ;;  %20062 = vmatpush3.msra.mxu0 %v10846_v2  ;;  %20049 = vmatmul.mubr.msk.f32.vlgmr.msra.gmra.mrb[242].mxu1 %vm3116_vm10, %v13661_v9 }
 0xde4   : > { %v20881_v39 = vpop.eup %20880  ;;  %v13664_v5 = vmul.f32 %v20879_v60, %v24224_v3  ;;  %20057 = vmatpush3.msra.mxu1 %v10841_v58  ;;  %20063 = vmatprep.mubr.msk.f32.mxu0 %vm20932_vm8, %v24881_v42  ;;  %v18086_v3 = vld [vmem:[%s24785_s10 + $0x28] sm:$0xff] }
 0xde5   : > { %v13663_v43 = vmul.f32 %v20881_v39, %v24226_v48  ;;  %20058 = vmatprep.mubr.msk.f32.mxu1 %vm20932_vm8, %v24881_v42  ;;  %20066 = vmatprep.subr.mxu1 %v18076_v32 }
 0xde6   : > { %20064 = vmatmul.mubr.msk.f32.vlgmr.msra.gmra.mrb[224].mxu0 %vm3116_vm10, %v13664_v5 }
 0xde7   : > { %20059 = vmatmul.mubr.msk.f32.vlgmr.msra.gmra.mrb[244].mxu1 %vm3116_vm10, %v13663_v43 }
 0xde8   : > { %20067 = vmatpush3.msra.mxu1 %v18076_v32 }
 0xde9   : > { %20080 = vmatprep.subr.mxu1 %v18086_v3 }
 0xe6e   : > { %v13734_v23 = vpop.f32.mrb[214].mxu1 }
 0xe6f   : > { %v19910_v48 = vpop.f32.mrb[215].mxu1  ;;  %20068 = vmatprep.mubr.msk.f32.mxu1 %vm3116_vm10, %v13734_v23 }
 0xe72   : > { %v13880_v51 = vpop.f32.mrb[216].mxu1 }
 0xe73   : > { %v13807_v11 = vpop.f32.mrb[194].mxu0  ;;  %v19920_v53 = vpop.f32.mrb[217].mxu1 }
 0xe74   : > { %v19915_v35 = vpop.f32.mrb[195].mxu0  ;;  %20069 = vmatmul.mubr.msk.f32.vlgmr.msra.gmra.mrb[246].mxu1 %vm3116_vm10, %v13807_v11  ;;  %v18085_v11 = vld [vmem:[%s24786_s11 + $0x1] ss:$0 sm:$0xff] }
 0xe75   : > { %20071 = vmatprep.mubr.msk.f32.mxu1 %vm3116_vm10, %v13880_v51  ;;  %20081 = vmatpush3.msra.mxu1 %v18086_v3 }
 0xe76   : > { %v14026_v59 = vpop.f32.mrb[218].mxu1  ;;  %20094 = vmatprep.subr.mxu1 %v18095_v1 }
 0xe77   : > { %v13953_v33 = vpop.f32.mrb[196].mxu0  ;;  %v19930_v55 = vpop.f32.mrb[219].mxu1 }
 0xe78   : > { %v19925_v6 = vpop.f32.mrb[197].mxu0  ;;  %20072 = vmatmul.mubr.msk.f32.gmra.mrb[248].mxu1 %vm3116_vm10, %v13953_v33  ;;  %v24936_v33 = vld [vmem:[#allocation13_spill] sm:$0xff] }
 0xe79   : > { %20074 = vmatprep.mubr.msk.f32.mxu1 %vm3116_vm10, %v14026_v59  ;;  %v24937_v6 = vld [vmem:[#allocation12_spill] sm:$0xff] }
 0xe7b   : > { %v14099_v52 = vpop.f32.mrb[198].mxu0 }
 0xe7c   : > { %v14172_v26 = vpop.f32.mrb[220].mxu1  ;;  %v19935_v18 = vpop.f32.mrb[199].mxu0  ;;  %20075 = vmatmul.mubr.msk.f32.gmra.mrb[250].mxu1 %vm3116_vm10, %v14099_v52 }
 0xe7d   : > { %v19940_v17 = vpop.f32.mrb[221].mxu1  ;;  %20077 = vmatprep.mubr.msk.f32.mxu1 %vm3116_vm10, %v14172_v26 }
 0xe7f   : > { %v14245_v50 = vpop.f32.mrb[200].mxu0 }
 0xe80   : > { %v14318_v25 = vpop.f32.mrb[222].mxu1  ;;  %v19945_v24 = vpop.f32.mrb[201].mxu0  ;;  %20078 = vmatmul.mubr.msk.f32.gmra.mrb[252].mxu1 %vm3116_vm10, %v14245_v50 }
 0xe81   : > { %v19950_v49 = vpop.f32.mrb[223].mxu1  ;;  %20082 = vmatprep.mubr.msk.f32.mxu1 %vm3116_vm10, %v14318_v25 }
 0xe82   : > { %v24938_v49 = vld [vmem:[#allocation15_spill] sm:$0xff] }
 0xe83   : > { %v14391_v40 = vpop.f32.mrb[202].mxu0 }
 0xe84   : > { %v14464_v16 = vpop.f32.mrb[224].mxu1  ;;  %v19955_v21 = vpop.f32.mrb[203].mxu0  ;;  %20083 = vmatmul.mubr.msk.f32.vlgmr.msra.gmra.mrb[246].mxu1 %vm3116_vm10, %v14391_v40 }
 0xe85   : > { %v19960_v31 = vpop.f32.mrb[225].mxu1  ;;  %20085 = vmatprep.mubr.msk.f32.mxu1 %vm3116_vm10, %v14464_v16  ;;  %20095 = vmatpush3.msra.mxu1 %v18095_v1 }
 0xe86   : > { %20108 = vmatprep.subr.mxu1 %v18104_v28 }
 0xe87   : > { %v14537_v46 = vpop.f32.mrb[204].mxu0 }
 0xe88   : > { %v14610_v0 = vpop.f32.mrb[226].mxu1  ;;  %v19965_v36 = vpop.f32.mrb[205].mxu0  ;;  %20086 = vmatmul.mubr.msk.f32.gmra.mrb[248].mxu1 %vm3116_vm10, %v14537_v46 }
 0xe89   : > { %v19970_v57 = vpop.f32.mrb[227].mxu1  ;;  %20088 = vmatprep.mubr.msk.f32.mxu1 %vm3116_vm10, %v14610_v0 }
 0xe8b   : > { %v14683_v27 = vpop.f32.mrb[206].mxu0 }
 0xe8c   : > { %v14756_v63 = vpop.f32.mrb[228].mxu1  ;;  %v19975_v14 = vpop.f32.mrb[207].mxu0  ;;  %20089 = vmatmul.mubr.msk.f32.gmra.mrb[250].mxu1 %vm3116_vm10, %v14683_v27  ;;  %v24940_v27 = vld [vmem:[#allocation17_spill] sm:$0xff] }
 0xe8d   : > { %v19980_v62 = vpop.f32.mrb[229].mxu1  ;;  %20091 = vmatprep.mubr.msk.f32.mxu1 %vm3116_vm10, %v14756_v63  ;;  %v24941_v14 = vld [vmem:[#allocation16_spill] sm:$0xff] }
 0xe8f   : > { %v14829_v29 = vpop.f32.mrb[208].mxu0 }
 0xe90   : > { %v19985_v54 = vpop.f32.mrb[209].mxu0  ;;  %20092 = vmatmul.mubr.msk.f32.gmra.mrb[252].mxu1 %vm3116_vm10, %v14829_v29 }
 0xe9d   : > { %v14975_v37 = vpop.f32.mrb[210].mxu0 }
 0xe9e   : > { %v14902_v56 = vpop.f32.mrb[230].mxu1  ;;  %v19995_v7 = vpop.f32.mrb[211].mxu0 }
 0xe9f   : > { %v19990_v47 = vpop.f32.mrb[231].mxu1  ;;  %20096 = vmatprep.mubr.msk.f32.mxu1 %vm3116_vm10, %v14902_v56 }
 0xea0   : > { %20097 = vmatmul.mubr.msk.f32.vlgmr.msra.gmra.mrb[246].mxu1 %vm3116_vm10, %v14975_v37 }
 0xea1   : > { %v15121_v30 = vpop.f32.mrb[212].mxu0  ;;  %20109 = vmatpush3.msra.mxu1 %v18104_v28  ;;  %v24939_v28 = vld [vmem:[#allocation14_spill] sm:$0xff] }
 0xea2   : > { %v15048_v45 = vpop.f32.mrb[232].mxu1  ;;  %v20005_v8 = vpop.f32.mrb[213].mxu0 }
 0xea3   : > { %v20000_v15 = vpop.f32.mrb[233].mxu1  ;;  %20099 = vmatprep.mubr.msk.f32.mxu1 %vm3116_vm10, %v15048_v45  ;;  %v24943_v8 = vld [vmem:[#allocation18_spill] sm:$0xff] }
 0xea4   : > { %20100 = vmatmul.mubr.msk.f32.gmra.mrb[248].mxu1 %vm3116_vm10, %v15121_v30  ;;  %v24942_v30 = vld [vmem:[#allocation19_spill] sm:$0xff] }
 0xea5   : > { %v15267_v41 = vpop.f32.mrb[214].mxu0 }
 0xea6   : > { %v15194_v22 = vpop.f32.mrb[234].mxu1  ;;  %v20015_v38 = vpop.f32.mrb[215].mxu0 }
 0xea7   : > { %v20010_v61 = vpop.f32.mrb[235].mxu1  ;;  %20102 = vmatprep.mubr.msk.f32.mxu1 %vm3116_vm10, %v15194_v22 }
 0xea8   : > { %20103 = vmatmul.mubr.msk.f32.gmra.mrb[250].mxu1 %vm3116_vm10, %v15267_v41 }
 0xea9   : > { %v15413_v12 = vpop.f32.mrb[216].mxu0 }
 0xeaa   : > { %v15340_v44 = vpop.f32.mrb[236].mxu1  ;;  %v20025_v20 = vpop.f32.mrb[217].mxu0 }
 0xeab   : > { %v20020_v4 = vpop.f32.mrb[237].mxu1  ;;  %20105 = vmatprep.mubr.msk.f32.mxu1 %vm3116_vm10, %v15340_v44 }
 0xeac   : > { %20106 = vmatmul.mubr.msk.f32.gmra.mrb[252].mxu1 %vm3116_vm10, %v15413_v12 }
 0xead   : > { %v15559_v34 = vpop.f32.mrb[218].mxu0 }
 0xeae   : > { %v15486_v13 = vpop.f32.mrb[238].mxu1  ;;  %v20035_v10 = vpop.f32.mrb[219].mxu0 }
 0xeaf   : > { %v20030_v2 = vpop.f32.mrb[239].mxu1  ;;  %20110 = vmatprep.mubr.msk.f32.mxu1 %vm3116_vm10, %v15486_v13 }
 0xeb0   : > { %20111 = vmatmul.mubr.msk.f32.vlgmr.msra.gmra.mrb[246].mxu1 %vm3116_vm10, %v15559_v34 }
 0xeb1   : > { %v15705_v9 = vpop.f32.mrb[220].mxu0 }
 0xeb2   : > { %v15632_v19 = vpop.f32.mrb[240].mxu1  ;;  %v20045_v58 = vpop.f32.mrb[221].mxu0 }
 0xeb3   : > { %v20040_v60 = vpop.f32.mrb[241].mxu1  ;;  %20113 = vmatprep.mubr.msk.f32.mxu1 %vm3116_vm10, %v15632_v19 }
 0xeb4   : > { %20114 = vmatmul.mubr.msk.f32.gmra.mrb[248].mxu1 %vm3116_vm10, %v15705_v9 }
 0xeb5   : > { %v15851_v39 = vpop.f32.mrb[222].mxu0 }
 0xeb6   : > { %v15778_v5 = vpop.f32.mrb[242].mxu1  ;;  %v20055_v43 = vpop.f32.mrb[223].mxu0 }
 0xeb7   : > { %v20050_v32 = vpop.f32.mrb[243].mxu1  ;;  %20116 = vmatprep.mubr.msk.f32.mxu1 %vm3116_vm10, %v15778_v5 }
 0xeb8   : > { %20117 = vmatmul.mubr.msk.f32.gmra.mrb[250].mxu1 %vm3116_vm10, %v15851_v39 }
 0xeb9   : > { %v15997_v3 = vpop.f32.mrb[224].mxu0 }
 0xeba   : > { %v15924_v23 = vpop.f32.mrb[244].mxu1  ;;  %v20065_v48 = vpop.f32.mrb[225].mxu0 }
 0xebb   : > { %v20060_v51 = vpop.f32.mrb[245].mxu1  ;;  %20119 = vmatprep.mubr.msk.f32.mxu1 %vm3116_vm10, %v15924_v23 }
 0xebc   : > { %20120 = vmatmul.mubr.msk.f32.gmra.mrb[252].mxu1 %vm3116_vm10, %v15997_v3 }
 0xf83   : > { %v20112_v53 = vpop.f32.mrb[246].mxu1 }
 0xf84   : > { %v20454_v1 = vadd.f32 %v20112_v53, %v18085_v11  ;;  %v16518_v35 = vpop.f32.mrb[247].mxu1 }
 0xf85   : > { %v20455_v59 = vadd.f32 %v18085_v11, %v16518_v35 }
 0xf86   : > { %v16566_v55 = vadd.f32 %v20454_v1, %v24936_v33 }
 0xf87   : > { %v16565_v52 = vadd.f32 %v20455_v59, %v24937_v6  ;;  %v20115_v26 = vpop.f32.mrb[248].mxu1 }
 0xf88   : > { %v20456_v18 = vadd.f32 %v20115_v26, %v18085_v11  ;;  %v16528_v17 = vpop.f32.mrb[249].mxu1  ;;  %v16580_v50 = vsel %vm1692_vm12, %v16566_v55, 0.0 }
 0xf89   : > { %v20457_v25 = vadd.f32 %v18085_v11, %v16528_v17  ;;  %16581 = vadd.xlane.f32.xlu0 %v16580_v50  ;;  %v16577_v24 = vsel %vm1692_vm12, %v16565_v52, 0.0 }
 0xf8a   : > { %v16568_v40 = vadd.f32 %v20456_v18, %v24938_v49  ;;  %16578 = vadd.xlane.f32.xlu1 %v16577_v24 }
 0xf8b   : > { %v16567_v16 = vadd.f32 %v20457_v25, %v24939_v28  ;;  %v20118_v21 = vpop.f32.mrb[250].mxu1 }
 0xf8c   : > { %v20458_v31 = vadd.f32 %v20118_v21, %v18085_v11  ;;  %v16538_v46 = vpop.f32.mrb[251].mxu1  ;;  %v16586_v0 = vsel %vm1692_vm12, %v16568_v40, 0.0  ;;  %v18118_v21 = vld [vmem:[%s24789_s14 + $0x28] sm:$0xff] }
 0xf8d   : > { %v20459_v36 = vadd.f32 %v18085_v11, %v16538_v46  ;;  %16587 = vadd.xlane.f32.xlu0 %v16586_v0  ;;  %v16583_v57 = vsel %vm1692_vm12, %v16567_v16, 0.0  ;;  %v18120_v0 = vld [vmem:[%s24789_s14 + $0x38] sm:$0xff] }
 0xf8e   : > { %v16570_v63 = vadd.f32 %v20458_v31, %v24940_v27  ;;  %16584 = vadd.xlane.f32.xlu1 %v16583_v57  ;;  %v18119_v31 = vld [vmem:[%s24789_s14 + $0x30] sm:$0xff]  ;;  %v18131_v57 = vld [vmem:[%s24791_s16 + $0x40] sm:$0xff]  ;;  %v18132_v27 = vld [vmem:[%s24791_s16 + $0x48] sm:$0xff] }
 0xf8f   : > { %v16569_v62 = vadd.f32 %v20459_v36, %v24941_v14  ;;  %v20121_v29 = vpop.f32.mrb[252].mxu1  ;;  %v20414_v36 = vpack.c.bf16 %v18120_v0, %v18119_v31 }
 0xf90   : > { %v20460_v54 = vadd.f32 %v20121_v29, %v18085_v11  ;;  %v16548_v37 = vpop.f32.mrb[253].mxu1  ;;  %v16592_v56 = vsel %vm1692_vm12, %v16570_v63, 0.0 }
 0xf91   : > { %v20461_v7 = vadd.f32 %v18085_v11, %v16548_v37  ;;  %16593 = vadd.xlane.f32.xlu0 %v16592_v56  ;;  %v16589_v47 = vsel %vm1692_vm12, %v16569_v62, 0.0 }
 0xf92   : > { %v16572_v45 = vadd.f32 %v20460_v54, %v24942_v30  ;;  %16590 = vadd.xlane.f32.xlu1 %v16589_v47 }
 0xf93   : > { %v16571_v15 = vadd.f32 %v20461_v7, %v24943_v8 }
 0xf94   : > { %v16598_v41 = vsel %vm1692_vm12, %v16572_v45, 0.0 }
 0xf95   : > { %16599 = vadd.xlane.f32.xlu0 %v16598_v41  ;;  %v16595_v22 = vsel %vm1692_vm12, %v16571_v15, 0.0 }
 0xf96   : > { %16596 = vadd.xlane.f32.xlu1 %v16595_v22 }
0x1016   : > { %v16582_v38 = vpop.xlane.xlu0 %16581 }
0x1017   : > { %v16602_v61 = vmul.f32 0.03125, %v16582_v38  ;;  %v16579_v12 = vpop.xlane.xlu1 %16578 }
0x1018   : > { %v16601_v44 = vmul.f32 0.03125, %v16579_v12 }
0x1019   : > { %v24516_v20 = vsub.f32 %v16566_v55, %v16602_v61 }
0x101a   : > { %v24518_v4 = vsub.f32 %v16565_v52, %v16601_v44  ;;  %v16588_v34 = vpop.xlane.xlu0 %16587 }
0x101b   : > { %v16604_v13 = vmul.f32 0.03125, %v16588_v34  ;;  %v16585_v10 = vpop.xlane.xlu1 %16584  ;;  %v16618_v2 = vmul.f32 %v24516_v20, %v24516_v20 }
0x101c   : > { %v16603_v9 = vmul.f32 0.03125, %v16585_v10  ;;  %v16617_v19 = vmul.f32 %v24518_v4, %v24518_v4 }
0x101d   : > { %v24524_v58 = vsub.f32 %v16568_v40, %v16604_v13  ;;  %v16628_v60 = vsel %vm1692_vm12, %v16618_v2, 0.0 }
0x101e   : > { %v24527_v39 = vsub.f32 %v16567_v16, %v16603_v9  ;;  %v16594_v5 = vpop.xlane.xlu0 %16593  ;;  %16629 = vadd.xlane.f32.xlu0 %v16628_v60  ;;  %v16625_v43 = vsel %vm1692_vm12, %v16617_v19, 0.0  ;;  %v18117_v16 = vld [vmem:[%s24789_s14 + $0x20] sm:$0xff] }
0x101f   : > { %v16606_v32 = vmul.f32 0.03125, %v16594_v5  ;;  %v16591_v3 = vpop.xlane.xlu1 %16590  ;;  %16626 = vadd.xlane.f32.xlu1 %v16625_v43  ;;  %v16620_v23 = vmul.f32 %v24524_v58, %v24524_v58  ;;  %v20410_v46 = vpack.c.bf16 %v18118_v21, %v18117_v16  ;;  %v18115_v60 = vld [vmem:[%s24787_s12 + $0x1] ss:$0 sm:$0xff] }
0x1020   : > { %v16605_v48 = vmul.f32 0.03125, %v16591_v3  ;;  %v16619_v51 = vmul.f32 %v24527_v39, %v24527_v39 }
0x1021   : > { %v24534_v11 = vsub.f32 %v16570_v63, %v16606_v32  ;;  %v16634_v53 = vsel %vm1692_vm12, %v16620_v23, 0.0  ;;  %20411 = vmatprep.subr.bf16.mxu0 %v20410_v46  ;;  %v20418_v63 = vpack.c.bf16 %v18132_v27, %v18131_v57  ;;  %v18116_v23 = vld [vmem:[%s24788_s13 + $0x1] ss:$0 sm:$0xff] }
0x1022   : > { %v24537_v1 = vsub.f32 %v16569_v62, %v16605_v48  ;;  %16635 = vadd.xlane.f32.xlu0 %v16634_v53  ;;  %v16600_v35 = vpop.xlane.xlu0 %16599  ;;  %v16631_v59 = vsel %vm1692_vm12, %v16619_v51, 0.0  ;;  %20413 = vmatpush3.bf16.msra.mxu0 %v20410_v46 }
0x1023   : > { %v16608_v33 = vmul.f32 0.03125, %v16600_v35  ;;  %16632 = vadd.xlane.f32.xlu1 %v16631_v59  ;;  %v16597_v55 = vpop.xlane.xlu1 %16596  ;;  %v16622_v6 = vmul.f32 %v24534_v11, %v24534_v11  ;;  %20415 = vmatprep.subr.bf16.mxu0 %v20414_v36  ;;  %v18133_v35 = vld [vmem:[%s24791_s16 + $0x50] sm:$0xff] }
0x1024   : > { %v16607_v52 = vmul.f32 0.03125, %v16597_v55  ;;  %v16621_v26 = vmul.f32 %v24537_v1, %v24537_v1 }
0x1025   : > { %v24544_v18 = vsub.f32 %v16572_v45, %v16608_v33  ;;  %v16640_v17 = vsel %vm1692_vm12, %v16622_v6, 0.0 }
0x1026   : > { %v24547_v50 = vsub.f32 %v16571_v15, %v16607_v52  ;;  %16641 = vadd.xlane.f32.xlu0 %v16640_v17  ;;  %v16637_v25 = vsel %vm1692_vm12, %v16621_v26, 0.0  ;;  %20417 = vmatpush3.bf16.msra.mxu0 %v20414_v36 }
0x1027   : > { %16638 = vadd.xlane.f32.xlu1 %v16637_v25  ;;  %v16624_v24 = vmul.f32 %v24544_v18, %v24544_v18  ;;  %20419 = vmatprep.subr.bf16.mxu0 %v20418_v63 }
0x1028   : > { %v16623_v49 = vmul.f32 %v24547_v50, %v24547_v50 }
0x1029   : > { %v16646_v40 = vsel %vm1692_vm12, %v16624_v24, 0.0  ;;  %v18135_v24 = vld [vmem:[%s24791_s16 + $0x60] sm:$0xff] }
0x102a   : > { %16647 = vadd.xlane.f32.xlu0 %v16646_v40  ;;  %v16643_v28 = vsel %vm1692_vm12, %v16623_v49, 0.0 }
0x102b   : > { %16644 = vadd.xlane.f32.xlu1 %v16643_v28 }
0x10ab   : > { %v16630_v14 = vpop.xlane.xlu0 %16629 }
0x10ac   : > { %v16650_v62 = vmul.f32 0.03125, %v16630_v14  ;;  %v16627_v29 = vpop.xlane.xlu1 %16626 }
0x10ad   : > { %v16649_v54 = vmul.f32 0.03125, %v16627_v29  ;;  %v18138_v29 = vld [vmem:[%s24791_s16 + $0x78] sm:$0xff] }
0x10ae   : > { %v16658_v37 = vadd.f32 1e-05, %v16650_v62 }
0x10af   : > { %v16657_v56 = vadd.f32 1e-05, %v16649_v54  ;;  %v16636_v7 = vpop.xlane.xlu0 %16635 }
0x10b0   : > { %20882 = vrsqrt.f32 %v16658_v37  ;;  %v16652_v47 = vmul.f32 0.03125, %v16636_v7  ;;  %v16633_v30 = vpop.xlane.xlu1 %16632  ;;  %v18122_v37 = vld [vmem:[%s24790_s15 + $0x1] ss:$0 sm:$0xff] }
0x10b1   : > { %20884 = vrsqrt.f32 %v16657_v56  ;;  %v16651_v45 = vmul.f32 0.03125, %v16633_v30 }
0x10b2   : > { %v16660_v8 = vadd.f32 1e-05, %v16652_v47 }
0x10b3   : > { %v16659_v15 = vadd.f32 1e-05, %v16651_v45  ;;  %v16642_v41 = vpop.xlane.xlu0 %16641 }
0x10b4   : > { %20886 = vrsqrt.f32 %v16660_v8  ;;  %v16654_v22 = vmul.f32 0.03125, %v16642_v41  ;;  %v16639_v38 = vpop.xlane.xlu1 %16638 }
0x10b5   : > { %20888 = vrsqrt.f32 %v16659_v15  ;;  %v16653_v61 = vmul.f32 0.03125, %v16639_v38 }
0x10b6   : > { %v16662_v12 = vadd.f32 1e-05, %v16654_v22 }
0x10b7   : > { %v16661_v44 = vadd.f32 1e-05, %v16653_v61  ;;  %v16648_v34 = vpop.xlane.xlu0 %16647 }
0x10b8   : > { %20890 = vrsqrt.f32 %v16662_v12  ;;  %v16656_v13 = vmul.f32 0.03125, %v16648_v34  ;;  %v16645_v10 = vpop.xlane.xlu1 %16644 }
0x10b9   : > { %20892 = vrsqrt.f32 %v16661_v44  ;;  %v16655_v2 = vmul.f32 0.03125, %v16645_v10 }
0x10ba   : > { %v20883_v9 = vpop.eup %20882  ;;  %v16664_v19 = vadd.f32 1e-05, %v16656_v13 }
0x10bb   : > { %v20885_v5 = vpop.eup %20884  ;;  %v16674_v43 = vmul.f32 %v20883_v9, %v24516_v20  ;;  %v16663_v32 = vadd.f32 1e-05, %v16655_v2  ;;  %v18134_v20 = vld [vmem:[%s24791_s16 + $0x58] sm:$0xff] }
0x10bc   : > { %20894 = vrsqrt.f32 %v16664_v19  ;;  %v16673_v3 = vmul.f32 %v20885_v5, %v24518_v4  ;;  %v20422_v26 = vpack.c.bf16 %v18134_v20, %v18133_v35 }
0x10bd   : > { %20896 = vrsqrt.f32 %v16663_v32  ;;  %v16688_v48 = vmul.f32 %v18115_v60, %v16674_v43 }
0x10be   : > { %v20887_v51 = vpop.eup %20886  ;;  %v16687_v53 = vmul.f32 %v18115_v60, %v16673_v3 }
0x10bf   : > { %v20889_v59 = vpop.eup %20888  ;;  %v16676_v33 = vmul.f32 %v20887_v51, %v24524_v58  ;;  %v24592_v6 = vadd.f32 %v18116_v23, %v16688_v48  ;;  %v18136_v58 = vld [vmem:[%s24791_s16 + $0x68] sm:$0xff] }
0x10c0   : > { %v24589_v4 = vadd.f32 %v18116_v23, %v16687_v53  ;;  %v16675_v55 = vmul.f32 %v20889_v59, %v24527_v39  ;;  %v20426_v31 = vpack.c.bf16 %v18136_v58, %v18135_v24 }
0x10c1   : > { %v16690_v52 = vmul.f32 %v18115_v60, %v16676_v33 }
0x10c2   : > { %v20891_v17 = vpop.eup %20890  ;;  %20130 = vmatprep.mubr.msk.f32.mxu0 %vm1692_vm12, %v24589_v4  ;;  %v16689_v25 = vmul.f32 %v18115_v60, %v16675_v55 }
0x10c3   : > { %v20893_v49 = vpop.eup %20892  ;;  %20131 = vmatmul.mubr.msk.f32.vlgmr.msra.gmra.mrb[226].mxu0 %vm1692_vm12, %v24592_v6  ;;  %v16678_v39 = vmul.f32 %v20891_v17, %v24534_v11  ;;  %v24608_v16 = vadd.f32 %v18116_v23, %v16690_v52 }
0x10c4   : > { %v24605_v40 = vadd.f32 %v18116_v23, %v16689_v25  ;;  %v16677_v28 = vmul.f32 %v20893_v49, %v24537_v1  ;;  %20421 = vmatpush3.bf16.msra.mxu0 %v20418_v63 }
0x10c5   : > { %v16692_v21 = vmul.f32 %v18115_v60, %v16678_v39  ;;  %20423 = vmatprep.subr.bf16.mxu0 %v20422_v26 }
0x10c6   : > { %v20895_v46 = vpop.eup %20894  ;;  %20133 = vmatprep.mubr.msk.f32.mxu0 %vm1692_vm12, %v24605_v40  ;;  %v16691_v0 = vmul.f32 %v18115_v60, %v16677_v28 }
0x10c7   : > { %v20897_v36 = vpop.eup %20896  ;;  %20134 = vmatmul.mubr.msk.f32.gmra.mrb[228].mxu0 %vm1692_vm12, %v24608_v16  ;;  %v16680_v11 = vmul.f32 %v20895_v46, %v24544_v18  ;;  %v24618_v27 = vadd.f32 %v18116_v23, %v16692_v21 }
0x10c8   : > { %v24615_v57 = vadd.f32 %v18116_v23, %v16691_v0  ;;  %v16679_v1 = vmul.f32 %v20897_v36, %v24547_v50  ;;  %20425 = vmatpush3.bf16.msra.mxu0 %v20422_v26  ;;  %v18137_v50 = vld [vmem:[%s24791_s16 + $0x70] sm:$0xff] }
0x10c9   : > { %v16694_v63 = vmul.f32 %v18115_v60, %v16680_v11  ;;  %20427 = vmatprep.subr.bf16.mxu0 %v20426_v31  ;;  %v20430_v54 = vpack.c.bf16 %v18138_v29, %v18137_v50 }
0x10ca   : > { %20136 = vmatprep.mubr.msk.f32.mxu0 %vm1692_vm12, %v24615_v57  ;;  %v16693_v14 = vmul.f32 %v18115_v60, %v16679_v1 }
0x10cb   : > { %20137 = vmatmul.mubr.msk.f32.gmra.mrb[230].mxu0 %vm1692_vm12, %v24618_v27  ;;  %v24626_v18 = vadd.f32 %v18116_v23, %v16694_v63 }
0x10cc   : > { %v24624_v62 = vadd.f32 %v18116_v23, %v16693_v14  ;;  %20429 = vmatpush3.bf16.msra.mxu0 %v20426_v31  ;;  %v18140_v23 = vld [vmem:[%s24792_s17 + $0x1] ss:$0 sm:$0xff] }
0x10cd   : > { %20431 = vmatprep.subr.bf16.mxu0 %v20430_v54 }
0x10ce   : > { %20139 = vmatprep.mubr.msk.f32.mxu0 %vm1692_vm12, %v24624_v62 }
0x10cf   : > { %20140 = vmatmul.mubr.msk.f32.gmra.mrb[232].mxu0 %vm1692_vm12, %v24626_v18 }
0x10d0   : > { %20433 = vmatpush3.bf16.msra.mxu0 %v20430_v54 }
0x10d1   : > { %20170 = vmatprep.subr.mxu0 %v24881_v42 }
0x1196   : > { %v20132_v56 = vpop.f32.mrb[226].mxu0 }
0x1197   : > { %v16818_v7 = vadd.f32 %v20132_v56, %v18122_v37  ;;  %v16812_v47 = vpop.f32.mrb[227].mxu0 }
0x1198   : > { %v16813_v30 = vadd.f32 %v18122_v37, %v16812_v47 }
0x1199   : > { %v16852_v15 = vmax.f32 %v16818_v7, 0.0 }
0x119a   : > { %v16851_v45 = vmax.f32 %v16813_v30, 0.0  ;;  %v20135_v8 = vpop.f32.mrb[228].mxu0 }
0x119b   : > { %v16828_v41 = vadd.f32 %v20135_v8, %v18122_v37  ;;  %v16822_v22 = vpop.f32.mrb[229].mxu0 }
0x119c   : > { %v16823_v38 = vadd.f32 %v18122_v37, %v16822_v22  ;;  %20158 = vmatprep.mubr.msk.f32.mxu0 %vm9137_vm13, %v16851_v45 }
0x119d   : > { %20159 = vmatmul.mubr.msk.f32.vlgmr.msra.gmra.mrb[234].mxu0 %vm9137_vm13, %v16852_v15  ;;  %v16854_v44 = vmax.f32 %v16828_v41, 0.0 }
0x119e   : > { %v16853_v61 = vmax.f32 %v16823_v38, 0.0  ;;  %v20138_v12 = vpop.f32.mrb[230].mxu0 }
0x119f   : > { %v16838_v34 = vadd.f32 %v20138_v12, %v18122_v37  ;;  %v16832_v13 = vpop.f32.mrb[231].mxu0 }
0x11a0   : > { %v16833_v10 = vadd.f32 %v18122_v37, %v16832_v13  ;;  %20161 = vmatprep.mubr.msk.f32.mxu0 %vm9137_vm13, %v16853_v61 }
0x11a1   : > { %20162 = vmatmul.mubr.msk.f32.gmra.mrb[236].mxu0 %vm9137_vm13, %v16854_v44  ;;  %v16856_v19 = vmax.f32 %v16838_v34, 0.0 }
0x11a2   : > { %v16855_v2 = vmax.f32 %v16833_v10, 0.0  ;;  %v20141_v9 = vpop.f32.mrb[232].mxu0 }
0x11a3   : > { %v16848_v60 = vadd.f32 %v20141_v9, %v18122_v37  ;;  %v16842_v5 = vpop.f32.mrb[233].mxu0 }
0x11a4   : > { %v16843_v43 = vadd.f32 %v18122_v37, %v16842_v5  ;;  %20164 = vmatprep.mubr.msk.f32.mxu0 %vm9137_vm13, %v16855_v2 }
0x11a5   : > { %20165 = vmatmul.mubr.msk.f32.gmra.mrb[238].mxu0 %vm9137_vm13, %v16856_v19  ;;  %v16858_v3 = vmax.f32 %v16848_v60, 0.0 }
0x11a6   : > { %v16857_v32 = vmax.f32 %v16843_v43, 0.0 }
0x11a8   : > { %20167 = vmatprep.mubr.msk.f32.mxu0 %vm9137_vm13, %v16857_v32 }
0x11a9   : > { %20168 = vmatmul.mubr.msk.f32.gmra.mrb[240].mxu0 %vm9137_vm13, %v16858_v3 }
0x11aa   : > { %20172 = vmatprep.mubr.msk.f32.mxu0 %vm20932_vm8, %v24881_v42 }
0x1270   : > { %v20160_v48 = vpop.f32.mrb[234].mxu0 }
0x1271   : > { %v16972_v51 = vadd.f32 %v20160_v48, %v18140_v23  ;;  %v16966_v53 = vpop.f32.mrb[235].mxu0 }
0x1272   : > { %v16967_v35 = vadd.f32 %v18140_v23, %v16966_v53 }
0x1273   : > { %v17006_v20 = vadd.f32 %v16972_v51, %v24592_v6 }
0x1274   : > { %v17005_v59 = vadd.f32 %v16967_v35, %v24589_v4  ;;  %v20163_v33 = vpop.f32.mrb[236].mxu0 }
0x1275   : > { %v16982_v55 = vadd.f32 %v20163_v33, %v18140_v23  ;;  %v16976_v52 = vpop.f32.mrb[237].mxu0  ;;  %v17020_v26 = vsel %vm1692_vm12, %v17006_v20, 0.0 }
0x1276   : > { %v16977_v17 = vadd.f32 %v18140_v23, %v16976_v52  ;;  %17021 = vadd.xlane.f32.xlu0 %v17020_v26  ;;  %v17017_v25 = vsel %vm1692_vm12, %v17005_v59, 0.0 }
0x1277   : > { %v17008_v24 = vadd.f32 %v16982_v55, %v24608_v16  ;;  %17018 = vadd.xlane.f32.xlu1 %v17017_v25 }
0x1278   : > { %v17007_v58 = vadd.f32 %v16977_v17, %v24605_v40  ;;  %v20166_v49 = vpop.f32.mrb[238].mxu0 }
0x1279   : > { %v16992_v39 = vadd.f32 %v20166_v49, %v18140_v23  ;;  %v16986_v28 = vpop.f32.mrb[239].mxu0  ;;  %v17026_v6 = vsel %vm1692_vm12, %v17008_v24, 0.0 }
0x127a   : > { %v16987_v4 = vadd.f32 %v18140_v23, %v16986_v28  ;;  %17027 = vadd.xlane.f32.xlu0 %v17026_v6  ;;  %v17023_v21 = vsel %vm1692_vm12, %v17007_v58, 0.0 }
0x127b   : > { %v17010_v31 = vadd.f32 %v16992_v39, %v24618_v27  ;;  %17024 = vadd.xlane.f32.xlu1 %v17023_v21 }
0x127c   : > { %v17009_v46 = vadd.f32 %v16987_v4, %v24615_v57  ;;  %v20169_v0 = vpop.f32.mrb[240].mxu0 }
0x127d   : > { %v17002_v36 = vadd.f32 %v20169_v0, %v18140_v23  ;;  %v16996_v16 = vpop.f32.mrb[241].mxu0  ;;  %v17032_v11 = vsel %vm1692_vm12, %v17010_v31, 0.0 }
0x127e   : > { %v16997_v40 = vadd.f32 %v18140_v23, %v16996_v16  ;;  %17033 = vadd.xlane.f32.xlu0 %v17032_v11  ;;  %v17029_v1 = vsel %vm1692_vm12, %v17009_v46, 0.0 }
0x127f   : > { %v17012_v63 = vadd.f32 %v17002_v36, %v24626_v18  ;;  %17030 = vadd.xlane.f32.xlu1 %v17029_v1 }
0x1280   : > { %v17011_v14 = vadd.f32 %v16997_v40, %v24624_v62 }
0x1281   : > { %v17038_v50 = vsel %vm1692_vm12, %v17012_v63, 0.0 }
0x1282   : > { %17039 = vadd.xlane.f32.xlu0 %v17038_v50  ;;  %v17035_v27 = vsel %vm1692_vm12, %v17011_v14, 0.0 }
0x1283   : > { %17036 = vadd.xlane.f32.xlu1 %v17035_v27 }
0x1303   : > { %v17022_v57 = vpop.xlane.xlu0 %17021 }
0x1304   : > { %v17042_v29 = vmul.f32 0.03125, %v17022_v57  ;;  %v17019_v54 = vpop.xlane.xlu1 %17018 }
0x1305   : > { %v17041_v37 = vmul.f32 0.03125, %v17019_v54 }
0x1306   : > { %v24671_v56 = vsub.f32 %v17006_v20, %v17042_v29  ;;  %v18151_v29 = vld [vmem:[%s24793_s18 + $0x1] ss:$0 sm:$0xff] }
0x1307   : > { %v24673_v7 = vsub.f32 %v17005_v59, %v17041_v37  ;;  %v17028_v47 = vpop.xlane.xlu0 %17027 }
0x1308   : > { %v17044_v30 = vmul.f32 0.03125, %v17028_v47  ;;  %v17025_v18 = vpop.xlane.xlu1 %17024  ;;  %v17058_v62 = vmul.f32 %v24671_v56, %v24671_v56 }
0x1309   : > { %v17043_v45 = vmul.f32 0.03125, %v17025_v18  ;;  %v17057_v8 = vmul.f32 %v24673_v7, %v24673_v7 }
0x130a   : > { %v24679_v15 = vsub.f32 %v17008_v24, %v17044_v30  ;;  %v17068_v41 = vsel %vm1692_vm12, %v17058_v62, 0.0  ;;  %v18152_v30 = vld [vmem:[%s24794_s19 + $0x1] ss:$0 sm:$0xff] }
0x130b   : > { %v24682_v22 = vsub.f32 %v17007_v58, %v17043_v45  ;;  %v17034_v38 = vpop.xlane.xlu0 %17033  ;;  %17069 = vadd.xlane.f32.xlu0 %v17068_v41  ;;  %v17065_v61 = vsel %vm1692_vm12, %v17057_v8, 0.0 }
0x130c   : > { %v17046_v12 = vmul.f32 0.03125, %v17034_v38  ;;  %v17031_v44 = vpop.xlane.xlu1 %17030  ;;  %17066 = vadd.xlane.f32.xlu1 %v17065_v61  ;;  %v17060_v34 = vmul.f32 %v24679_v15, %v24679_v15 }
0x130d   : > { %v17045_v13 = vmul.f32 0.03125, %v17031_v44  ;;  %v17059_v10 = vmul.f32 %v24682_v22, %v24682_v22 }
0x130e   : > { %v24689_v2 = vsub.f32 %v17010_v31, %v17046_v12  ;;  %v17074_v9 = vsel %vm1692_vm12, %v17060_v34, 0.0 }
0x130f   : > { %v24692_v19 = vsub.f32 %v17009_v46, %v17045_v13  ;;  %17075 = vadd.xlane.f32.xlu0 %v17074_v9  ;;  %v17040_v60 = vpop.xlane.xlu0 %17039  ;;  %v17071_v5 = vsel %vm1692_vm12, %v17059_v10, 0.0 }
0x1310   : > { %v17048_v43 = vmul.f32 0.03125, %v17040_v60  ;;  %17072 = vadd.xlane.f32.xlu1 %v17071_v5  ;;  %v17037_v32 = vpop.xlane.xlu1 %17036  ;;  %v17062_v3 = vmul.f32 %v24689_v2, %v24689_v2 }
0x1311   : > { %v17047_v23 = vmul.f32 0.03125, %v17037_v32  ;;  %v17061_v48 = vmul.f32 %v24692_v19, %v24692_v19 }
0x1312   : > { %v24699_v51 = vsub.f32 %v17012_v63, %v17048_v43  ;;  %v17080_v53 = vsel %vm1692_vm12, %v17062_v3, 0.0 }
0x1313   : > { %v24702_v35 = vsub.f32 %v17011_v14, %v17047_v23  ;;  %17081 = vadd.xlane.f32.xlu0 %v17080_v53  ;;  %v17077_v20 = vsel %vm1692_vm12, %v17061_v48, 0.0 }
0x1314   : > { %17078 = vadd.xlane.f32.xlu1 %v17077_v20  ;;  %v17064_v59 = vmul.f32 %v24699_v51, %v24699_v51 }
0x1315   : > { %v17063_v33 = vmul.f32 %v24702_v35, %v24702_v35 }
0x1316   : > { %v17086_v55 = vsel %vm1692_vm12, %v17064_v59, 0.0 }
0x1317   : > { %17087 = vadd.xlane.f32.xlu0 %v17086_v55  ;;  %v17083_v52 = vsel %vm1692_vm12, %v17063_v33, 0.0 }
0x1318   : > { %17084 = vadd.xlane.f32.xlu1 %v17083_v52 }
0x1398   : > { %v17070_v26 = vpop.xlane.xlu0 %17069 }
0x1399   : > { %v17090_v17 = vmul.f32 0.03125, %v17070_v26  ;;  %v17067_v25 = vpop.xlane.xlu1 %17066 }
0x139a   : > { %v17089_v24 = vmul.f32 0.03125, %v17067_v25 }
0x139b   : > { %v17098_v58 = vadd.f32 1e-05, %v17090_v17 }
0x139c   : > { %v17097_v49 = vadd.f32 1e-05, %v17089_v24  ;;  %v17076_v39 = vpop.xlane.xlu0 %17075 }
0x139d   : > { %20898 = vrsqrt.f32 %v17098_v58  ;;  %v17092_v28 = vmul.f32 0.03125, %v17076_v39  ;;  %v17073_v6 = vpop.xlane.xlu1 %17072 }
0x139e   : > { %20900 = vrsqrt.f32 %v17097_v49  ;;  %v17091_v4 = vmul.f32 0.03125, %v17073_v6  ;;  %v17197_v49 = vlaneseq }
0x139f   : > { %v17100_v21 = vadd.f32 1e-05, %v17092_v28 }
0x13a0   : > { %v17099_v31 = vadd.f32 1e-05, %v17091_v4  ;;  %v17082_v46 = vpop.xlane.xlu0 %17081  ;;  %v17198_v39 = vand.u32 127, %v17197_v49  ;;  %v17200_v28 = vshrl.u32 %v17197_v49, 7 }
0x13a1   : > { %20902 = vrsqrt.f32 %v17100_v21  ;;  %v17094_v0 = vmul.f32 0.03125, %v17082_v46  ;;  %v17079_v36 = vpop.xlane.xlu1 %17078 }
0x13a2   : > { %20904 = vrsqrt.f32 %v17099_v31  ;;  %v17093_v16 = vmul.f32 0.03125, %v17079_v36  ;;  %v17201_v4 = vsub.s32 %v17198_v39, %v17200_v28 }
0x13a3   : > { %v17102_v11 = vadd.f32 1e-05, %v17094_v0 }
0x13a4   : > { %v17101_v40 = vadd.f32 1e-05, %v17093_v16  ;;  %v17088_v1 = vpop.xlane.xlu0 %17087 }
0x13a5   : > { %20906 = vrsqrt.f32 %v17102_v11  ;;  %v17096_v63 = vmul.f32 0.03125, %v17088_v1  ;;  %v17085_v14 = vpop.xlane.xlu1 %17084 }
0x13a6   : > { %20908 = vrsqrt.f32 %v17101_v40  ;;  %v17095_v50 = vmul.f32 0.03125, %v17085_v14 }
0x13a7   : > { %v20899_v27 = vpop.eup %20898  ;;  %v17104_v57 = vadd.f32 1e-05, %v17096_v63 }
0x13a8   : > { %v20901_v54 = vpop.eup %20900  ;;  %v17103_v37 = vadd.f32 1e-05, %v17095_v50  ;;  %v17114_v47 = vmul.f32 %v20899_v27, %v24671_v56 }
0x13a9   : > { %20910 = vrsqrt.f32 %v17104_v57  ;;  %v17113_v18 = vmul.f32 %v20901_v54, %v24673_v7 }
0x13aa   : > { %20912 = vrsqrt.f32 %v17103_v37  ;;  %v17128_v62 = vmul.f32 %v18151_v29, %v17114_v47 }
0x13ab   : > { %v20903_v45 = vpop.eup %20902  ;;  %v17127_v8 = vmul.f32 %v18151_v29, %v17113_v18 }
0x13ac   : > { %v20905_v41 = vpop.eup %20904  ;;  %v17142_v38 = vadd.f32 %v18152_v30, %v17128_v62  ;;  %v17116_v61 = vmul.f32 %v20903_v45, %v24679_v15 }
0x13ad   : > { %v17141_v12 = vadd.f32 %v18152_v30, %v17127_v8  ;;  %v17115_v44 = vmul.f32 %v20905_v41, %v24682_v22 }
0x13ae   : > { %v17152_v56 = vsel %vm1692_vm12, %v17142_v38, 0.0  ;;  %v17130_v34 = vmul.f32 %v18151_v29, %v17116_v61  ;;  %v17318_v38 = vld [vmem:[%s24797_s22] sm:$0xff]  ;;  %v17319_v61 = vld [vmem:[%s24797_s22 + $0x8] sm:$0xff] }
0x13af   : > { %v20907_v13 = vpop.eup %20906  ;;  %17153 = vadd.xlane.f32.xlu0 %v17152_v56  ;;  %v17149_v10 = vsel %vm1692_vm12, %v17141_v12, 0.0  ;;  %v17129_v9 = vmul.f32 %v18151_v29, %v17115_v44 }
0x13b0   : > { %v20909_v7 = vpop.eup %20908  ;;  %17150 = vadd.xlane.f32.xlu1 %v17149_v10  ;;  %v17144_v60 = vadd.f32 %v18152_v30, %v17130_v34  ;;  %v17118_v5 = vmul.f32 %v20907_v13, %v24689_v2  ;;  %v20435_v13 = vpack.c.bf16 %v17319_v61, %v17318_v38 }
0x13b1   : > { %v17143_v43 = vadd.f32 %v18152_v30, %v17129_v9  ;;  %v17117_v32 = vmul.f32 %v20909_v7, %v24692_v19  ;;  %v17320_v9 = vld [vmem:[%s24797_s22 + $0x10] sm:$0xff]  ;;  %v17321_v7 = vld [vmem:[%s24797_s22 + $0x18] sm:$0xff] }
0x13b2   : > { %v17158_v15 = vsel %vm1692_vm12, %v17144_v60, 0.0  ;;  %v17132_v3 = vmul.f32 %v18151_v29, %v17118_v5  ;;  %v20438_v5 = vpack.c.bf16 %v17321_v7, %v17320_v9 }
0x13b3   : > { %v20911_v22 = vpop.eup %20910  ;;  %17159 = vadd.xlane.f32.xlu0 %v17158_v15  ;;  %v17155_v23 = vsel %vm1692_vm12, %v17143_v43, 0.0  ;;  %v17131_v48 = vmul.f32 %v18151_v29, %v17117_v32  ;;  %v17322_v43 = vld [vmem:[%s24797_s22 + $0x20] sm:$0xff]  ;;  %v17323_v32 = vld [vmem:[%s24797_s22 + $0x28] sm:$0xff] }
0x13b4   : > { %v20913_v53 = vpop.eup %20912  ;;  %17156 = vadd.xlane.f32.xlu1 %v17155_v23  ;;  %v17146_v20 = vadd.f32 %v18152_v30, %v17132_v3  ;;  %v17120_v59 = vmul.f32 %v20911_v22, %v24699_v51  ;;  %v17181_v51 = vld [vmem:[%s24795_s20] sm:$0xff]  ;;  %v20441_v15 = vpack.c.bf16 %v17323_v32, %v17322_v43  ;;  %v17325_v3 = vld [vmem:[%s24797_s22 + $0x38] sm:$0xff] }
0x13b5   : > { %v17145_v33 = vadd.f32 %v18152_v30, %v17131_v48  ;;  %v17119_v55 = vmul.f32 %v20913_v53, %v24702_v35  ;;  %20171 = vmatpush3.msra.mxu0 %v17181_v51  ;;  %v20933_v35 = vmov 0.0|0.0   ;;  %v18153_v23 = vld [vmem:[%s24796_s21] ss:$0 sm:$0xff] }
0x13b6   : > { %v17164_v2 = vsel %vm1692_vm12, %v17146_v20, 0.0  ;;  %v17134_v52 = vmul.f32 %v18151_v29, %v17120_v59  ;;  %20434 = vmatprep.subr.bf16.mxu0 %v20933_v35 }
0x13b7   : > { %17165 = vadd.xlane.f32.xlu0 %v17164_v2  ;;  %v17161_v19 = vsel %vm1692_vm12, %v17145_v33, 0.0  ;;  %v17133_v26 = vmul.f32 %v18151_v29, %v17119_v55  ;;  %v18155_v33 = vld [vmem:[#allocation2] ss:$0 sm:$0xff] }
0x13b8   : > { %17162 = vadd.xlane.f32.xlu1 %v17161_v19  ;;  %v17148_v17 = vadd.f32 %v18152_v30, %v17134_v52 }
0x13b9   : > { %v17147_v25 = vadd.f32 %v18152_v30, %v17133_v26 }
0x13ba   : > { %v17170_v24 = vsel %vm1692_vm12, %v17148_v17, 0.0 }
0x13bb   : > { %17171 = vadd.xlane.f32.xlu0 %v17170_v24  ;;  %v17167_v58 = vsel %vm1692_vm12, %v17147_v25, 0.0  ;;  %vm17231_vm12 = vcmask 1041409  }
0x13bc   : > { %17168 = vadd.xlane.f32.xlu1 %v17167_v58 }
0x143c   : > { %v17154_v6 = vpop.xlane.xlu0 %17153 }
0x143d   : > { %v17174_v21 = vmul.f32 0.03125, %v17154_v6  ;;  %v17151_v31 = vpop.xlane.xlu1 %17150 }
0x143e   : > { %v17173_v46 = vmul.f32 0.03125, %v17151_v31 }
0x143f   : > { %v17206_v36 = vrot.slane %v17174_v21, %v17201_v4 }
0x1440   : > { %v17160_v0 = vpop.xlane.xlu0 %17159  ;;  %v17202_v16 = vrot.slane %v17173_v46, %v17201_v4 }
0x1441   : > { %v17157_v11 = vpop.xlane.xlu1 %17156  ;;  %v17176_v1 = vmul.f32 0.03125, %v17160_v0 }
0x1442   : > { %v17175_v40 = vmul.f32 0.03125, %v17157_v11  ;;  %v17232_v50 = vsel %vm17231_vm12, %v17206_v36, %v17202_v16 }
0x1443   : > { %v17214_v54 = vrot.slane %v17176_v1, %v17201_v4 }
0x1444   : > { %v17210_v63 = vrot.slane %v17175_v40, %v17201_v4  ;;  %v17166_v14 = vpop.xlane.xlu0 %17165 }
0x1445   : > { %v17163_v27 = vpop.xlane.xlu1 %17162  ;;  %v17178_v37 = vmul.f32 0.03125, %v17166_v14 }
0x1446   : > { %v17234_v57 = vsel %vm17233_vm14, %v17210_v63, %v17232_v50  ;;  %v17177_v29 = vmul.f32 0.03125, %v17163_v27 }
0x1447   : > { %v17236_v18 = vsel %vm17235_vm15, %v17214_v54, %v17234_v57  ;;  %v17222_v12 = vrot.slane %v17178_v37, %v17201_v4 }
0x1448   : > { %v17218_v47 = vrot.slane %v17177_v29, %v17201_v4  ;;  %v17172_v30 = vpop.xlane.xlu0 %17171 }
0x1449   : > { %v17180_v62 = vmul.f32 0.03125, %v17172_v30  ;;  %v17169_v45 = vpop.xlane.xlu1 %17168 }
0x144a   : > { %v17238_v8 = vsel %vm17237_vm0, %v17218_v47, %v17236_v18  ;;  %v17179_v41 = vmul.f32 0.03125, %v17169_v45 }
0x144b   : > { %v17230_v56 = vrot.slane %v17180_v62, %v17201_v4  ;;  %v17240_v34 = vsel %vm17239_vm1, %v17222_v12, %v17238_v8 }
0x144c   : > { %v17226_v44 = vrot.slane %v17179_v41, %v17201_v4 }
0x144e   : > { %v17242_v10 = vsel %vm17241_vm2, %v17226_v44, %v17240_v34 }
0x144f   : > { %v17244_v60 = vsel %vm17243_vm3, %v17230_v56, %v17242_v10 }
0x1450   : > { %20173 = vmatmul.mubr.msk.f32.vlgmr.msra.gmra.mrb[242].mxu0 %vm3116_vm10, %v17244_v60 }
0x1451   : > { %20436 = vmatpush3.bf16.msra.mxu0 %v20435_v13  ;;  %20191 = vmatprep.mubr.msk.f32.mxu0 %vm20932_vm8, %v24881_v42  ;;  %v17324_v42 = vld [vmem:[%s24797_s22 + $0x30] sm:$0xff] }
0x1452   : > { %20437 = vmatprep.subr.bf16.mxu0 %v20933_v35  ;;  %v20444_v22 = vpack.c.bf16 %v17325_v3, %v17324_v42 }
0x1455   : > { %20439 = vmatpush3.bf16.msra.mxu0 %v20438_v5 }
0x1456   : > { %20440 = vmatprep.subr.bf16.mxu0 %v20933_v35 }
0x1459   : > { %20442 = vmatpush3.bf16.msra.mxu0 %v20441_v15 }
0x145a   : > { %20443 = vmatprep.subr.bf16.mxu0 %v20933_v35 }
0x145d   : > { %20445 = vmatpush3.bf16.msra.mxu0 %v20444_v22 }
0x1523   : > { %v17313_v48 = vpop.f32.mrb[242].mxu0 }
0x1524   : > { %v17314_v53 = vadd.f32 %v18153_v23, %v17313_v48  ;;  %v20174_v20 = vpop.f32.mrb[243].mxu0 }
0x1526   : > { %v17317_v59 = vmax.f32 %v17314_v53, 0.0 }
0x1528   : > { %20192 = vmatmul.mubr.msk.f32.vlgmr.msra.gmra.mrb[244].mxu0 %vm9137_vm13, %v17317_v59 }
0x15fb   : > { %v17402_v55 = vpop.f32.mrb[244].mxu0 }
0x15fc   : > { %v17403_v2 = vadd.f32 %v18155_v33, %v17402_v55  ;;  %v20193_v52 = vpop.f32.mrb[245].mxu0 }
0x15fe   : > { %17407 = vst.msk [vmem:[%s739_s0] sm:$0xff] %vm17406_vm4, %v17403_v2 }
0x15ff PF: > { %s24944_s1 = sld [smem:[#allocation3_spill]] }
0x1605   : > { %s36_s27 = sadd.s32 1, %s24944_s1  }
0x1606   : > { %p33_p5 = scmp.ge.s32.totalorder %s36_s27, 4  }
0x1608   :  { %35 = sbr.rel (!%p33_p5) target bundleno = 10 (0xa), region = 204 }

</bundles_post_ra>
